<compile_context>
chip_gen: v5e
topology: v5e:2x2
jax: 0.10.0
libtpu: 0.0.40
codegen_flags: <defaults>
</compile_context>

<pallas_src>
import functools

import numpy as np

import jax
import jax.numpy as jnp
from jax import lax
from jax.experimental import pallas as pl
from jax.experimental.pallas import tpu as pltpu


def _round_up(x, m):
    return (x + m - 1) // m * m


# ----------------------------------------------------------------------------
# Fused forward-pass kernel
# ----------------------------------------------------------------------------
def _net_kernel(x_ref, v1_ref, w1_ref, b1_ref, w2_ref, b2_ref, w3_ref, b3_ref,
                gam_ref, bet_ref, wf1_ref, bf1_ref, wf2_ref, bf2_ref,
                wf3_ref, bf3_ref, o_ref, tap_ref, feat_ref,
                *, n_batch, wp, img_stride, n_valid):
    f32, bf16 = jnp.float32, jnp.bfloat16
    m = x_ref.shape[-1]

    def shifted(v, off):
        # result[:, c] = v[:, c + off] (cyclic; wrap-around only lands in
        # masked / never-consumed columns -- see header notes).
        if off == 0:
            return v
        return pltpu.roll(v, shift=(-off) % m, axis=1)

    def stack_taps(src, step):
        # Write the 9 shifted (dilation `step`) copies of `src` (8, M) into the
        # shared (72, M) scratch -> one K=72 GEMM per conv.
        for t in range(9):
            dy, dx = t // 3 - 1, t % 3 - 1
            tap_ref[pl.ds(t * 8, 8), :] = shifted(src, (dy * wp + dx) * step)

    def max2x2(v, step):
        # Max over the 2x2 window (top-left at each column) with spacing `step`.
        return jnp.maximum(jnp.maximum(v, shifted(v, step)),
                           jnp.maximum(shifted(v, step * wp),
                                       shifted(v, step * (wp + 1))))

    # ---- conv1 (3->6, padded to 8 ch, 3x3, pad 1) + ReLU: one (8,72)@(72,M)
    stack_taps(x_ref[...], 1)
    a1 = jnp.maximum(
        jnp.dot(w1_ref[...], tap_ref[...].astype(bf16),
                preferred_element_type=f32) + b1_ref[...], 0.0)        # (8, M)

    # ---- maxpool 2x2: window max kept in place at odd (y, x) positions; the
    # valid mask re-establishes the zero padding conv2 needs at image borders.
    v1 = v1_ref[...]                                                   # (1, M)
    p1 = max2x2(a1, 1) * v1                                            # (8, M)

    # ---- conv2 (6->16, 3x3, pad 1 in pooled coords) == dilation-2 conv on the
    # sparse pooled map: one (16,72)@(72,M) GEMM.
    stack_taps(p1, 2)
    x0 = jnp.maximum(
        jnp.dot(w2_ref[...], tap_ref[...].astype(bf16),
                preferred_element_type=f32) + b2_ref[...], 0.0)        # (16, M)

    # ---- conv3 (1x1) + ReLU; skipconnect candidate 1: x1 + x0
    x1 = jnp.maximum(
        jnp.dot(w3_ref[...], x0.astype(bf16),
                preferred_element_type=f32) + b3_ref[...], 0.0)
    y = x1 + x0

    # ---- BatchNorm2d: training-mode biased batch stats over valid columns.
    # TODO(synk): becomes a two-pass cross-block reduction if a batch grid is
    #             added for v7x megacore.
    inv_n = 1.0 / float(n_valid)
    mean = jnp.sum(y * v1, axis=1, keepdims=True) * inv_n              # (16, 1)
    diff = (y - mean) * v1
    var = jnp.sum(diff * diff, axis=1, keepdims=True) * inv_n
    ybn = (y - mean) * lax.rsqrt(var + 1e-5) * gam_ref[...] + bet_ref[...]

    # ---- maxpool 2x2 in pooled coords (offsets {0,2}) and AdaptiveAvgPool2d(4)
    # == exact 2x2 average in pool2 coords (offsets {0,4}); both stay in place.
    m2 = max2x2(ybn, 2)                                                # (16, M)
    m3 = (m2 + shifted(m2, 4) + shifted(m2, 4 * wp)
          + shifted(m2, 4 * (wp + 1))) * 0.25                          # (16, M)

    # ---- flatten: gather the 16 GAP positions per image into a (256, N) slab
    # (PyTorch CHW order folded into the host-side fc1 weight permutation),
    # then fc1/fc2/fc3 as three dense GEMMs.
    for s in range(16):
        p, q = s // 4, s % 4
        base = (8 * p + 1) * wp + (8 * q + 1)
        for b in range(n_batch):
            c0 = b * img_stride + base
            feat_ref[pl.ds(s * 16, 16), pl.ds(b, 1)] = m3[:, c0:c0 + 1]
    feats = feat_ref[...].astype(bf16)                                 # (256, N)

    h1 = jnp.maximum(jnp.dot(wf1_ref[...], feats,
                             preferred_element_type=f32) + bf1_ref[...], 0.0)
    h2 = jnp.maximum(jnp.dot(wf2_ref[...], h1.astype(bf16),
                             preferred_element_type=f32) + bf2_ref[...], 0.0)
    o_ref[...] = (jnp.dot(wf3_ref[...], h2.astype(bf16),
                          preferred_element_type=f32)
                  + bf3_ref[...]).astype(o_ref.dtype)                  # (10, N)


# ----------------------------------------------------------------------------
# Wrapper
# ----------------------------------------------------------------------------
def net_forward(x_nchw, params):
    n, c_in, h, w = x_nchw.shape
    assert c_in == 3 and h == 32 and w == 32, "Net expects 3x32x32 inputs"

    hp, wp = h + 2, w + 2                       # zero-padded conv grid (34x34)
    img = hp * wp                               # columns per image
    m = _round_up(n * img, 128)                 # lane-aligned slab width
    hh, wh = h // 2, w // 2                     # pooled spatial extent (16x16)

    # Pool1-valid mask: 1 at padded coords (y, x) both odd in [1, 31] -- the
    # in-place locations of the 16x16 pooled map.  O(N) memory.
    v1 = np.zeros((1, m), np.float32)
    for b in range(n):
        for a in range(hh):
            for c in range(wh):
                v1[0, b * img + (2 * a + 1) * wp + (2 * c + 1)] = 1.0

    # Input: NCHW -> channel-padded (8, N*34*34) zero-padded, lane-aligned slab.
    xt = jnp.transpose(x_nchw, (1, 0, 2, 3))                    # (3, N, H, W)
    xt = jnp.pad(xt, ((0, 0), (0, 0), (1, 1), (1, 1)))          # conv zero pad
    xt = xt.reshape(3, n * img)
    xt = jnp.pad(xt, ((0, 5), (0, m - n * img)))                # 8 ch, lane pad

    bf16 = jnp.bfloat16
    # Conv weights stacked along the contraction axis: (C_out, 9 taps * 8 ch),
    # with zero padding in the unused channel slots.
    w1s = jnp.transpose(params["w1"], (0, 2, 3, 1))             # (6, 3, 3, 3)
    w1s = jnp.pad(w1s, ((0, 2), (0, 0), (0, 0), (0, 5))).reshape(8, 72)
    w2s = jnp.transpose(params["w2"], (0, 2, 3, 1))             # (16, 3, 3, 6)
    w2s = jnp.pad(w2s, ((0, 0), (0, 0), (0, 0), (0, 2))).reshape(16, 72)
    # fc1 weight permuted so the kernel's (spatial-major, channel-minor)
    # feature stacking matches PyTorch's CHW flatten order.
    wf1 = params["fc1_w"].reshape(120, 16, 16).transpose(0, 2, 1).reshape(120, 256)

    args = (
        xt, jnp.asarray(v1),
        w1s.astype(bf16), jnp.pad(params["b1"], (0, 2)).reshape(8, 1),
        w2s.astype(bf16), params["b2"].reshape(16, 1),
        params["w3"].reshape(16, 16).astype(bf16), params["b3"].reshape(16, 1),
        params["bn_gamma"].reshape(16, 1), params["bn_beta"].reshape(16, 1),
        wf1.astype(bf16), params["fc1_b"].reshape(120, 1),
        params["fc2_w"].astype(bf16), params["fc2_b"].reshape(84, 1),
        params["fc3_w"].astype(bf16), params["fc3_b"].reshape(10, 1),
    )

    kernel = functools.partial(_net_kernel, n_batch=n, wp=wp, img_stride=img,
                               n_valid=n * hh * wh)
    vmem = pl.BlockSpec(memory_space=pltpu.MemorySpace.VMEM)
    # Peak VMEM ~1.5 MiB (the 72xM f32 tap scratch dominates) -- well under the
    # default scoped limit on v5e/v6e/v7x, so no vmem_limit override is needed.
    out_t = pl.pallas_call(
        kernel,
        out_shape=jax.ShapeDtypeStruct((10, n), jnp.float32),
        in_specs=[vmem] * len(args),
        out_specs=vmem,
        scratch_shapes=[pltpu.VMEM((72, m), jnp.float32),
                        pltpu.VMEM((256, n), jnp.float32)],
    )(*args)
    return out_t.T                                               # (N, 10)


def init_params(key):
    ks = jax.random.split(key, 16)
    rnd = lambda k, shape, s=0.1: s * jax.random.normal(k, shape, jnp.float32)
    return {
        # LayerChoice candidate 0: Conv2d(3, 6, 3, padding=1)
        "w1": rnd(ks[0], (6, 3, 3, 3)), "b1": rnd(ks[1], (6,)),
        # LayerChoice candidate 0: Conv2d(6, 16, 3, padding=1)
        "w2": rnd(ks[2], (16, 6, 3, 3)), "b2": rnd(ks[3], (16,)),
        # Conv2d(16, 16, 1)
        "w3": rnd(ks[4], (16, 16, 1, 1)), "b3": rnd(ks[5], (16,)),
        # BatchNorm2d(16) affine params
        "bn_gamma": 1.0 + rnd(ks[6], (16,)), "bn_beta": rnd(ks[7], (16,)),
        # Linear layers (PyTorch layout: (out_features, in_features))
        "fc1_w": rnd(ks[8], (120, 256)), "fc1_b": rnd(ks[9], (120,)),
        "fc2_w": rnd(ks[10], (84, 120)), "fc2_b": rnd(ks[11], (84,)),
        "fc3_w": rnd(ks[12], (10, 84)), "fc3_b": rnd(ks[13], (10,)),
    }


if __name__ == "__main__":
    key = jax.random.PRNGKey(0)
    pkey, xkey = jax.random.split(key)
    params = init_params(pkey)
    # CIFAR-like input: batch=2, 3 channels, 32x32 spatial (NCHW).
    x = jax.random.normal(xkey, (2, 3, 32, 32), jnp.float32)

    out = jax.block_until_ready(jax.jit(net_forward)(x, params))
    assert out.shape == (2, 10) and out.dtype == jnp.float32
    print("KERNEL_OK")
</pallas_src>

<mosaic_0001>
module attributes {stable_mosaic.version = 11 : i64} {
  func.func @_net_kernel(%arg0: memref<8x2432xf32, #tpu.memory_space<vmem>>, %arg1: memref<1x2432xf32, #tpu.memory_space<vmem>>, %arg2: memref<8x72xbf16, #tpu.memory_space<vmem>>, %arg3: memref<8x1xf32, #tpu.memory_space<vmem>>, %arg4: memref<16x72xbf16, #tpu.memory_space<vmem>>, %arg5: memref<16x1xf32, #tpu.memory_space<vmem>>, %arg6: memref<16x16xbf16, #tpu.memory_space<vmem>>, %arg7: memref<16x1xf32, #tpu.memory_space<vmem>>, %arg8: memref<16x1xf32, #tpu.memory_space<vmem>>, %arg9: memref<16x1xf32, #tpu.memory_space<vmem>>, %arg10: memref<120x256xbf16, #tpu.memory_space<vmem>>, %arg11: memref<120x1xf32, #tpu.memory_space<vmem>>, %arg12: memref<84x120xbf16, #tpu.memory_space<vmem>>, %arg13: memref<84x1xf32, #tpu.memory_space<vmem>>, %arg14: memref<10x84xbf16, #tpu.memory_space<vmem>>, %arg15: memref<10x1xf32, #tpu.memory_space<vmem>>, %arg16: memref<10x2xf32, #tpu.memory_space<vmem>>, %arg17: memref<72x2432xf32, #tpu.memory_space<vmem>>, %arg18: memref<256x2xf32, #tpu.memory_space<vmem>>) attributes {dimension_semantics = [], scalar_prefetch = 0 : i64, scratch_operands = 2 : i64, tpu.core_type = #tpu.core_type<tc>} {
    %c0 = arith.constant 0 : index
    %c0_0 = arith.constant 0 : index
    %0 = vector.load %arg0[%c0, %c0_0] : memref<8x2432xf32, #tpu.memory_space<vmem>>, vector<8x2432xf32>
    %c35_i32 = arith.constant 35 : i32
    %1 = tpu.dynamic_rotate %0 by %c35_i32 dim 1 : vector<8x2432xf32>, i32 -> vector<8x2432xf32>
    %c0_1 = arith.constant 0 : index
    %c0_2 = arith.constant 0 : index
    %2 = vector.load %arg17[%c0_1, %c0_2] : memref<72x2432xf32, #tpu.memory_space<vmem>>, vector<8x2432xf32>
    tpu.vector_store %arg17[%c0_1, %c0_2], %1 {strides = array<i32>} : memref<72x2432xf32, #tpu.memory_space<vmem>>, vector<8x2432xf32>,
    %c34_i32 = arith.constant 34 : i32
    %3 = tpu.dynamic_rotate %0 by %c34_i32 dim 1 : vector<8x2432xf32>, i32 -> vector<8x2432xf32>
    %c8 = arith.constant 8 : index
    %c0_3 = arith.constant 0 : index
    %4 = vector.load %arg17[%c8, %c0_3] : memref<72x2432xf32, #tpu.memory_space<vmem>>, vector<8x2432xf32>
    tpu.vector_store %arg17[%c8, %c0_3], %3 {strides = array<i32>} : memref<72x2432xf32, #tpu.memory_space<vmem>>, vector<8x2432xf32>,
    %c33_i32 = arith.constant 33 : i32
    %5 = tpu.dynamic_rotate %0 by %c33_i32 dim 1 : vector<8x2432xf32>, i32 -> vector<8x2432xf32>
    %c16 = arith.constant 16 : index
    %c0_4 = arith.constant 0 : index
    %6 = vector.load %arg17[%c16, %c0_4] : memref<72x2432xf32, #tpu.memory_space<vmem>>, vector<8x2432xf32>
    tpu.vector_store %arg17[%c16, %c0_4], %5 {strides = array<i32>} : memref<72x2432xf32, #tpu.memory_space<vmem>>, vector<8x2432xf32>,
    %c1_i32 = arith.constant 1 : i32
    %7 = tpu.dynamic_rotate %0 by %c1_i32 dim 1 : vector<8x2432xf32>, i32 -> vector<8x2432xf32>
    %c24 = arith.constant 24 : index
    %c0_5 = arith.constant 0 : index
    %8 = vector.load %arg17[%c24, %c0_5] : memref<72x2432xf32, #tpu.memory_space<vmem>>, vector<8x2432xf32>
    tpu.vector_store %arg17[%c24, %c0_5], %7 {strides = array<i32>} : memref<72x2432xf32, #tpu.memory_space<vmem>>, vector<8x2432xf32>,
    %c32 = arith.constant 32 : index
    %c0_6 = arith.constant 0 : index
    %9 = vector.load %arg17[%c32, %c0_6] : memref<72x2432xf32, #tpu.memory_space<vmem>>, vector<8x2432xf32>
    tpu.vector_store %arg17[%c32, %c0_6], %0 {strides = array<i32>} : memref<72x2432xf32, #tpu.memory_space<vmem>>, vector<8x2432xf32>,
    %c2431_i32 = arith.constant 2431 : i32
    %10 = tpu.dynamic_rotate %0 by %c2431_i32 dim 1 : vector<8x2432xf32>, i32 -> vector<8x2432xf32>
    %c40 = arith.constant 40 : index
    %c0_7 = arith.constant 0 : index
    %11 = vector.load %arg17[%c40, %c0_7] : memref<72x2432xf32, #tpu.memory_space<vmem>>, vector<8x2432xf32>
    tpu.vector_store %arg17[%c40, %c0_7], %10 {strides = array<i32>} : memref<72x2432xf32, #tpu.memory_space<vmem>>, vector<8x2432xf32>,
    %c2399_i32 = arith.constant 2399 : i32
    %12 = tpu.dynamic_rotate %0 by %c2399_i32 dim 1 : vector<8x2432xf32>, i32 -> vector<8x2432xf32>
    %c48 = arith.constant 48 : index
    %c0_8 = arith.constant 0 : index
    %13 = vector.load %arg17[%c48, %c0_8] : memref<72x2432xf32, #tpu.memory_space<vmem>>, vector<8x2432xf32>
    tpu.vector_store %arg17[%c48, %c0_8], %12 {strides = array<i32>} : memref<72x2432xf32, #tpu.memory_space<vmem>>, vector<8x2432xf32>,
    %c2398_i32 = arith.constant 2398 : i32
    %14 = tpu.dynamic_rotate %0 by %c2398_i32 dim 1 : vector<8x2432xf32>, i32 -> vector<8x2432xf32>
    %c56 = arith.constant 56 : index
    %c0_9 = arith.constant 0 : index
    %15 = vector.load %arg17[%c56, %c0_9] : memref<72x2432xf32, #tpu.memory_space<vmem>>, vector<8x2432xf32>
    tpu.vector_store %arg17[%c56, %c0_9], %14 {strides = array<i32>} : memref<72x2432xf32, #tpu.memory_space<vmem>>, vector<8x2432xf32>,
    %c2397_i32 = arith.constant 2397 : i32
    %16 = tpu.dynamic_rotate %0 by %c2397_i32 dim 1 : vector<8x2432xf32>, i32 -> vector<8x2432xf32>
    %c64 = arith.constant 64 : index
    %c0_10 = arith.constant 0 : index
    %17 = vector.load %arg17[%c64, %c0_10] : memref<72x2432xf32, #tpu.memory_space<vmem>>, vector<8x2432xf32>
    tpu.vector_store %arg17[%c64, %c0_10], %16 {strides = array<i32>} : memref<72x2432xf32, #tpu.memory_space<vmem>>, vector<8x2432xf32>,
    %c0_11 = arith.constant 0 : index
    %c0_12 = arith.constant 0 : index
    %18 = vector.load %arg2[%c0_11, %c0_12] : memref<8x72xbf16, #tpu.memory_space<vmem>>, vector<8x72xbf16>
    %c0_13 = arith.constant 0 : index
    %c0_14 = arith.constant 0 : index
    %19 = vector.load %arg17[%c0_13, %c0_14] : memref<72x2432xf32, #tpu.memory_space<vmem>>, vector<72x2432xf32>
    %20 = arith.truncf %19 : vector<72x2432xf32> to vector<72x2432xbf16>
    %cst = arith.constant dense<0.000000e+00> : vector<8x2432xf32>
    %21 = tpu.matmul %18, %20, %cst {dimension_numbers = #tpu.dot_dimension_numbers<[1], [0], [0], [1], [0, 0, 1, 1], [], []>} : vector<8x72xbf16>, vector<72x2432xbf16>, vector<8x2432xf32> -> vector<8x2432xf32>
    %c0_15 = arith.constant 0 : index
    %c0_16 = arith.constant 0 : index
    %22 = vector.load %arg3[%c0_15, %c0_16] : memref<8x1xf32, #tpu.memory_space<vmem>>, vector<8x1xf32>
    %23 = vector.broadcast %22 : vector<8x1xf32> to vector<8x2432xf32>
    %24 = arith.addf %21, %23 : vector<8x2432xf32>
    %cst_17 = arith.constant 0.000000e+00 : f32
    %25 = vector.broadcast %cst_17 : f32 to vector<8x2432xf32>
    %26 = arith.maximumf %24, %25 : vector<8x2432xf32>
    %c0_18 = arith.constant 0 : index
    %c0_19 = arith.constant 0 : index
    %27 = vector.load %arg1[%c0_18, %c0_19] : memref<1x2432xf32, #tpu.memory_space<vmem>>, vector<1x2432xf32>
    %c2431_i32_20 = arith.constant 2431 : i32
    %28 = tpu.dynamic_rotate %26 by %c2431_i32_20 dim 1 : vector<8x2432xf32>, i32 -> vector<8x2432xf32>
    %29 = arith.maximumf %26, %28 : vector<8x2432xf32>
    %c2398_i32_21 = arith.constant 2398 : i32
    %30 = tpu.dynamic_rotate %26 by %c2398_i32_21 dim 1 : vector<8x2432xf32>, i32 -> vector<8x2432xf32>
    %c2397_i32_22 = arith.constant 2397 : i32
    %31 = tpu.dynamic_rotate %26 by %c2397_i32_22 dim 1 : vector<8x2432xf32>, i32 -> vector<8x2432xf32>
    %32 = arith.maximumf %30, %31 : vector<8x2432xf32>
    %33 = arith.maximumf %29, %32 : vector<8x2432xf32>
    %34 = vector.broadcast %27 : vector<1x2432xf32> to vector<8x2432xf32>
    %35 = arith.mulf %33, %34 : vector<8x2432xf32>
    %c70_i32 = arith.constant 70 : i32
    %36 = tpu.dynamic_rotate %35 by %c70_i32 dim 1 : vector<8x2432xf32>, i32 -> vector<8x2432xf32>
    %c0_23 = arith.constant 0 : index
    %c0_24 = arith.constant 0 : index
    %37 = vector.load %arg17[%c0_23, %c0_24] : memref<72x2432xf32, #tpu.memory_space<vmem>>, vector<8x2432xf32>
    tpu.vector_store %arg17[%c0_23, %c0_24], %36 {strides = array<i32>} : memref<72x2432xf32, #tpu.memory_space<vmem>>, vector<8x2432xf32>,
    %c68_i32 = arith.constant 68 : i32
    %38 = tpu.dynamic_rotate %35 by %c68_i32 dim 1 : vector<8x2432xf32>, i32 -> vector<8x2432xf32>
    %c8_25 = arith.constant 8 : index
    %c0_26 = arith.constant 0 : index
    %39 = vector.load %arg17[%c8_25, %c0_26] : memref<72x2432xf32, #tpu.memory_space<vmem>>, vector<8x2432xf32>
    tpu.vector_store %arg17[%c8_25, %c0_26], %38 {strides = array<i32>} : memref<72x2432xf32, #tpu.memory_space<vmem>>, vector<8x2432xf32>,
    %c66_i32 = arith.constant 66 : i32
    %40 = tpu.dynamic_rotate %35 by %c66_i32 dim 1 : vector<8x2432xf32>, i32 -> vector<8x2432xf32>
    %c16_27 = arith.constant 16 : index
    %c0_28 = arith.constant 0 : index
    %41 = vector.load %arg17[%c16_27, %c0_28] : memref<72x2432xf32, #tpu.memory_space<vmem>>, vector<8x2432xf32>
    tpu.vector_store %arg17[%c16_27, %c0_28], %40 {strides = array<i32>} : memref<72x2432xf32, #tpu.memory_space<vmem>>, vector<8x2432xf32>,
    %c2_i32 = arith.constant 2 : i32
    %42 = tpu.dynamic_rotate %35 by %c2_i32 dim 1 : vector<8x2432xf32>, i32 -> vector<8x2432xf32>
    %c24_29 = arith.constant 24 : index
    %c0_30 = arith.constant 0 : index
    %43 = vector.load %arg17[%c24_29, %c0_30] : memref<72x2432xf32, #tpu.memory_space<vmem>>, vector<8x2432xf32>
    tpu.vector_store %arg17[%c24_29, %c0_30], %42 {strides = array<i32>} : memref<72x2432xf32, #tpu.memory_space<vmem>>, vector<8x2432xf32>,
    %c32_31 = arith.constant 32 : index
    %c0_32 = arith.constant 0 : index
    %44 = vector.load %arg17[%c32_31, %c0_32] : memref<72x2432xf32, #tpu.memory_space<vmem>>, vector<8x2432xf32>
    tpu.vector_store %arg17[%c32_31, %c0_32], %35 {strides = array<i32>} : memref<72x2432xf32, #tpu.memory_space<vmem>>, vector<8x2432xf32>,
    %c2430_i32 = arith.constant 2430 : i32
    %45 = tpu.dynamic_rotate %35 by %c2430_i32 dim 1 : vector<8x2432xf32>, i32 -> vector<8x2432xf32>
    %c40_33 = arith.constant 40 : index
    %c0_34 = arith.constant 0 : index
    %46 = vector.load %arg17[%c40_33, %c0_34] : memref<72x2432xf32, #tpu.memory_space<vmem>>, vector<8x2432xf32>
    tpu.vector_store %arg17[%c40_33, %c0_34], %45 {strides = array<i32>} : memref<72x2432xf32, #tpu.memory_space<vmem>>, vector<8x2432xf32>,
    %c2366_i32 = arith.constant 2366 : i32
    %47 = tpu.dynamic_rotate %35 by %c2366_i32 dim 1 : vector<8x2432xf32>, i32 -> vector<8x2432xf32>
    %c48_35 = arith.constant 48 : index
    %c0_36 = arith.constant 0 : index
    %48 = vector.load %arg17[%c48_35, %c0_36] : memref<72x2432xf32, #tpu.memory_space<vmem>>, vector<8x2432xf32>
    tpu.vector_store %arg17[%c48_35, %c0_36], %47 {strides = array<i32>} : memref<72x2432xf32, #tpu.memory_space<vmem>>, vector<8x2432xf32>,
    %c2364_i32 = arith.constant 2364 : i32
    %49 = tpu.dynamic_rotate %35 by %c2364_i32 dim 1 : vector<8x2432xf32>, i32 -> vector<8x2432xf32>
    %c56_37 = arith.constant 56 : index
    %c0_38 = arith.constant 0 : index
    %50 = vector.load %arg17[%c56_37, %c0_38] : memref<72x2432xf32, #tpu.memory_space<vmem>>, vector<8x2432xf32>
    tpu.vector_store %arg17[%c56_37, %c0_38], %49 {strides = array<i32>} : memref<72x2432xf32, #tpu.memory_space<vmem>>, vector<8x2432xf32>,
    %c2362_i32 = arith.constant 2362 : i32
    %51 = tpu.dynamic_rotate %35 by %c2362_i32 dim 1 : vector<8x2432xf32>, i32 -> vector<8x2432xf32>
    %c64_39 = arith.constant 64 : index
    %c0_40 = arith.constant 0 : index
    %52 = vector.load %arg17[%c64_39, %c0_40] : memref<72x2432xf32, #tpu.memory_space<vmem>>, vector<8x2432xf32>
    tpu.vector_store %arg17[%c64_39, %c0_40], %51 {strides = array<i32>} : memref<72x2432xf32, #tpu.memory_space<vmem>>, vector<8x2432xf32>,
    %c0_41 = arith.constant 0 : index
    %c0_42 = arith.constant 0 : index
    %53 = vector.load %arg4[%c0_41, %c0_42] : memref<16x72xbf16, #tpu.memory_space<vmem>>, vector<16x72xbf16>
    %c0_43 = arith.constant 0 : index
    %c0_44 = arith.constant 0 : index
    %54 = vector.load %arg17[%c0_43, %c0_44] : memref<72x2432xf32, #tpu.memory_space<vmem>>, vector<72x2432xf32>
    %55 = arith.truncf %54 : vector<72x2432xf32> to vector<72x2432xbf16>
    %cst_45 = arith.constant dense<0.000000e+00> : vector<16x2432xf32>
    %56 = tpu.matmul %53, %55, %cst_45 {dimension_numbers = #tpu.dot_dimension_numbers<[1], [0], [0], [1], [0, 0, 1, 1], [], []>} : vector<16x72xbf16>, vector<72x2432xbf16>, vector<16x2432xf32> -> vector<16x2432xf32>
    %c0_46 = arith.constant 0 : index
    %c0_47 = arith.constant 0 : index
    %57 = vector.load %arg5[%c0_46, %c0_47] : memref<16x1xf32, #tpu.memory_space<vmem>>, vector<16x1xf32>
    %58 = vector.broadcast %57 : vector<16x1xf32> to vector<16x2432xf32>
    %59 = arith.addf %56, %58 : vector<16x2432xf32>
    %cst_48 = arith.constant 0.000000e+00 : f32
    %60 = vector.broadcast %cst_48 : f32 to vector<16x2432xf32>
    %61 = arith.maximumf %59, %60 : vector<16x2432xf32>
    %c0_49 = arith.constant 0 : index
    %c0_50 = arith.constant 0 : index
    %62 = vector.load %arg6[%c0_49, %c0_50] : memref<16x16xbf16, #tpu.memory_space<vmem>>, vector<16x16xbf16>
    %63 = arith.truncf %61 : vector<16x2432xf32> to vector<16x2432xbf16>
    %cst_51 = arith.constant dense<0.000000e+00> : vector<16x2432xf32>
    %64 = tpu.matmul %62, %63, %cst_51 {dimension_numbers = #tpu.dot_dimension_numbers<[1], [0], [0], [1], [0, 0, 1, 1], [], []>} : vector<16x16xbf16>, vector<16x2432xbf16>, vector<16x2432xf32> -> vector<16x2432xf32>
    %c0_52 = arith.constant 0 : index
    %c0_53 = arith.constant 0 : index
    %65 = vector.load %arg7[%c0_52, %c0_53] : memref<16x1xf32, #tpu.memory_space<vmem>>, vector<16x1xf32>
    %66 = vector.broadcast %65 : vector<16x1xf32> to vector<16x2432xf32>
    %67 = arith.addf %64, %66 : vector<16x2432xf32>
    %cst_54 = arith.constant 0.000000e+00 : f32
    %68 = vector.broadcast %cst_54 : f32 to vector<16x2432xf32>
    %69 = arith.maximumf %67, %68 : vector<16x2432xf32>
    %70 = arith.addf %69, %61 : vector<16x2432xf32>
    %71 = vector.broadcast %27 : vector<1x2432xf32> to vector<16x2432xf32>
    %72 = arith.mulf %70, %71 : vector<16x2432xf32>
    %cst_55 = arith.constant dense<0.000000e+00> : vector<16xf32>
    %73 = vector.multi_reduction <add>, %72, %cst_55 [1] : vector<16x2432xf32> to vector<16xf32>
    %74 = vector.shape_cast %73 : vector<16xf32> to vector<16x1xf32>
    %cst_56 = arith.constant 0.001953125 : f32
    %75 = vector.broadcast %cst_56 : f32 to vector<16x1xf32>
    %76 = arith.mulf %74, %75 : vector<16x1xf32>
    %77 = vector.broadcast %76 : vector<16x1xf32> to vector<16x2432xf32>
    %78 = arith.subf %70, %77 : vector<16x2432xf32>
    %79 = vector.broadcast %27 : vector<1x2432xf32> to vector<16x2432xf32>
    %80 = arith.mulf %78, %79 : vector<16x2432xf32>
    %81 = arith.mulf %80, %80 : vector<16x2432xf32>
    %cst_57 = arith.constant dense<0.000000e+00> : vector<16xf32>
    %82 = vector.multi_reduction <add>, %81, %cst_57 [1] : vector<16x2432xf32> to vector<16xf32>
    %83 = vector.shape_cast %82 : vector<16xf32> to vector<16x1xf32>
    %cst_58 = arith.constant 0.001953125 : f32
    %84 = vector.broadcast %cst_58 : f32 to vector<16x1xf32>
    %85 = arith.mulf %83, %84 : vector<16x1xf32>
    %86 = vector.broadcast %76 : vector<16x1xf32> to vector<16x2432xf32>
    %87 = arith.subf %70, %86 : vector<16x2432xf32>
    %cst_59 = arith.constant 9.99999974E-6 : f32
    %88 = vector.broadcast %cst_59 : f32 to vector<16x1xf32>
    %89 = arith.addf %85, %88 : vector<16x1xf32>
    %90 = math.rsqrt %89 : vector<16x1xf32>
    %91 = vector.broadcast %90 : vector<16x1xf32> to vector<16x2432xf32>
    %92 = arith.mulf %87, %91 : vector<16x2432xf32>
    %c0_60 = arith.constant 0 : index
    %c0_61 = arith.constant 0 : index
    %93 = vector.load %arg8[%c0_60, %c0_61] : memref<16x1xf32, #tpu.memory_space<vmem>>, vector<16x1xf32>
    %94 = vector.broadcast %93 : vector<16x1xf32> to vector<16x2432xf32>
    %95 = arith.mulf %92, %94 : vector<16x2432xf32>
    %c0_62 = arith.constant 0 : index
    %c0_63 = arith.constant 0 : index
    %96 = vector.load %arg9[%c0_62, %c0_63] : memref<16x1xf32, #tpu.memory_space<vmem>>, vector<16x1xf32>
    %97 = vector.broadcast %96 : vector<16x1xf32> to vector<16x2432xf32>
    %98 = arith.addf %95, %97 : vector<16x2432xf32>
    %c2430_i32_64 = arith.constant 2430 : i32
    %99 = tpu.dynamic_rotate %98 by %c2430_i32_64 dim 1 : vector<16x2432xf32>, i32 -> vector<16x2432xf32>
    %100 = arith.maximumf %98, %99 : vector<16x2432xf32>
    %c2364_i32_65 = arith.constant 2364 : i32
    %101 = tpu.dynamic_rotate %98 by %c2364_i32_65 dim 1 : vector<16x2432xf32>, i32 -> vector<16x2432xf32>
    %c2362_i32_66 = arith.constant 2362 : i32
    %102 = tpu.dynamic_rotate %98 by %c2362_i32_66 dim 1 : vector<16x2432xf32>, i32 -> vector<16x2432xf32>
    %103 = arith.maximumf %101, %102 : vector<16x2432xf32>
    %104 = arith.maximumf %100, %103 : vector<16x2432xf32>
    %c2428_i32 = arith.constant 2428 : i32
    %105 = tpu.dynamic_rotate %104 by %c2428_i32 dim 1 : vector<16x2432xf32>, i32 -> vector<16x2432xf32>
    %106 = arith.addf %104, %105 : vector<16x2432xf32>
    %c2296_i32 = arith.constant 2296 : i32
    %107 = tpu.dynamic_rotate %104 by %c2296_i32 dim 1 : vector<16x2432xf32>, i32 -> vector<16x2432xf32>
    %108 = arith.addf %106, %107 : vector<16x2432xf32>
    %c2292_i32 = arith.constant 2292 : i32
    %109 = tpu.dynamic_rotate %104 by %c2292_i32 dim 1 : vector<16x2432xf32>, i32 -> vector<16x2432xf32>
    %110 = arith.addf %108, %109 : vector<16x2432xf32>
    %cst_67 = arith.constant 2.500000e-01 : f32
    %111 = vector.broadcast %cst_67 : f32 to vector<16x2432xf32>
    %112 = arith.mulf %110, %111 : vector<16x2432xf32>
    %113 = vector.extract_strided_slice %112 {offsets = [0, 35], sizes = [16, 1], strides = [1, 1]} : vector<16x2432xf32> to vector<16x1xf32>
    %c0_68 = arith.constant 0 : index
    %c0_69 = arith.constant 0 : index
    %114 = vector.load %arg18[%c0_68, %c0_69] : memref<256x2xf32, #tpu.memory_space<vmem>>, vector<16x1xf32>
    tpu.vector_store %arg18[%c0_68, %c0_69], %113 {strides = array<i32>} : memref<256x2xf32, #tpu.memory_space<vmem>>, vector<16x1xf32>,
    %115 = vector.extract_strided_slice %112 {offsets = [0, 1191], sizes = [16, 1], strides = [1, 1]} : vector<16x2432xf32> to vector<16x1xf32>
    %c0_70 = arith.constant 0 : index
    %c1 = arith.constant 1 : index
    %116 = vector.load %arg18[%c0_70, %c1] : memref<256x2xf32, #tpu.memory_space<vmem>>, vector<16x1xf32>
    tpu.vector_store %arg18[%c0_70, %c1], %115 {strides = array<i32>} : memref<256x2xf32, #tpu.memory_space<vmem>>, vector<16x1xf32>,
    %117 = vector.extract_strided_slice %112 {offsets = [0, 43], sizes = [16, 1], strides = [1, 1]} : vector<16x2432xf32> to vector<16x1xf32>
    %c16_71 = arith.constant 16 : index
    %c0_72 = arith.constant 0 : index
    %118 = vector.load %arg18[%c16_71, %c0_72] : memref<256x2xf32, #tpu.memory_space<vmem>>, vector<16x1xf32>
    tpu.vector_store %arg18[%c16_71, %c0_72], %117 {strides = array<i32>} : memref<256x2xf32, #tpu.memory_space<vmem>>, vector<16x1xf32>,
    %119 = vector.extract_strided_slice %112 {offsets = [0, 1199], sizes = [16, 1], strides = [1, 1]} : vector<16x2432xf32> to vector<16x1xf32>
    %c16_73 = arith.constant 16 : index
    %c1_74 = arith.constant 1 : index
    %120 = vector.load %arg18[%c16_73, %c1_74] : memref<256x2xf32, #tpu.memory_space<vmem>>, vector<16x1xf32>
    tpu.vector_store %arg18[%c16_73, %c1_74], %119 {strides = array<i32>} : memref<256x2xf32, #tpu.memory_space<vmem>>, vector<16x1xf32>,
    %121 = vector.extract_strided_slice %112 {offsets = [0, 51], sizes = [16, 1], strides = [1, 1]} : vector<16x2432xf32> to vector<16x1xf32>
    %c32_75 = arith.constant 32 : index
    %c0_76 = arith.constant 0 : index
    %122 = vector.load %arg18[%c32_75, %c0_76] : memref<256x2xf32, #tpu.memory_space<vmem>>, vector<16x1xf32>
    tpu.vector_store %arg18[%c32_75, %c0_76], %121 {strides = array<i32>} : memref<256x2xf32, #tpu.memory_space<vmem>>, vector<16x1xf32>,
    %123 = vector.extract_strided_slice %112 {offsets = [0, 1207], sizes = [16, 1], strides = [1, 1]} : vector<16x2432xf32> to vector<16x1xf32>
    %c32_77 = arith.constant 32 : index
    %c1_78 = arith.constant 1 : index
    %124 = vector.load %arg18[%c32_77, %c1_78] : memref<256x2xf32, #tpu.memory_space<vmem>>, vector<16x1xf32>
    tpu.vector_store %arg18[%c32_77, %c1_78], %123 {strides = array<i32>} : memref<256x2xf32, #tpu.memory_space<vmem>>, vector<16x1xf32>,
    %125 = vector.extract_strided_slice %112 {offsets = [0, 59], sizes = [16, 1], strides = [1, 1]} : vector<16x2432xf32> to vector<16x1xf32>
    %c48_79 = arith.constant 48 : index
    %c0_80 = arith.constant 0 : index
    %126 = vector.load %arg18[%c48_79, %c0_80] : memref<256x2xf32, #tpu.memory_space<vmem>>, vector<16x1xf32>
    tpu.vector_store %arg18[%c48_79, %c0_80], %125 {strides = array<i32>} : memref<256x2xf32, #tpu.memory_space<vmem>>, vector<16x1xf32>,
    %127 = vector.extract_strided_slice %112 {offsets = [0, 1215], sizes = [16, 1], strides = [1, 1]} : vector<16x2432xf32> to vector<16x1xf32>
    %c48_81 = arith.constant 48 : index
    %c1_82 = arith.constant 1 : index
    %128 = vector.load %arg18[%c48_81, %c1_82] : memref<256x2xf32, #tpu.memory_space<vmem>>, vector<16x1xf32>
    tpu.vector_store %arg18[%c48_81, %c1_82], %127 {strides = array<i32>} : memref<256x2xf32, #tpu.memory_space<vmem>>, vector<16x1xf32>,
    %129 = vector.extract_strided_slice %112 {offsets = [0, 307], sizes = [16, 1], strides = [1, 1]} : vector<16x2432xf32> to vector<16x1xf32>
    %c64_83 = arith.constant 64 : index
    %c0_84 = arith.constant 0 : index
    %130 = vector.load %arg18[%c64_83, %c0_84] : memref<256x2xf32, #tpu.memory_space<vmem>>, vector<16x1xf32>
    tpu.vector_store %arg18[%c64_83, %c0_84], %129 {strides = array<i32>} : memref<256x2xf32, #tpu.memory_space<vmem>>, vector<16x1xf32>,
    %131 = vector.extract_strided_slice %112 {offsets = [0, 1463], sizes = [16, 1], strides = [1, 1]} : vector<16x2432xf32> to vector<16x1xf32>
    %c64_85 = arith.constant 64 : index
    %c1_86 = arith.constant 1 : index
    %132 = vector.load %arg18[%c64_85, %c1_86] : memref<256x2xf32, #tpu.memory_space<vmem>>, vector<16x1xf32>
    tpu.vector_store %arg18[%c64_85, %c1_86], %131 {strides = array<i32>} : memref<256x2xf32, #tpu.memory_space<vmem>>, vector<16x1xf32>,
    %133 = vector.extract_strided_slice %112 {offsets = [0, 315], sizes = [16, 1], strides = [1, 1]} : vector<16x2432xf32> to vector<16x1xf32>
    %c80 = arith.constant 80 : index
    %c0_87 = arith.constant 0 : index
    %134 = vector.load %arg18[%c80, %c0_87] : memref<256x2xf32, #tpu.memory_space<vmem>>, vector<16x1xf32>
    tpu.vector_store %arg18[%c80, %c0_87], %133 {strides = array<i32>} : memref<256x2xf32, #tpu.memory_space<vmem>>, vector<16x1xf32>,
    %135 = vector.extract_strided_slice %112 {offsets = [0, 1471], sizes = [16, 1], strides = [1, 1]} : vector<16x2432xf32> to vector<16x1xf32>
    %c80_88 = arith.constant 80 : index
    %c1_89 = arith.constant 1 : index
    %136 = vector.load %arg18[%c80_88, %c1_89] : memref<256x2xf32, #tpu.memory_space<vmem>>, vector<16x1xf32>
    tpu.vector_store %arg18[%c80_88, %c1_89], %135 {strides = array<i32>} : memref<256x2xf32, #tpu.memory_space<vmem>>, vector<16x1xf32>,
    %137 = vector.extract_strided_slice %112 {offsets = [0, 323], sizes = [16, 1], strides = [1, 1]} : vector<16x2432xf32> to vector<16x1xf32>
    %c96 = arith.constant 96 : index
    %c0_90 = arith.constant 0 : index
    %138 = vector.load %arg18[%c96, %c0_90] : memref<256x2xf32, #tpu.memory_space<vmem>>, vector<16x1xf32>
    tpu.vector_store %arg18[%c96, %c0_90], %137 {strides = array<i32>} : memref<256x2xf32, #tpu.memory_space<vmem>>, vector<16x1xf32>,
    %139 = vector.extract_strided_slice %112 {offsets = [0, 1479], sizes = [16, 1], strides = [1, 1]} : vector<16x2432xf32> to vector<16x1xf32>
    %c96_91 = arith.constant 96 : index
    %c1_92 = arith.constant 1 : index
    %140 = vector.load %arg18[%c96_91, %c1_92] : memref<256x2xf32, #tpu.memory_space<vmem>>, vector<16x1xf32>
    tpu.vector_store %arg18[%c96_91, %c1_92], %139 {strides = array<i32>} : memref<256x2xf32, #tpu.memory_space<vmem>>, vector<16x1xf32>,
    %141 = vector.extract_strided_slice %112 {offsets = [0, 331], sizes = [16, 1], strides = [1, 1]} : vector<16x2432xf32> to vector<16x1xf32>
    %c112 = arith.constant 112 : index
    %c0_93 = arith.constant 0 : index
    %142 = vector.load %arg18[%c112, %c0_93] : memref<256x2xf32, #tpu.memory_space<vmem>>, vector<16x1xf32>
    tpu.vector_store %arg18[%c112, %c0_93], %141 {strides = array<i32>} : memref<256x2xf32, #tpu.memory_space<vmem>>, vector<16x1xf32>,
    %143 = vector.extract_strided_slice %112 {offsets = [0, 1487], sizes = [16, 1], strides = [1, 1]} : vector<16x2432xf32> to vector<16x1xf32>
    %c112_94 = arith.constant 112 : index
    %c1_95 = arith.constant 1 : index
    %144 = vector.load %arg18[%c112_94, %c1_95] : memref<256x2xf32, #tpu.memory_space<vmem>>, vector<16x1xf32>
    tpu.vector_store %arg18[%c112_94, %c1_95], %143 {strides = array<i32>} : memref<256x2xf32, #tpu.memory_space<vmem>>, vector<16x1xf32>,
    %145 = vector.extract_strided_slice %112 {offsets = [0, 579], sizes = [16, 1], strides = [1, 1]} : vector<16x2432xf32> to vector<16x1xf32>
    %c128 = arith.constant 128 : index
    %c0_96 = arith.constant 0 : index
    %146 = vector.load %arg18[%c128, %c0_96] : memref<256x2xf32, #tpu.memory_space<vmem>>, vector<16x1xf32>
    tpu.vector_store %arg18[%c128, %c0_96], %145 {strides = array<i32>} : memref<256x2xf32, #tpu.memory_space<vmem>>, vector<16x1xf32>,
    %147 = vector.extract_strided_slice %112 {offsets = [0, 1735], sizes = [16, 1], strides = [1, 1]} : vector<16x2432xf32> to vector<16x1xf32>
    %c128_97 = arith.constant 128 : index
    %c1_98 = arith.constant 1 : index
    %148 = vector.load %arg18[%c128_97, %c1_98] : memref<256x2xf32, #tpu.memory_space<vmem>>, vector<16x1xf32>
    tpu.vector_store %arg18[%c128_97, %c1_98], %147 {strides = array<i32>} : memref<256x2xf32, #tpu.memory_space<vmem>>, vector<16x1xf32>,
    %149 = vector.extract_strided_slice %112 {offsets = [0, 587], sizes = [16, 1], strides = [1, 1]} : vector<16x2432xf32> to vector<16x1xf32>
    %c144 = arith.constant 144 : index
    %c0_99 = arith.constant 0 : index
    %150 = vector.load %arg18[%c144, %c0_99] : memref<256x2xf32, #tpu.memory_space<vmem>>, vector<16x1xf32>
    tpu.vector_store %arg18[%c144, %c0_99], %149 {strides = array<i32>} : memref<256x2xf32, #tpu.memory_space<vmem>>, vector<16x1xf32>,
    %151 = vector.extract_strided_slice %112 {offsets = [0, 1743], sizes = [16, 1], strides = [1, 1]} : vector<16x2432xf32> to vector<16x1xf32>
    %c144_100 = arith.constant 144 : index
    %c1_101 = arith.constant 1 : index
    %152 = vector.load %arg18[%c144_100, %c1_101] : memref<256x2xf32, #tpu.memory_space<vmem>>, vector<16x1xf32>
    tpu.vector_store %arg18[%c144_100, %c1_101], %151 {strides = array<i32>} : memref<256x2xf32, #tpu.memory_space<vmem>>, vector<16x1xf32>,
    %153 = vector.extract_strided_slice %112 {offsets = [0, 595], sizes = [16, 1], strides = [1, 1]} : vector<16x2432xf32> to vector<16x1xf32>
    %c160 = arith.constant 160 : index
    %c0_102 = arith.constant 0 : index
    %154 = vector.load %arg18[%c160, %c0_102] : memref<256x2xf32, #tpu.memory_space<vmem>>, vector<16x1xf32>
    tpu.vector_store %arg18[%c160, %c0_102], %153 {strides = array<i32>} : memref<256x2xf32, #tpu.memory_space<vmem>>, vector<16x1xf32>,
    %155 = vector.extract_strided_slice %112 {offsets = [0, 1751], sizes = [16, 1], strides = [1, 1]} : vector<16x2432xf32> to vector<16x1xf32>
    %c160_103 = arith.constant 160 : index
    %c1_104 = arith.constant 1 : index
    %156 = vector.load %arg18[%c160_103, %c1_104] : memref<256x2xf32, #tpu.memory_space<vmem>>, vector<16x1xf32>
    tpu.vector_store %arg18[%c160_103, %c1_104], %155 {strides = array<i32>} : memref<256x2xf32, #tpu.memory_space<vmem>>, vector<16x1xf32>,
    %157 = vector.extract_strided_slice %112 {offsets = [0, 603], sizes = [16, 1], strides = [1, 1]} : vector<16x2432xf32> to vector<16x1xf32>
    %c176 = arith.constant 176 : index
    %c0_105 = arith.constant 0 : index
    %158 = vector.load %arg18[%c176, %c0_105] : memref<256x2xf32, #tpu.memory_space<vmem>>, vector<16x1xf32>
    tpu.vector_store %arg18[%c176, %c0_105], %157 {strides = array<i32>} : memref<256x2xf32, #tpu.memory_space<vmem>>, vector<16x1xf32>,
    %159 = vector.extract_strided_slice %112 {offsets = [0, 1759], sizes = [16, 1], strides = [1, 1]} : vector<16x2432xf32> to vector<16x1xf32>
    %c176_106 = arith.constant 176 : index
    %c1_107 = arith.constant 1 : index
    %160 = vector.load %arg18[%c176_106, %c1_107] : memref<256x2xf32, #tpu.memory_space<vmem>>, vector<16x1xf32>
    tpu.vector_store %arg18[%c176_106, %c1_107], %159 {strides = array<i32>} : memref<256x2xf32, #tpu.memory_space<vmem>>, vector<16x1xf32>,
    %161 = vector.extract_strided_slice %112 {offsets = [0, 851], sizes = [16, 1], strides = [1, 1]} : vector<16x2432xf32> to vector<16x1xf32>
    %c192 = arith.constant 192 : index
    %c0_108 = arith.constant 0 : index
    %162 = vector.load %arg18[%c192, %c0_108] : memref<256x2xf32, #tpu.memory_space<vmem>>, vector<16x1xf32>
    tpu.vector_store %arg18[%c192, %c0_108], %161 {strides = array<i32>} : memref<256x2xf32, #tpu.memory_space<vmem>>, vector<16x1xf32>,
    %163 = vector.extract_strided_slice %112 {offsets = [0, 2007], sizes = [16, 1], strides = [1, 1]} : vector<16x2432xf32> to vector<16x1xf32>
    %c192_109 = arith.constant 192 : index
    %c1_110 = arith.constant 1 : index
    %164 = vector.load %arg18[%c192_109, %c1_110] : memref<256x2xf32, #tpu.memory_space<vmem>>, vector<16x1xf32>
    tpu.vector_store %arg18[%c192_109, %c1_110], %163 {strides = array<i32>} : memref<256x2xf32, #tpu.memory_space<vmem>>, vector<16x1xf32>,
    %165 = vector.extract_strided_slice %112 {offsets = [0, 859], sizes = [16, 1], strides = [1, 1]} : vector<16x2432xf32> to vector<16x1xf32>
    %c208 = arith.constant 208 : index
    %c0_111 = arith.constant 0 : index
    %166 = vector.load %arg18[%c208, %c0_111] : memref<256x2xf32, #tpu.memory_space<vmem>>, vector<16x1xf32>
    tpu.vector_store %arg18[%c208, %c0_111], %165 {strides = array<i32>} : memref<256x2xf32, #tpu.memory_space<vmem>>, vector<16x1xf32>,
    %167 = vector.extract_strided_slice %112 {offsets = [0, 2015], sizes = [16, 1], strides = [1, 1]} : vector<16x2432xf32> to vector<16x1xf32>
    %c208_112 = arith.constant 208 : index
    %c1_113 = arith.constant 1 : index
    %168 = vector.load %arg18[%c208_112, %c1_113] : memref<256x2xf32, #tpu.memory_space<vmem>>, vector<16x1xf32>
    tpu.vector_store %arg18[%c208_112, %c1_113], %167 {strides = array<i32>} : memref<256x2xf32, #tpu.memory_space<vmem>>, vector<16x1xf32>,
    %169 = vector.extract_strided_slice %112 {offsets = [0, 867], sizes = [16, 1], strides = [1, 1]} : vector<16x2432xf32> to vector<16x1xf32>
    %c224 = arith.constant 224 : index
    %c0_114 = arith.constant 0 : index
    %170 = vector.load %arg18[%c224, %c0_114] : memref<256x2xf32, #tpu.memory_space<vmem>>, vector<16x1xf32>
    tpu.vector_store %arg18[%c224, %c0_114], %169 {strides = array<i32>} : memref<256x2xf32, #tpu.memory_space<vmem>>, vector<16x1xf32>,
    %171 = vector.extract_strided_slice %112 {offsets = [0, 2023], sizes = [16, 1], strides = [1, 1]} : vector<16x2432xf32> to vector<16x1xf32>
    %c224_115 = arith.constant 224 : index
    %c1_116 = arith.constant 1 : index
    %172 = vector.load %arg18[%c224_115, %c1_116] : memref<256x2xf32, #tpu.memory_space<vmem>>, vector<16x1xf32>
    tpu.vector_store %arg18[%c224_115, %c1_116], %171 {strides = array<i32>} : memref<256x2xf32, #tpu.memory_space<vmem>>, vector<16x1xf32>,
    %173 = vector.extract_strided_slice %112 {offsets = [0, 875], sizes = [16, 1], strides = [1, 1]} : vector<16x2432xf32> to vector<16x1xf32>
    %c240 = arith.constant 240 : index
    %c0_117 = arith.constant 0 : index
    %174 = vector.load %arg18[%c240, %c0_117] : memref<256x2xf32, #tpu.memory_space<vmem>>, vector<16x1xf32>
    tpu.vector_store %arg18[%c240, %c0_117], %173 {strides = array<i32>} : memref<256x2xf32, #tpu.memory_space<vmem>>, vector<16x1xf32>,
    %175 = vector.extract_strided_slice %112 {offsets = [0, 2031], sizes = [16, 1], strides = [1, 1]} : vector<16x2432xf32> to vector<16x1xf32>
    %c240_118 = arith.constant 240 : index
    %c1_119 = arith.constant 1 : index
    %176 = vector.load %arg18[%c240_118, %c1_119] : memref<256x2xf32, #tpu.memory_space<vmem>>, vector<16x1xf32>
    tpu.vector_store %arg18[%c240_118, %c1_119], %175 {strides = array<i32>} : memref<256x2xf32, #tpu.memory_space<vmem>>, vector<16x1xf32>,
    %c0_120 = arith.constant 0 : index
    %c0_121 = arith.constant 0 : index
    %177 = vector.load %arg18[%c0_120, %c0_121] : memref<256x2xf32, #tpu.memory_space<vmem>>, vector<256x2xf32>
    %178 = arith.truncf %177 : vector<256x2xf32> to vector<256x2xbf16>
    %c0_122 = arith.constant 0 : index
    %c0_123 = arith.constant 0 : index
    %179 = vector.load %arg10[%c0_122, %c0_123] : memref<120x256xbf16, #tpu.memory_space<vmem>>, vector<120x256xbf16>
    %cst_124 = arith.constant dense<0.000000e+00> : vector<120x2xf32>
    %180 = tpu.matmul %179, %178, %cst_124 {dimension_numbers = #tpu.dot_dimension_numbers<[1], [0], [0], [1], [0, 0, 1, 1], [], []>} : vector<120x256xbf16>, vector<256x2xbf16>, vector<120x2xf32> -> vector<120x2xf32>
    %c0_125 = arith.constant 0 : index
    %c0_126 = arith.constant 0 : index
    %181 = vector.load %arg11[%c0_125, %c0_126] : memref<120x1xf32, #tpu.memory_space<vmem>>, vector<120x1xf32>
    %182 = vector.broadcast %181 : vector<120x1xf32> to vector<120x2xf32>
    %183 = arith.addf %180, %182 : vector<120x2xf32>
    %cst_127 = arith.constant 0.000000e+00 : f32
    %184 = vector.broadcast %cst_127 : f32 to vector<120x2xf32>
    %185 = arith.maximumf %183, %184 : vector<120x2xf32>
    %c0_128 = arith.constant 0 : index
    %c0_129 = arith.constant 0 : index
    %186 = vector.load %arg12[%c0_128, %c0_129] : memref<84x120xbf16, #tpu.memory_space<vmem>>, vector<84x120xbf16>
    %187 = arith.truncf %185 : vector<120x2xf32> to vector<120x2xbf16>
    %cst_130 = arith.constant dense<0.000000e+00> : vector<84x2xf32>
    %188 = tpu.matmul %186, %187, %cst_130 {dimension_numbers = #tpu.dot_dimension_numbers<[1], [0], [0], [1], [0, 0, 1, 1], [], []>} : vector<84x120xbf16>, vector<120x2xbf16>, vector<84x2xf32> -> vector<84x2xf32>
    %c0_131 = arith.constant 0 : index
    %c0_132 = arith.constant 0 : index
    %189 = vector.load %arg13[%c0_131, %c0_132] : memref<84x1xf32, #tpu.memory_space<vmem>>, vector<84x1xf32>
    %190 = vector.broadcast %189 : vector<84x1xf32> to vector<84x2xf32>
    %191 = arith.addf %188, %190 : vector<84x2xf32>
    %cst_133 = arith.constant 0.000000e+00 : f32
    %192 = vector.broadcast %cst_133 : f32 to vector<84x2xf32>
    %193 = arith.maximumf %191, %192 : vector<84x2xf32>
    %c0_134 = arith.constant 0 : index
    %c0_135 = arith.constant 0 : index
    %194 = vector.load %arg14[%c0_134, %c0_135] : memref<10x84xbf16, #tpu.memory_space<vmem>>, vector<10x84xbf16>
    %195 = arith.truncf %193 : vector<84x2xf32> to vector<84x2xbf16>
    %cst_136 = arith.constant dense<0.000000e+00> : vector<10x2xf32>
    %196 = tpu.matmul %194, %195, %cst_136 {dimension_numbers = #tpu.dot_dimension_numbers<[1], [0], [0], [1], [0, 0, 1, 1], [], []>} : vector<10x84xbf16>, vector<84x2xbf16>, vector<10x2xf32> -> vector<10x2xf32>
    %c0_137 = arith.constant 0 : index
    %c0_138 = arith.constant 0 : index
    %197 = vector.load %arg15[%c0_137, %c0_138] : memref<10x1xf32, #tpu.memory_space<vmem>>, vector<10x1xf32>
    %198 = vector.broadcast %197 : vector<10x1xf32> to vector<10x2xf32>
    %199 = arith.addf %196, %198 : vector<10x2xf32>
    %c0_139 = arith.constant 0 : index
    %c0_140 = arith.constant 0 : index
    %200 = vector.load %arg16[%c0_139, %c0_140] : memref<10x2xf32, #tpu.memory_space<vmem>>, vector<10x2xf32>
    tpu.vector_store %arg16[%c0_139, %c0_140], %199 {strides = array<i32>} : memref<10x2xf32, #tpu.memory_space<vmem>>, vector<10x2xf32>,
    return
  }
}

</mosaic_0001>

<bundles_post_ra>
// kernel: net_forward.1
= control target key start
LH: loop header
LB: loop body
LE: loop exit
PB: predicated region body
PF: predicated region fallthrough
CT: control target
= control target key end

     0   :  { %s6231_s19 = smov 35   ;;  %s6232_s20 = smov 34   ;;  %v111_v37 = vlaneseq  ;;  %vm987_vm6 = vcmask 1043456   ;;  %vm983_vm9 = vcmask 588800   ;;  %s12293_s0 = inlined_call_operand.vmem [shape: f32[8,2432], index: 0, kind: input, shape index: {}]   ;;  %s12294_s2 = inlined_call_operand.vmem [shape: bf16[8,72], index: 2, kind: input, shape index: {}]   ;;  %s12295_s3 = inlined_call_operand.vmem [shape: f32[8,1], index: 3, kind: input, shape index: {}]   ;;  %s12296_s1 = inlined_call_operand.vmem [shape: f32[1,2432], index: 1, kind: input, shape index: {}]   ;;  %s12297_s4 = inlined_call_operand.vmem [shape: bf16[16,72], index: 4, kind: input, shape index: {}]   ;;  %s12298_s5 = inlined_call_operand.vmem [shape: f32[16,1], index: 5, kind: input, shape index: {}]   ;;  %s12299_s7 = inlined_call_operand.vmem [shape: f32[16,1], index: 7, kind: input, shape index: {}]   ;;  %s12300_s8 = inlined_call_operand.vmem [shape: f32[16,1], index: 8, kind: input, shape index: {}]   ;;  %s12301_s9 = inlined_call_operand.vmem [shape: f32[16,1], index: 9, kind: input, shape index: {}]   ;;  %s12302_s6 = inlined_call_operand.vmem [shape: bf16[16,16], index: 6, kind: input, shape index: {}]   ;;  %s12303_s11 = inlined_call_operand.vmem [shape: f32[120,1], index: 11, kind: input, shape index: {}]   ;;  %s12304_s13 = inlined_call_operand.vmem [shape: f32[84,1], index: 13, kind: input, shape index: {}]   ;;  %s12305_s15 = inlined_call_operand.vmem [shape: f32[10,1], index: 15, kind: input, shape index: {}]   ;;  %s12306_s10 = inlined_call_operand.vmem [shape: bf16[120,256], index: 10, kind: input, shape index: {}]   ;;  %s12307_s12 = inlined_call_operand.vmem [shape: bf16[84,120], index: 12, kind: input, shape index: {}]   ;;  %s12308_s14 = inlined_call_operand.vmem [shape: bf16[10,84], index: 14, kind: input, shape index: {}]   ;;  %s12309_s16 = inlined_call_operand.vmem [shape: f32[10,2], index: 16, kind: output, shape index: {}]  }
   0x1   :  { %12622 = sst [smem:[#allocation77_spill]] %s12293_s0  ;;  %s6233_s21 = smov 33  }
   0x2   :  { %s12623_s23 = sld [smem:[#allocation77_spill]]  ;;  %s6235_s22 = smov 127   ;;  %v6544_v38 = vand.u32 127, %v111_v37 }
   0x3   :  { %s6236_s24 = smov 95   ;;  %s6237_s25 = smov 94  }
   0x4   :  { %12627 = vst [vmem:[#allocation7_spill] sm:$0xff] %v6544_v38  ;;  %vm190_vm0 = vcmp.lt.s32.totalorder %v6544_v38, 34  ;;  %vm113_vm1 = vcmp.lt.s32.totalorder %v6544_v38, 35  ;;  %s6238_s26 = smov 93   ;;  %vm344_vm2 = vcmp.lt.s32.totalorder %v6544_v38, 1  ;;  %vm267_vm3 = vcmp.lt.s32.totalorder %v6544_v38, 33 }
   0x5   :  { %vm517_vm4 = vcmp.lt.s32.totalorder %v6544_v38, 95  ;;  %vm671_vm5 = vcmp.lt.s32.totalorder %v6544_v38, 93  ;;  %vm594_vm7 = vcmp.lt.s32.totalorder %v6544_v38, 94  ;;  %vm440_vm8 = vcmp.lt.s32.totalorder %v6544_v38, 127  ;;  %s6245_s27 = smov 60   ;;  %s6246_s28 = smov 2  }
   0x6   :  { %vm2198_vm10 = vcmp.lt.s32.totalorder %v6544_v38, 58  ;;  %vm1640_vm11 = vcmp.lt.s32.totalorder %v6544_v38, 70  ;;  %vm1717_vm12 = vcmp.lt.s32.totalorder %v6544_v38, 68  ;;  %vm2044_vm13 = vcmp.lt.s32.totalorder %v6544_v38, 62  ;;  %s6252_s29 = smov 69   ;;  %s6253_s30 = smov 61  }
   0x7   :  { %vm1967_vm14 = vcmp.lt.s32.totalorder %v6544_v38, 126  ;;  %vm2121_vm15 = vcmp.lt.s32.totalorder %v6544_v38, 60  ;;  %s6257_s0 = smov 82   ;;  %s6258_s17 = smov 21  }
   0x8   :  { %v62_v0 = vld [vmem:[%s12623_s23 + $0x40] sm:$0xff]  ;;  %v63_v1 = vld [vmem:[%s12623_s23 + $0x48] sm:$0xff]  ;;  %v64_v9 = vld [vmem:[%s12623_s23 + $0x50] sm:$0xff]  ;;  %s6261_s18 = smov 90  }
   0x9   :  { %v58_v2 = vld [vmem:[%s12623_s23 + $0x20] sm:$0xff]  ;;  %v6361_v3 = vpack.i.bf16 %v63_v1, %v62_v0  ;;  %v59_v4 = vld [vmem:[%s12623_s23 + $0x28] sm:$0xff]  ;;  %v65_v10 = vld [vmem:[%s12623_s23 + $0x58] sm:$0xff] }
   0xa   :  { %v6369_v5 = vld [vmem:[%s12623_s23] sm:$0xff]  ;;  %v6374_v6 = vld [vmem:[%s12623_s23 + $0x8] sm:$0xff]  ;;  %v6376_v7 = vpack.i.bf16 %v59_v4, %v58_v2  ;;  %v60_v11 = vld [vmem:[%s12623_s23 + $0x30] sm:$0xff]  ;;  %v6412_v15 = vpack.i.bf16 %v65_v10, %v64_v9 }
   0xb   :  { %v6380_v8 = vpack.i.bf16 %v6374_v6, %v6369_v5  ;;  %5510 = vrot.lane.b32.xlu2 %v6361_v3, %s6231_s19  ;;  %v6400_v12 = vld [vmem:[%s12623_s23 + $0x38] sm:$0xff]  ;;  %v6405_v13 = vld [vmem:[%s12623_s23 + $0x10] sm:$0xff]  ;;  %v70_v18 = vld [vmem:[%s12623_s23 + $0x80] sm:$0xff] }
   0xc   :  { %5500 = vrot.lane.b32.xlu1 %v6376_v7, %s6231_s19  ;;  %v6410_v14 = vld [vmem:[%s12623_s23 + $0x18] sm:$0xff]  ;;  %v6415_v16 = vpack.i.bf16 %v6400_v12, %v60_v11  ;;  %v71_v19 = vld [vmem:[%s12623_s23 + $0x88] sm:$0xff]  ;;  %v68_v20 = vld [vmem:[%s12623_s23 + $0x70] sm:$0xff] }
   0xd   :  { %5490 = vrot.lane.b32.xlu0 %v6380_v8, %s6231_s19  ;;  %v6419_v17 = vpack.i.bf16 %v6410_v14, %v6405_v13  ;;  %v69_v21 = vld [vmem:[%s12623_s23 + $0x78] sm:$0xff]  ;;  %v66_v22 = vld [vmem:[%s12623_s23 + $0x60] sm:$0xff]  ;;  %v67_v23 = vld [vmem:[%s12623_s23 + $0x68] sm:$0xff]  ;;  %v6445_v24 = vpack.i.bf16 %v71_v19, %v70_v18 }
   0xe   :  { %v6447_v25 = vpack.i.bf16 %v69_v21, %v68_v20  ;;  %v6449_v26 = vpack.i.bf16 %v67_v23, %v66_v22  ;;  %v6460_v27 = vld [vmem:[%s12623_s23 + $0x90] sm:$0xff] }
  0x13   :  { %5515 = vrot.lane.b32.xlu2 %v6412_v15, %s6231_s19 }
  0x14   :  { %5505 = vrot.lane.b32.xlu1 %v6415_v16, %s6231_s19 }
  0x15   :  { %5495 = vrot.lane.b32.xlu0 %v6419_v17, %s6231_s19 }
  0x1b   :  { %5530 = vrot.lane.b32.xlu2 %v6445_v24, %s6231_s19 }
  0x1c   :  { %5525 = vrot.lane.b32.xlu1 %v6447_v25, %s6231_s19 }
  0x1d   :  { %5520 = vrot.lane.b32.xlu0 %v6449_v26, %s6231_s19 }
  0x23   :  { %5540 = vrot.lane.b32.xlu2 %v6419_v17, %s6232_s20 }
  0x24   :  { %5535 = vrot.lane.b32.xlu1 %v6380_v8, %s6232_s20 }
  0x25   :  { %109 = vrot.lane.b32.xlu0 %v6460_v27, %s6231_s19  ;;  %s6234_s19 = smov 1  }
  0x2b   :  { %5555 = vrot.lane.b32.xlu2 %v6361_v3, %s6232_s20 }
  0x2c   :  { %5550 = vrot.lane.b32.xlu1 %v6415_v16, %s6232_s20 }
  0x2d   :  { %5545 = vrot.lane.b32.xlu0 %v6376_v7, %s6232_s20 }
  0x33   :  { %5570 = vrot.lane.b32.xlu2 %v6447_v25, %s6232_s20 }
  0x34   :  { %5565 = vrot.lane.b32.xlu1 %v6449_v26, %s6232_s20 }
  0x35   :  { %5560 = vrot.lane.b32.xlu0 %v6412_v15, %s6232_s20 }
  0x3b   :  { %5580 = vrot.lane.b32.xlu2 %v6380_v8, %s6233_s21 }
  0x3c   :  { %188 = vrot.lane.b32.xlu1 %v6460_v27, %s6232_s20 }
  0x3d   :  { %5575 = vrot.lane.b32.xlu0 %v6445_v24, %s6232_s20 }
  0x43   :  { %5595 = vrot.lane.b32.xlu2 %v6415_v16, %s6233_s21 }
  0x44   :  { %5590 = vrot.lane.b32.xlu1 %v6376_v7, %s6233_s21 }
  0x45   :  { %5585 = vrot.lane.b32.xlu0 %v6419_v17, %s6233_s21 }
  0x4b   :  { %5610 = vrot.lane.b32.xlu2 %v6449_v26, %s6233_s21 }
  0x4c   :  { %5605 = vrot.lane.b32.xlu1 %v6412_v15, %s6233_s21 }
  0x4d   :  { %5600 = vrot.lane.b32.xlu0 %v6361_v3, %s6233_s21 }
  0x53   :  { %265 = vrot.lane.b32.xlu2 %v6460_v27, %s6233_s21 }
  0x54   :  { %5620 = vrot.lane.b32.xlu1 %v6445_v24, %s6233_s21 }
  0x55   :  { %5615 = vrot.lane.b32.xlu0 %v6447_v25, %s6233_s21  ;;  %s6242_s21 = smov 68  }
  0x5b   :  { %5635 = vrot.lane.b32.xlu2 %v6376_v7, %s6234_s19 }
  0x5c   :  { %5630 = vrot.lane.b32.xlu1 %v6419_v17, %s6234_s19 }
  0x5d   :  { %5625 = vrot.lane.b32.xlu0 %v6380_v8, %s6234_s19 }
  0x63   :  { %5650 = vrot.lane.b32.xlu2 %v6412_v15, %s6234_s19 }
  0x64   :  { %5645 = vrot.lane.b32.xlu1 %v6361_v3, %s6234_s19 }
  0x65   :  { %5640 = vrot.lane.b32.xlu0 %v6415_v16, %s6234_s19  ;;  %v6500_v28 = vpop.permute.xlu2 %5510 }
  0x66   :  { %12624 = vst [vmem:[#allocation4_spill] sm:$0xff] %v6500_v28  ;;  %v12314_v55 = vunpack.i.h.bf16 %v6500_v28 }
  0x6b   :  { %5665 = vrot.lane.b32.xlu2 %v6445_v24, %s6234_s19 }
  0x6c   :  { %5660 = vrot.lane.b32.xlu1 %v6447_v25, %s6234_s19 }
  0x6d   :  { %5655 = vrot.lane.b32.xlu0 %v6449_v26, %s6234_s19  ;;  %v6505_v29 = vpop.permute.xlu2 %5515 }
  0x6e   :  { %v12315_v56 = vunpack.i.l.bf16 %v6505_v29  ;;  %v12316_v57 = vunpack.i.h.bf16 %v6505_v29 }
  0x70   :  { %v6614_v9 = vsel %vm113_vm1, %v12314_v55, %v12315_v56 }
  0x71   :  { %12632 = vst [vmem:[#allocation12_spill] sm:$0xff] %v6614_v9 }
  0x73   :  { %5675 = vrot.lane.b32.xlu2 %v6419_v17, %s6235_s22 }
  0x74   :  { %5670 = vrot.lane.b32.xlu1 %v6380_v8, %s6235_s22 }
  0x75   :  { %342 = vrot.lane.b32.xlu0 %v6460_v27, %s6234_s19  ;;  %v6512_v30 = vpop.permute.xlu2 %5530  ;;  %s6243_s19 = smov 126  }
  0x7b   :  { %5690 = vrot.lane.b32.xlu2 %v6361_v3, %s6235_s22 }
  0x7c   :  { %5685 = vrot.lane.b32.xlu1 %v6415_v16, %s6235_s22 }
  0x7d   :  { %5680 = vrot.lane.b32.xlu0 %v6376_v7, %s6235_s22  ;;  %v6520_v31 = vpop.permute.xlu2 %5540 }
  0x7e   :  { %v6522_v32 = vpop.permute.xlu1 %5500 }
  0x7f   :  { %v6524_v33 = vpop.permute.xlu0 %5490 }
  0x83   :  { %5705 = vrot.lane.b32.xlu2 %v6447_v25, %s6235_s22 }
  0x84   :  { %5700 = vrot.lane.b32.xlu1 %v6449_v26, %s6235_s22 }
  0x85   :  { %5695 = vrot.lane.b32.xlu0 %v6412_v15, %s6235_s22  ;;  %v6532_v34 = vpop.permute.xlu2 %5555 }
  0x86   :  { %12625 = vst [vmem:[#allocation5_spill] sm:$0xff] %v6532_v34  ;;  %v6534_v35 = vpop.permute.xlu1 %5505  ;;  %v12311_v60 = vunpack.i.h.bf16 %v6532_v34 }
  0x87   :  { %12626 = vst [vmem:[#allocation6_spill] sm:$0xff] %v6534_v35  ;;  %v6536_v36 = vpop.permute.xlu0 %5495 }
  0x8b   :  { %5715 = vrot.lane.b32.xlu2 %v6380_v8, %s6236_s24 }
  0x8c   :  { %438 = vrot.lane.b32.xlu1 %v6460_v27, %s6235_s22 }
  0x8d   :  { %5710 = vrot.lane.b32.xlu0 %v6445_v24, %s6235_s22  ;;  %v6546_v39 = vpop.permute.xlu2 %5570 }
  0x8e   :  { %v6548_v40 = vpop.permute.xlu1 %5525  ;;  %v5573_v41 = vunpack.i.h.bf16 %v6546_v39  ;;  %v5572_v42 = vunpack.i.l.bf16 %v6546_v39 }
  0x8f   :  { %v5521_v43 = vpop.permute.xlu0 %5520  ;;  %v5528_v44 = vunpack.i.h.bf16 %v6548_v40  ;;  %v5527_v45 = vunpack.i.l.bf16 %v6548_v40 }
  0x90   :  { %v6560_v46 = vsel %vm190_vm0, %v5572_v42, %v5573_v41  ;;  %v5522_v58 = vunpack.i.l.bf16 %v5521_v43  ;;  %v5523_v61 = vunpack.i.h.bf16 %v5521_v43  ;;  %v5533_v43 = vunpack.i.h.bf16 %v6512_v30 }
  0x91   :  { %12628 = vst [vmem:[#allocation8_spill] sm:$0xff] %v6560_v46  ;;  %v6564_v47 = vsel %vm113_vm1, %v5527_v45, %v5528_v44 }
  0x92   :  { %12629 = vst [vmem:[#allocation9_spill] sm:$0xff] %v6564_v47  ;;  %v6618_v10 = vsel %vm113_vm1, %v5522_v58, %v5523_v61  ;;  %v6632_v18 = vsel %vm113_vm1, %v12316_v57, %v5522_v58  ;;  %v6654_v37 = vsel %vm113_vm1, %v5523_v61, %v5527_v45  ;;  %v5532_v58 = vunpack.i.l.bf16 %v6512_v30 }
  0x93   :  { %5730 = vrot.lane.b32.xlu2 %v6415_v16, %s6236_s24  ;;  %12633 = vst [vmem:[#allocation13_spill] sm:$0xff] %v6618_v10 }
  0x94   :  { %5725 = vrot.lane.b32.xlu1 %v6376_v7, %s6236_s24  ;;  %12635 = vst [vmem:[#allocation15_spill] sm:$0xff] %v6632_v18  ;;  %v6674_v23 = vsel %vm113_vm1, %v5528_v44, %v5532_v58  ;;  %v6678_v30 = vsel %vm113_vm1, %v5532_v58, %v5533_v43 }
  0x95   :  { %5720 = vrot.lane.b32.xlu0 %v6419_v17, %s6236_s24  ;;  %v6574_v49 = vpop.permute.xlu2 %5580  ;;  %12638 = vst [vmem:[#allocation18_spill] sm:$0xff] %v6654_v37 }
  0x96   :  { %v6576_v50 = vpop.permute.xlu1 %5535  ;;  %12640 = vst [vmem:[#allocation20_spill] sm:$0xff] %v6674_v23 }
  0x97   :  { %v6578_v51 = vpop.permute.xlu0 %109  ;;  %12641 = vst [vmem:[#allocation21_spill] sm:$0xff] %v6678_v30 }
  0x98   :  { %v6683_v22 = vsel %vm113_vm1, %v5533_v43, %v6578_v51 }
  0x99   :  { %12642 = vst [vmem:[#allocation22_spill] sm:$0xff] %v6683_v22 }
  0x9b   :  { %5745 = vrot.lane.b32.xlu2 %v6449_v26, %s6236_s24 }
  0x9c   :  { %5740 = vrot.lane.b32.xlu1 %v6412_v15, %s6236_s24 }
  0x9d   :  { %5735 = vrot.lane.b32.xlu0 %v6361_v3, %s6236_s24  ;;  %v6586_v52 = vpop.permute.xlu2 %5595 }
  0x9e   :  { %12630 = vst [vmem:[#allocation10_spill] sm:$0xff] %v6586_v52  ;;  %v6588_v53 = vpop.permute.xlu1 %5550 }
  0x9f   :  { %v6590_v54 = vpop.permute.xlu0 %5545 }
  0xa3   :  { %515 = vrot.lane.b32.xlu2 %v6460_v27, %s6236_s24 }
  0xa4   :  { %5755 = vrot.lane.b32.xlu1 %v6445_v24, %s6236_s24 }
  0xa5   :  { %5750 = vrot.lane.b32.xlu0 %v6447_v25, %s6236_s24  ;;  %v6601_v59 = vpop.permute.xlu2 %5610  ;;  %s6244_s24 = smov 62  }
  0xa6   :  { %v5566_v62 = vpop.permute.xlu1 %5565  ;;  %v5613_v23 = vunpack.i.h.bf16 %v6601_v59 }
  0xa7   :  { %v6604_v63 = vpop.permute.xlu0 %5560  ;;  %v5568_v0 = vunpack.i.h.bf16 %v5566_v62  ;;  %v5567_v1 = vunpack.i.l.bf16 %v5566_v62 }
  0xa8   :  { %12631 = vst [vmem:[#allocation11_spill] sm:$0xff] %v6604_v63  ;;  %v12313_v2 = vunpack.i.h.bf16 %v6604_v63  ;;  %v12312_v4 = vunpack.i.l.bf16 %v6604_v63  ;;  %v5542_v63 = vunpack.i.l.bf16 %v6520_v31 }
  0xa9   :  { %v6642_v20 = vsel %vm190_vm0, %v5567_v1, %v5568_v0  ;;  %v6658_v40 = vsel %vm190_vm0, %v5568_v0, %v5572_v42 }
  0xaa   :  { %v6626_v11 = vsel %vm190_vm0, %v12311_v60, %v12312_v4  ;;  %v6638_v19 = vsel %vm190_vm0, %v12313_v2, %v5567_v1  ;;  %12637 = vst [vmem:[#allocation17_spill] sm:$0xff] %v6642_v20 }
  0xab   :  { %12634 = vst [vmem:[#allocation14_spill] sm:$0xff] %v6626_v11  ;;  %5770 = vrot.lane.b32.xlu2 %v6376_v7, %s6237_s25 }
  0xac   :  { %12636 = vst [vmem:[#allocation16_spill] sm:$0xff] %v6638_v19  ;;  %5765 = vrot.lane.b32.xlu1 %v6419_v17, %s6237_s25 }
  0xad   :  { %12639 = vst [vmem:[#allocation19_spill] sm:$0xff] %v6658_v40  ;;  %5760 = vrot.lane.b32.xlu0 %v6380_v8, %s6237_s25  ;;  %v6668_v1 = vpop.permute.xlu2 %265 }
  0xae   :  { %v6670_v45 = vpop.permute.xlu1 %188 }
  0xaf   :  { %v5576_v61 = vpop.permute.xlu0 %5575 }
  0xb0   :  { %v5578_v42 = vunpack.i.h.bf16 %v5576_v61  ;;  %v5577_v0 = vunpack.i.l.bf16 %v5576_v61 }
  0xb2   :  { %v6689_v62 = vsel %vm190_vm0, %v5573_v41, %v5577_v0  ;;  %v6693_v61 = vsel %vm190_vm0, %v5577_v0, %v5578_v42  ;;  %v6698_v44 = vsel %vm190_vm0, %v5578_v42, %v6670_v45 }
  0xb3   :  { %12643 = vst [vmem:[#allocation23_spill] sm:$0xff] %v6689_v62  ;;  %5785 = vrot.lane.b32.xlu2 %v6412_v15, %s6237_s25 }
  0xb4   :  { %12644 = vst [vmem:[#allocation24_spill] sm:$0xff] %v6693_v61  ;;  %5780 = vrot.lane.b32.xlu1 %v6361_v3, %s6237_s25 }
  0xb5   :  { %12645 = vst [vmem:[#allocation25_spill] sm:$0xff] %v6698_v44  ;;  %5775 = vrot.lane.b32.xlu0 %v6415_v16, %s6237_s25  ;;  %v6712_v41 = vpop.permute.xlu2 %5635 }
  0xb6   :  { %v6714_v42 = vpop.permute.xlu1 %5590 }
  0xb7   :  { %v6716_v0 = vpop.permute.xlu0 %5585 }
  0xbb   :  { %5800 = vrot.lane.b32.xlu2 %v6445_v24, %s6237_s25 }
  0xbc   :  { %5795 = vrot.lane.b32.xlu1 %v6447_v25, %s6237_s25 }
  0xbd   :  { %5790 = vrot.lane.b32.xlu0 %v6449_v26, %s6237_s25  ;;  %v6724_v39 = vpop.permute.xlu2 %5650 }
  0xbe   :  { %12646 = vst [vmem:[#allocation26_spill] sm:$0xff] %v6724_v39  ;;  %v6726_v43 = vpop.permute.xlu1 %5605  ;;  %v12331_v61 = vunpack.i.l.bf16 %v6724_v39 }
  0xbf   :  { %12647 = vst [vmem:[#allocation27_spill] sm:$0xff] %v6726_v43  ;;  %v6728_v58 = vpop.permute.xlu0 %5600  ;;  %v12656_v20 = vunpack.i.h.bf16 %v6726_v43 }
  0xc0   :  { %12648 = vst [vmem:[#allocation28_spill] sm:$0xff] %v6728_v58  ;;  %v12326_v44 = vunpack.i.h.bf16 %v6728_v58 }
  0xc3   :  { %5810 = vrot.lane.b32.xlu2 %v6419_v17, %s6238_s26 }
  0xc4   :  { %5805 = vrot.lane.b32.xlu1 %v6380_v8, %s6238_s26 }
  0xc5   :  { %592 = vrot.lane.b32.xlu0 %v6460_v27, %s6237_s25  ;;  %v6736_v48 = vpop.permute.xlu2 %5665 }
  0xc6   :  { %v12317_v21 = vunpack.i.h.bf16 %v6736_v48  ;;  %v5667_v60 = vunpack.i.l.bf16 %v6736_v48  ;;  %v6740_v4 = vpop.permute.xlu1 %5620 }
  0xc7   :  { %v5616_v2 = vpop.permute.xlu0 %5615  ;;  %v5623_v55 = vunpack.i.h.bf16 %v6740_v4  ;;  %v5622_v56 = vunpack.i.l.bf16 %v6740_v4 }
  0xc8   :  { %v6750_v8 = vsel %vm344_vm2, %v5667_v60, %v12317_v21 }
  0xc9   :  { %12649 = vst [vmem:[#allocation29_spill] sm:$0xff] %v6750_v8  ;;  %v6754_v17 = vsel %vm267_vm3, %v5622_v56, %v5623_v55  ;;  %v5618_v8 = vunpack.i.h.bf16 %v5616_v2 }
  0xca   :  { %12650 = vst [vmem:[#allocation30_spill] sm:$0xff] %v6754_v17 }
  0xcb   :  { %5825 = vrot.lane.b32.xlu2 %v6361_v3, %s6238_s26  ;;  %v6860_v19 = vsel %vm267_vm3, %v5618_v8, %v5622_v56 }
  0xcc   :  { %5820 = vrot.lane.b32.xlu1 %v6415_v16, %s6238_s26  ;;  %12665 = vst [vmem:[#allocation43_spill] sm:$0xff] %v6860_v19 }
  0xcd   :  { %5815 = vrot.lane.b32.xlu0 %v6376_v7, %s6238_s26  ;;  %v6764_v4 = vpop.permute.xlu2 %5675  ;;  %v12327_v7 = vunpack.i.l.bf16 %v6726_v43 }
  0xce   :  { %v6766_v21 = vpop.permute.xlu1 %5630 }
  0xcf   :  { %v6768_v22 = vpop.permute.xlu0 %5625  ;;  %v12683_v58 = vunpack.i.l.bf16 %v6766_v21 }
  0xd0   :  { %v12684_v43 = vunpack.i.h.bf16 %v6768_v22 }
  0xd3   :  { %5840 = vrot.lane.b32.xlu2 %v6447_v25, %s6238_s26 }
  0xd4   :  { %5835 = vrot.lane.b32.xlu1 %v6449_v26, %s6238_s26  ;;  %v5612_v26 = vunpack.i.l.bf16 %v6601_v59  ;;  %v5617_v59 = vunpack.i.l.bf16 %v5616_v2 }
  0xd5   :  { %5830 = vrot.lane.b32.xlu0 %v6412_v15, %s6238_s26  ;;  %v6774_v57 = vpop.permute.xlu2 %5690  ;;  %v6792_v15 = vsel %vm267_vm3, %v12326_v44, %v12327_v7 }
  0xd6   :  { %v6776_v3 = vpop.permute.xlu1 %5645  ;;  %12652 = vst [vmem:[#allocation32_spill] sm:$0xff] %v6792_v15  ;;  %v6824_v44 = vsel %vm267_vm3, %v5612_v26, %v5613_v23  ;;  %v6828_v37 = vsel %vm267_vm3, %v5613_v23, %v5617_v59 }
  0xd7   :  { %12651 = vst [vmem:[#allocation31_spill] sm:$0xff] %v6776_v3  ;;  %v6778_v16 = vpop.permute.xlu0 %5640  ;;  %v12330_v30 = vunpack.i.h.bf16 %v6776_v3  ;;  %v5538_v3 = vunpack.i.h.bf16 %v6576_v50 }
  0xd8   :  { %12658 = vst [vmem:[#allocation37_spill] sm:$0xff] %v6824_v44 }
  0xd9   :  { %v6800_v62 = vsel %vm344_vm2, %v12330_v30, %v12331_v61  ;;  %v6814_v61 = vsel %vm267_vm3, %v5617_v59, %v5618_v8  ;;  %12659 = vst [vmem:[#allocation38_spill] sm:$0xff] %v6828_v37 }
  0xda   :  { %12653 = vst [vmem:[#allocation33_spill] sm:$0xff] %v6800_v62 }
  0xdb   :  { %12655 = vst [vmem:[#allocation35_spill] sm:$0xff] %v6814_v61 }
  0xdc   :  { %669 = vrot.lane.b32.xlu1 %v6460_v27, %s6238_s26 }
  0xdd   :  { %5845 = vrot.lane.b32.xlu0 %v6445_v24, %s6238_s26  ;;  %v6809_v7 = vpop.permute.xlu2 %5705  ;;  %v6820_v24 = vsel %vm267_vm3, %v12656_v20, %v5612_v26 }
  0xde   :  { %12654 = vst [vmem:[#allocation34_spill] sm:$0xff] %v6809_v7  ;;  %v5661_v40 = vpop.permute.xlu1 %5660 }
  0xdf   :  { %v5656_v30 = vpop.permute.xlu0 %5655  ;;  %v5663_v2 = vunpack.i.h.bf16 %v5661_v40  ;;  %v5662_v17 = vunpack.i.l.bf16 %v5661_v40  ;;  %12657 = vst [vmem:[#allocation36_spill] sm:$0xff] %v6820_v24  ;;  %v12661_v40 = vunpack.i.h.bf16 %v6724_v39 }
  0xe0   :  { %v5658_v10 = vunpack.i.h.bf16 %v5656_v30  ;;  %v5657_v27 = vunpack.i.l.bf16 %v5656_v30 }
  0xe1   :  { %v6832_v18 = vsel %vm344_vm2, %v5662_v17, %v5663_v2 }
  0xe2   :  { %12660 = vst [vmem:[#allocation39_spill] sm:$0xff] %v6832_v18  ;;  %v6838_v30 = vsel %vm344_vm2, %v12661_v40, %v5657_v27  ;;  %v6842_v20 = vsel %vm344_vm2, %v5657_v27, %v5658_v10  ;;  %v6846_v26 = vsel %vm344_vm2, %v5658_v10, %v5662_v17  ;;  %v6864_v10 = vsel %vm344_vm2, %v5663_v2, %v5667_v60 }
  0xe3   :  { %12662 = vst [vmem:[#allocation40_spill] sm:$0xff] %v6838_v30  ;;  %v12667_v27 = vunpack.i.h.bf16 %v6736_v48  ;;  %v6884_v60 = vsel %vm267_vm3, %v5623_v55, %v6668_v1 }
  0xe4   :  { %12663 = vst [vmem:[#allocation41_spill] sm:$0xff] %v6842_v20 }
  0xe5   :  { %12664 = vst [vmem:[#allocation42_spill] sm:$0xff] %v6846_v26  ;;  %v6868_v17 = vpop.permute.xlu2 %5715 }
  0xe6   :  { %12666 = vst [vmem:[#allocation44_spill] sm:$0xff] %v6864_v10  ;;  %v6870_v59 = vpop.permute.xlu1 %5670  ;;  %v12347_v10 = vunpack.i.l.bf16 %v6868_v17 }
  0xe7   :  { %v6872_v23 = vpop.permute.xlu0 %342  ;;  %12669 = vst [vmem:[#allocation46_spill] sm:$0xff] %v6884_v60 }
  0xe8   :  { %v6879_v56 = vsel %vm344_vm2, %v12667_v27, %v6872_v23 }
  0xe9   :  { %12668 = vst [vmem:[#allocation45_spill] sm:$0xff] %v6879_v56 }
  0xed   :  { %v6888_v2 = vpop.permute.xlu2 %5730 }
  0xee   :  { %v6890_v25 = vpop.permute.xlu1 %5685 }
  0xef   :  { %v6892_v40 = vpop.permute.xlu0 %5680 }
  0xf5   :  { %v6894_v19 = vpop.permute.xlu2 %5745 }
  0xf6   :  { %v6896_v48 = vpop.permute.xlu1 %5700 }
  0xf7   :  { %12670 = vst [vmem:[#allocation47_spill] sm:$0xff] %v6896_v48  ;;  %v6898_v27 = vpop.permute.xlu0 %5695 }
  0xf8   :  { %12671 = vst [vmem:[#allocation48_spill] sm:$0xff] %v6898_v27  ;;  %v5492_v27 = vunpack.i.l.bf16 %v6524_v33 }
  0xfd   :  { %v6902_v55 = vpop.permute.xlu2 %515 }
  0xfe   :  { %12672 = vst [vmem:[#allocation49_spill] sm:$0xff] %v6902_v55  ;;  %v6909_v8 = vsel %vm517_vm4, %v6902_v55, %v12347_v10  ;;  %v6911_v60 = vpop.permute.xlu1 %438 }
  0xff   :  { %12673 = vst [vmem:[#allocation50_spill] sm:$0xff] %v6909_v8  ;;  %v6913_v56 = vpop.permute.xlu0 %5710 }
 0x100   :  { %12674 = vst [vmem:[#allocation51_spill] sm:$0xff] %v6911_v60 }
 0x101   :  { %12675 = vst [vmem:[#allocation52_spill] sm:$0xff] %v6913_v56 }
 0x105   :  { %v6915_v37 = vpop.permute.xlu2 %5770 }
 0x106   :  { %v6917_v26 = vpop.permute.xlu1 %5725 }
 0x107   :  { %v6919_v44 = vpop.permute.xlu0 %5720 }
 0x108   :  { %v12368_v56 = vunpack.i.h.bf16 %v6919_v44  ;;  %v12369_v7 = vunpack.i.l.bf16 %v6919_v44 }
 0x10a   :  { %v533_v15 = vsel %vm517_vm4, %v12369_v7, %v12368_v56  ;;  %v12682_v7 = vunpack.i.h.bf16 %v6764_v4  ;;  %v5497_v56 = vunpack.i.l.bf16 %v6536_v36 }
 0x10d   :  { %v6921_v20 = vpop.permute.xlu2 %5785 }
 0x10e   :  { %v6923_v24 = vpop.permute.xlu1 %5740 }
 0x10f   :  { %12676 = vst [vmem:[#allocation53_spill] sm:$0xff] %v6923_v24  ;;  %v6925_v30 = vpop.permute.xlu0 %5735 }
 0x115   :  { %v6927_v47 = vpop.permute.xlu2 %5800 }
 0x116   :  { %12677 = vst [vmem:[#allocation54_spill] sm:$0xff] %v6927_v47  ;;  %v6929_v10 = vpop.permute.xlu1 %5755  ;;  %v12376_v47 = vunpack.i.l.bf16 %v6764_v4 }
 0x117   :  { %12678 = vst [vmem:[#allocation55_spill] sm:$0xff] %v6929_v10  ;;  %v6931_v55 = vpop.permute.xlu0 %5750 }
 0x118   :  { %12679 = vst [vmem:[#allocation56_spill] sm:$0xff] %v6931_v55 }
 0x11d   :  { %v6933_v60 = vpop.permute.xlu2 %5810 }
 0x11e   :  { %v12361_v46 = vunpack.i.h.bf16 %v6933_v60  ;;  %v12362_v9 = vunpack.i.l.bf16 %v6933_v60  ;;  %v6938_v11 = vpop.permute.xlu1 %5765 }
 0x11f   :  { %v6940_v61 = vpop.permute.xlu0 %5760 }
 0x120   :  { %v687_v62 = vsel %vm671_vm5, %v12362_v9, %v12361_v46  ;;  %v12680_v46 = vunpack.i.h.bf16 %v6938_v11  ;;  %v12681_v9 = vunpack.i.l.bf16 %v6938_v11 }
 0x121   :  { %v960_v55 = vpack.c.bf16 %v687_v62, %v687_v62 }
 0x122   :  { %v610_v62 = vsel %vm594_vm7, %v12681_v9, %v12680_v46  ;;  %v456_v46 = vsel %vm440_vm8, %v12376_v47, %v12682_v7  ;;  %v5583_v9 = vunpack.i.h.bf16 %v6574_v49  ;;  %v5503_v47 = vunpack.i.h.bf16 %v6522_v32 }
 0x123   :  { %v995_v18 = vsel %vm987_vm6, %v960_v55, 0  ;;  %v941_v34 = vpack.c.bf16 %v610_v62, %v533_v15  ;;  %v922_v15 = vpack.c.bf16 %v456_v46, %v6405_v13  ;;  %v5493_v62 = vunpack.i.h.bf16 %v6524_v33 }
 0x124   :  { %1074 = vmatpush.bf16.msra.mxu2 %v995_v18  ;;  %v12382_v18 = vunpack.i.l.bf16 %v6716_v0  ;;  %v5502_v13 = vunpack.i.l.bf16 %v6522_v32  ;;  %v5543_v46 = vunpack.i.h.bf16 %v6520_v31  ;;  %v5498_v32 = vunpack.i.h.bf16 %v6536_v36 }
 0x125   :  { %v5537_v31 = vunpack.i.l.bf16 %v6576_v50  ;;  %v130_v24 = vsel %vm113_vm1, %v5493_v62, %v5497_v56  ;;  %v5582_v33 = vunpack.i.l.bf16 %v6574_v49  ;;  %v7026_v50 = vsel %vm113_vm1, %v5492_v27, %v5493_v62  ;;  %v7132_v8 = vpop.permute.xlu2 %5825 }
 0x126   :  { %v6969_v55 = vpop.permute.xlu1 %5780  ;;  %v284_v39 = vsel %vm267_vm3, %v5583_v9, %v12382_v18  ;;  %v207_v18 = vsel %vm190_vm0, %v5538_v3, %v5542_v63  ;;  %v7018_v48 = vsel %vm113_vm1, %v5497_v56, %v5498_v32  ;;  %v12689_v56 = vunpack.i.h.bf16 %v6500_v28 }
 0x127   :  { %v6971_v10 = vpop.permute.xlu0 %5775  ;;  %v884_v36 = vpack.c.bf16 %v207_v18, %v130_v24  ;;  %v7046_v24 = vsel %vm190_vm0, %v5537_v31, %v5538_v3  ;;  %v12692_v18 = vunpack.i.h.bf16 %v6534_v35  ;;  %v7056_v62 = vsel %vm113_vm1, %v5498_v32, %v5502_v13  ;;  %v7067_v3 = vld [vmem:[%s12294_s2] sm:$0xf]  ;;  %s6247_s2 = smov 66  }
 0x128   :  { %1075 = vmatpush.bf16.msra.mxu2 %v941_v34  ;;  %v361_v34 = vsel %vm344_vm2, %v12684_v43, %v12683_v58  ;;  %v5507_v58 = vunpack.i.l.bf16 %v6534_v35  ;;  %12693 = vst [vmem:[#allocation60_spill] sm:$0xff] %v7056_v62  ;;  %v5762_v32 = vunpack.i.l.bf16 %v6940_v61 }
 0x129   :  { %v903_v7 = vpack.c.bf16 %v361_v34, %v284_v39  ;;  %v7022_v39 = vsel %vm190_vm0, %v5542_v63, %v5543_v46  ;;  %v12686_v34 = vunpack.i.h.bf16 %v6505_v29 }
 0x12c   :  { %1076 = vmatpush.bf16.msra.mxu2 %v922_v15 }
 0x12e   :  { %v7005_v43 = vpop.permute.xlu1 %5795 }
 0x12f   :  { %12685 = vst [vmem:[#allocation57_spill] sm:$0xff] %v7005_v43  ;;  %v7007_v15 = vpop.permute.xlu0 %5790  ;;  %v12687_v43 = vunpack.i.l.bf16 %v6505_v29  ;;  %v7052_v29 = vsel %vm113_vm1, %v5507_v58, %v12692_v18  ;;  %v7079_v18 = vsel %vm113_vm1, %v6578_v51, %v5492_v27  ;;  %v5547_v51 = vunpack.i.l.bf16 %v6590_v54 }
 0x130   :  { %1077 = vmatpush.bf16.msra.mxu2 %v903_v7  ;;  %v12690_v7 = vunpack.i.l.bf16 %v6500_v28  ;;  %v5627_v28 = vunpack.i.l.bf16 %v6768_v22 }
 0x131   :  { %v7034_v49 = vsel %vm113_vm1, %v12687_v43, %v12686_v34  ;;  %v7060_v43 = vsel %vm113_vm1, %v5502_v13, %v5503_v47  ;;  %v7074_v13 = vsel %vm267_vm3, %v5582_v33, %v5583_v9  ;;  %v7108_v9 = vsel %vm190_vm0, %v6670_v45, %v5537_v31 }
 0x132   :  { %12688 = vst [vmem:[#allocation58_spill] sm:$0xff] %v7034_v49  ;;  %v7042_v63 = vsel %vm113_vm1, %v12690_v7, %v12689_v56  ;;  %v5763_v7 = vunpack.i.h.bf16 %v6940_v61  ;;  %v12699_v34 = vunpack.i.h.bf16 %v6588_v53  ;;  %v12700_v56 = vunpack.i.l.bf16 %v6588_v53 }
 0x133   :  { %12691 = vst [vmem:[#allocation59_spill] sm:$0xff] %v7042_v63  ;;  %v5718_v61 = vunpack.i.h.bf16 %v6868_v17  ;;  %v12702_v31 = vunpack.i.l.bf16 %v6933_v60 }
 0x134   :  { %12694 = vst [vmem:[#allocation61_spill] sm:$0xff] %v7060_v43  ;;  %1078 = vmatpush.bf16.msra.mxu2 %v884_v36  ;;  %v7083_v36 = vsel %vm113_vm1, %v5503_v47, %v5507_v58  ;;  %v7116_v47 = vsel %vm190_vm0, %v12700_v56, %v12699_v34  ;;  %v5673_v34 = vunpack.i.h.bf16 %v6870_v59  ;;  %v612_v56 = vsel %vm594_vm7, %v5762_v32, %v5763_v7 }
 0x135   :  { %12695 = vst [vmem:[#allocation62_spill] sm:$0xff] %v7083_v36 }
 0x136   :  { %v7088_v63 = vpop.permute.xlu1 %5805 }
 0x137   :  { %12696 = vst [vmem:[#allocation63_spill] sm:$0xff] %v7088_v63  ;;  %v7090_v35 = vpop.permute.xlu0 %592  ;;  %v5808_v27 = vunpack.i.h.bf16 %v7088_v63  ;;  %5273 = vmatmul.msk.bf16.vlgmr.msra.gmra.mxu2 %vm983_vm9, %v7067_v3  ;;  %v12701_v49 = vunpack.i.l.bf16 %v7088_v63  ;;  %v12704_v63 = vunpack.i.l.bf16 %v6586_v52 }
 0x138   :  { %12697 = vst [vmem:[#allocation64_spill] sm:$0xff] %v7090_v35  ;;  %v7100_v58 = vsel %vm594_vm7, %v7090_v35, %v5762_v32 }
 0x139   :  { %12698 = vst [vmem:[#allocation65_spill] sm:$0xff] %v7100_v58  ;;  %v689_v45 = vsel %vm671_vm5, %v12701_v49, %v5808_v27  ;;  %v688_v36 = vsel %vm671_vm5, %v5808_v27, %v12702_v31  ;;  %v7137_v58 = vsel %vm267_vm3, %v6668_v1, %v5582_v33  ;;  %v12703_v49 = vunpack.i.h.bf16 %v6586_v52 }
 0x13a   :  { %v958_v43 = vpack.c.bf16 %v689_v45, %v689_v45  ;;  %v959_v35 = vpack.c.bf16 %v688_v36, %v688_v36  ;;  %v7149_v31 = vsel %vm190_vm0, %v5543_v46, %v5547_v51  ;;  %v12706_v36 = vunpack.i.h.bf16 %v6590_v54 }
 0x13b   :  { %v7145_v27 = vsel %vm267_vm3, %v12704_v63, %v12703_v49  ;;  %12705 = vst [vmem:[#allocation66_spill] sm:$0xff] %v7149_v31  ;;  %v12708_v63 = vunpack.i.l.bf16 %v6938_v11  ;;  %v12397_v31 = vunpack.i.h.bf16 %v6971_v10 }
 0x13c   :  { %v7155_v45 = vsel %vm190_vm0, %v5547_v51, %v12706_v36  ;;  %v989_v1 = vsel %vm987_vm6, %v958_v43, 0  ;;  %v992_v33 = vsel %vm987_vm6, %v959_v35, 0  ;;  %v12709_v51 = vunpack.i.h.bf16 %v6768_v22 }
 0x13d   :  { %12707 = vst [vmem:[#allocation67_spill] sm:$0xff] %v7155_v45  ;;  %v611_v49 = vsel %vm594_vm7, %v5763_v7, %v12708_v63  ;;  %1048 = vmatpush.bf16.msra.mxu0 %v989_v1  ;;  %1061 = vmatpush.bf16.msra.mxu1 %v992_v33  ;;  %v12710_v7 = vunpack.i.l.bf16 %v6868_v17  ;;  %v12711_v33 = vunpack.i.l.bf16 %v6919_v44  ;;  %v12712_v63 = vunpack.i.l.bf16 %v6870_v59 }
 0x13e   :  { %v362_v43 = vsel %vm344_vm2, %v5627_v28, %v12709_v51  ;;  %v7174_v36 = vpop.permute.xlu1 %5820  ;;  %v12393_v17 = vunpack.i.l.bf16 %v6969_v55 }
 0x13f   :  { %v5816_v45 = vpop.permute.xlu0 %5815  ;;  %v535_v1 = vsel %vm517_vm4, %v12710_v7, %v5718_v61  ;;  %v534_v22 = vsel %vm517_vm4, %v5718_v61, %v12711_v33  ;;  %v458_v51 = vsel %vm440_vm8, %v12712_v63, %v5673_v34  ;;  %v12392_v46 = vunpack.i.h.bf16 %v7174_v36 }
 0x140   :  { %v5817_v35 = vunpack.i.l.bf16 %v5816_v45  ;;  %v939_v32 = vpack.c.bf16 %v612_v56, %v535_v1  ;;  %v940_v52 = vpack.c.bf16 %v611_v49, %v534_v22  ;;  %v12713_v7 = vunpack.i.l.bf16 %v6764_v4 }
 0x141   :  { %v363_v61 = vsel %vm344_vm2, %v6872_v23, %v5627_v28  ;;  %v5818_v63 = vunpack.i.h.bf16 %v5816_v45  ;;  %v12714_v56 = vunpack.i.h.bf16 %v6933_v60  ;;  %v12715_v1 = vunpack.i.l.bf16 %v7132_v8 }
 0x142   :  { %v457_v62 = vsel %vm440_vm8, %v5673_v34, %v12713_v7  ;;  %1049 = vmatpush.bf16.msra.mxu0 %v939_v32  ;;  %1062 = vmatpush.bf16.msra.mxu1 %v940_v52  ;;  %v5772_v22 = vunpack.i.l.bf16 %v6915_v37  ;;  %v920_v28 = vpack.c.bf16 %v458_v51, %v6369_v5  ;;  %v12396_v52 = vunpack.i.h.bf16 %v6888_v2 }
 0x143   :  { %v686_v49 = vsel %vm671_vm5, %v12714_v56, %v5817_v35  ;;  %v682_v34 = vsel %vm671_vm5, %v12392_v46, %v12715_v1  ;;  %v5727_v60 = vunpack.i.l.bf16 %v6917_v26  ;;  %v12394_v32 = vunpack.i.l.bf16 %v6925_v30 }
 0x144   :  { %v961_v23 = vpack.c.bf16 %v686_v49, %v686_v49  ;;  %v965_v45 = vpack.c.bf16 %v682_v34, %v682_v34  ;;  %v921_v7 = vpack.c.bf16 %v457_v62, %v6374_v6  ;;  %v12395_v56 = vunpack.i.h.bf16 %v6890_v25 }
 0x145   :  { %v12716_v46 = vunpack.i.h.bf16 %v6938_v11  ;;  %v5682_v51 = vunpack.i.l.bf16 %v6892_v40  ;;  %v605_v6 = vsel %vm594_vm7, %v12397_v31, %v12393_v17  ;;  %v685_v62 = vsel %vm671_vm5, %v5817_v35, %v5818_v63 }
 0x146   :  { %v998_v33 = vsel %vm987_vm6, %v961_v23, 0  ;;  %v1010_v1 = vsel %vm987_vm6, %v965_v45, 0  ;;  %1050 = vmatpush.bf16.msra.mxu0 %v920_v28  ;;  %1063 = vmatpush.bf16.msra.mxu1 %v921_v7  ;;  %v12717_v49 = vunpack.i.l.bf16 %v7174_v36  ;;  %v5633_v34 = vunpack.i.h.bf16 %v6766_v21 }
 0x147   :  { %v609_v5 = vsel %vm594_vm7, %v12716_v46, %v5772_v22  ;;  %v5637_v46 = vunpack.i.l.bf16 %v6712_v41  ;;  %v12398_v28 = vunpack.i.h.bf16 %v6778_v16  ;;  %1087 = vmatpush.bf16.msrb.mxu2 %v998_v33  ;;  %1139 = vmatpush.bf16.msra.mxu3 %v1010_v1  ;;  %v902_v23 = vpack.c.bf16 %v362_v43, %v7074_v13 }
 0x148   :  { %v684_v11 = vsel %vm671_vm5, %v5818_v63, %v12717_v49  ;;  %v5642_v45 = vunpack.i.l.bf16 %v6778_v16  ;;  %v901_v7 = vpack.c.bf16 %v363_v61, %v7137_v58  ;;  %v12718_v35 = vunpack.i.h.bf16 %v6919_v44  ;;  %v7253_v61 = vpop.permute.xlu1 %5835  ;;  %v7255_v44 = vpop.permute.xlu0 %5830 }
 0x149   :  { %v528_v63 = vsel %vm517_vm4, %v12396_v52, %v12394_v32  ;;  %v962_v49 = vpack.c.bf16 %v685_v62, %v685_v62  ;;  %v963_v13 = vpack.c.bf16 %v684_v11, %v684_v11  ;;  %v5588_v43 = vunpack.i.h.bf16 %v6716_v0 }
 0x14a   :  { %v532_v17 = vsel %vm517_vm4, %v12718_v35, %v5727_v60  ;;  %v946_v1 = vpack.c.bf16 %v605_v6, %v528_v63  ;;  %v5773_v58 = vunpack.i.h.bf16 %v6915_v37  ;;  %1051 = vmatpush.bf16.msra.mxu0 %v901_v7  ;;  %1064 = vmatpush.bf16.msra.mxu1 %v902_v23  ;;  %v12719_v35 = vunpack.i.h.bf16 %v6764_v4 }
 0x14b   :  { %v942_v33 = vpack.c.bf16 %v609_v5, %v532_v17  ;;  %v12720_v5 = vunpack.i.l.bf16 %v6774_v57  ;;  %v5728_v6 = vunpack.i.h.bf16 %v6917_v26  ;;  %v5777_v62 = vunpack.i.l.bf16 %v6971_v10 }
 0x14c   :  { %v455_v17 = vsel %vm440_vm8, %v12719_v35, %v5682_v51  ;;  %v5837_v11 = vunpack.i.l.bf16 %v7253_v61  ;;  %v5833_v23 = vunpack.i.h.bf16 %v7255_v44  ;;  %1140 = vmatpush.bf16.msra.mxu3 %v946_v1  ;;  %v5732_v4 = vunpack.i.l.bf16 %v6888_v2 }
 0x14d   :  { %v451_v37 = vsel %vm440_vm8, %v12395_v56, %v12720_v5  ;;  %1088 = vmatpush.bf16.msrb.mxu2 %v942_v33  ;;  %v12721_v7 = vunpack.i.l.bf16 %v6716_v0  ;;  %v12722_v26 = vunpack.i.l.bf16 %v6766_v21  ;;  %v356_v33 = vsel %vm344_vm2, %v5642_v45, %v12398_v28  ;;  %v977_v21 = vld [vmem:[%s12295_s3] sm:$0xff]  ;;  %s6241_s3 = smov 70  }
 0x14e   :  { %v923_v1 = vpack.c.bf16 %v455_v17, %v6410_v14  ;;  %v927_v5 = vpack.c.bf16 %v451_v37, %v6400_v12  ;;  %v1004_v32 = vsel %vm987_vm6, %v963_v13, 0  ;;  %v5593_v56 = vunpack.i.h.bf16 %v6714_v42 }
 0x14f   :  { %v283_v63 = vsel %vm267_vm3, %v12721_v7, %v5588_v43  ;;  %v360_v35 = vsel %vm344_vm2, %v12722_v26, %v5633_v34  ;;  %v1001_v7 = vsel %vm987_vm6, %v962_v49, 0  ;;  %v5687_v52 = vunpack.i.l.bf16 %v6890_v25 }
 0x150   :  { %v5683_v26 = vunpack.i.h.bf16 %v6892_v40  ;;  %v12723_v31 = vpack.c.bf16 %v7108_v9, %v7079_v18  ;;  %v12724_v28 = vpack.c.bf16 %v7046_v24, %v7026_v50  ;;  %v608_v12 = vsel %vm594_vm7, %v5772_v22, %v5773_v58  ;;  %1141 = vmatpush.bf16.msra.mxu3 %v927_v5  ;;  %v6216_v5 = vld [vmem:[%s12623_s23 + $0x20] sm:$0xff] }
 0x151   :  { %v5592_v14 = vunpack.i.l.bf16 %v6714_v42  ;;  %1089 = vmatpush.bf16.msrb.mxu2 %v923_v1  ;;  %v531_v49 = vsel %vm517_vm4, %v5727_v60, %v5728_v6  ;;  %v607_v18 = vsel %vm594_vm7, %v5773_v58, %v5777_v62  ;;  %v678_v50 = vsel %vm671_vm5, %v5833_v23, %v5837_v11 }
 0x152   :  { %1052 = vmatpush.bf16.msra.mxu0 %v12723_v31  ;;  %1065 = vmatpush.bf16.msra.mxu1 %v12724_v28  ;;  %v904_v24 = vpack.c.bf16 %v360_v35, %v283_v63  ;;  %v908_v9 = vpack.c.bf16 %v356_v33, %v7145_v27  ;;  %v12725_v31 = vunpack.i.l.bf16 %v6588_v53  ;;  %v12726_v22 = vunpack.i.h.bf16 %v6590_v54 }
 0x153   :  { %v454_v54 = vsel %vm440_vm8, %v5682_v51, %v5683_v26  ;;  %v12727_v27 = vunpack.i.h.bf16 %v7174_v36  ;;  %v12728_v28 = vunpack.i.l.bf16 %v7174_v36  ;;  %v943_v58 = vpack.c.bf16 %v608_v12, %v531_v49 }
 0x154   :  { %v7327_v60 = vsel %vm190_vm0, %v12726_v22, %v12725_v31  ;;  %v453_v37 = vsel %vm440_vm8, %v5683_v26, %v5687_v52  ;;  %1142 = vmatpush.bf16.msra.mxu3 %v908_v9  ;;  %v889_v40 = vpack.c.bf16 %v7116_v47, %v7052_v29  ;;  %v281_v36 = vsel %vm267_vm3, %v5592_v14, %v5593_v56  ;;  %v6217_v26 = vld [vmem:[%s12623_s23 + $0x28] sm:$0xff]  ;;  %v12731_v9 = vld [vmem:[#allocation47_spill] sm:$0xff] }
 0x155   :  { %5271 = vmatmul.msk.bf16.vlgmr.msra.gmra.mxu0 %vm983_vm9, %v7067_v3  ;;  %5272 = vmatmul.msk.bf16.vlgmr.msra.gmra.mxu1 %vm983_vm9, %v7067_v3  ;;  %v683_v13 = vsel %vm671_vm5, %v12728_v28, %v12727_v27  ;;  %v12729_v51 = vunpack.i.h.bf16 %v6712_v41  ;;  %v5792_v35 = vunpack.i.l.bf16 %v7007_v15  ;;  %v359_v29 = vsel %vm344_vm2, %v5633_v34, %v5637_v46  ;;  %v12734_v27 = vld [vmem:[#allocation66_spill] sm:$0xff] }
 0x156   :  { %1100 = vmatpush.bf16.msrb.mxu0 %v1001_v7  ;;  %1113 = vmatpush.bf16.msrb.mxu1 %v1004_v32  ;;  %v530_v32 = vsel %vm517_vm4, %v5728_v6, %v5732_v4  ;;  %v969_v6 = vpack.c.bf16 %v678_v50, %v678_v50  ;;  %v964_v33 = vpack.c.bf16 %v683_v13, %v683_v13  ;;  %v5747_v47 = vunpack.i.l.bf16 %v6894_v19  ;;  %v12735_v13 = vld [vmem:[#allocation61_spill] sm:$0xff] }
 0x157   :  { %v944_v17 = vpack.c.bf16 %v607_v18, %v530_v32  ;;  %1090 = vmatpush.bf16.msrb.mxu2 %v904_v24  ;;  %v358_v63 = vsel %vm344_vm2, %v5637_v46, %v12729_v51  ;;  %v5788_v1 = vunpack.i.h.bf16 %v6921_v20  ;;  %v924_v7 = vpack.c.bf16 %v454_v54, %v6216_v5  ;;  %v12730_v46 = vld [vmem:[#allocation53_spill] sm:$0xff]  ;;  %v12733_v54 = vld [vmem:[#allocation60_spill] sm:$0xff] }
 0x158   :  { %v925_v12 = vpack.c.bf16 %v453_v37, %v6217_v26  ;;  %v6239_v49 = vmov 0   ;;  %v5743_v34 = vunpack.i.h.bf16 %v12730_v46  ;;  %v5828_v18 = vunpack.i.h.bf16 %v7132_v8  ;;  %1143 = vmatpush.bf16.msra.mxu3 %v889_v40  ;;  %v12737_v37 = vld [vmem:[#allocation48_spill] sm:$0xff] }
 0x159   :  { %5849 = vset.pattern.permute.xlu2 %v6239_v49  ;;  %6210 = vset.pattern.permute.xlu0 %v6239_v49  ;;  %v5832_v50 = vunpack.i.l.bf16 %v7255_v44  ;;  %v1022_v24 = vsel %vm987_vm6, %v969_v6, 0  ;;  %v5702_v31 = vunpack.i.l.bf16 %v12731_v9  ;;  %v12732_v22 = vpack.c.bf16 %v7022_v39, %v7018_v48 }
 0x15a   :  { %1101 = vmatpush.bf16.msrb.mxu0 %v943_v58  ;;  %1114 = vmatpush.bf16.msrb.mxu1 %v944_v17  ;;  %v282_v32 = vsel %vm267_vm3, %v5588_v43, %v5592_v14  ;;  %v886_v28 = vpack.c.bf16 %v12734_v27, %v12733_v54  ;;  %v12736_v58 = vld [vmem:[#allocation67_spill] sm:$0xff]  ;;  %v5698_v6 = vunpack.i.h.bf16 %v12737_v37  ;;  %v1007_v51 = vsel %vm987_vm6, %v964_v33, 0  ;;  %v7437_v33 = vpop.permute.xlu0 %5845 }
 0x15b   :  { %980 = vperm.xlu2 %5849, %v977_v21   ;;  %6211 = vset.pattern.permute.xlu1 %v6239_v49  ;;  %v887_v17 = vpack.c.bf16 %v12736_v58, %v12735_v13  ;;  %v12738_v48 = vunpack.i.h.bf16 %v6971_v10  ;;  %v601_v39 = vsel %vm594_vm7, %v5788_v1, %v5792_v35  ;;  %v905_v43 = vpack.c.bf16 %v359_v29, %v282_v32  ;;  %v12747_v32 = vld [vmem:[#allocation27_spill] sm:$0xff] }
 0x15c   :  { %1091 = vmatpush.bf16.msrb.mxu2 %v12732_v22  ;;  %1191 = vmatpush.bf16.msrb.mxu3 %v1022_v24  ;;  %v906_v14 = vpack.c.bf16 %v358_v63, %v281_v36  ;;  %v12739_v40 = vunpack.i.h.bf16 %v6888_v2  ;;  %v12740_v36 = vunpack.i.l.bf16 %v7132_v8  ;;  %v7435_v63 = vpop.permute.xlu2 %5840  ;;  %v5783_v24 = vunpack.i.h.bf16 %v6969_v55 }
 0x15d   :  { %v606_v0 = vsel %vm594_vm7, %v5777_v62, %v12738_v48  ;;  %5278 = vmatmul.msk.bf16.vlgmr.msra.gmra.mxu3 %vm983_vm9, %v7067_v3  ;;  %v524_v62 = vsel %vm517_vm4, %v5743_v34, %v5747_v47  ;;  %v12746_v22 = vunpack.i.h.bf16 %v6890_v25  ;;  %v12748_v54 = vunpack.i.h.bf16 %v12747_v32 }
 0x15e   :  { %1102 = vmatpush.bf16.msrb.mxu0 %v924_v7  ;;  %1115 = vmatpush.bf16.msrb.mxu1 %v925_v12  ;;  %v529_v10 = vsel %vm517_vm4, %v5732_v4, %v12739_v40  ;;  %v681_v2 = vsel %vm671_vm5, %v12740_v36, %v5828_v18  ;;  %v680_v4 = vsel %vm671_vm5, %v5828_v18, %v5832_v50  ;;  %v12741_v7 = vld [vmem:[#allocation10_spill] sm:$0xff]  ;;  %v12749_v27 = vunpack.i.l.bf16 %v12747_v32  ;;  %v12757_v32 = vld [vmem:[#allocation31_spill] sm:$0xff] }
 0x15f   :  { %5274 = vmatmul.msk.bf16.vlgmr.msrb.gmra.mxu2 %vm983_vm9, %v7067_v3  ;;  %v945_v29 = vpack.c.bf16 %v606_v0, %v529_v10  ;;  %v950_v5 = vpack.c.bf16 %v601_v39, %v524_v62  ;;  %v12742_v26 = vunpack.i.l.bf16 %v12741_v7  ;;  %v12743_v12 = vld [vmem:[#allocation26_spill] sm:$0xff]  ;;  %v452_v42 = vsel %vm440_vm8, %v5687_v52, %v12746_v22  ;;  %v12754_v22 = vld [vmem:[#allocation11_spill] sm:$0xff] }
 0x160   :  { %1126 = vmatpush.bf16.msra.mxu2 %v1007_v51  ;;  %v12744_v49 = vunpack.i.h.bf16 %v12743_v12  ;;  %v12745_v21 = vunpack.i.l.bf16 %v12743_v12  ;;  %v275_v13 = vsel %vm267_vm3, %v12749_v27, %v12748_v54  ;;  %v966_v25 = vpack.c.bf16 %v681_v2, %v681_v2  ;;  %v6218_v62 = vld [vmem:[%s12623_s23 + $0x30] sm:$0xff]  ;;  %v6219_v2 = vld [vmem:[%s12623_s23 + $0x58] sm:$0xff] }
 0x161   :  { %v280_v8 = vsel %vm267_vm3, %v5593_v56, %v12742_v26  ;;  %v447_v56 = vsel %vm440_vm8, %v5698_v6, %v5702_v31  ;;  %1192 = vmatpush.bf16.msrb.mxu3 %v950_v5  ;;  %v967_v58 = vpack.c.bf16 %v680_v4, %v680_v4  ;;  %v5843_v52 = vunpack.i.h.bf16 %v7435_v63 }
 0x162   :  { %v352_v18 = vsel %vm344_vm2, %v12745_v21, %v12744_v49  ;;  %1103 = vmatpush.bf16.msrb.mxu0 %v905_v43  ;;  %1116 = vmatpush.bf16.msrb.mxu1 %v906_v14  ;;  %v5847_v51 = vunpack.i.l.bf16 %v7437_v33  ;;  %v5693_v48 = vunpack.i.h.bf16 %v6774_v57  ;;  %v5787_v0 = vunpack.i.l.bf16 %v6921_v20 }
 0x163   :  { %v5738_v39 = vunpack.i.h.bf16 %v6925_v30  ;;  %v12750_v43 = vunpack.i.h.bf16 %v6712_v41  ;;  %v5697_v40 = vunpack.i.l.bf16 %v12737_v37  ;;  %v5742_v10 = vunpack.i.l.bf16 %v12730_v46 }
 0x164   :  { %1127 = vmatpush.bf16.msra.mxu2 %v945_v29  ;;  %v926_v36 = vpack.c.bf16 %v452_v42, %v6218_v62  ;;  %v931_v4 = vpack.c.bf16 %v447_v56, %v6219_v2  ;;  %v12751_v29 = vld [vmem:[#allocation28_spill] sm:$0xff]  ;;  %v12752_v41 = vunpack.i.l.bf16 %v6925_v30  ;;  %v12753_v26 = vunpack.i.l.bf16 %v6969_v55  ;;  %v12760_v62 = vld [vmem:[#allocation62_spill] sm:$0xff] }
 0x165   :  { %v357_v14 = vsel %vm344_vm2, %v12750_v43, %v5642_v45  ;;  %v5602_v5 = vunpack.i.l.bf16 %v12751_v29  ;;  %v603_v49 = vsel %vm594_vm7, %v5783_v24, %v5787_v0  ;;  %v679_v30 = vsel %vm671_vm5, %v5832_v50, %v5833_v23  ;;  %v12759_v43 = vld [vmem:[#allocation5_spill] sm:$0xff] }
 0x166   :  { %1104 = vmatpush.bf16.msrb.mxu0 %v886_v28  ;;  %1117 = vmatpush.bf16.msrb.mxu1 %v887_v17  ;;  %v527_v45 = vsel %vm517_vm4, %v12752_v41, %v5738_v39  ;;  %v604_v12 = vsel %vm594_vm7, %v12753_v26, %v5783_v24  ;;  %v1013_v28 = vsel %vm987_vm6, %v966_v25, 0  ;;  %v1016_v17 = vsel %vm987_vm6, %v967_v58, 0  ;;  %v12763_v41 = vld [vmem:[#allocation57_spill] sm:$0xff] }
 0x167   :  { %1193 = vmatpush.bf16.msrb.mxu3 %v931_v4  ;;  %v674_v55 = vsel %vm671_vm5, %v5843_v52, %v5847_v51  ;;  %v907_v21 = vpack.c.bf16 %v357_v14, %v280_v8  ;;  %v912_v24 = vpack.c.bf16 %v352_v18, %v275_v13  ;;  %v12755_v42 = vunpack.i.h.bf16 %v12754_v22 }
 0x168   :  { %1128 = vmatpush.bf16.msra.mxu2 %v926_v36  ;;  %v12756_v56 = vunpack.i.l.bf16 %v12754_v22  ;;  %v5647_v23 = vunpack.i.l.bf16 %v12757_v32  ;;  %v526_v50 = vsel %vm517_vm4, %v5738_v39, %v5742_v10  ;;  %v12758_v8 = vunpack.i.l.bf16 %v6774_v57  ;;  %v12761_v57 = vld [vmem:[#allocation58_spill] sm:$0xff] }
 0x169   :  { %5275 = vmatmul.msk.bf16.vlgmr.msrb.gmra.mxu0 %vm983_vm9, %v7067_v3  ;;  %5276 = vmatmul.msk.bf16.vlgmr.msrb.gmra.mxu1 %vm983_vm9, %v7067_v3  ;;  %v449_v54 = vsel %vm440_vm8, %v5693_v48, %v5697_v40  ;;  %v947_v27 = vpack.c.bf16 %v604_v12, %v527_v45  ;;  %v948_v13 = vpack.c.bf16 %v603_v49, %v526_v50  ;;  %v5557_v14 = vunpack.i.l.bf16 %v12759_v43  ;;  %v12765_v49 = vld [vmem:[#allocation54_spill] sm:$0xff] }
 0x16a   :  { %1152 = vmatpush.bf16.msra.mxu0 %v1013_v28  ;;  %1165 = vmatpush.bf16.msra.mxu1 %v1016_v17  ;;  %v198_v44 = vsel %vm190_vm0, %v12756_v56, %v12755_v42  ;;  %v450_v18 = vsel %vm440_vm8, %v12758_v8, %v5693_v48  ;;  %v968_v25 = vpack.c.bf16 %v679_v30, %v679_v30  ;;  %v12762_v2 = vunpack.i.h.bf16 %v12741_v7  ;;  %v6220_v7 = vld [vmem:[%s12623_s23 + $0x40] sm:$0xff]  ;;  %v6221_v30 = vld [vmem:[%s12623_s23 + $0x48] sm:$0xff]  ;;  %v12769_v50 = vld [vmem:[#allocation34_spill] sm:$0xff] }
 0x16b   :  { %v973_v58 = vpack.c.bf16 %v674_v55, %v674_v55  ;;  %1194 = vmatpush.bf16.msrb.mxu3 %v912_v24  ;;  %v888_v39 = vpack.c.bf16 %v7327_v60, %v12760_v62  ;;  %v893_v36 = vpack.c.bf16 %v198_v44, %v12761_v57  ;;  %v5798_v48 = vunpack.i.h.bf16 %v12763_v41  ;;  %v12767_v24 = vld [vmem:[#allocation55_spill] sm:$0xff] }
 0x16c   :  { %1129 = vmatpush.bf16.msra.mxu2 %v907_v21  ;;  %v278_v4 = vsel %vm267_vm3, %v12762_v2, %v5602_v5  ;;  %v5838_v45 = vunpack.i.h.bf16 %v7253_v61  ;;  %v5842_v26 = vunpack.i.l.bf16 %v7435_v63  ;;  %v12764_v12 = vunpack.i.h.bf16 %v12751_v29 }
 0x16d   :  { %v5802_v28 = vunpack.i.l.bf16 %v12765_v49  ;;  %v928_v17 = vpack.c.bf16 %v450_v18, %v6220_v7  ;;  %v929_v55 = vpack.c.bf16 %v449_v54, %v6221_v30  ;;  %v12766_v21 = vunpack.i.h.bf16 %v6778_v16 }
 0x16e   :  { %1153 = vmatpush.bf16.msra.mxu0 %v947_v27  ;;  %1166 = vmatpush.bf16.msra.mxu1 %v948_v13  ;;  %v277_v60 = vsel %vm267_vm3, %v5602_v5, %v12764_v12  ;;  %v5757_v22 = vunpack.i.l.bf16 %v12767_v24  ;;  %v12768_v5 = vld [vmem:[#allocation56_spill] sm:$0xff]  ;;  %v1019_v56 = vsel %vm987_vm6, %v968_v25, 0  ;;  %v1034_v44 = vsel %vm987_vm6, %v973_v58, 0 }
 0x16f   :  { %v355_v29 = vsel %vm344_vm2, %v12766_v21, %v5647_v23  ;;  %v5753_v42 = vunpack.i.h.bf16 %v12768_v5  ;;  %v5708_v8 = vunpack.i.h.bf16 %v12769_v50  ;;  %1195 = vmatpush.bf16.msrb.mxu3 %v893_v36  ;;  %v12770_v18 = vunpack.i.h.bf16 %v12757_v32  ;;  %v12771_v13 = vld [vmem:[#allocation52_spill] sm:$0xff]  ;;  %v12776_v36 = vld [vmem:[#allocation6_spill] sm:$0xff]  ;;  %v6223_v21 = vld [vmem:[%s12623_s23 + $0x78] sm:$0xff] }
 0x170   :  { %1130 = vmatpush.bf16.msra.mxu2 %v888_v39  ;;  %v525_v54 = vsel %vm517_vm4, %v5742_v10, %v5743_v34  ;;  %v602_v27 = vsel %vm594_vm7, %v5787_v0, %v5788_v1  ;;  %v5712_v25 = vunpack.i.l.bf16 %v12771_v13  ;;  %v597_v46 = vsel %vm594_vm7, %v5798_v48, %v5802_v28 }
 0x171   :  { %v354_v16 = vsel %vm344_vm2, %v5647_v23, %v12770_v18  ;;  %v677_v34 = vsel %vm671_vm5, %v5837_v11, %v5838_v45  ;;  %v676_v20 = vsel %vm671_vm5, %v5838_v45, %v5842_v26  ;;  %v909_v1 = vpack.c.bf16 %v355_v29, %v278_v4 }
 0x172   :  { %1154 = vmatpush.bf16.msra.mxu0 %v928_v17  ;;  %1167 = vmatpush.bf16.msra.mxu1 %v929_v55  ;;  %v12772_v0 = vunpack.i.h.bf16 %v6588_v53  ;;  %v12773_v32 = vunpack.i.h.bf16 %v12759_v43  ;;  %v910_v11 = vpack.c.bf16 %v354_v16, %v277_v60  ;;  %v520_v53 = vsel %vm517_vm4, %v5753_v42, %v5757_v22  ;;  %v12778_v60 = vld [vmem:[#allocation59_spill] sm:$0xff]  ;;  %v6222_v17 = vld [vmem:[%s12623_s23 + $0x50] sm:$0xff] }
 0x173   :  { %1243 = vmatpush.bf16.msra.mxu3 %v1034_v44  ;;  %5277 = vmatmul.msk.bf16.vlgmr.msra.gmra.mxu2 %vm983_vm9, %v7067_v3  ;;  %v448_v23 = vsel %vm440_vm8, %v5697_v40, %v5698_v6  ;;  %v949_v58 = vpack.c.bf16 %v602_v27, %v525_v54  ;;  %v954_v43 = vpack.c.bf16 %v597_v46, %v520_v53  ;;  %v5797_v57 = vunpack.i.l.bf16 %v12763_v41  ;;  %v12774_v6 = vld [vmem:[#allocation4_spill] sm:$0xff] }
 0x174   :  { %1178 = vmatpush.bf16.msrb.mxu2 %v1019_v56  ;;  %v201_v10 = vsel %vm190_vm0, %v12772_v0, %v5557_v14  ;;  %v200_v61 = vsel %vm190_vm0, %v5557_v14, %v12773_v32  ;;  %5282 = vmatmul.msk.bf16.vlgmr.msrb.gmra.mxu3 %vm983_vm9, %v7067_v3  ;;  %v970_v14 = vpack.c.bf16 %v677_v34, %v677_v34  ;;  %v5793_v37 = vunpack.i.h.bf16 %v7007_v15  ;;  %v12783_v32 = vld [vmem:[#allocation35_spill] sm:$0xff] }
 0x175   :  { %v971_v62 = vpack.c.bf16 %v676_v20, %v676_v20  ;;  %v443_v39 = vsel %vm440_vm8, %v5708_v8, %v5712_v25  ;;  %v12775_v40 = vunpack.i.l.bf16 %v12774_v6  ;;  %v12777_v2 = vunpack.i.h.bf16 %v12776_v36 }
 0x176   :  { %1155 = vmatpush.bf16.msra.mxu0 %v909_v1  ;;  %1168 = vmatpush.bf16.msra.mxu1 %v910_v11  ;;  %v5748_v45 = vunpack.i.h.bf16 %v6894_v19  ;;  %v891_v7 = vpack.c.bf16 %v200_v61, %v12778_v60  ;;  %v930_v30 = vpack.c.bf16 %v448_v23, %v6222_v17  ;;  %v5752_v55 = vunpack.i.l.bf16 %v12768_v5  ;;  %v12780_v1 = vld [vmem:[#allocation32_spill] sm:$0xff]  ;;  %v6225_v23 = vld [vmem:[%s12623_s23 + $0x68] sm:$0xff] }
 0x177   :  { %1244 = vmatpush.bf16.msra.mxu3 %v954_v43  ;;  %v124_v4 = vsel %vm113_vm1, %v12777_v2, %v12775_v40  ;;  %v935_v29 = vpack.c.bf16 %v443_v39, %v6223_v21  ;;  %v1025_v56 = vsel %vm987_vm6, %v970_v14, 0  ;;  %v1028_v44 = vsel %vm987_vm6, %v971_v62, 0  ;;  %v6224_v11 = vld [vmem:[%s12623_s23 + $0x60] sm:$0xff]  ;;  %v670_v43 = vpop.permute.xlu1 %669  ;;  %v12785_v14 = vld [vmem:[#allocation14_spill] sm:$0xff]  ;;  %v12795_v60 = vld [vmem:[#allocation37_spill] sm:$0xff] }
 0x178   :  { %1179 = vmatpush.bf16.msrb.mxu2 %v949_v58  ;;  %v890_v12 = vpack.c.bf16 %v201_v10, %v124_v4  ;;  %v5707_v18 = vunpack.i.l.bf16 %v12769_v50  ;;  %v5703_v16 = vunpack.i.h.bf16 %v12731_v9  ;;  %v600_v54 = vsel %vm594_vm7, %v5792_v35, %v5793_v37  ;;  %v12782_v10 = vld [vmem:[#allocation39_spill] sm:$0xff]  ;;  %v12788_v39 = vld [vmem:[#allocation8_spill] sm:$0xff] }
 0x179   :  { %v599_v27 = vsel %vm594_vm7, %v5793_v37, %v5797_v57  ;;  %v675_v46 = vsel %vm671_vm5, %v5842_v26, %v5843_v52  ;;  %v523_v15 = vsel %vm517_vm4, %v5747_v47, %v5748_v45  ;;  %v522_v35 = vsel %vm517_vm4, %v5748_v45, %v5752_v55  ;;  %v12779_v26 = vld [vmem:[#allocation33_spill] sm:$0xff]  ;;  %v12791_v45 = vld [vmem:[#allocation40_spill] sm:$0xff] }
 0x17a   :  { %1156 = vmatpush.bf16.msra.mxu0 %v890_v12  ;;  %1169 = vmatpush.bf16.msra.mxu1 %v891_v7  ;;  %v951_v63 = vpack.c.bf16 %v600_v54, %v523_v15  ;;  %v952_v34 = vpack.c.bf16 %v599_v27, %v522_v35  ;;  %v972_v20 = vpack.c.bf16 %v675_v46, %v675_v46  ;;  %v5848_v52 = vunpack.i.h.bf16 %v7437_v33  ;;  %v12789_v37 = vld [vmem:[#allocation9_spill] sm:$0xff]  ;;  %v12792_v12 = vld [vmem:[#allocation36_spill] sm:$0xff] }
 0x17b   :  { %1245 = vmatpush.bf16.msra.mxu3 %v935_v29  ;;  %v12781_v0 = vpack.c.bf16 %v12779_v26, %v12780_v1  ;;  %v12784_v61 = vpack.c.bf16 %v12782_v10, %v12783_v32  ;;  %v446_v19 = vsel %vm440_vm8, %v5702_v31, %v5703_v16  ;;  %v445_v47 = vsel %vm440_vm8, %v5703_v16, %v5707_v18  ;;  %v12786_v31 = vld [vmem:[#allocation12_spill] sm:$0xff]  ;;  %v12800_v54 = vld [vmem:[#allocation17_spill] sm:$0xff]  ;;  %v12807_v1 = vld [vmem:[#allocation42_spill] sm:$0xff] }
 0x17c   :  { %1180 = vmatpush.bf16.msrb.mxu2 %v930_v30  ;;  %v932_v53 = vpack.c.bf16 %v446_v19, %v6224_v11  ;;  %v933_v58 = vpack.c.bf16 %v445_v47, %v6225_v23  ;;  %v1031_v9 = vsel %vm987_vm6, %v972_v20, 0  ;;  %v12787_v62 = vpack.c.bf16 %v12785_v14, %v12786_v31  ;;  %v12801_v27 = vld [vmem:[#allocation13_spill] sm:$0xff]  ;;  %v12803_v15 = vld [vmem:[#allocation64_spill] sm:$0xff]  ;;  %v12810_v32 = vld [vmem:[#allocation51_spill] sm:$0xff] }
 0x17d   :  { %5279 = vmatmul.msk.bf16.vlgmr.msra.gmra.mxu0 %vm983_vm9, %v7067_v3  ;;  %5280 = vmatmul.msk.bf16.vlgmr.msra.gmra.mxu1 %vm983_vm9, %v7067_v3  ;;  %v12790_v6 = vpack.c.bf16 %v12788_v39, %v12789_v37  ;;  %v673_v40 = vsel %vm671_vm5, %v5847_v51, %v5848_v52  ;;  %v521_v36 = vsel %vm517_vm4, %v5752_v55, %v5753_v42  ;;  %v5803_v42 = vunpack.i.h.bf16 %v12765_v49  ;;  %v6226_v55 = vld [vmem:[%s12623_s23 + $0x70] sm:$0xff]  ;;  %v6227_v19 = vld [vmem:[%s12623_s23 + $0x80] sm:$0xff]  ;;  %v12811_v11 = vld [vmem:[#allocation19_spill] sm:$0xff] }
 0x17e   :  { %1204 = vmatpush.bf16.msrb.mxu0 %v1025_v56  ;;  %1217 = vmatpush.bf16.msrb.mxu1 %v1028_v44  ;;  %v598_v2 = vsel %vm594_vm7, %v5797_v57, %v5798_v48  ;;  %v672_v4 = vsel %vm671_vm5, %v5848_v52, %v670_v43  ;;  %v974_v33 = vpack.c.bf16 %v673_v40, %v673_v40  ;;  %v5758_v41 = vunpack.i.h.bf16 %v12767_v24  ;;  %v12794_v57 = vld [vmem:[#allocation41_spill] sm:$0xff]  ;;  %v12797_v56 = vld [vmem:[#allocation16_spill] sm:$0xff]  ;;  %v12798_v44 = vld [vmem:[#allocation15_spill] sm:$0xff] }
 0x17f   :  { %1246 = vmatpush.bf16.msra.mxu3 %v12784_v61  ;;  %v953_v51 = vpack.c.bf16 %v598_v2, %v521_v36  ;;  %v975_v5 = vpack.c.bf16 %v672_v4, %v672_v4  ;;  %v12793_v48 = vpack.c.bf16 %v12791_v45, %v12792_v12  ;;  %v12796_v7 = vpack.c.bf16 %v12794_v57, %v12795_v60  ;;  %v12815_v14 = vld [vmem:[#allocation44_spill] sm:$0xff]  ;;  %v12816_v31 = vld [vmem:[#allocation43_spill] sm:$0xff]  ;;  %v12818_v39 = vld [vmem:[#allocation29_spill] sm:$0xff] }
 0x180   :  { %1181 = vmatpush.bf16.msrb.mxu2 %v12781_v0  ;;  %v444_v17 = vsel %vm440_vm8, %v5707_v18, %v5708_v8  ;;  %v1037_v30 = vsel %vm987_vm6, %v974_v33, 0  ;;  %v12799_v16 = vpack.c.bf16 %v12797_v56, %v12798_v44  ;;  %v12802_v50 = vpack.c.bf16 %v12800_v54, %v12801_v27  ;;  %v12808_v0 = vld [vmem:[#allocation38_spill] sm:$0xff]  ;;  %v12821_v40 = vld [vmem:[#allocation65_spill] sm:$0xff]  ;;  %v12824_v33 = vld [vmem:[#allocation23_spill] sm:$0xff] }
 0x181   :  { %v934_v21 = vpack.c.bf16 %v444_v17, %v6226_v55  ;;  %v1040_v29 = vsel %vm987_vm6, %v975_v5, 0  ;;  %v519_v8 = vsel %vm517_vm4, %v5757_v22, %v5758_v41  ;;  %v596_v18 = vsel %vm594_vm7, %v5802_v28, %v5803_v42  ;;  %v12806_v28 = vld [vmem:[#allocation49_spill] sm:$0xff]  ;;  %v12819_v37 = vld [vmem:[#allocation30_spill] sm:$0xff] }
 0x182   :  { %1205 = vmatpush.bf16.msrb.mxu0 %v951_v63  ;;  %1218 = vmatpush.bf16.msrb.mxu1 %v952_v34  ;;  %v5713_v46 = vunpack.i.h.bf16 %v12771_v13  ;;  %v595_v35 = vsel %vm594_vm7, %v5803_v42, %v12803_v15  ;;  %v12804_v63 = vld [vmem:[#allocation63_spill] sm:$0xff]  ;;  %v955_v49 = vpack.c.bf16 %v596_v18, %v519_v8  ;;  %v518_v22 = vsel %vm517_vm4, %v5758_v41, %v12806_v28  ;;  %v6228_v13 = vld [vmem:[%s12623_s23 + $0x88] sm:$0xff]  ;;  %v12822_v36 = vld [vmem:[#allocation50_spill] sm:$0xff] }
 0x183   :  { %1247 = vmatpush.bf16.msra.mxu3 %v12790_v6  ;;  %v12805_v34 = vunpack.i.l.bf16 %v12804_v63  ;;  %v956_v20 = vpack.c.bf16 %v595_v35, %v518_v22  ;;  %v12809_v10 = vpack.c.bf16 %v12807_v1, %v12808_v0  ;;  %v12820_v6 = vpack.c.bf16 %v12818_v39, %v12819_v37  ;;  %v12827_v42 = vld [vmem:[#allocation24_spill] sm:$0xff]  ;;  %v12828_v41 = vld [vmem:[#allocation21_spill] sm:$0xff] }
 0x184   :  { %1182 = vmatpush.bf16.msrb.mxu2 %v12787_v62  ;;  %v442_v52 = vsel %vm440_vm8, %v5712_v25, %v5713_v46  ;;  %v441_v61 = vsel %vm440_vm8, %v5713_v46, %v12810_v32  ;;  %v12817_v62 = vpack.c.bf16 %v12815_v14, %v12816_v31  ;;  %v12823_v2 = vpack.c.bf16 %v12821_v40, %v12822_v36  ;;  %v12830_v12 = vld [vmem:[#allocation45_spill] sm:$0xff] }
 0x185   :  { %v690_v24 = vsel %vm671_vm5, %v670_v43, %v12805_v34  ;;  %v936_v47 = vpack.c.bf16 %v442_v52, %v6227_v19  ;;  %v937_v25 = vpack.c.bf16 %v441_v61, %v6228_v13  ;;  %v12829_v45 = vpack.c.bf16 %v12827_v42, %v12828_v41  ;;  %v12833_v60 = vld [vmem:[#allocation25_spill] sm:$0xff] }
 0x186   :  { %1206 = vmatpush.bf16.msrb.mxu0 %v932_v53  ;;  %1219 = vmatpush.bf16.msrb.mxu1 %v933_v58  ;;  %v976_v26 = vpack.c.bf16 %v690_v24, %v690_v24  ;;  %v12812_v53 = vld [vmem:[#allocation18_spill] sm:$0xff]  ;;  %vm1871_vm0 = vcmp.lt.s32.totalorder %v6544_v38, 2  ;;  %vm1794_vm1 = vcmp.lt.s32.totalorder %v6544_v38, 66  ;;  %vm2924_vm2 = vcmask 130048  }
 0x187   :  { %5281 = vmatmul.msk.bf16.vlgmr.msrb.gmra.mxu2 %vm983_vm9, %v7067_v3  ;;  %5286 = vmatmul.msk.bf16.vlgmr.msra.gmra.mxu3 %vm983_vm9, %v7067_v3  ;;  %v12813_v23 = vpack.c.bf16 %v12811_v11, %v12812_v53 }
 0x188   :  { %1230 = vmatpush.bf16.msra.mxu2 %v1031_v9  ;;  %v1043_v58 = vsel %vm987_vm6, %v976_v26, 0  ;;  %v12814_v9 = vunpack.i.l.bf16 %v6870_v59  ;;  %v6229_v59 = vld [vmem:[%s12623_s23 + $0x90] sm:$0xff]  ;;  %s6263_s23 = smov 45  }
 0x18a   :  { %1207 = vmatpush.bf16.msrb.mxu0 %v12793_v48  ;;  %1220 = vmatpush.bf16.msrb.mxu1 %v12796_v7  ;;  %v459_v43 = vsel %vm440_vm8, %v12810_v32, %v12814_v9  ;;  %v12831_v48 = vld [vmem:[#allocation46_spill] sm:$0xff] }
 0x18b   :  { %v938_v4 = vpack.c.bf16 %v459_v43, %v6229_v59  ;;  %v12832_v57 = vpack.c.bf16 %v12830_v12, %v12831_v48  ;;  %v12834_v7 = vld [vmem:[#allocation22_spill] sm:$0xff] }
 0x18c   :  { %1231 = vmatpush.bf16.msra.mxu2 %v953_v51  ;;  %v12825_v51 = vld [vmem:[#allocation20_spill] sm:$0xff]  ;;  %v12835_v17 = vpack.c.bf16 %v12833_v60, %v12834_v7 }
 0x18d   :  { %v12826_v5 = vpack.c.bf16 %v12824_v33, %v12825_v51 }
 0x18e   :  { %1208 = vmatpush.bf16.msrb.mxu0 %v12799_v16  ;;  %1221 = vmatpush.bf16.msrb.mxu1 %v12802_v50 }
 0x190   :  { %1232 = vmatpush.bf16.msra.mxu2 %v934_v21 }
 0x191   :  { %5283 = vmatmul.msk.bf16.vlgmr.msrb.gmra.mxu0 %vm983_vm9, %v7067_v3  ;;  %5284 = vmatmul.msk.bf16.vlgmr.msrb.gmra.mxu1 %vm983_vm9, %v7067_v3 }
 0x192   :  { %1256 = vmatpush.bf16.msra.mxu0 %v1037_v30  ;;  %1269 = vmatpush.bf16.msra.mxu1 %v1040_v29 }
 0x194   :  { %1233 = vmatpush.bf16.msra.mxu2 %v12809_v10 }
 0x196   :  { %1257 = vmatpush.bf16.msra.mxu0 %v955_v49  ;;  %1270 = vmatpush.bf16.msra.mxu1 %v956_v20 }
 0x198   :  { %1234 = vmatpush.bf16.msra.mxu2 %v12813_v23 }
 0x19a   :  { %1258 = vmatpush.bf16.msra.mxu0 %v936_v47  ;;  %1271 = vmatpush.bf16.msra.mxu1 %v937_v25 }
 0x19b   :  { %5285 = vmatmul.msk.bf16.vlgmr.msra.gmra.mxu2 %vm983_vm9, %v7067_v3 }
 0x19c   :  { %1282 = vmatpush.bf16.msrb.mxu2 %v1043_v58 }
 0x19e   :  { %1259 = vmatpush.bf16.msra.mxu0 %v12817_v62  ;;  %1272 = vmatpush.bf16.msra.mxu1 %v12820_v6 }
 0x1a0   :  { %1283 = vmatpush.bf16.msrb.mxu2 %v12823_v2 }
 0x1a2   :  { %1260 = vmatpush.bf16.msra.mxu0 %v12826_v5  ;;  %1273 = vmatpush.bf16.msra.mxu1 %v12829_v45 }
 0x1a4   :  { %1284 = vmatpush.bf16.msrb.mxu2 %v938_v4 }
 0x1a5   :  { %5287 = vmatmul.msk.bf16.vlgmr.msra.gmra.mxu0 %vm983_vm9, %v7067_v3  ;;  %5288 = vmatmul.msk.bf16.vlgmr.msra.gmra.mxu1 %vm983_vm9, %v7067_v3 }
 0x1a8   :  { %1285 = vmatpush.bf16.msrb.mxu2 %v12832_v57 }
 0x1ac   :  { %1286 = vmatpush.bf16.msrb.mxu2 %v12835_v17 }
 0x1af   :  { %5289 = vmatmul.msk.bf16.vlgmr.msrb.gmra.mxu2 %vm983_vm9, %v7067_v3 }
 0x1b5   :  { %v7817_v21 = vpop.permute.xlu2 %980 }
 0x1ba   :  { %v1080_v30 = vpop.f32.mrf.mxu2 }
 0x1bb   :  { %v1081_v46 = vadd.f32 %v1080_v30, %v7817_v21 }
 0x1bd   :  { %v7839_v34 = vmax.f32 %v1081_v46, 0.0 }
 0x1c2   :  { %v1082_v55 = vpop.f32.mrf.mxu2 }
 0x1d2   :  { %v1054_v29 = vpop.f32.mrf.mxu0  ;;  %v1067_v56 = vpop.f32.mrf.mxu1 }
 0x1d3   :  { %v1055_v44 = vadd.f32 %v1054_v29, %v7817_v21  ;;  %v1068_v16 = vadd.f32 %v1067_v56, %v7817_v21 }
 0x1d5   :  { %v7821_v54 = vmax.f32 %v1055_v44, 0.0  ;;  %v7823_v27 = vmax.f32 %v1068_v16, 0.0 }
 0x1d7   :  { %1314 = vrot.lane.b32.xlu0 %v7821_v54, %s6235_s22  ;;  %1392 = vrot.lane.b32.xlu2 %v7823_v27, %s6237_s25 }
 0x1d8   :  { %1316 = vrot.lane.b32.xlu1 %v7823_v27, %s6235_s22 }
 0x1da   :  { %v1056_v3 = vpop.f32.mrf.mxu0  ;;  %v1069_v50 = vpop.f32.mrf.mxu1 }
 0x1df   :  { %1449 = vrot.lane.b32.xlu0 %v7823_v27, %s6238_s26  ;;  %1447 = vrot.lane.b32.xlu2 %v7821_v54, %s6238_s26 }
 0x1e0   :  { %1390 = vrot.lane.b32.xlu1 %v7821_v54, %s6237_s25  ;;  %v1145_v18 = vpop.f32.mrf.mxu3 }
 0x1e1   :  { %v1146_v15 = vadd.f32 %v1145_v18, %v7817_v21 }
 0x1e2   :  { %v1093_v8 = vpop.f32.mrf.mxu2 }
 0x1e3   :  { %v7841_v24 = vmax.f32 %v1146_v15, 0.0  ;;  %v1094_v53 = vadd.f32 %v1093_v8, %v7817_v21 }
 0x1e5   :  { %v7875_v58 = vmax.f32 %v1094_v53, 0.0 }
 0x1e6   :  { %v1106_v35 = vpop.f32.mrf.mxu0  ;;  %v1119_v63 = vpop.f32.mrf.mxu1 }
 0x1e7   :  { %1394 = vrot.lane.b32.xlu0 %v7839_v34, %s6237_s25  ;;  %1318 = vrot.lane.b32.xlu2 %v7839_v34, %s6235_s22  ;;  %v1120_v52 = vadd.f32 %v1119_v63, %v7817_v21  ;;  %v1107_v26 = vadd.f32 %v1106_v35, %v7817_v21 }
 0x1e8   :  { %1328 = vrot.lane.b32.xlu1 %v7841_v24, %s6235_s22  ;;  %v1147_v28 = vpop.f32.mrf.mxu3 }
 0x1e9   :  { %v7857_v10 = vmax.f32 %v1120_v52, 0.0  ;;  %v7859_v32 = vmax.f32 %v1107_v26, 0.0 }
 0x1ea   :  { %v1095_v49 = vpop.f32.mrf.mxu2 }
 0x1ee   :  { %v1108_v22 = vpop.f32.mrf.mxu0  ;;  %v1121_v20 = vpop.f32.mrf.mxu1 }
 0x1ef   :  { %1461 = vrot.lane.b32.xlu0 %v7841_v24, %s6238_s26  ;;  %1404 = vrot.lane.b32.xlu2 %v7841_v24, %s6237_s25 }
 0x1f0   :  { %1451 = vrot.lane.b32.xlu1 %v7839_v34, %s6238_s26 }
 0x1f6   :  { %v1132_v1 = vpop.f32.mrf.mxu2 }
 0x1f7   :  { %v1197_v0 = vpop.f32.mrf.mxu3  ;;  %1400 = vrot.lane.b32.xlu0 %v7857_v10, %s6237_s25  ;;  %1324 = vrot.lane.b32.xlu2 %v7857_v10, %s6235_s22  ;;  %v1133_v5 = vadd.f32 %v1132_v1, %v7817_v21 }
 0x1f8   :  { %1322 = vrot.lane.b32.xlu1 %v7859_v32, %s6235_s22  ;;  %v1198_v23 = vadd.f32 %v1197_v0, %v7817_v21 }
 0x1f9   :  { %v7904_v41 = vmax.f32 %v1133_v5, 0.0 }
 0x1fa   :  { %v1158_v61 = vpop.f32.mrf.mxu0  ;;  %v1171_v19 = vpop.f32.mrf.mxu1  ;;  %v7877_v9 = vmax.f32 %v1198_v23, 0.0 }
 0x1fb   :  { %v1172_v39 = vadd.f32 %v1171_v19, %v7817_v21  ;;  %v1159_v59 = vadd.f32 %v1158_v61, %v7817_v21 }
 0x1fd   :  { %v7886_v40 = vmax.f32 %v1172_v39, 0.0  ;;  %v7895_v4 = vmax.f32 %v1159_v59, 0.0 }
 0x1fe   :  { %v1134_v47 = vpop.f32.mrf.mxu2 }
 0x1ff   :  { %v1199_v13 = vpop.f32.mrf.mxu3  ;;  %1455 = vrot.lane.b32.xlu0 %v7859_v32, %s6238_s26  ;;  %1398 = vrot.lane.b32.xlu2 %v7859_v32, %s6237_s25 }
 0x200   :  { %1457 = vrot.lane.b32.xlu1 %v7857_v10, %s6238_s26 }
 0x202   :  { %v1160_v25 = vpop.f32.mrf.mxu0  ;;  %v1173_v11 = vpop.f32.mrf.mxu1 }
 0x207   :  { %1320 = vrot.lane.b32.xlu0 %v7875_v58, %s6235_s22  ;;  %1336 = vrot.lane.b32.xlu2 %v7877_v9, %s6235_s22 }
 0x208   :  { %1396 = vrot.lane.b32.xlu1 %v7875_v58, %s6237_s25 }
 0x20a   :  { %v1184_v43 = vpop.f32.mrf.mxu2  ;;  %v1249_v14 = vpop.f32.mrf.mxu3 }
 0x20b   :  { %v1250_v48 = vadd.f32 %v1249_v14, %v7817_v21  ;;  %v1185_v29 = vadd.f32 %v1184_v43, %v7817_v21 }
 0x20d   :  { %v7913_v60 = vmax.f32 %v1250_v48, 0.0  ;;  %v7932_v16 = vmax.f32 %v1185_v29, 0.0 }
 0x20e   :  { %v1210_v31 = vpop.f32.mrf.mxu0  ;;  %v1223_v62 = vpop.f32.mrf.mxu1 }
 0x20f   :  { %1412 = vrot.lane.b32.xlu0 %v7877_v9, %s6237_s25  ;;  %1453 = vrot.lane.b32.xlu2 %v7875_v58, %s6238_s26  ;;  %v1224_v17 = vadd.f32 %v1223_v62, %v7817_v21  ;;  %v1211_v56 = vadd.f32 %v1210_v31, %v7817_v21 }
 0x210   :  { %1408 = vrot.lane.b32.xlu1 %v7886_v40, %s6237_s25 }
 0x211   :  { %v7922_v30 = vmax.f32 %v1224_v17, 0.0  ;;  %v7934_v3 = vmax.f32 %v1211_v56, 0.0 }
 0x212   :  { %v1186_v37 = vpop.f32.mrf.mxu2  ;;  %v1251_v6 = vpop.f32.mrf.mxu3 }
 0x213   :  { %v8024_v6 = vld [vmem:[%s12296_s1] sm:$0xff] }
 0x214   :  { %v8028_v59 = vperm.slane %v8024_v6, 1 }
 0x216   :  { %v1212_v36 = vpop.f32.mrf.mxu0  ;;  %v1225_v2 = vpop.f32.mrf.mxu1  ;;  %12836 = vst [vmem:[#allocation53_spill] sm:$0xff] %v8028_v59 }
 0x217   :  { %1332 = vrot.lane.b32.xlu0 %v7886_v40, %s6235_s22  ;;  %1330 = vrot.lane.b32.xlu2 %v7895_v4, %s6235_s22 }
 0x218   :  { %1463 = vrot.lane.b32.xlu1 %v7895_v4, %s6238_s26 }
 0x21e   :  { %v1236_v33 = vpop.f32.mrf.mxu2 }
 0x21f   :  { %1406 = vrot.lane.b32.xlu0 %v7895_v4, %s6237_s25  ;;  %1465 = vrot.lane.b32.xlu2 %v7886_v40, %s6238_s26  ;;  %v1237_v63 = vadd.f32 %v1236_v33, %v7817_v21 }
 0x220   :  { %1402 = vrot.lane.b32.xlu1 %v7904_v41, %s6237_s25 }
 0x221   :  { %v7969_v20 = vmax.f32 %v1237_v63, 0.0 }
 0x222   :  { %v1262_v51 = vpop.f32.mrf.mxu0  ;;  %v1275_v42 = vpop.f32.mrf.mxu1 }
 0x223   :  { %v1276_v50 = vadd.f32 %v1275_v42, %v7817_v21  ;;  %v1263_v46 = vadd.f32 %v1262_v51, %v7817_v21  ;;  %v8031_v51 = vperm.slane %v8024_v6, 0 }
 0x225   :  { %v7945_v18 = vmax.f32 %v1276_v50, 0.0  ;;  %v7956_v35 = vmax.f32 %v1263_v46, 0.0  ;;  %12837 = vst [vmem:[#allocation47_spill] sm:$0xff] %v8031_v51 }
 0x226   :  { %v1238_v45 = vpop.f32.mrf.mxu2 }
 0x227   :  { %1326 = vrot.lane.b32.xlu0 %v7904_v41, %s6235_s22  ;;  %1459 = vrot.lane.b32.xlu2 %v7904_v41, %s6238_s26 }
 0x228   :  { %1420 = vrot.lane.b32.xlu1 %v7913_v60, %s6237_s25 }
 0x22a   :  { %v1264_v12 = vpop.f32.mrf.mxu0  ;;  %v1277_v57 = vpop.f32.mrf.mxu1 }
 0x22f   :  { %1344 = vrot.lane.b32.xlu0 %v7913_v60, %s6235_s22  ;;  %1416 = vrot.lane.b32.xlu2 %v7922_v30, %s6237_s25 }
 0x230   :  { %1340 = vrot.lane.b32.xlu1 %v7922_v30, %s6235_s22 }
 0x231   :  { %v1393_v44 = vpop.permute.xlu2 %1392 }
 0x232   :  { %v1288_v7 = vpop.f32.mrf.mxu2 }
 0x233   :  { %v1289_v0 = vadd.f32 %v1288_v7, %v7817_v21 }
 0x235   :  { %v7992_v13 = vmax.f32 %v1289_v0, 0.0 }
 0x237   :  { %1338 = vrot.lane.b32.xlu0 %v7934_v3, %s6235_s22  ;;  %1410 = vrot.lane.b32.xlu2 %v7932_v16, %s6237_s25 }
 0x238   :  { %1414 = vrot.lane.b32.xlu1 %v7934_v3, %s6237_s25 }
 0x239   :  { %v7943_v8 = vpop.permute.xlu2 %1447 }
 0x23a   :  { %v1290_v55 = vpop.f32.mrf.mxu2 }
 0x23f   :  { %1467 = vrot.lane.b32.xlu0 %v7932_v16, %s6238_s26  ;;  %1348 = vrot.lane.b32.xlu2 %v7945_v18, %s6235_s22 }
 0x240   :  { %1334 = vrot.lane.b32.xlu1 %v7932_v16, %s6235_s22 }
 0x241   :  { %v7954_v15 = vpop.permute.xlu2 %1318 }
 0x247   :  { %1424 = vrot.lane.b32.xlu0 %v7945_v18, %s6237_s25  ;;  %1422 = vrot.lane.b32.xlu2 %v7956_v35, %s6237_s25 }
 0x248   :  { %1346 = vrot.lane.b32.xlu1 %v7956_v35, %s6235_s22 }
 0x249   :  { %v7965_v49 = vpop.permute.xlu0 %1314  ;;  %v7967_v28 = vpop.permute.xlu2 %1404 }
 0x24a   :  { %v1317_v22 = vpop.permute.xlu1 %1316 }
 0x24b   :  { %v1368_v11 = vsel %vm440_vm8, %v1317_v22, %v7954_v15  ;;  %v1369_v43 = vsel %vm440_vm8, %v7965_v49, %v1317_v22 }
 0x24c   :  { %v1372_v37 = vmax.f32 %v7823_v27, %v1368_v11  ;;  %v1371_v2 = vmax.f32 %v7821_v54, %v1369_v43  ;;  %v8081_v11 = vperm.slane %v8024_v6, 3 }
 0x24e   :  { %12839 = vst [vmem:[#allocation66_spill] sm:$0xff] %v8081_v11 }
 0x24f   :  { %1418 = vrot.lane.b32.xlu0 %v7969_v20, %s6237_s25  ;;  %1342 = vrot.lane.b32.xlu2 %v7969_v20, %s6235_s22 }
 0x250   :  { %1469 = vrot.lane.b32.xlu1 %v7877_v9, %s6238_s26 }
 0x251   :  { %v1450_v52 = vpop.permute.xlu0 %1449  ;;  %v7977_v26 = vpop.permute.xlu2 %1324 }
 0x252   :  { %v7979_v1 = vpop.permute.xlu1 %1390  ;;  %v1502_v25 = vsel %vm671_vm5, %v7943_v8, %v1450_v52 }
 0x253   :  { %v1445_v21 = vsel %vm594_vm7, %v7979_v1, %v1393_v44 }
 0x254   :  { %v1504_v31 = vmax.f32 %v1445_v21, %v1502_v25  ;;  %v8078_v21 = vperm.slane %v8024_v6, 2 }
 0x256   :  { %v1523_v5 = vmax.f32 %v1371_v2, %v1504_v31  ;;  %12838 = vst [vmem:[#allocation60_spill] sm:$0xff] %v8078_v21 }
 0x257   :  { %1473 = vrot.lane.b32.xlu0 %v7922_v30, %s6238_s26  ;;  %1471 = vrot.lane.b32.xlu2 %v7934_v3, %s6238_s26 }
 0x258   :  { %1475 = vrot.lane.b32.xlu1 %v7969_v20, %s6238_s26  ;;  %v8045_v12 = vmul.f32 %v8031_v51, %v1523_v5 }
 0x259   :  { %v1395_v61 = vpop.permute.xlu0 %1394  ;;  %v7988_v19 = vpop.permute.xlu2 %1398 }
 0x25a   :  { %v7990_v47 = vpop.permute.xlu1 %1328  ;;  %v1444_v62 = vsel %vm594_vm7, %v1393_v44, %v1395_v61 }
 0x25f   :  { %1350 = vrot.lane.b32.xlu0 %v7992_v13, %s6235_s22  ;;  %1477 = vrot.lane.b32.xlu2 %v7913_v60, %s6238_s26  ;;  %s6265_s22 = smov 37  }
 0x260   :  { %1426 = vrot.lane.b32.xlu1 %v7992_v13, %s6237_s25  ;;  %s6240_s25 = smov 58  }
 0x261   :  { %v8009_v53 = vpop.permute.xlu0 %1461  ;;  %v8011_v23 = vpop.permute.xlu2 %1336 }
 0x262   :  { %v1452_v14 = vpop.permute.xlu1 %1451 }
 0x263   :  { %v1501_v39 = vsel %vm671_vm5, %v1450_v52, %v1452_v14 }
 0x264   :  { %v1505_v36 = vmax.f32 %v1444_v62, %v1501_v39 }
 0x266   :  { %v1524_v33 = vmax.f32 %v1372_v37, %v1505_v36 }
 0x267   :  { %1479 = vrot.lane.b32.xlu0 %v7956_v35, %s6238_s26  ;;  %1483 = vrot.lane.b32.xlu2 %v7992_v13, %s6238_s26 }
 0x268   :  { %1481 = vrot.lane.b32.xlu1 %v7945_v18, %s6238_s26  ;;  %v8040_v27 = vmul.f32 %v8028_v59, %v1524_v33 }
 0x269   :  { %v8042_v54 = vpop.permute.xlu0 %1400  ;;  %v1454_v42 = vpop.permute.xlu2 %1453 }
 0x26a   :  { %v1323_v45 = vpop.permute.xlu1 %1322  ;;  %v5860_v48 = vpack.i.bf16 %v8040_v27, %v8045_v12  ;;  %v1500_v56 = vsel %vm671_vm5, %v1452_v14, %v1454_v42 }
 0x26f   :  { %5861 = vrot.lane.b32.xlu2 %v5860_v48, %s6240_s25  ;;  %5851 = vrot.lane.b32.xlu0 %v5860_v48, %s6241_s3 }
 0x270   :  { %5856 = vrot.lane.b32.xlu1 %v5860_v48, %s6242_s21 }
 0x271   :  { %v1456_v57 = vpop.permute.xlu0 %1455  ;;  %v8052_v7 = vpop.permute.xlu2 %1330 }
 0x272   :  { %v8054_v17 = vpop.permute.xlu1 %1457  ;;  %v1499_v44 = vsel %vm671_vm5, %v1454_v42, %v1456_v57  ;;  %v1441_v42 = vsel %vm594_vm7, %v7988_v19, %v8042_v54 }
 0x273   :  { %v1498_v5 = vsel %vm671_vm5, %v1456_v57, %v8054_v17 }
 0x277   :  { %5876 = vrot.lane.b32.xlu2 %v5860_v48, %s6243_s19  ;;  %5866 = vrot.lane.b32.xlu0 %v5860_v48, %s6244_s24 }
 0x278   :  { %5871 = vrot.lane.b32.xlu1 %v5860_v48, %s6245_s27  ;;  %v1365_v48 = vsel %vm440_vm8, %v1323_v45, %v7977_v26 }
 0x279   :  { %v1321_v55 = vpop.permute.xlu0 %1320  ;;  %v8059_v29 = vpop.permute.xlu2 %1465 }
 0x27a   :  { %v1366_v50 = vsel %vm440_vm8, %v1321_v55, %v1323_v45  ;;  %v1367_v46 = vsel %vm440_vm8, %v7954_v15, %v1321_v55  ;;  %v1397_v63 = vpop.permute.xlu1 %1396  ;;  %v1508_v55 = vmax.f32 %v1441_v42, %v1498_v5 }
 0x27b   :  { %v1373_v22 = vmax.f32 %v7839_v34, %v1367_v46  ;;  %v1374_v52 = vmax.f32 %v7875_v58, %v1366_v50  ;;  %v1442_v0 = vsel %vm594_vm7, %v1397_v63, %v7988_v19  ;;  %v1443_v25 = vsel %vm594_vm7, %v1395_v61, %v1397_v63 }
 0x27c   :  { %v1506_v43 = vmax.f32 %v1443_v25, %v1500_v56  ;;  %v1507_v15 = vmax.f32 %v1442_v0, %v1499_v44  ;;  %v1375_v50 = vmax.f32 %v7859_v32, %v1365_v48  ;;  %v8123_v63 = vperm.slane %v8024_v6, 4 }
 0x27d   :  { %v1362_v32 = vsel %vm440_vm8, %v7990_v47, %v8052_v7 }
 0x27e   :  { %v1525_v14 = vmax.f32 %v1373_v22, %v1506_v43  ;;  %v1526_v31 = vmax.f32 %v1374_v52, %v1507_v15  ;;  %12840 = vst [vmem:[#allocation61_spill] sm:$0xff] %v8123_v63  ;;  %v1527_v22 = vmax.f32 %v1375_v50, %v1508_v55  ;;  %v1378_v25 = vmax.f32 %v7841_v24, %v1362_v32 }
 0x27f   :  { %v8146_v15 = vperm.slane %v8024_v6, 7  ;;  %v8158_v24 = vperm.slane %v8024_v6, 5 }
 0x280   :  { %v8084_v34 = vmul.f32 %v8078_v21, %v1525_v14  ;;  %v8087_v58 = vmul.f32 %v8081_v11, %v1526_v31  ;;  %v8143_v43 = vmul.f32 %v8123_v63, %v1527_v22 }
 0x281   :  { %v8089_v62 = vpop.permute.xlu0 %1412  ;;  %v1460_v39 = vpop.permute.xlu2 %1459  ;;  %12841 = vst [vmem:[#allocation67_spill] sm:$0xff] %v8146_v15 }
 0x282   :  { %v8091_v61 = vpop.permute.xlu1 %1408  ;;  %v5890_v37 = vpack.i.bf16 %v8087_v58, %v8084_v34  ;;  %v5915_v57 = vpack.i.bf16 %v8084_v34, %v8040_v27  ;;  %v1496_v31 = vsel %vm671_vm5, %v1460_v39, %v8009_v53  ;;  %12842 = vst [vmem:[#allocation48_spill] sm:$0xff] %v8158_v24 }
 0x284   :  { %5891 = vrot.lane.b32.xlu0 %v5890_v37, %s6240_s25  ;;  %5886 = vrot.lane.b32.xlu2 %v5890_v37, %s6242_s21 }
 0x285   :  { %5881 = vrot.lane.b32.xlu1 %v5890_v37, %s6241_s3 }
 0x289   :  { %v8098_v36 = vpop.permute.xlu0 %1332  ;;  %v8100_v2 = vpop.permute.xlu2 %1416 }
 0x28a   :  { %v8102_v33 = vpop.permute.xlu1 %1463 }
 0x28b   :  { %v1495_v45 = vsel %vm671_vm5, %v8009_v53, %v8102_v33 }
 0x28c   :  { %5906 = vrot.lane.b32.xlu0 %v5890_v37, %s6243_s19  ;;  %5901 = vrot.lane.b32.xlu2 %v5890_v37, %s6245_s27 }
 0x28d   :  { %5896 = vrot.lane.b32.xlu1 %v5890_v37, %s6244_s24  ;;  %v8161_v37 = vperm.slane %v8024_v6, 6 }
 0x28f   :  { %12843 = vst [vmem:[#allocation10_spill] sm:$0xff] %v8161_v37 }
 0x291   :  { %v1407_v56 = vpop.permute.xlu0 %1406  ;;  %v8117_v44 = vpop.permute.xlu2 %1410 }
 0x292   :  { %v1403_v46 = vpop.permute.xlu1 %1402  ;;  %v1438_v19 = vsel %vm594_vm7, %v7967_v28, %v1407_v56 }
 0x293   :  { %v1511_v52 = vmax.f32 %v1438_v19, %v1495_v45  ;;  %v1440_v0 = vsel %vm594_vm7, %v8042_v54, %v1403_v46  ;;  %v1439_v14 = vsel %vm594_vm7, %v1403_v46, %v7967_v28  ;;  %v1497_v54 = vsel %vm671_vm5, %v8054_v17, %v1460_v39 }
 0x294   :  { %5916 = vrot.lane.b32.xlu2 %v5915_v57, %s6246_s28  ;;  %v1509_v48 = vmax.f32 %v1440_v0, %v1497_v54  ;;  %v8175_v17 = vpack.i.bf16 %v8143_v43, %v8087_v58  ;;  %v1510_v39 = vmax.f32 %v1439_v14, %v1496_v31  ;;  %v1437_v31 = vsel %vm594_vm7, %v1407_v56, %v8091_v61 }
 0x295   :  { %5911 = vrot.lane.b32.xlu1 %v5915_v57, %s6247_s2  ;;  %v1530_v6 = vmax.f32 %v1378_v25, %v1511_v52  ;;  %v1361_v54 = vsel %vm440_vm8, %v8052_v7, %v8098_v36  ;;  %v1436_v7 = vsel %vm594_vm7, %v8091_v61, %v8117_v44 }
 0x297   :  { %v8182_v22 = vmul.f32 %v8146_v15, %v1530_v6 }
 0x299   :  { %v1327_v5 = vpop.permute.xlu0 %1326  ;;  %v8163_v42 = vpop.permute.xlu2 %1348 }
 0x29a   :  { %v1363_v28 = vsel %vm440_vm8, %v1327_v5, %v7990_v47  ;;  %v1364_v53 = vsel %vm440_vm8, %v7977_v26, %v1327_v5  ;;  %v8171_v55 = vpop.permute.xlu1 %1420  ;;  %v1494_v5 = vsel %vm671_vm5, %v8102_v33, %v8059_v29 }
 0x29b   :  { %v1376_v50 = vmax.f32 %v7857_v10, %v1364_v53  ;;  %v1377_v46 = vmax.f32 %v7904_v41, %v1363_v28  ;;  %v1379_v28 = vmax.f32 %v7895_v4, %v1361_v54  ;;  %v8231_v53 = vld [vmem:[%s12296_s1 + $0x8] sm:$0xff] }
 0x29c   :  { %5921 = vrot.lane.b32.xlu2 %v8175_v17, %s6247_s2 }
 0x29d   :  { %v1528_v47 = vmax.f32 %v1376_v50, %v1509_v48  ;;  %v1529_v57 = vmax.f32 %v1377_v46, %v1510_v39  ;;  %v1512_v48 = vmax.f32 %v1437_v31, %v1494_v5  ;;  %v8246_v46 = vperm.slane %v8231_v53, 0 }
 0x29f   :  { %v8185_v26 = vmul.f32 %v8158_v24, %v1528_v47  ;;  %v8188_v19 = vmul.f32 %v8161_v37, %v1529_v57  ;;  %12844 = vst [vmem:[#allocation26_spill] sm:$0xff] %v8246_v46  ;;  %v1531_v47 = vmax.f32 %v1379_v28, %v1512_v48  ;;  %v8249_v57 = vperm.slane %v8231_v53, 1 }
 0x2a1   :  { %v8190_v32 = vpop.permute.xlu0 %1344  ;;  %v8192_v45 = vpop.permute.xlu2 %1422  ;;  %v5925_v10 = vpack.i.bf16 %v8185_v26, %v8143_v43  ;;  %v8198_v41 = vpack.i.bf16 %v8182_v22, %v8188_v19  ;;  %12845 = vst [vmem:[#allocation27_spill] sm:$0xff] %v8249_v57 }
 0x2a2   :  { %v8200_v52 = vpop.permute.xlu1 %1340 }
 0x2a3   :  { %5941 = vrot.lane.b32.xlu1 %v8198_v41, %s6242_s21  ;;  %5931 = vrot.lane.b32.xlu0 %v8198_v41, %s6241_s3 }
 0x2a4   :  { %5926 = vrot.lane.b32.xlu2 %v5925_v10, %s6241_s3 }
 0x2a9   :  { %v8207_v0 = vpop.permute.xlu0 %1338  ;;  %v8209_v25 = vpop.permute.xlu2 %1342 }
 0x2aa   :  { %v8211_v14 = vpop.permute.xlu1 %1414  ;;  %v1358_v28 = vsel %vm440_vm8, %v8011_v23, %v8207_v0 }
 0x2ab   :  { %5951 = vrot.lane.b32.xlu1 %v5925_v10, %s6244_s24  ;;  %5936 = vrot.lane.b32.xlu0 %v5925_v10, %s6242_s21 }
 0x2ac   :  { %5956 = vrot.lane.b32.xlu2 %v5925_v10, %s6245_s27 }
 0x2b1   :  { %v1468_v6 = vpop.permute.xlu0 %1467  ;;  %v1472_v56 = vpop.permute.xlu2 %1471 }
 0x2b2   :  { %v1493_v39 = vsel %vm671_vm5, %v8059_v29, %v1468_v6  ;;  %v1335_v33 = vpop.permute.xlu1 %1334 }
 0x2b3   :  { %v1513_v50 = vmax.f32 %v1436_v7, %v1493_v39  ;;  %v1360_v4 = vsel %vm440_vm8, %v8098_v36, %v1335_v33  ;;  %5971 = vrot.lane.b32.xlu1 %v8198_v41, %s6240_s25  ;;  %5946 = vrot.lane.b32.xlu0 %v5925_v10, %s6240_s25  ;;  %v8256_v36 = vmul.f32 %v8246_v46, %v1531_v47 }
 0x2b4   :  { %v1380_v61 = vmax.f32 %v7886_v40, %v1360_v4  ;;  %5976 = vrot.lane.b32.xlu2 %v8198_v41, %s6244_s24  ;;  %v1359_v7 = vsel %vm440_vm8, %v1335_v33, %v8011_v23  ;;  %v8286_v4 = vperm.slane %v8231_v53, 2 }
 0x2b6   :  { %v1532_v29 = vmax.f32 %v1380_v61, %v1513_v50  ;;  %12846 = vst [vmem:[#allocation28_spill] sm:$0xff] %v8286_v4  ;;  %v1382_v61 = vmax.f32 %v7877_v9, %v1358_v28 }
 0x2b8   :  { %v8259_v31 = vmul.f32 %v8249_v57, %v1532_v29  ;;  %v1434_v29 = vsel %vm594_vm7, %v8089_v62, %v8211_v14  ;;  %v1381_v57 = vmax.f32 %v7932_v16, %v1359_v7 }
 0x2b9   :  { %v8261_v54 = vpop.permute.xlu0 %1424  ;;  %v8263_v5 = vpop.permute.xlu2 %1477 }
 0x2ba   :  { %v1347_v48 = vpop.permute.xlu1 %1346  ;;  %v8267_v40 = vpack.i.bf16 %v8259_v31, %v8256_v36 }
 0x2bb   :  { %5961 = vrot.lane.b32.xlu0 %v5925_v10, %s6243_s19  ;;  %v1435_v10 = vsel %vm594_vm7, %v8117_v44, %v8089_v62  ;;  %v8299_v44 = vperm.slane %v8231_v53, 3 }
 0x2bc   :  { %5986 = vrot.lane.b32.xlu1 %v8267_v40, %s6241_s3 }
 0x2bd   :  { %12847 = vst [vmem:[#allocation11_spill] sm:$0xff] %v8299_v44 }
 0x2c1   :  { %v1419_v39 = vpop.permute.xlu0 %1418  ;;  %v8279_v50 = vpop.permute.xlu2 %1483 }
 0x2c2   :  { %v1470_v47 = vpop.permute.xlu1 %1469 }
 0x2c3   :  { %v1491_v23 = vsel %vm671_vm5, %v1470_v47, %v1472_v56  ;;  %v1492_v33 = vsel %vm671_vm5, %v1468_v6, %v1470_v47  ;;  %5966 = vrot.lane.b32.xlu0 %v8175_v17, %s6246_s28 }
 0x2c4   :  { %v1514_v46 = vmax.f32 %v1435_v10, %v1492_v33  ;;  %v1515_v15 = vmax.f32 %v1434_v29, %v1491_v23  ;;  %5996 = vrot.lane.b32.xlu1 %v8267_v40, %s6240_s25  ;;  %v1356_v29 = vsel %vm440_vm8, %v8200_v52, %v8209_v25 }
 0x2c6   :  { %v1533_v9 = vmax.f32 %v1381_v57, %v1514_v46  ;;  %v1534_v62 = vmax.f32 %v1382_v61, %v1515_v15  ;;  %v1357_v61 = vsel %vm440_vm8, %v8207_v0, %v8200_v52  ;;  %v1433_v0 = vsel %vm594_vm7, %v8211_v14, %v8100_v2 }
 0x2c7   :  { %v1384_v52 = vmax.f32 %v7922_v30, %v1356_v29  ;;  %v8358_v14 = vperm.slane %v8231_v53, 5  ;;  %v1355_v30 = vsel %vm440_vm8, %v8209_v25, %v8190_v32  ;;  %v1430_v25 = vsel %vm594_vm7, %v8171_v55, %v8192_v45 }
 0x2c8   :  { %v8306_v28 = vmul.f32 %v8286_v4, %v1533_v9  ;;  %v8309_v6 = vmul.f32 %v8299_v44, %v1534_v62 }
 0x2c9   :  { %v1474_v16 = vpop.permute.xlu0 %1473  ;;  %v8312_v7 = vpop.permute.xlu2 %5861  ;;  %12850 = vst [vmem:[#allocation62_spill] sm:$0xff] %v8358_v14 }
 0x2ca   :  { %12848 = vst [vmem:[#allocation31_spill] sm:$0xff] %v8312_v7  ;;  %v12406_v10 = vunpack.i.h.bf16 %v8312_v7  ;;  %v12405_v17 = vunpack.i.l.bf16 %v8312_v7  ;;  %v1476_v47 = vpop.permute.xlu1 %1475  ;;  %v8318_v46 = vpack.i.bf16 %v8309_v6, %v8306_v28  ;;  %v1490_v15 = vsel %vm671_vm5, %v1472_v56, %v1474_v16 }
 0x2cb   :  { %v1489_v57 = vsel %vm671_vm5, %v1474_v16, %v1476_v47  ;;  %5981 = vrot.lane.b32.xlu0 %v8198_v41, %s6245_s27  ;;  %v1516_v33 = vmax.f32 %v1433_v0, %v1490_v15  ;;  %v1383_v16 = vmax.f32 %v7934_v3, %v1357_v61  ;;  %v1488_v15 = vsel %vm671_vm5, %v1476_v47, %v8263_v5 }
 0x2cc   :  { %6001 = vrot.lane.b32.xlu1 %v8198_v41, %s6243_s19  ;;  %v2216_v56 = vsel %vm2198_vm10, %v12405_v17, %v12406_v10  ;;  %v1432_v41 = vsel %vm594_vm7, %v8100_v2, %v1419_v39  ;;  %5991 = vrot.lane.b32.xlu2 %v8318_v46, %s6241_s3  ;;  %v8355_v17 = vperm.slane %v8231_v53, 4  ;;  %v1431_v3 = vsel %vm594_vm7, %v1419_v39, %v8171_v55 }
 0x2cd   :  { %v2486_v23 = vpack.c.bf16 %v2216_v56, %v2216_v56  ;;  %v1517_v9 = vmax.f32 %v1432_v41, %v1489_v57  ;;  %v1535_v10 = vmax.f32 %v1383_v16, %v1516_v33  ;;  %v1353_v61 = vsel %vm440_vm8, %v1347_v48, %v8163_v42 }
 0x2ce   :  { %12849 = vst [vmem:[#allocation5_spill] sm:$0xff] %v8355_v17  ;;  %v1354_v47 = vsel %vm440_vm8, %v8190_v32, %v1347_v48  ;;  %v1518_v29 = vmax.f32 %v1431_v3, %v1488_v15  ;;  %v8392_v41 = vpack.i.bf16 %v8188_v19, %v8185_v26  ;;  %v1385_v32 = vmax.f32 %v7969_v20, %v1355_v30 }
 0x2cf   :  { %v2526_v62 = vsel %vm987_vm6, %v2486_v23, 0  ;;  %v1536_v57 = vmax.f32 %v1384_v52, %v1517_v9  ;;  %v8385_v39 = vmul.f32 %v8355_v17, %v1535_v10  ;;  %v8396_v48 = vperm.slane %v8231_v53, 6  ;;  %v1313_v9 = vld [vmem:[%s12296_s1 + $0x10] sm:$0x7]  ;;  %s6259_s1 = smov 85  }
 0x2d0   :  { %2585 = vmatpush.bf16.msrb.mxu3 %v2526_v62  ;;  %v1429_v10 = vsel %vm594_vm7, %v8192_v45, %v8261_v54  ;;  %v1386_v33 = vmax.f32 %v7913_v60, %v1354_v47  ;;  %v1387_v20 = vmax.f32 %v7956_v35, %v1353_v61  ;;  %v8414_v62 = vperm.slane %v8231_v53, 7 }
 0x2d1   :  { %v1351_v2 = vpop.permute.xlu0 %1350  ;;  %v8388_v0 = vmul.f32 %v8358_v14, %v1536_v57  ;;  %12852 = vst [vmem:[#allocation57_spill] sm:$0xff] %v8396_v48  ;;  %v8423_v16 = vperm.slane %v1313_v9, 0  ;;  %v8426_v52 = vpop.permute.xlu2 %5876 }
 0x2d2   :  { %v1427_v56 = vpop.permute.xlu1 %1426  ;;  %v1370_v23 = vsel %vm440_vm8, %v1351_v2, %v7965_v49  ;;  %12853 = vst [vmem:[#allocation54_spill] sm:$0xff] %v8414_v62  ;;  %v1503_v49 = vsel %vm671_vm5, %v8279_v50, %v7943_v8  ;;  %v1352_v45 = vsel %vm440_vm8, %v8163_v42, %v1351_v2 }
 0x2d3   :  { %6011 = vrot.lane.b32.xlu0 %v8267_v40, %s6245_s27  ;;  %12851 = vst [vmem:[#allocation58_spill] sm:$0xff] %v8388_v0  ;;  %v1446_v55 = vsel %vm594_vm7, %v1427_v56, %v7979_v1  ;;  %v1537_v1 = vmax.f32 %v1385_v32, %v1518_v29  ;;  %v1389_v35 = vmax.f32 %v7992_v13, %v1370_v23 }
 0x2d4   :  { %6006 = vrot.lane.b32.xlu2 %v8267_v40, %s6244_s24  ;;  %12854 = vst [vmem:[#allocation55_spill] sm:$0xff] %v8423_v16  ;;  %v1522_v15 = vmax.f32 %v1446_v55, %v1503_v49  ;;  %v8433_v8 = vpack.i.bf16 %v8388_v0, %v8385_v39  ;;  %v1428_v42 = vsel %vm594_vm7, %v8261_v54, %v1427_v56  ;;  %v8450_v54 = vperm.slane %v1313_v9, 2 }
 0x2d5   :  { %12855 = vst [vmem:[#allocation56_spill] sm:$0xff] %v8426_v52  ;;  %v1388_v3 = vmax.f32 %v7945_v18, %v1352_v45  ;;  %v8453_v32 = vmul.f32 %v8396_v48, %v1537_v1 }
 0x2d6   :  { %12857 = vst [vmem:[#allocation52_spill] sm:$0xff] %v8450_v54  ;;  %v1541_v56 = vmax.f32 %v1389_v35, %v1522_v15 }
 0x2d7   :  { %12858 = vst [vmem:[#allocation4_spill] sm:$0xff] %v8453_v32 }
 0x2d9   :  { %v1480_v60 = vpop.permute.xlu0 %1479 }
 0x2da   :  { %v1487_v53 = vsel %vm671_vm5, %v8263_v5, %v1480_v60  ;;  %v1482_v57 = vpop.permute.xlu1 %1481  ;;  %v8444_v5 = vperm.slane %v1313_v9, 1 }
 0x2db   :  { %v1519_v2 = vmax.f32 %v1430_v25, %v1487_v53  ;;  %v1485_v13 = vsel %vm671_vm5, %v1482_v57, %v8279_v50  ;;  %v1486_v30 = vsel %vm671_vm5, %v1480_v60, %v1482_v57  ;;  %6016 = vrot.lane.b32.xlu0 %v8433_v8, %s6241_s3 }
 0x2dc   :  { %12856 = vst [vmem:[#allocation34_spill] sm:$0xff] %v8444_v5  ;;  %v1520_v61 = vmax.f32 %v1429_v10, %v1486_v30  ;;  %v1521_v47 = vmax.f32 %v1428_v42, %v1485_v13  ;;  %6031 = vrot.lane.b32.xlu2 %v8392_v41, %s6246_s28  ;;  %v5879_v13 = vunpack.i.h.bf16 %v8426_v52 }
 0x2dd   :  { %v1538_v29 = vmax.f32 %v1386_v33, %v1519_v2 }
 0x2de   :  { %v1539_v50 = vmax.f32 %v1387_v20, %v1520_v61  ;;  %v1540_v25 = vmax.f32 %v1388_v3, %v1521_v47  ;;  %v8472_v20 = vmul.f32 %v8450_v54, %v1541_v56  ;;  %v8474_v9 = vpop.permute.xlu2 %5886 }
 0x2df   :  { %v8456_v18 = vmul.f32 %v8414_v62, %v1538_v29  ;;  %v12412_v29 = vunpack.i.l.bf16 %v8426_v52 }
 0x2e0   :  { %v8459_v23 = vmul.f32 %v8423_v16, %v1539_v50  ;;  %v8462_v55 = vmul.f32 %v8444_v5, %v1540_v25  ;;  %12862 = vst [vmem:[#allocation32_spill] sm:$0xff] %v8472_v20  ;;  %v6040_v47 = vpack.i.bf16 %v8472_v20, %v8045_v12  ;;  %v6060_v25 = vpack.i.bf16 %v8256_v36, %v8472_v20 }
 0x2e1   :  { %12859 = vst [vmem:[#allocation6_spill] sm:$0xff] %v8456_v18  ;;  %v8464_v10 = vpop.permute.xlu0 %5851  ;;  %v8468_v33 = vpack.i.bf16 %v8456_v18, %v8453_v32 }
 0x2e2   :  { %12860 = vst [vmem:[#allocation59_spill] sm:$0xff] %v8459_v23  ;;  %v12410_v49 = vunpack.i.h.bf16 %v8464_v10  ;;  %v12408_v1 = vunpack.i.l.bf16 %v8464_v10  ;;  %v8478_v45 = vpop.permute.xlu1 %5856  ;;  %v8482_v60 = vpack.i.bf16 %v8462_v55, %v8459_v23 }
 0x2e3   :  { %12861 = vst [vmem:[#allocation33_spill] sm:$0xff] %v8462_v55  ;;  %v12409_v35 = vunpack.i.h.bf16 %v8478_v45  ;;  %v12407_v15 = vunpack.i.l.bf16 %v8478_v45  ;;  %6021 = vrot.lane.b32.xlu1 %v8468_v33, %s6241_s3  ;;  %1638 = vrot.lane.b32.xlu0 %v8472_v20, %s6241_s3 }
 0x2e4   :  { %6036 = vrot.lane.b32.xlu2 %v8482_v60, %s6241_s3  ;;  %v8499_v53 = vsel %vm1640_vm11, %v12408_v1, %v12410_v49  ;;  %s6266_s3 = smov 42  }
 0x2e5   :  { %v8507_v57 = vsel %vm1717_vm12, %v12407_v15, %v12409_v35  ;;  %v1985_v35 = vsel %vm1967_vm14, %v12412_v29, %v5879_v13 }
 0x2e6   :  { %v8530_v42 = vpop.permute.xlu2 %5901  ;;  %v2448_v49 = vpack.c.bf16 %v1985_v35, %v8045_v12  ;;  %v12865_v35 = vunpack.i.h.bf16 %v8312_v7 }
 0x2e7   :  { %v5903_v5 = vunpack.i.l.bf16 %v8530_v42  ;;  %v12866_v16 = vunpack.i.h.bf16 %v8530_v42 }
 0x2e9   :  { %v8511_v2 = vpop.permute.xlu0 %5866  ;;  %v2137_v62 = vsel %vm2121_vm15, %v5903_v5, %v12866_v16 }
 0x2ea   :  { %12863 = vst [vmem:[#allocation39_spill] sm:$0xff] %v8511_v2  ;;  %v5869_v30 = vunpack.i.h.bf16 %v8511_v2  ;;  %v12411_v3 = vunpack.i.l.bf16 %v8511_v2  ;;  %v8517_v61 = vpop.permute.xlu1 %5871 }
 0x2eb   :  { %12864 = vst [vmem:[#allocation35_spill] sm:$0xff] %v8517_v61  ;;  %v5874_v56 = vunpack.i.h.bf16 %v8517_v61  ;;  %v12413_v50 = vunpack.i.l.bf16 %v8517_v61  ;;  %6026 = vrot.lane.b32.xlu1 %v8392_v41, %s6247_s2  ;;  %6041 = vrot.lane.b32.xlu0 %v6040_v47, %s6247_s2 }
 0x2ec   :  { %v2062_v15 = vsel %vm2044_vm13, %v12411_v3, %v5869_v30  ;;  %6061 = vrot.lane.b32.xlu2 %v6060_v25, %s6242_s21  ;;  %v6065_v3 = vpack.i.bf16 %v8256_v36, %v8182_v22 }
 0x2ed   :  { %v2139_v41 = vsel %vm2121_vm15, %v12413_v50, %v5874_v56 }
 0x2ee   :  { %v2467_v1 = vpack.c.bf16 %v2139_v41, %v2062_v15  ;;  %v8553_v15 = vpop.permute.xlu2 %5916 }
 0x2f0   :  { %2586 = vmatpush.bf16.msrb.mxu3 %v2467_v1 }
 0x2f3   :  { %6051 = vrot.lane.b32.xlu1 %v6040_v47, %s6246_s28  ;;  %6046 = vrot.lane.b32.xlu0 %v8267_v40, %s6243_s19 }
 0x2f4   :  { %2587 = vmatpush.bf16.msrb.mxu3 %v2448_v49  ;;  %6066 = vrot.lane.b32.xlu2 %v6065_v3, %s6247_s2 }
 0x2f6   :  { %v8555_v25 = vpop.permute.xlu0 %5891 }
 0x2f7   :  { %v12418_v41 = vunpack.i.h.bf16 %v8555_v25  ;;  %v5893_v1 = vunpack.i.l.bf16 %v8555_v25  ;;  %v8559_v12 = vpop.permute.xlu1 %5881 }
 0x2f9   :  { %v2215_v47 = vsel %vm2198_vm10, %v12865_v35, %v5893_v1  ;;  %v2214_v40 = vsel %vm2198_vm10, %v5893_v1, %v12418_v41 }
 0x2fa   :  { %v2487_v49 = vpack.c.bf16 %v2215_v47, %v2215_v47  ;;  %v2488_v29 = vpack.c.bf16 %v2214_v40, %v2214_v40  ;;  %v8582_v40 = vpop.permute.xlu2 %5921 }
 0x2fb   :  { %6056 = vrot.lane.b32.xlu1 %v8318_v46, %s6240_s25  ;;  %6071 = vrot.lane.b32.xlu0 %v6065_v3, %s6246_s28 }
 0x2fc   :  { %v2529_v50 = vsel %vm987_vm6, %v2487_v49, 0  ;;  %v2532_v54 = vsel %vm987_vm6, %v2488_v29, 0  ;;  %6081 = vrot.lane.b32.xlu2 %v8318_v46, %s6244_s24 }
 0x2fd   :  { %2599 = vmatpush.bf16.msrb.mxu0 %v2529_v50  ;;  %2613 = vmatpush.bf16.msrb.mxu1 %v2532_v54  ;;  %v2138_v54 = vsel %vm2121_vm15, %v5874_v56, %v5903_v5  ;;  %v12429_v5 = vunpack.i.h.bf16 %v8553_v15 }
 0x2fe   :  { %v8578_v1 = vpop.permute.xlu0 %5906 }
 0x2ff   :  { %v8580_v47 = vpop.permute.xlu1 %5896  ;;  %v5908_v3 = vunpack.i.l.bf16 %v8578_v1  ;;  %v12867_v56 = vunpack.i.h.bf16 %v8578_v1 }
 0x300   :  { %v12431_v49 = vunpack.i.h.bf16 %v8580_v47  ;;  %v5898_v29 = vunpack.i.l.bf16 %v8580_v47 }
 0x301   :  { %v1983_v16 = vsel %vm1967_vm14, %v5908_v3, %v12867_v56  ;;  %v12427_v56 = vunpack.i.l.bf16 %v8474_v9 }
 0x302   :  { %v2061_v50 = vsel %vm2044_vm13, %v5869_v30, %v5898_v29  ;;  %v2060_v35 = vsel %vm2044_vm13, %v5898_v29, %v12431_v49  ;;  %v1984_v30 = vsel %vm1967_vm14, %v5879_v13, %v5908_v3  ;;  %v12425_v29 = vunpack.i.l.bf16 %v8553_v15  ;;  %v8623_v3 = vpop.permute.xlu2 %5926 }
 0x303   :  { %6076 = vrot.lane.b32.xlu1 %v8433_v8, %s6240_s25  ;;  %v2468_v41 = vpack.c.bf16 %v2138_v54, %v2061_v50  ;;  %v2469_v48 = vpack.c.bf16 %v2137_v62, %v2060_v35  ;;  %6086 = vrot.lane.b32.xlu0 %v8318_v46, %s6245_s27  ;;  %v2449_v35 = vpack.c.bf16 %v1984_v30, %v8040_v27  ;;  %v12428_v54 = vunpack.i.l.bf16 %v8559_v12 }
 0x304   :  { %6096 = vrot.lane.b32.xlu2 %v8433_v8, %s6244_s24  ;;  %v2450_v50 = vpack.c.bf16 %v1983_v16, %v8084_v34  ;;  %v1888_v34 = vsel %vm1871_vm0, %v12425_v29, %v12429_v5  ;;  %v12868_v16 = vunpack.i.h.bf16 %v8464_v10  ;;  %v5884_v5 = vunpack.i.h.bf16 %v8559_v12 }
 0x305   :  { %2600 = vmatpush.bf16.msrb.mxu0 %v2468_v41  ;;  %2614 = vmatpush.bf16.msrb.mxu1 %v2469_v48  ;;  %v6110_v48 = vpack.i.bf16 %v8306_v28, %v8259_v31  ;;  %v12870_v17 = vunpack.i.l.bf16 %v8623_v3  ;;  %v12484_v7 = vunpack.i.h.bf16 %v8623_v3 }
 0x307   :  { %v8614_v62 = vpop.permute.xlu1 %5911  ;;  %v8713_v49 = vsel %vm1640_vm11, %v5884_v5, %v12870_v17 }
 0x308   :  { %v12430_v13 = vunpack.i.h.bf16 %v8614_v62  ;;  %v12426_v41 = vunpack.i.l.bf16 %v8614_v62 }
 0x309   :  { %2601 = vmatpush.bf16.msrb.mxu0 %v2449_v35  ;;  %2615 = vmatpush.bf16.msrb.mxu1 %v2450_v50  ;;  %v1657_v35 = vsel %vm1640_vm11, %v12868_v16, %v12428_v54 }
 0x30a   :  { %v1811_v27 = vsel %vm1794_vm1, %v12426_v41, %v12430_v13  ;;  %v8663_v29 = vpop.permute.xlu2 %5956 }
 0x30b   :  { %6091 = vrot.lane.b32.xlu1 %v8318_v46, %s6243_s19  ;;  %v2431_v30 = vpack.c.bf16 %v1888_v34, %v1811_v27  ;;  %6101 = vrot.lane.b32.xlu0 %v8433_v8, %s6245_s27  ;;  %v12869_v46 = vunpack.i.h.bf16 %v8478_v45  ;;  %v8660_v34 = vld [vmem:[%s12297_s4] sm:$0xff] }
 0x30c   :  { %6111 = vrot.lane.b32.xlu2 %v6110_v48, %s6246_s28 }
 0x30d   :  { %2616 = vmatpush.bf16.msrb.mxu1 %v2431_v30  ;;  %v1734_v50 = vsel %vm1717_vm12, %v12869_v46, %v12427_v56  ;;  %v12441_v46 = vunpack.i.h.bf16 %v8663_v29 }
 0x30e   :  { %v2412_v27 = vpack.c.bf16 %v1734_v50, %v1657_v35  ;;  %v6130_v35 = vpack.i.bf16 %v8385_v39, %v8309_v6  ;;  %v5958_v50 = vunpack.i.l.bf16 %v8663_v29 }
 0x310   :  { %v8705_v14 = vsel %vm2121_vm15, %v5958_v50, %v12441_v46  ;;  %v12873_v46 = vunpack.i.h.bf16 %v8555_v25 }
 0x311   :  { %2617 = vmatpush.bf16.msrb.mxu1 %v2412_v27 }
 0x312   :  { %v8692_v13 = vpop.permute.xlu2 %5976 }
 0x313   :  { %6106 = vrot.lane.b32.xlu1 %v6110_v48, %s6247_s2  ;;  %6116 = vrot.lane.b32.xlu0 %v8433_v8, %s6243_s19 }
 0x314   :  { %6126 = vrot.lane.b32.xlu2 %v6110_v48, %s6242_s21  ;;  %5296 = vmatmul.msk.bf16.vlgmr.msrb.gmra.mxu1 %vm983_vm9, %v8660_v34 }
 0x315   :  { %v8668_v30 = vpop.permute.xlu0 %5931  ;;  %v8670_v16 = vpop.permute.xlu1 %5941 }
 0x31b   :  { %6121 = vrot.lane.b32.xlu1 %v8468_v33, %s6240_s25  ;;  %6131 = vrot.lane.b32.xlu0 %v6130_v35, %s6247_s2 }
 0x31c   :  { %6141 = vrot.lane.b32.xlu2 %v8482_v60, %s6240_s25 }
 0x31d   :  { %v8684_v48 = vpop.permute.xlu1 %5951  ;;  %v8686_v27 = vpop.permute.xlu0 %5936 }
 0x31e   :  { %v12438_v41 = vunpack.i.h.bf16 %v8684_v48  ;;  %v5953_v56 = vunpack.i.l.bf16 %v8684_v48  ;;  %v12871_v44 = vunpack.i.l.bf16 %v8686_v27 }
 0x320   :  { %v8699_v8 = vsel %vm2044_vm13, %v5953_v56, %v12438_v41  ;;  %v12872_v41 = vunpack.i.h.bf16 %v8474_v9 }
 0x322   :  { %v8721_v4 = vsel %vm1717_vm12, %v12872_v41, %v12871_v44 }
 0x323   :  { %6136 = vrot.lane.b32.xlu1 %v6130_v35, %s6246_s28  ;;  %6146 = vrot.lane.b32.xlu0 %v6130_v35, %s6242_s21 }
 0x324   :  { %6156 = vrot.lane.b32.xlu2 %v8468_v33, %s6245_s27 }
 0x325   :  { %v8729_v17 = vpop.permute.xlu1 %5971  ;;  %v8731_v54 = vpop.permute.xlu0 %5946 }
 0x326   :  { %v5974_v37 = vunpack.i.h.bf16 %v8729_v17  ;;  %v12456_v24 = vunpack.i.l.bf16 %v8729_v17  ;;  %v12458_v44 = vunpack.i.l.bf16 %v8731_v54  ;;  %v8736_v41 = vpop.permute.xlu2 %5991 }
 0x328   :  { %v2210_v35 = vsel %vm2198_vm10, %v12456_v24, %v5974_v37  ;;  %v2213_v63 = vsel %vm2198_vm10, %v12873_v46, %v12458_v44  ;;  %v12874_v24 = vunpack.i.h.bf16 %v8580_v47 }
 0x329   :  { %v2492_v11 = vpack.c.bf16 %v2210_v35, %v2210_v35  ;;  %v2489_v21 = vpack.c.bf16 %v2213_v63, %v2213_v63  ;;  %v5923_v35 = vunpack.i.l.bf16 %v8582_v40 }
 0x32a   :  { %v2059_v25 = vsel %vm2044_vm13, %v12874_v24, %v5953_v56  ;;  %v12876_v24 = vunpack.i.h.bf16 %v8578_v1  ;;  %v6175_v56 = vpack.i.bf16 %v8453_v32, %v8388_v0 }
 0x32b   :  { %6151 = vrot.lane.b32.xlu1 %v8468_v33, %s6244_s24  ;;  %v2544_v51 = vsel %vm987_vm6, %v2492_v11, 0  ;;  %6161 = vrot.lane.b32.xlu0 %v8468_v33, %s6243_s19  ;;  %v2535_v59 = vsel %vm987_vm6, %v2489_v21, 0  ;;  %v12875_v11 = vunpack.i.h.bf16 %v8530_v42 }
 0x32c   :  { %2669 = vmatpush.bf16.msra.mxu1 %v2544_v51  ;;  %6171 = vrot.lane.b32.xlu2 %v8482_v60, %s6245_s27 }
 0x32d   :  { %2627 = vmatpush.bf16.msra.mxu2 %v2535_v59  ;;  %v8760_v63 = vpop.permute.xlu0 %5961  ;;  %v2136_v33 = vsel %vm2121_vm15, %v12875_v11, %v5958_v50  ;;  %v12459_v50 = vunpack.i.h.bf16 %v8582_v40 }
 0x32e   :  { %v8762_v46 = vpop.permute.xlu1 %5986  ;;  %v12457_v51 = vunpack.i.l.bf16 %v8760_v63  ;;  %v8769_v21 = vpop.permute.xlu2 %6006  ;;  %v2470_v47 = vpack.c.bf16 %v2136_v33, %v2059_v25 }
 0x330   :  { %v1982_v59 = vsel %vm1967_vm14, %v12876_v24, %v12457_v51  ;;  %v8800_v24 = vsel %vm1794_vm1, %v5923_v35, %v12459_v50 }
 0x331   :  { %2628 = vmatpush.bf16.msra.mxu2 %v2470_v47  ;;  %v2451_v42 = vpack.c.bf16 %v1982_v59, %v8087_v58 }
 0x333   :  { %6166 = vrot.lane.b32.xlu1 %v8482_v60, %s6244_s24  ;;  %6176 = vrot.lane.b32.xlu0 %v6175_v56, %s6247_s2 }
 0x334   :  { %6186 = vrot.lane.b32.xlu2 %v8482_v60, %s6243_s19  ;;  %v12877_v60 = vunpack.i.h.bf16 %v8614_v62 }
 0x335   :  { %2629 = vmatpush.bf16.msra.mxu2 %v2451_v42  ;;  %v8787_v1 = vpop.permute.xlu0 %5966  ;;  %v12878_v42 = vunpack.i.h.bf16 %v8553_v15 }
 0x336   :  { %v8789_v25 = vpop.permute.xlu1 %5996  ;;  %v12461_v11 = vunpack.i.h.bf16 %v8787_v1  ;;  %v5968_v58 = vunpack.i.l.bf16 %v8787_v1  ;;  %v8793_v33 = vpop.permute.xlu2 %6031  ;;  %v1810_v59 = vsel %vm1794_vm1, %v12877_v60, %v5923_v35  ;;  %v6195_v60 = vpack.i.bf16 %v8459_v23, %v8456_v18 }
 0x337   :  { %v12462_v47 = vunpack.i.l.bf16 %v8789_v25  ;;  %v12880_v35 = vunpack.i.h.bf16 %v8474_v9 }
 0x338   :  { %v1887_v51 = vsel %vm1871_vm0, %v12878_v42, %v5968_v58  ;;  %v8818_v50 = vsel %vm1871_vm0, %v5968_v58, %v12461_v11  ;;  %v12879_v42 = vunpack.i.l.bf16 %v8559_v12  ;;  %v12881_v11 = vunpack.i.l.bf16 %v8474_v9 }
 0x339   :  { %v2209_v44 = vsel %vm2198_vm10, %v5974_v37, %v12462_v47  ;;  %v2432_v52 = vpack.c.bf16 %v1887_v51, %v1810_v59  ;;  %v5979_v51 = vunpack.i.h.bf16 %v8692_v13 }
 0x33a   :  { %v1656_v37 = vsel %vm1640_vm11, %v12879_v42, %v5884_v5  ;;  %v2493_v58 = vpack.c.bf16 %v2209_v44, %v2209_v44  ;;  %v1733_v12 = vsel %vm1717_vm12, %v12881_v11, %v12880_v35  ;;  %v12883_v11 = vunpack.i.l.bf16 %v8692_v13 }
 0x33b   :  { %6181 = vrot.lane.b32.xlu1 %v6175_v56, %s6246_s28  ;;  %2196 = vrot.lane.b32.xlu0 %v8472_v20, %s6240_s25  ;;  %v2413_v42 = vpack.c.bf16 %v1733_v12, %v1656_v37 }
 0x33c   :  { %2630 = vmatpush.bf16.msra.mxu2 %v2432_v52  ;;  %6196 = vrot.lane.b32.xlu2 %v6195_v60, %s6247_s2  ;;  %v2547_v9 = vsel %vm987_vm6, %v2493_v58, 0  ;;  %v2056_v35 = vsel %vm2044_vm13, %v12883_v11, %v5979_v51 }
 0x33d   :  { %v8840_v47 = vpop.permute.xlu0 %5981 }
 0x33e   :  { %v8842_v5 = vpop.permute.xlu1 %6001  ;;  %v5984_v52 = vunpack.i.h.bf16 %v8840_v47  ;;  %v12468_v44 = vunpack.i.l.bf16 %v8840_v47  ;;  %v8846_v61 = vpop.permute.xlu2 %6036 }
 0x33f   :  { %12882 = vst [vmem:[#allocation14_spill] sm:$0xff] %v8846_v61  ;;  %v12469_v59 = vunpack.i.h.bf16 %v8842_v5  ;;  %v12465_v2 = vunpack.i.l.bf16 %v8842_v5 }
 0x340   :  { %2631 = vmatpush.bf16.msra.mxu2 %v2413_v42  ;;  %v2133_v37 = vsel %vm2121_vm15, %v12468_v44, %v5984_v52  ;;  %v12466_v42 = vunpack.i.l.bf16 %v8769_v21 }
 0x341   :  { %v2473_v12 = vpack.c.bf16 %v2133_v37, %v2056_v35  ;;  %v1979_v58 = vsel %vm1967_vm14, %v12465_v2, %v12469_v59 }
 0x342   :  { %v2454_v11 = vpack.c.bf16 %v1979_v58, %v8188_v19  ;;  %v2055_v37 = vsel %vm2044_vm13, %v5979_v51, %v12466_v42  ;;  %v2505_v51 = vld [vmem:[%s12298_s5] sm:$0xff] }
 0x343   :  { %5297 = vmatmul.msk.bf16.vlgmr.msra.gmra.mxu2 %vm983_vm9, %v8660_v34  ;;  %6191 = vrot.lane.b32.xlu1 %v6175_v56, %s6242_s21 }
 0x344   :  { %2683 = vmatpush.bf16.msrb.mxu2 %v2547_v9  ;;  %6201 = vrot.lane.b32.xlu0 %v6195_v60, %s6246_s28 }
 0x345   :  { %2670 = vmatpush.bf16.msra.mxu1 %v2473_v12  ;;  %2042 = vrot.lane.b32.xlu2 %v8472_v20, %s6244_s24  ;;  %v8872_v9 = vpop.permute.xlu0 %6011  ;;  %s6251_s24 = smov 50  }
 0x346   :  { %v12467_v56 = vunpack.i.l.bf16 %v8872_v9  ;;  %v8876_v35 = vpop.permute.xlu2 %6061 }
 0x348   :  { %v2132_v12 = vsel %vm2121_vm15, %v5984_v52, %v12467_v56  ;;  %v2506_v52 = vld [vmem:[%s12298_s5 + $0x8] sm:$0xff]  ;;  %s6254_s5 = smov 77  }
 0x349   :  { %2671 = vmatpush.bf16.msra.mxu1 %v2454_v11  ;;  %v2474_v2 = vpack.c.bf16 %v2132_v12, %v2055_v37  ;;  %v2908_v11 = vld [vmem:[%s12299_s7 + $0x8] sm:$0xff]  ;;  %v12478_v12 = vunpack.i.l.bf16 %v8793_v33  ;;  %v12481_v37 = vunpack.i.l.bf16 %v8670_v16 }
 0x34b   :  { %6206 = vrot.lane.b32.xlu1 %v6195_v60, %s6242_s21  ;;  %2684 = vmatpush.bf16.msrb.mxu2 %v2474_v2 }
 0x34c   :  { %2119 = vrot.lane.b32.xlu0 %v8472_v20, %s6245_s27 }
 0x34d   :  { %1790 = vrot.lane.b32.xlu2 %v8462_v55, %s6247_s2  ;;  %v8891_v19 = vpop.permute.xlu0 %6016 }
 0x34e   :  { %12884 = vst [vmem:[#allocation12_spill] sm:$0xff] %v8891_v19  ;;  %v8893_v58 = vpop.permute.xlu2 %6066  ;;  %v12890_v19 = vunpack.i.l.bf16 %v8731_v54 }
 0x353   :  { %1965 = vrot.lane.b32.xlu1 %v8472_v20, %s6243_s19 }
 0x354   :  { %1867 = vrot.lane.b32.xlu0 %v8462_v55, %s6246_s28  ;;  %s6256_s28 = smov 74  }
 0x355   :  { %2509 = vperm.xlu2 %5849, %v2505_v51   ;;  %v8902_v60 = vpop.permute.xlu1 %6021  ;;  %v8904_v2 = vpop.permute.xlu0 %1638 }
 0x356   :  { %12885 = vst [vmem:[#allocation8_spill] sm:$0xff] %v8902_v60  ;;  %v8916_v51 = vpop.permute.xlu2 %6081  ;;  %v12888_v60 = vunpack.i.h.bf16 %v8686_v27 }
 0x35b   :  { %1713 = vrot.lane.b32.xlu1 %v8462_v55, %s6242_s21  ;;  %v3567_v55 = vld [vmem:[%s12300_s8 + $0x8] sm:$0xff]  ;;  %s6255_s21 = smov 53  }
 0x35c   :  { %2514 = vperm.xlu0 %6210, %v2506_v52  }
 0x35d   :  { %2916 = vperm.xlu2 %5849, %v2908_v11   ;;  %v8918_v42 = vpop.permute.xlu1 %6026  ;;  %v8921_v44 = vpop.permute.xlu0 %6041  ;;  %v12887_v11 = vunpack.i.h.bf16 %v8793_v33 }
 0x35e   :  { %12886 = vst [vmem:[#allocation9_spill] sm:$0xff] %v8921_v44  ;;  %v12476_v59 = vunpack.i.h.bf16 %v8918_v42  ;;  %v12475_v20 = vunpack.i.l.bf16 %v8918_v42  ;;  %v8960_v32 = vpop.permute.xlu2 %6096 }
 0x35f   :  { %v1884_v56 = vsel %vm1871_vm0, %v12478_v12, %v12887_v11 }
 0x360   :  { %v1807_v52 = vsel %vm1794_vm1, %v12475_v20, %v12476_v59  ;;  %v1730_v20 = vsel %vm1717_vm12, %v12888_v60, %v12481_v37  ;;  %v5949_v59 = vunpack.i.h.bf16 %v8731_v54  ;;  %v12893_v54 = vunpack.i.l.bf16 %v8614_v62 }
 0x361   :  { %v2435_v61 = vpack.c.bf16 %v1884_v56, %v1807_v52  ;;  %v6043_v56 = vunpack.i.l.bf16 %v8921_v44  ;;  %v12889_v52 = vunpack.i.l.bf16 %v8668_v30 }
 0x363   :  { %2672 = vmatpush.bf16.msra.mxu1 %v2435_v61  ;;  %v1653_v11 = vsel %vm1640_vm11, %v12484_v7, %v12889_v52 }
 0x364   :  { %v2416_v18 = vpack.c.bf16 %v1730_v20, %v1653_v11  ;;  %v12891_v20 = vunpack.i.l.bf16 %v8729_v17  ;;  %v12892_v11 = vunpack.i.h.bf16 %v8921_v44  ;;  %v12894_v17 = vunpack.i.l.bf16 %v8553_v15 }
 0x365   :  { %3575 = vperm.xlu2 %5849, %v3567_v55   ;;  %v8958_v12 = vpop.permute.xlu1 %6051  ;;  %v8962_v60 = vpop.permute.xlu0 %6046  ;;  %v2212_v55 = vsel %vm2198_vm10, %v12890_v19, %v5949_v59  ;;  %v1812_v19 = vsel %vm1794_vm1, %v6043_v56, %v12893_v54  ;;  %v5934_v54 = vunpack.i.h.bf16 %v8668_v30 }
 0x366   :  { %v12486_v61 = vunpack.i.h.bf16 %v8958_v12  ;;  %v6053_v37 = vunpack.i.l.bf16 %v8958_v12  ;;  %v6048_v0 = vunpack.i.l.bf16 %v8962_v60  ;;  %v2211_v52 = vsel %vm2198_vm10, %v5949_v59, %v12891_v20 }
 0x367   :  { %2673 = vmatpush.bf16.msra.mxu1 %v2416_v18  ;;  %v1813_v7 = vsel %vm1794_vm1, %v12892_v11, %v6043_v56  ;;  %v12895_v11 = vunpack.i.h.bf16 %v8842_v5  ;;  %v2491_v56 = vpack.c.bf16 %v2211_v52, %v2211_v52 }
 0x368   :  { %v1890_v18 = vsel %vm1871_vm0, %v12486_v61, %v6053_v37  ;;  %v1889_v59 = vsel %vm1871_vm0, %v6053_v37, %v12894_v17  ;;  %v12896_v61 = vunpack.i.l.bf16 %v8464_v10  ;;  %v3616_v37 = vld [vmem:[%s12301_s9] sm:$0xff]  ;;  %v12897_v10 = vunpack.i.l.bf16 %v8478_v45 }
 0x369   :  { %v2429_v20 = vpack.c.bf16 %v1890_v18, %v1813_v7  ;;  %v2430_v23 = vpack.c.bf16 %v1889_v59, %v1812_v19  ;;  %v1978_v44 = vsel %vm1967_vm14, %v12895_v11, %v6048_v0  ;;  %v2490_v7 = vpack.c.bf16 %v2212_v55, %v2212_v55  ;;  %3620 = vperm.xlu0 %6210, %v3616_v37  }
 0x36a   :  { %v1659_v62 = vsel %vm1640_vm11, %v8904_v2, %v12896_v61  ;;  %5300 = vmatmul.msk.bf16.vlgmr.msra.gmra.mxu1 %vm983_vm9, %v8660_v34  ;;  %v2455_v15 = vpack.c.bf16 %v1978_v44, %v8182_v22  ;;  %v12898_v18 = vunpack.i.l.bf16 %v8876_v35  ;;  %v5944_v55 = vunpack.i.h.bf16 %v8670_v16 }
 0x36b   :  { %2588 = vmatpush.bf16.msrb.mxu3 %v2429_v20  ;;  %2602 = vmatpush.bf16.msrb.mxu0 %v2430_v23  ;;  %v2538_v52 = vsel %vm987_vm6, %v2490_v7, 0  ;;  %v5964_v45 = vunpack.i.h.bf16 %v8760_v63  ;;  %v6068_v59 = vunpack.i.l.bf16 %v8893_v58  ;;  %v12899_v11 = vpack.c.bf16 %v8507_v57, %v8499_v53 }
 0x36c   :  { %2685 = vmatpush.bf16.msrb.mxu2 %v2455_v15  ;;  %v1736_v61 = vsel %vm1717_vm12, %v12898_v18, %v12897_v10  ;;  %v9027_v15 = vpop.permute.xlu2 %6111  ;;  %v12900_v37 = vunpack.i.l.bf16 %v8840_v47  ;;  %v12901_v7 = vunpack.i.h.bf16 %v8663_v29  ;;  %v12902_v53 = vunpack.i.h.bf16 %v8918_v42 }
 0x36d   :  { %v6057_v22 = vpop.permute.xlu1 %6056  ;;  %v2410_v44 = vpack.c.bf16 %v1736_v61, %v1659_v62  ;;  %v9017_v19 = vpop.permute.xlu0 %6071  ;;  %v2541_v62 = vsel %vm987_vm6, %v2491_v56, 0  ;;  %v12903_v56 = vunpack.i.h.bf16 %v8793_v33 }
 0x36e   :  { %v6059_v17 = vunpack.i.h.bf16 %v6057_v22  ;;  %v6058_v23 = vunpack.i.l.bf16 %v6057_v22  ;;  %v6073_v20 = vunpack.i.l.bf16 %v9017_v19  ;;  %v2134_v10 = vsel %vm2121_vm15, %v12901_v7, %v12900_v37 }
 0x36f   :  { %2589 = vmatpush.bf16.msrb.mxu3 %v2410_v44  ;;  %2603 = vmatpush.bf16.msrb.mxu0 %v12899_v11  ;;  %v1806_v57 = vsel %vm1794_vm1, %v12902_v53, %v6068_v59  ;;  %v12904_v22 = vunpack.i.l.bf16 %v8692_v13  ;;  %v12905_v44 = vunpack.i.h.bf16 %v8684_v48  ;;  %v12906_v11 = vunpack.i.l.bf16 %v8668_v30 }
 0x370   :  { %v2206_v18 = vsel %vm2198_vm10, %v6058_v23, %v6059_v17  ;;  %v1883_v29 = vsel %vm1871_vm0, %v12903_v56, %v6073_v20  ;;  %v12908_v48 = vunpack.i.l.bf16 %v8760_v63  ;;  %v12910_v56 = vunpack.i.l.bf16 %v8842_v5 }
 0x371   :  { %v2496_v47 = vpack.c.bf16 %v2206_v18, %v2206_v18  ;;  %v2436_v61 = vpack.c.bf16 %v1883_v29, %v1806_v57  ;;  %v12907_v18 = vunpack.i.l.bf16 %v8670_v16  ;;  %v5999_v57 = vunpack.i.h.bf16 %v8789_v25 }
 0x372   :  { %5294 = vmatmul.msk.bf16.vlgmr.msrb.gmra.mxu3 %vm983_vm9, %v8660_v34  ;;  %5295 = vmatmul.msk.bf16.vlgmr.msrb.gmra.mxu0 %vm983_vm9, %v8660_v34  ;;  %v1981_v53 = vsel %vm1967_vm14, %v12908_v48, %v5964_v45  ;;  %v1980_v29 = vsel %vm1967_vm14, %v5964_v45, %v12910_v56  ;;  %v12911_v45 = vunpack.i.l.bf16 %v8918_v42 }
 0x373   :  { %2641 = vmatpush.bf16.msra.mxu3 %v2538_v52  ;;  %2655 = vmatpush.bf16.msra.mxu0 %v2541_v62  ;;  %v2057_v52 = vsel %vm2044_vm13, %v12905_v44, %v12904_v22  ;;  %v1652_v62 = vsel %vm1640_vm11, %v12906_v11, %v5934_v54  ;;  %v2556_v7 = vsel %vm987_vm6, %v2496_v47, 0  ;;  %v1729_v13 = vsel %vm1717_vm12, %v12907_v18, %v5944_v55 }
 0x374   :  { %v2472_v37 = vpack.c.bf16 %v2134_v10, %v2057_v52  ;;  %2686 = vmatpush.bf16.msrb.mxu2 %v2436_v61  ;;  %v12909_v10 = vpack.c.bf16 %v8705_v14, %v8699_v8  ;;  %v6084_v47 = vunpack.i.h.bf16 %v8916_v51  ;;  %v6083_v22 = vunpack.i.l.bf16 %v8916_v51  ;;  %2725 = vmatpush.bf16.msrb.mxu1 %v2556_v7 }
 0x375   :  { %v9086_v63 = vpop.permute.xlu1 %6076  ;;  %v6087_v44 = vpop.permute.xlu0 %6086  ;;  %v2417_v52 = vpack.c.bf16 %v1729_v13, %v1652_v62  ;;  %v2452_v14 = vpack.c.bf16 %v1981_v53, %v8143_v43  ;;  %v2453_v5 = vpack.c.bf16 %v1980_v29, %v8185_v26  ;;  %v12912_v18 = vunpack.i.h.bf16 %v8582_v40 }
 0x376   :  { %v6078_v61 = vunpack.i.l.bf16 %v9086_v63  ;;  %v6089_v8 = vunpack.i.h.bf16 %v6087_v44  ;;  %v6088_v11 = vunpack.i.l.bf16 %v6087_v44  ;;  %v12913_v43 = vunpack.i.l.bf16 %v8789_v25  ;;  %v9111_v13 = vpop.permute.xlu2 %6126 }
 0x377   :  { %2642 = vmatpush.bf16.msra.mxu3 %v12909_v10  ;;  %2656 = vmatpush.bf16.msra.mxu0 %v2472_v37  ;;  %v1808_v37 = vsel %vm1794_vm1, %v12912_v18, %v12911_v45  ;;  %v2052_v26 = vsel %vm2044_vm13, %v6083_v22, %v6084_v47  ;;  %v12915_v25 = vunpack.i.h.bf16 %v8787_v1  ;;  %v2207_v10 = vsel %vm2198_vm10, %v5999_v57, %v6058_v23 }
 0x378   :  { %2687 = vmatpush.bf16.msrb.mxu2 %v2417_v52  ;;  %v2205_v62 = vsel %vm2198_vm10, %v6059_v17, %v6078_v61  ;;  %v2208_v7 = vsel %vm2198_vm10, %v12913_v43, %v5999_v57  ;;  %v2129_v40 = vsel %vm2121_vm15, %v6088_v11, %v6089_v8  ;;  %v12914_v17 = vunpack.i.l.bf16 %v8793_v33 }
 0x379   :  { %v2497_v42 = vpack.c.bf16 %v2205_v62, %v2205_v62  ;;  %v2477_v48 = vpack.c.bf16 %v2129_v40, %v2052_v26  ;;  %v2494_v44 = vpack.c.bf16 %v2208_v7, %v2208_v7  ;;  %v6014_v52 = vunpack.i.h.bf16 %v8872_v9 }
 0x37a   :  { %v1885_v53 = vsel %vm1871_vm0, %v12915_v25, %v12914_v17  ;;  %v12916_v1 = vpack.c.bf16 %v8818_v50, %v8800_v24  ;;  %v12917_v33 = vunpack.i.h.bf16 %v8686_v27  ;;  %v12918_v23 = vunpack.i.l.bf16 %v8686_v27 }
 0x37b   :  { %2643 = vmatpush.bf16.msra.mxu3 %v2452_v14  ;;  %2657 = vmatpush.bf16.msra.mxu0 %v2453_v5  ;;  %v2434_v56 = vpack.c.bf16 %v1885_v53, %v1808_v37  ;;  %v2559_v29 = vsel %vm987_vm6, %v2497_v42, 0  ;;  %v6098_v14 = vunpack.i.l.bf16 %v8960_v32  ;;  %v2495_v45 = vpack.c.bf16 %v2207_v10, %v2207_v10 }
 0x37c   :  { %5301 = vmatmul.msk.bf16.vlgmr.msrb.gmra.mxu2 %vm983_vm9, %v8660_v34  ;;  %2726 = vmatpush.bf16.msrb.mxu1 %v2477_v48  ;;  %v1731_v57 = vsel %vm1717_vm12, %v12918_v23, %v12917_v33  ;;  %v6009_v18 = vunpack.i.h.bf16 %v8769_v21  ;;  %v12919_v50 = vunpack.i.h.bf16 %v8623_v3  ;;  %v12920_v24 = vunpack.i.l.bf16 %v8623_v3 }
 0x37d   :  { %2739 = vmatpush.bf16.msra.mxu2 %v2559_v29  ;;  %v6092_v5 = vpop.permute.xlu1 %6091  ;;  %v9136_v37 = vpop.permute.xlu0 %6101  ;;  %v2550_v40 = vsel %vm987_vm6, %v2494_v44, 0  ;;  %v6049_v42 = vunpack.i.h.bf16 %v8962_v60  ;;  %v12921_v48 = vpack.c.bf16 %v8721_v4, %v8713_v49  ;;  %v2051_v3 = vsel %vm2044_vm13, %v6084_v47, %v6098_v14 }
 0x37e   :  { %v6094_v62 = vunpack.i.h.bf16 %v6092_v5  ;;  %v6093_v43 = vunpack.i.l.bf16 %v6092_v5  ;;  %v1654_v27 = vsel %vm1640_vm11, %v12920_v24, %v12919_v50  ;;  %v6103_v7 = vunpack.i.l.bf16 %v9136_v37 }
 0x37f   :  { %2644 = vmatpush.bf16.msra.mxu3 %v12916_v1  ;;  %2658 = vmatpush.bf16.msra.mxu0 %v2434_v56  ;;  %v2415_v26 = vpack.c.bf16 %v1731_v57, %v1654_v27  ;;  %v12922_v25 = vunpack.i.l.bf16 %v8872_v9  ;;  %v2553_v10 = vsel %vm987_vm6, %v2495_v45, 0  ;;  %v2130_v56 = vsel %vm2121_vm15, %v6014_v52, %v6088_v11 }
 0x380   :  { %v1975_v17 = vsel %vm1967_vm14, %v6093_v43, %v6094_v62  ;;  %v2128_v49 = vsel %vm2121_vm15, %v6089_v8, %v6103_v7  ;;  %v12923_v9 = vunpack.i.l.bf16 %v8769_v21  ;;  %v6114_v44 = vunpack.i.h.bf16 %v9027_v15  ;;  %v9181_v21 = vpop.permute.xlu2 %6141 }
 0x381   :  { %v2131_v53 = vsel %vm2121_vm15, %v12922_v25, %v6014_v52  ;;  %v2458_v4 = vpack.c.bf16 %v1975_v17, %v8306_v28  ;;  %v2478_v47 = vpack.c.bf16 %v2128_v49, %v2051_v3  ;;  %v2053_v8 = vsel %vm2044_vm13, %v6009_v18, %v6083_v22 }
 0x382   :  { %v2054_v29 = vsel %vm2044_vm13, %v12923_v9, %v6009_v18  ;;  %v6113_v11 = vunpack.i.l.bf16 %v9027_v15  ;;  %v6074_v52 = vunpack.i.h.bf16 %v9017_v19  ;;  %v2476_v1 = vpack.c.bf16 %v2130_v56, %v2053_v8 }
 0x383   :  { %2645 = vmatpush.bf16.msra.mxu3 %v12921_v48  ;;  %2659 = vmatpush.bf16.msra.mxu0 %v2415_v26  ;;  %v2475_v28 = vpack.c.bf16 %v2131_v53, %v2054_v29  ;;  %v1977_v33 = vsel %vm1967_vm14, %v6048_v0, %v6049_v42  ;;  %v5989_v51 = vunpack.i.h.bf16 %v8762_v46  ;;  %v6069_v22 = vunpack.i.h.bf16 %v8893_v58 }
 0x384   :  { %2727 = vmatpush.bf16.msrb.mxu1 %v2458_v4  ;;  %2740 = vmatpush.bf16.msra.mxu2 %v2478_v47  ;;  %v1976_v57 = vsel %vm1967_vm14, %v6049_v42, %v6093_v43  ;;  %v6129_v5 = vunpack.i.h.bf16 %v9111_v13  ;;  %v6128_v45 = vunpack.i.l.bf16 %v9111_v13  ;;  %v6064_v50 = vunpack.i.h.bf16 %v8876_v35 }
 0x385   :  { %v9191_v23 = vpop.permute.xlu1 %6106  ;;  %v9197_v18 = vpop.permute.xlu0 %6116  ;;  %v6079_v24 = vunpack.i.h.bf16 %v9086_v63  ;;  %v2456_v26 = vpack.c.bf16 %v1977_v33, %v8256_v36  ;;  %v2457_v43 = vpack.c.bf16 %v1976_v57, %v8259_v31  ;;  %v1880_v42 = vsel %vm1871_vm0, %v6113_v11, %v6114_v44 }
 0x386   :  { %5298 = vmatmul.msk.bf16.vlgmr.msra.gmra.mxu3 %vm983_vm9, %v8660_v34  ;;  %5299 = vmatmul.msk.bf16.vlgmr.msra.gmra.mxu0 %vm983_vm9, %v8660_v34  ;;  %v6109_v60 = vunpack.i.h.bf16 %v9191_v23  ;;  %v6108_v0 = vunpack.i.l.bf16 %v9191_v23  ;;  %v6118_v27 = vunpack.i.l.bf16 %v9197_v18  ;;  %v1882_v48 = vsel %vm1871_vm0, %v6073_v20, %v6074_v52 }
 0x387   :  { %2697 = vmatpush.bf16.msrb.mxu3 %v2550_v40  ;;  %2711 = vmatpush.bf16.msrb.mxu0 %v2553_v10  ;;  %v5988_v17 = vunpack.i.l.bf16 %v8762_v46  ;;  %v5993_v25 = vunpack.i.l.bf16 %v8736_v41  ;;  %v1805_v46 = vsel %vm1794_vm1, %v6068_v59, %v6069_v22  ;;  %v1726_v20 = vsel %vm1717_vm12, %v6128_v45, %v6129_v5 }
 0x388   :  { %v1803_v40 = vsel %vm1794_vm1, %v6108_v0, %v6109_v60  ;;  %v1974_v31 = vsel %vm1967_vm14, %v6094_v62, %v6118_v27  ;;  %v1804_v3 = vsel %vm1794_vm1, %v6069_v22, %v6108_v0  ;;  %v2437_v62 = vpack.c.bf16 %v1882_v48, %v1805_v46  ;;  %v9256_v47 = vpop.permute.xlu2 %6156 }
 0x389   :  { %v2439_v36 = vpack.c.bf16 %v1880_v42, %v1803_v40  ;;  %v2459_v19 = vpack.c.bf16 %v1974_v31, %v8309_v6  ;;  %v1881_v53 = vsel %vm1871_vm0, %v6074_v52, %v6113_v11  ;;  %v2204_v6 = vsel %vm2198_vm10, %v6078_v61, %v6079_v24 }
 0x38a   :  { %v2438_v58 = vpack.c.bf16 %v1881_v53, %v1804_v3  ;;  %v1649_v59 = vsel %vm1640_vm11, %v5989_v51, %v5993_v25  ;;  %v1728_v10 = vsel %vm1717_vm12, %v5944_v55, %v6064_v50  ;;  %v1651_v63 = vsel %vm1640_vm11, %v5934_v54, %v5988_v17 }
 0x38b   :  { %2698 = vmatpush.bf16.msrb.mxu3 %v2475_v28  ;;  %2712 = vmatpush.bf16.msrb.mxu0 %v2476_v1  ;;  %v2420_v49 = vpack.c.bf16 %v1726_v20, %v1649_v59  ;;  %v1727_v61 = vsel %vm1717_vm12, %v6064_v50, %v6128_v45  ;;  %v6104_v56 = vunpack.i.h.bf16 %v9136_v37  ;;  %v2498_v55 = vpack.c.bf16 %v2204_v6, %v2204_v6  ;;  %v12924_v6 = vld [vmem:[#allocation12_spill] sm:$0xff] }
 0x38c   :  { %2728 = vmatpush.bf16.msrb.mxu1 %v2439_v36  ;;  %2741 = vmatpush.bf16.msra.mxu2 %v2459_v19  ;;  %v2418_v28 = vpack.c.bf16 %v1728_v10, %v1651_v63  ;;  %v1650_v30 = vsel %vm1640_vm11, %v5988_v17, %v5989_v51  ;;  %v6099_v54 = vunpack.i.h.bf16 %v8960_v32  ;;  %v6119_v22 = vunpack.i.h.bf16 %v9197_v18  ;;  %v12925_v18 = vld [vmem:[#allocation58_spill] sm:$0xff] }
 0x38d   :  { %v6122_v4 = vpop.permute.xlu1 %6121  ;;  %v9258_v9 = vpop.permute.xlu0 %6131  ;;  %v2419_v8 = vpack.c.bf16 %v1727_v61, %v1650_v30  ;;  %v2562_v51 = vsel %vm987_vm6, %v2498_v55, 0  ;;  %v2127_v57 = vsel %vm2121_vm15, %v6103_v7, %v6104_v56  ;;  %v5994_v17 = vunpack.i.h.bf16 %v8736_v41 }
 0x38e   :  { %v6124_v16 = vunpack.i.h.bf16 %v6122_v4  ;;  %v6123_v29 = vunpack.i.l.bf16 %v6122_v4  ;;  %v6133_v50 = vunpack.i.l.bf16 %v9258_v9  ;;  %v6144_v36 = vunpack.i.h.bf16 %v9181_v21 }
 0x38f   :  { %2699 = vmatpush.bf16.msrb.mxu3 %v2456_v26  ;;  %2713 = vmatpush.bf16.msrb.mxu0 %v2457_v43  ;;  %v6143_v43 = vunpack.i.l.bf16 %v9181_v21  ;;  %v6134_v19 = vunpack.i.h.bf16 %v9258_v9  ;;  %v6158_v10 = vunpack.i.l.bf16 %v9256_v47 }
 0x390   :  { %2729 = vmatpush.bf16.msrb.mxu1 %v2420_v49  ;;  %v2203_v11 = vsel %vm2198_vm10, %v6079_v24, %v6123_v29  ;;  %v2202_v52 = vsel %vm2198_vm10, %v6123_v29, %v6124_v16  ;;  %v2050_v24 = vsel %vm2044_vm13, %v6098_v14, %v6099_v54  ;;  %v1973_v14 = vsel %vm1967_vm14, %v6118_v27, %v6119_v22  ;;  %v9306_v3 = vpop.permute.xlu2 %6171 }
 0x391   :  { %v2499_v1 = vpack.c.bf16 %v2203_v11, %v2203_v11  ;;  %v2500_v33 = vpack.c.bf16 %v2202_v52, %v2202_v52  ;;  %v2479_v26 = vpack.c.bf16 %v2127_v57, %v2050_v24  ;;  %v1802_v46 = vsel %vm1794_vm1, %v6109_v60, %v6133_v50 }
 0x392   :  { %v2201_v20 = vsel %vm2198_vm10, %v6124_v16, %v6143_v43  ;;  %v6159_v60 = vunpack.i.h.bf16 %v9256_v47  ;;  %v1801_v13 = vsel %vm1794_vm1, %v6133_v50, %v6134_v19  ;;  %v2126_v11 = vsel %vm2121_vm15, %v6104_v56, %v6158_v10 }
 0x393   :  { %2700 = vmatpush.bf16.msrb.mxu3 %v2437_v62  ;;  %2714 = vmatpush.bf16.msrb.mxu0 %v2438_v58  ;;  %v2565_v45 = vsel %vm987_vm6, %v2499_v1, 0  ;;  %v2568_v0 = vsel %vm987_vm6, %v2500_v33, 0  ;;  %v2460_v62 = vpack.c.bf16 %v1973_v14, %v8385_v39  ;;  %v6018_v58 = vunpack.i.l.bf16 %v12924_v6 }
 0x394   :  { %5304 = vmatmul.msk.bf16.vlgmr.msrb.gmra.mxu1 %vm983_vm9, %v8660_v34  ;;  %v1648_v39 = vsel %vm1640_vm11, %v5993_v25, %v5994_v17  ;;  %v2125_v1 = vsel %vm2121_vm15, %v6158_v10, %v6159_v60  ;;  %v12927_v10 = vld [vmem:[#allocation6_spill] sm:$0xff] }
 0x395   :  { %2781 = vmatpush.bf16.msra.mxu1 %v2568_v0  ;;  %v9290_v7 = vpop.permute.xlu1 %6136  ;;  %v9293_v40 = vpop.permute.xlu0 %6146  ;;  %v1647_v47 = vsel %vm1640_vm11, %v5994_v17, %v6018_v58  ;;  %v6173_v0 = vunpack.i.l.bf16 %v9306_v3  ;;  %v12926_v17 = vld [vmem:[#allocation4_spill] sm:$0xff] }
 0x396   :  { %v6139_v42 = vunpack.i.h.bf16 %v9290_v7  ;;  %v6138_v48 = vunpack.i.l.bf16 %v9290_v7  ;;  %v6148_v31 = vunpack.i.l.bf16 %v9293_v40  ;;  %v6149_v59 = vunpack.i.h.bf16 %v9293_v40  ;;  %v12932_v40 = vld [vmem:[#allocation14_spill] sm:$0xff] }
 0x397   :  { %2701 = vmatpush.bf16.msrb.mxu3 %v2418_v28  ;;  %2715 = vmatpush.bf16.msrb.mxu0 %v2419_v8 }
 0x398   :  { %v1879_v27 = vsel %vm1871_vm0, %v6114_v44, %v6138_v48  ;;  %v1878_v23 = vsel %vm1871_vm0, %v6138_v48, %v6139_v42  ;;  %v1725_v15 = vsel %vm1717_vm12, %v6129_v5, %v6148_v31  ;;  %v2501_v44 = vpack.c.bf16 %v2201_v20, %v2201_v20 }
 0x399   :  { %v2440_v53 = vpack.c.bf16 %v1879_v27, %v1802_v46  ;;  %v2200_v5 = vsel %vm2198_vm10, %v6143_v43, %v6144_v36  ;;  %v2441_v41 = vpack.c.bf16 %v1878_v23, %v1801_v13  ;;  %v2421_v49 = vpack.c.bf16 %v1725_v15, %v1648_v39 }
 0x39a   :  { %5302 = vmatmul.msk.bf16.vlgmr.msrb.gmra.mxu3 %vm983_vm9, %v8660_v34  ;;  %5303 = vmatmul.msk.bf16.vlgmr.msrb.gmra.mxu0 %vm983_vm9, %v8660_v34  ;;  %v1724_v16 = vsel %vm1717_vm12, %v6148_v31, %v6149_v59  ;;  %v2571_v28 = vsel %vm987_vm6, %v2501_v44, 0  ;;  %v2502_v30 = vpack.c.bf16 %v2200_v5, %v2200_v5  ;;  %v2124_v27 = vsel %vm2121_vm15, %v6159_v60, %v6173_v0  ;;  %v12928_v5 = vld [vmem:[#allocation59_spill] sm:$0xff] }
 0x39b   :  { %2753 = vmatpush.bf16.msra.mxu3 %v2562_v51  ;;  %2767 = vmatpush.bf16.msra.mxu0 %v2565_v45  ;;  %v2422_v33 = vpack.c.bf16 %v1724_v16, %v1647_v47  ;;  %v9365_v45 = vpop.permute.xlu2 %6186 }
 0x39c   :  { %2742 = vmatpush.bf16.msra.mxu2 %v2440_v53  ;;  %v2574_v37 = vsel %vm987_vm6, %v2502_v30, 0  ;;  %v6189_v50 = vunpack.i.h.bf16 %v9365_v45  ;;  %v12929_v30 = vld [vmem:[#allocation8_spill] sm:$0xff] }
 0x39d   :  { %v6152_v4 = vpop.permute.xlu1 %6151  ;;  %v6162_v63 = vpop.permute.xlu0 %6161 }
 0x39e   :  { %v6154_v25 = vunpack.i.h.bf16 %v6152_v4  ;;  %v6153_v61 = vunpack.i.l.bf16 %v6152_v4  ;;  %v6164_v29 = vunpack.i.h.bf16 %v6162_v63  ;;  %v6163_v55 = vunpack.i.l.bf16 %v6162_v63 }
 0x39f   :  { %2754 = vmatpush.bf16.msra.mxu3 %v2479_v26 }
 0x3a0   :  { %2743 = vmatpush.bf16.msra.mxu2 %v2421_v49  ;;  %v2049_v8 = vsel %vm2044_vm13, %v6099_v54, %v6153_v61  ;;  %v2048_v52 = vsel %vm2044_vm13, %v6153_v61, %v6154_v25  ;;  %v1972_v32 = vsel %vm1967_vm14, %v6119_v22, %v6163_v55  ;;  %v1971_v56 = vsel %vm1967_vm14, %v6163_v55, %v6164_v29 }
 0x3a1   :  { %v2480_v51 = vpack.c.bf16 %v2126_v11, %v2049_v8  ;;  %v2481_v57 = vpack.c.bf16 %v2125_v1, %v2048_v52  ;;  %v6174_v54 = vunpack.i.h.bf16 %v9306_v3  ;;  %v2461_v26 = vpack.c.bf16 %v1972_v32, %v12925_v18 }
 0x3a2   :  { %v6188_v22 = vunpack.i.l.bf16 %v9365_v45  ;;  %v2462_v31 = vpack.c.bf16 %v1971_v56, %v12926_v17  ;;  %v6023_v8 = vunpack.i.l.bf16 %v12929_v30 }
 0x3a3   :  { %2755 = vmatpush.bf16.msra.mxu3 %v2460_v62  ;;  %5305 = vmatmul.msk.bf16.vlgmr.msra.gmra.mxu2 %vm983_vm9, %v8660_v34 }
 0x3a4   :  { %2795 = vmatpush.bf16.msrb.mxu2 %v2571_v28  ;;  %2768 = vmatpush.bf16.msra.mxu0 %v2480_v51  ;;  %v1970_v23 = vsel %vm1967_vm14, %v6164_v29, %v6188_v22  ;;  %v1969_v15 = vsel %vm1967_vm14, %v6188_v22, %v6189_v50  ;;  %v6019_v28 = vunpack.i.h.bf16 %v12924_v6 }
 0x3a5   :  { %2782 = vmatpush.bf16.msra.mxu1 %v2481_v57  ;;  %v9379_v24 = vpop.permute.xlu1 %6166  ;;  %v6177_v43 = vpop.permute.xlu0 %6176  ;;  %v2463_v13 = vpack.c.bf16 %v1970_v23, %v12927_v10  ;;  %v2464_v4 = vpack.c.bf16 %v1969_v15, %v12928_v5  ;;  %v12933_v5 = vld [vmem:[#allocation39_spill] sm:$0xff] }
 0x3a6   :  { %v6169_v48 = vunpack.i.h.bf16 %v9379_v24  ;;  %v6168_v14 = vunpack.i.l.bf16 %v9379_v24  ;;  %v6178_v39 = vunpack.i.l.bf16 %v6177_v43  ;;  %v6179_v44 = vunpack.i.h.bf16 %v6177_v43 }
 0x3a7   :  { %2756 = vmatpush.bf16.msra.mxu3 %v2441_v41  ;;  %v9408_v41 = vpop.permute.xlu2 %6196  ;;  %v1645_v21 = vsel %vm1640_vm11, %v6019_v28, %v6023_v8 }
 0x3a8   :  { %2769 = vmatpush.bf16.msra.mxu0 %v2461_v26  ;;  %v2047_v46 = vsel %vm2044_vm13, %v6154_v25, %v6168_v14  ;;  %v2046_v20 = vsel %vm2044_vm13, %v6168_v14, %v6169_v48  ;;  %v1800_v61 = vsel %vm1794_vm1, %v6134_v19, %v6178_v39  ;;  %v1799_v29 = vsel %vm1794_vm1, %v6178_v39, %v6179_v44 }
 0x3a9   :  { %2783 = vmatpush.bf16.msra.mxu1 %v2462_v31  ;;  %v2482_v62 = vpack.c.bf16 %v2124_v27, %v2047_v46  ;;  %v6199_v11 = vunpack.i.h.bf16 %v9408_v41  ;;  %v6198_v19 = vunpack.i.l.bf16 %v9408_v41  ;;  %v6024_v27 = vunpack.i.h.bf16 %v12929_v30 }
 0x3ab   :  { %2757 = vmatpush.bf16.msra.mxu3 %v2422_v33  ;;  %2796 = vmatpush.bf16.msrb.mxu2 %v2482_v62  ;;  %v1797_v18 = vsel %vm1794_vm1, %v6198_v19, %v6199_v11  ;;  %v6038_v62 = vunpack.i.l.bf16 %v12932_v40  ;;  %v1644_v10 = vsel %vm1640_vm11, %v6023_v8, %v6024_v27 }
 0x3ad   :  { %v6182_v60 = vpop.permute.xlu1 %6181  ;;  %v2197_v49 = vpop.permute.xlu0 %2196 }
 0x3ae   :  { %5306 = vmatmul.msk.bf16.vlgmr.msra.gmra.mxu3 %vm983_vm9, %v8660_v34  ;;  %v2123_v34 = vsel %vm2121_vm15, %v6173_v0, %v6174_v54  ;;  %v6184_v63 = vunpack.i.h.bf16 %v6182_v60  ;;  %v6183_v25 = vunpack.i.l.bf16 %v6182_v60  ;;  %v2199_v7 = vsel %vm2198_vm10, %v6144_v36, %v2197_v49  ;;  %v6230_v60 = vld [vmem:[%s12297_s4] sm:$0xff]  ;;  %s6260_s4 = smov 26  }
 0x3af   :  { %2809 = vmatpush.bf16.msrb.mxu3 %v2574_v37  ;;  %v2483_v53 = vpack.c.bf16 %v2123_v34, %v2046_v20  ;;  %2797 = vmatpush.bf16.msrb.mxu2 %v2463_v13  ;;  %v1646_v37 = vsel %vm1640_vm11, %v6018_v58, %v6019_v28  ;;  %v1798_v0 = vsel %vm1794_vm1, %v6179_v44, %v6198_v19  ;;  %v2043_v26 = vpop.permute.xlu2 %2042  ;;  %v12937_v19 = vld [vmem:[#allocation56_spill] sm:$0xff] }
 0x3b0   :  { %v1877_v47 = vsel %vm1871_vm0, %v6139_v42, %v6183_v25  ;;  %v1876_v55 = vsel %vm1871_vm0, %v6183_v25, %v6184_v63  ;;  %v12930_v42 = vld [vmem:[#allocation31_spill] sm:$0xff]  ;;  %v2503_v6 = vpack.c.bf16 %v2199_v7, %v2199_v7  ;;  %v1643_v13 = vsel %vm1640_vm11, %v6024_v27, %v6038_v62 }
 0x3b1   :  { %v2442_v16 = vpack.c.bf16 %v1877_v47, %v1800_v61  ;;  %v2443_v9 = vpack.c.bf16 %v1876_v55, %v1799_v29  ;;  %v12931_v52 = vunpack.i.l.bf16 %v12930_v42  ;;  %v12935_v25 = vld [vmem:[#allocation35_spill] sm:$0xff]  ;;  %v12938_v7 = vunpack.i.l.bf16 %v12937_v19 }
 0x3b2   :  { %v12936_v61 = vunpack.i.l.bf16 %v12935_v25 }
 0x3b3   :  { %2810 = vmatpush.bf16.msrb.mxu3 %v2483_v53  ;;  %2770 = vmatpush.bf16.msra.mxu0 %v2442_v16  ;;  %v2217_v1 = vsel %vm2198_vm10, %v2197_v49, %v12931_v52  ;;  %v2045_v16 = vsel %vm2044_vm13, %v6169_v48, %v2043_v26 }
 0x3b4   :  { %2784 = vmatpush.bf16.msra.mxu1 %v2443_v9  ;;  %v2504_v22 = vpack.c.bf16 %v2217_v1, %v2217_v1  ;;  %v12939_v1 = vld [vmem:[#allocation33_spill] sm:$0xff] }
 0x3b5   :  { %v6192_v33 = vpop.permute.xlu1 %6191 }
 0x3b6   :  { %v9434_v51 = vpop.permute.xlu0 %6201  ;;  %v6194_v57 = vunpack.i.h.bf16 %v6192_v33  ;;  %v6193_v32 = vunpack.i.l.bf16 %v6192_v33  ;;  %v2580_v53 = vsel %vm987_vm6, %v2504_v22, 0 }
 0x3b7   :  { %2811 = vmatpush.bf16.msrb.mxu3 %v2464_v4  ;;  %v6204_v36 = vunpack.i.h.bf16 %v9434_v51  ;;  %v6203_v56 = vunpack.i.l.bf16 %v9434_v51  ;;  %v12934_v4 = vunpack.i.l.bf16 %v12933_v5  ;;  %v1791_v8 = vpop.permute.xlu2 %1790 }
 0x3b8   :  { %v1723_v58 = vsel %vm1717_vm12, %v6149_v59, %v6193_v32  ;;  %v1722_v43 = vsel %vm1717_vm12, %v6193_v32, %v6194_v57  ;;  %v2577_v59 = vsel %vm987_vm6, %v2503_v6, 0  ;;  %v12941_v32 = vunpack.i.h.bf16 %v8958_v12 }
 0x3b9   :  { %v2423_v14 = vpack.c.bf16 %v1723_v58, %v1646_v37  ;;  %v2424_v17 = vpack.c.bf16 %v1722_v43, %v1645_v21  ;;  %v1875_v31 = vsel %vm1871_vm0, %v6184_v63, %v6203_v56  ;;  %v1874_v46 = vsel %vm1871_vm0, %v6203_v56, %v6204_v36  ;;  %v12942_v56 = vld [vmem:[#allocation9_spill] sm:$0xff] }
 0x3ba   :  { %v2444_v20 = vpack.c.bf16 %v1875_v31, %v1798_v0  ;;  %v2445_v34 = vpack.c.bf16 %v1874_v46, %v1797_v18  ;;  %v2063_v49 = vsel %vm2044_vm13, %v2043_v26, %v12934_v4  ;;  %v6039_v37 = vunpack.i.h.bf16 %v12932_v40 }
 0x3bb   :  { %2771 = vmatpush.bf16.msra.mxu0 %v2423_v14  ;;  %2785 = vmatpush.bf16.msra.mxu1 %v2424_v17  ;;  %v1796_v21 = vsel %vm1794_vm1, %v6199_v11, %v1791_v8  ;;  %v12943_v0 = vunpack.i.h.bf16 %v12942_v56  ;;  %v12944_v43 = vunpack.i.l.bf16 %v8876_v35  ;;  %vm4425_vm13 = vcmask 7168  }
 0x3bc   :  { %2798 = vmatpush.bf16.msrb.mxu2 %v2444_v20  ;;  %2812 = vmatpush.bf16.msrb.mxu3 %v2445_v34  ;;  %v1641_v11 = vsel %vm1640_vm11, %v6039_v37, %v8904_v2  ;;  %v1642_v46 = vsel %vm1640_vm11, %v6038_v62, %v6039_v37  ;;  %v9554_v62 = vld [vmem:[%s12302_s6] sm:$0xff]  ;;  %s6264_s6 = smov 29  }
 0x3bd   :  { %v6207_v23 = vpop.permute.xlu1 %6206  ;;  %v1795_v12 = vsel %vm1794_vm1, %v1791_v8, %v12943_v0  ;;  %vm5263_vm1 = vcmask 15360  }
 0x3be   :  { %v2120_v15 = vpop.permute.xlu0 %2119  ;;  %v6209_v39 = vunpack.i.h.bf16 %v6207_v23  ;;  %v6208_v44 = vunpack.i.l.bf16 %v6207_v23  ;;  %5307 = vmatmul.msk.bf16.vlgmr.msra.gmra.mxu0 %vm983_vm9, %v6230_v60  ;;  %5308 = vmatmul.msk.bf16.vlgmr.msra.gmra.mxu1 %vm983_vm9, %v6230_v60 }
 0x3bf   :  { %2823 = vmatpush.bf16.msrb.mxu0 %v2577_v59  ;;  %2837 = vmatpush.bf16.msrb.mxu1 %v2580_v53  ;;  %v2122_v63 = vsel %vm2121_vm15, %v6174_v54, %v2120_v15  ;;  %v2140_v47 = vsel %vm2121_vm15, %v2120_v15, %v12936_v61  ;;  %v9523_v26 = vpop.permute.xlu2 %2509  ;;  %v2619_v59 = vpop.f32.mrf.mxu1 }
 0x3c0   :  { %v2484_v29 = vpack.c.bf16 %v2122_v63, %v2045_v16  ;;  %v2485_v55 = vpack.c.bf16 %v2140_v47, %v2063_v49  ;;  %v1721_v28 = vsel %vm1717_vm12, %v6194_v57, %v6208_v44  ;;  %v1720_v3 = vsel %vm1717_vm12, %v6208_v44, %v6209_v39  ;;  %v12940_v57 = vld [vmem:[#allocation32_spill] sm:$0xff] }
 0x3c1   :  { %v2425_v30 = vpack.c.bf16 %v1721_v28, %v1644_v10  ;;  %v2426_v54 = vpack.c.bf16 %v1720_v3, %v1643_v13  ;;  %v9576_v61 = vadd.f32 %v2619_v59, %v9523_v26 }
 0x3c3   :  { %2824 = vmatpush.bf16.msrb.mxu0 %v2484_v29  ;;  %2838 = vmatpush.bf16.msrb.mxu1 %v2485_v55 }
 0x3c4   :  { %2799 = vmatpush.bf16.msrb.mxu2 %v2425_v30  ;;  %2813 = vmatpush.bf16.msrb.mxu3 %v2426_v54  ;;  %v12522_v54 = vmax.f32 %v9576_v61, 0.0 }
 0x3c5   :  { %v1966_v9 = vpop.permute.xlu1 %1965 }
 0x3c6   :  { %v1868_v24 = vpop.permute.xlu0 %1867  ;;  %v1968_v48 = vsel %vm1967_vm14, %v6189_v50, %v1966_v9  ;;  %v1986_v42 = vsel %vm1967_vm14, %v1966_v9, %v12938_v7  ;;  %v2633_v52 = vpop.f32.mrf.mxu2 }
 0x3c7   :  { %5309 = vmatmul.msk.bf16.vlgmr.msrb.gmra.mxu2 %vm983_vm9, %v6230_v60  ;;  %5310 = vmatmul.msk.bf16.vlgmr.msrb.gmra.mxu3 %vm983_vm9, %v6230_v60  ;;  %v2465_v33 = vpack.c.bf16 %v1968_v48, %v12939_v1  ;;  %v1873_v51 = vsel %vm1871_vm0, %v6204_v36, %v1868_v24  ;;  %v2466_v45 = vpack.c.bf16 %v1986_v42, %v12940_v57  ;;  %v2907_v36 = vld [vmem:[%s12299_s7] sm:$0xff]  ;;  %v2621_v15 = vpop.f32.mrf.mxu1  ;;  %s6262_s7 = smov 18  }
 0x3c8   :  { %v1872_v50 = vsel %vm1871_vm0, %v1868_v24, %v12941_v32  ;;  %v2446_v18 = vpack.c.bf16 %v1873_v51, %v1796_v21  ;;  %2911 = vperm.xlu1 %6211, %v2907_v36   ;;  %v9526_v41 = vadd.f32 %v2633_v52, %v9523_v26  ;;  %vm5241_vm0 = vcmask 687104  }
 0x3c9   :  { %2825 = vmatpush.bf16.msrb.mxu0 %v2465_v33  ;;  %2839 = vmatpush.bf16.msrb.mxu1 %v2466_v45  ;;  %v2447_v6 = vpack.c.bf16 %v1872_v50, %v1795_v12 }
 0x3ca   :  { %v12521_v34 = vmax.f32 %v9526_v41, 0.0 }
 0x3cd   :  { %v1714_v22 = vpop.permute.xlu1 %1713  ;;  %2826 = vmatpush.bf16.msrb.mxu0 %v2446_v18  ;;  %2840 = vmatpush.bf16.msrb.mxu1 %v2447_v6 }
 0x3ce   :  { %v9531_v58 = vpop.permute.xlu0 %2514  ;;  %v1718_v14 = vsel %vm1717_vm12, %v1714_v22, %v12944_v43  ;;  %v1719_v17 = vsel %vm1717_vm12, %v6209_v39, %v1714_v22  ;;  %v2635_v31 = vpop.f32.mrf.mxu2 }
 0x3cf   :  { %v9542_v27 = vadd.f32 %v2635_v31, %v9531_v58  ;;  %v2427_v20 = vpack.c.bf16 %v1719_v17, %v1642_v46  ;;  %v2428_v2 = vpack.c.bf16 %v1718_v14, %v1641_v11  ;;  %v9569_v5 = vadd.f32 %v2621_v15, %v9531_v58 }
 0x3d1   :  { %v12516_v35 = vmax.f32 %v9542_v27, 0.0  ;;  %2827 = vmatpush.bf16.msrb.mxu0 %v2427_v20  ;;  %2841 = vmatpush.bf16.msrb.mxu1 %v2428_v2  ;;  %v12518_v28 = vmax.f32 %v9569_v5, 0.0 }
 0x3d3   :  { %v2891_v40 = vpack.c.bf16 %v12516_v35, %v12521_v34  ;;  %v2890_v9 = vpack.c.bf16 %v12518_v28, %v12522_v54 }
 0x3d4   :  { %5311 = vmatmul.msk.bf16.vlgmr.msrb.gmra.mxu0 %vm983_vm9, %v6230_v60  ;;  %5312 = vmatmul.msk.bf16.vlgmr.msrb.gmra.mxu1 %vm983_vm9, %v6230_v60 }
 0x3d5   :  { %2977 = vmatpush.bf16.msra.mxu3 %v2891_v40 }
 0x3d8   :  { %5320 = vmatmul.msk.bf16.vlgmr.msra.gmra.mxu3 %vm2924_vm2, %v9554_v62 }
 0x3e7   :  { %v2675_v63 = vpop.f32.mrf.mxu1 }
 0x3e8   :  { %v9631_v0 = vadd.f32 %v2675_v63, %v9523_v26 }
 0x3ea   :  { %v12512_v14 = vmax.f32 %v9631_v0, 0.0 }
 0x3ef   :  { %v2605_v53 = vpop.f32.mrf.mxu0  ;;  %v2677_v42 = vpop.f32.mrf.mxu1 }
 0x3f0   :  { %v9566_v13 = vadd.f32 %v2605_v53, %v9523_v26  ;;  %v9621_v37 = vadd.f32 %v2677_v42, %v9531_v58 }
 0x3f2   :  { %v2849_v29 = vmax.f32 %v9566_v13, 0.0  ;;  %v12502_v22 = vmax.f32 %v9621_v37, 0.0 }
 0x3f4   :  { %v2894_v17 = vpack.c.bf16 %v12502_v22, %v12512_v14 }
 0x3f5   :  { %v2591_v23 = vpop.f32.mrf.mxu3 }
 0x3f6   :  { %v9563_v10 = vadd.f32 %v2591_v23, %v9523_v26 }
 0x3f7   :  { %v2607_v39 = vpop.f32.mrf.mxu0 }
 0x3f8   :  { %v9560_v44 = vadd.f32 %v2607_v39, %v9531_v58  ;;  %v2848_v47 = vmax.f32 %v9563_v10, 0.0 }
 0x3fa   :  { %v12520_v25 = vmax.f32 %v9560_v44, 0.0 }
 0x3fc   :  { %v2889_v30 = vpack.c.bf16 %v12520_v25, %v2849_v29 }
 0x3fd   :  { %v2593_v60 = vpop.f32.mrf.mxu3 }
 0x3fe   :  { %v9572_v4 = vadd.f32 %v2593_v60, %v9531_v58 }
 0x3ff   :  { %v2689_v49 = vpop.f32.mrf.mxu2 }
 0x400   :  { %v12519_v16 = vmax.f32 %v9572_v4, 0.0  ;;  %v9592_v8 = vadd.f32 %v2689_v49, %v9523_v26 }
 0x402   :  { %v2888_v3 = vpack.c.bf16 %v12519_v16, %v2848_v47  ;;  %v12508_v52 = vmax.f32 %v9592_v8, 0.0 }
 0x403   :  { %v2661_v55 = vpop.f32.mrf.mxu0 }
 0x404   :  { %2935 = vmatpush.bf16.msra.mxu2 %v2888_v3  ;;  %v9604_v7 = vadd.f32 %v2661_v55, %v9523_v26 }
 0x406   :  { %v12515_v45 = vmax.f32 %v9604_v7, 0.0 }
 0x407   :  { %v2691_v24 = vpop.f32.mrf.mxu2  ;;  %5317 = vmatmul.msk.bf16.vlgmr.msra.gmra.mxu2 %vm2924_vm2, %v9554_v62 }
 0x408   :  { %2949 = vmatpush.bf16.msrb.mxu2 %v2889_v30  ;;  %v9599_v19 = vadd.f32 %v2691_v24, %v9531_v58 }
 0x409   :  { %v2647_v48 = vpop.f32.mrf.mxu3 }
 0x40a   :  { %v12500_v1 = vmax.f32 %v9599_v19, 0.0  ;;  %v9618_v50 = vadd.f32 %v2647_v48, %v9523_v26 }
 0x40b   :  { %v2663_v33 = vpop.f32.mrf.mxu0 }
 0x40c   :  { %2963 = vmatpush.bf16.msra.mxu2 %v2890_v9  ;;  %v9609_v51 = vadd.f32 %v2663_v33, %v9531_v58  ;;  %v2895_v57 = vpack.c.bf16 %v12500_v1, %v12508_v52  ;;  %v12517_v12 = vmax.f32 %v9618_v50, 0.0 }
 0x40e   :  { %v12507_v32 = vmax.f32 %v9609_v51, 0.0  ;;  %3033 = vmatpush.bf16.msrb.mxu3 %v2895_v57 }
 0x410   :  { %v2893_v21 = vpack.c.bf16 %v12507_v32, %v12515_v45 }
 0x411   :  { %v2649_v36 = vpop.f32.mrf.mxu3  ;;  %5324 = vmatmul.msk.bf16.vlgmr.msrb.gmra.mxu3 %vm2924_vm2, %v9554_v62  ;;  %v2731_v6 = vpop.f32.mrf.mxu1 }
 0x412   :  { %v9628_v56 = vadd.f32 %v2649_v36, %v9531_v58  ;;  %3005 = vmatpush.bf16.msra.mxu1 %v2893_v21  ;;  %v9672_v49 = vadd.f32 %v2731_v6, %v9523_v26 }
 0x414   :  { %v12511_v18 = vmax.f32 %v9628_v56, 0.0  ;;  %v12498_v9 = vmax.f32 %v9672_v49, 0.0 }
 0x415   :  { %5322 = vmatmul.msk.bf16.vlgmr.msra.gmra.mxu1 %vm2924_vm2, %v9554_v62 }
 0x416   :  { %v2892_v43 = vpack.c.bf16 %v12511_v18, %v12517_v12  ;;  %v9822_v12 = vpop.permute.xlu2 %2916 }
 0x417   :  { %v2717_v11 = vpop.f32.mrf.mxu0  ;;  %5318 = vmatmul.msk.bf16.vlgmr.msrb.gmra.mxu2 %vm2924_vm2, %v9554_v62 }
 0x418   :  { %2991 = vmatpush.bf16.msra.mxu0 %v2892_v43  ;;  %3019 = vmatpush.bf16.msrb.mxu2 %v2894_v17  ;;  %v9654_v46 = vadd.f32 %v2717_v11, %v9523_v26 }
 0x419   :  { %v2733_v2 = vpop.f32.mrf.mxu1 }
 0x41a   :  { %v12499_v59 = vmax.f32 %v9654_v46, 0.0  ;;  %v9665_v15 = vadd.f32 %v2733_v2, %v9531_v58 }
 0x41b   :  { %5321 = vmatmul.msk.bf16.vlgmr.msra.gmra.mxu0 %vm2924_vm2, %v9554_v62 }
 0x41c   :  { %v12490_v3 = vmax.f32 %v9665_v15, 0.0 }
 0x41d   :  { %v2703_v31 = vpop.f32.mrf.mxu3 }
 0x41e   :  { %v9662_v23 = vadd.f32 %v2703_v31, %v9523_v26  ;;  %v2898_v42 = vpack.c.bf16 %v12490_v3, %v12498_v9 }
 0x41f   :  { %v2719_v20 = vpop.f32.mrf.mxu0 }
 0x420   :  { %v9657_v40 = vadd.f32 %v2719_v20, %v9531_v58  ;;  %v12501_v55 = vmax.f32 %v9662_v23, 0.0 }
 0x422   :  { %v12491_v53 = vmax.f32 %v9657_v40, 0.0 }
 0x424   :  { %v2897_v39 = vpack.c.bf16 %v12491_v53, %v12499_v59 }
 0x425   :  { %v2705_v60 = vpop.f32.mrf.mxu3 }
 0x426   :  { %v9675_v63 = vadd.f32 %v2705_v60, %v9531_v58  ;;  %3061 = vmatpush.bf16.msrb.mxu1 %v2897_v39  ;;  %v2745_v48 = vpop.f32.mrf.mxu2  ;;  %v3566_v60 = vld [vmem:[%s12300_s8] sm:$0xff] }
 0x427   :  { %5319 = vmatmul.msk.bf16.vlgmr.msra.gmra.mxu2 %vm2924_vm2, %v9554_v62  ;;  %v9696_v57 = vadd.f32 %v2745_v48, %v9523_v26  ;;  %3570 = vperm.xlu1 %6211, %v3566_v60  }
 0x428   :  { %v12493_v30 = vmax.f32 %v9675_v63, 0.0  ;;  %3075 = vmatpush.bf16.msra.mxu2 %v2898_v42 }
 0x429   :  { %5326 = vmatmul.msk.bf16.vlgmr.msrb.gmra.mxu1 %vm2924_vm2, %v9554_v62  ;;  %v12492_v6 = vmax.f32 %v9696_v57, 0.0 }
 0x42a   :  { %v2896_v24 = vpack.c.bf16 %v12493_v30, %v12501_v55 }
 0x42c   :  { %3047 = vmatpush.bf16.msrb.mxu0 %v2896_v24 }
 0x42e   :  { %v2747_v21 = vpop.f32.mrf.mxu2 }
 0x42f   :  { %5325 = vmatmul.msk.bf16.vlgmr.msrb.gmra.mxu0 %vm2924_vm2, %v9554_v62  ;;  %v9699_v36 = vadd.f32 %v2747_v21, %v9531_v58 }
 0x431   :  { %v2759_v33 = vpop.f32.mrf.mxu3  ;;  %v12488_v43 = vmax.f32 %v9699_v36, 0.0 }
 0x432   :  { %v9703_v11 = vadd.f32 %v2759_v33, %v9523_v26  ;;  %v3617_v33 = vld [vmem:[%s12301_s9 + $0x8] sm:$0xff]  ;;  %s6248_s9 = smov 124  }
 0x433   :  { %v2899_v31 = vpack.c.bf16 %v12488_v43, %v12492_v6  ;;  %3625 = vperm.xlu1 %6211, %v3617_v33  }
 0x434   :  { %v12489_v2 = vmax.f32 %v9703_v11, 0.0 }
 0x435   :  { %3089 = vmatpush.bf16.msra.mxu3 %v2899_v31 }
 0x437   :  { %5323 = vmatmul.msk.bf16.vlgmr.msrb.gmra.mxu2 %vm2924_vm2, %v9554_v62 }
 0x438   :  { %5328 = vmatmul.msk.bf16.vlgmr.msra.gmra.mxu3 %vm2924_vm2, %v9554_v62 }
 0x439   :  { %v2761_v17 = vpop.f32.mrf.mxu3 }
 0x43a   :  { %v9711_v20 = vadd.f32 %v2761_v17, %v9531_v58  ;;  %v9817_v18 = vpop.permute.xlu1 %2911 }
 0x43b   :  { %v2773_v48 = vpop.f32.mrf.mxu0  ;;  %v2787_v42 = vpop.f32.mrf.mxu1 }
 0x43c   :  { %v12487_v39 = vmax.f32 %v9711_v20, 0.0  ;;  %v9732_v21 = vadd.f32 %v2773_v48, %v9523_v26  ;;  %v9735_v17 = vadd.f32 %v2787_v42, %v9523_v26 }
 0x43e   :  { %v2900_v24 = vpack.c.bf16 %v12487_v39, %v12489_v2  ;;  %v12495_v43 = vmax.f32 %v9732_v21, 0.0  ;;  %v12497_v2 = vmax.f32 %v9735_v17, 0.0 }
 0x440   :  { %3103 = vmatpush.bf16.msra.mxu0 %v2900_v24 }
 0x443   :  { %5329 = vmatmul.msk.bf16.vlgmr.msra.gmra.mxu0 %vm2924_vm2, %v9554_v62  ;;  %v2775_v31 = vpop.f32.mrf.mxu0  ;;  %v2789_v60 = vpop.f32.mrf.mxu1 }
 0x444   :  { %v9738_v24 = vadd.f32 %v2775_v31, %v9531_v58  ;;  %v9741_v39 = vadd.f32 %v2789_v60, %v9531_v58 }
 0x446   :  { %v12494_v33 = vmax.f32 %v9738_v24, 0.0  ;;  %v12496_v48 = vmax.f32 %v9741_v39, 0.0 }
 0x447   :  { %5327 = vmatmul.msk.bf16.vlgmr.msra.gmra.mxu2 %vm2924_vm2, %v9554_v62 }
 0x448   :  { %v2901_v42 = vpack.c.bf16 %v12494_v33, %v12495_v43  ;;  %v2902_v31 = vpack.c.bf16 %v12496_v48, %v12497_v2 }
 0x44a   :  { %v2801_v60 = vpop.f32.mrf.mxu2  ;;  %v2815_v3 = vpop.f32.mrf.mxu3  ;;  %3117 = vmatpush.bf16.msra.mxu1 %v2901_v42  ;;  %3131 = vmatpush.bf16.msrb.mxu2 %v2902_v31 }
 0x44b   :  { %v9760_v53 = vadd.f32 %v2801_v60, %v9523_v26  ;;  %v9763_v6 = vadd.f32 %v2815_v3, %v9523_v26 }
 0x44d   :  { %5330 = vmatmul.msk.bf16.vlgmr.msra.gmra.mxu1 %vm2924_vm2, %v9554_v62  ;;  %v12504_v31 = vmax.f32 %v9760_v53, 0.0  ;;  %v12506_v9 = vmax.f32 %v9763_v6, 0.0 }
 0x451   :  { %v2829_v2 = vpop.f32.mrf.mxu0  ;;  %v2843_v42 = vpop.f32.mrf.mxu1 }
 0x452   :  { %v2803_v30 = vpop.f32.mrf.mxu2  ;;  %v2817_v33 = vpop.f32.mrf.mxu3  ;;  %v9789_v1 = vadd.f32 %v2843_v42, %v9523_v26 }
 0x453   :  { %v9766_v43 = vadd.f32 %v2803_v30, %v9531_v58  ;;  %v9769_v48 = vadd.f32 %v2817_v33, %v9531_v58  ;;  %v9786_v33 = vadd.f32 %v2829_v2, %v9523_v26 }
 0x454   :  { %12946 = vst [vmem:[#allocation36_spill] sm:$0xff] %v9789_v1 }
 0x455   :  { %12945 = vst [vmem:[#allocation40_spill] sm:$0xff] %v9769_v48  ;;  %v12503_v60 = vmax.f32 %v9766_v43, 0.0  ;;  %v12505_v59 = vmax.f32 %v9769_v48, 0.0  ;;  %v12510_v2 = vmax.f32 %v9786_v33, 0.0 }
 0x457   :  { %v2903_v3 = vpack.c.bf16 %v12503_v60, %v12504_v31  ;;  %v2904_v30 = vpack.c.bf16 %v12505_v59, %v12506_v9  ;;  %5331 = vmatmul.msk.bf16.vlgmr.msrb.gmra.mxu2 %vm2924_vm2, %v9554_v62 }
 0x459   :  { %3145 = vmatpush.bf16.msrb.mxu3 %v2903_v3  ;;  %3159 = vmatpush.bf16.msrb.mxu0 %v2904_v30  ;;  %v2831_v55 = vpop.f32.mrf.mxu0  ;;  %v2845_v22 = vpop.f32.mrf.mxu1  ;;  %v12514_v3 = vmax.f32 %v9789_v1, 0.0 }
 0x45a   :  { %v9792_v60 = vadd.f32 %v2831_v55, %v9531_v58  ;;  %v9795_v31 = vadd.f32 %v2845_v22, %v9531_v58 }
 0x45b   :  { %v2979_v52 = vpop.f32.mrf.mxu3 }
 0x45c   :  { %12947 = vst [vmem:[#allocation41_spill] sm:$0xff] %v9792_v60  ;;  %5332 = vmatmul.msk.bf16.vlgmr.msrb.gmra.mxu3 %vm2924_vm2, %v9554_v62  ;;  %5333 = vmatmul.msk.bf16.vlgmr.msrb.gmra.mxu0 %vm2924_vm2, %v9554_v62  ;;  %v12509_v26 = vmax.f32 %v9792_v60, 0.0  ;;  %v12513_v42 = vmax.f32 %v9795_v31, 0.0  ;;  %v2980_v16 = vadd.f32 %v2979_v52, %v9817_v18 }
 0x45d   :  { %12948 = vst [vmem:[#allocation37_spill] sm:$0xff] %v9795_v31  ;;  %v12954_v31 = vld [vmem:[#allocation47_spill] sm:$0xff] }
 0x45e   :  { %v2905_v58 = vpack.c.bf16 %v12509_v26, %v12510_v2  ;;  %v2906_v22 = vpack.c.bf16 %v12513_v42, %v12514_v3  ;;  %v3197_v13 = vmax.f32 %v2980_v16, 0.0  ;;  %v12956_v16 = vmax.f32 %v9526_v41, 0.0 }
 0x460   :  { %3173 = vmatpush.bf16.msrb.mxu1 %v2905_v58  ;;  %3187 = vmatpush.bf16.msra.mxu2 %v2906_v22  ;;  %v9851_v60 = vadd.f32 %v3197_v13, %v12956_v16 }
 0x463   :  { %5334 = vmatmul.msk.bf16.vlgmr.msrb.gmra.mxu1 %vm2924_vm2, %v9554_v62  ;;  %v2981_v3 = vpop.f32.mrf.mxu3 }
 0x467   :  { %5335 = vmatmul.msk.bf16.vlgmr.msra.gmra.mxu2 %vm2924_vm2, %v9554_v62  ;;  %vm5265_vm2 = vcmask 9216  }
 0x48a   :  { %v2937_v55 = vpop.f32.mrf.mxu2 }
 0x48b   :  { %v2938_v22 = vadd.f32 %v2937_v55, %v9817_v18 }
 0x48d   :  { %v3194_v62 = vmax.f32 %v2938_v22, 0.0 }
 0x492   :  { %v2939_v30 = vpop.f32.mrf.mxu2  ;;  %v3007_v26 = vpop.f32.mrf.mxu1 }
 0x493   :  { %v2940_v55 = vadd.f32 %v2939_v30, %v9822_v12 }
 0x498   :  { %v2993_v9 = vpop.f32.mrf.mxu0 }
 0x499   :  { %v2994_v22 = vadd.f32 %v2993_v9, %v9817_v18 }
 0x49a   :  { %v2951_v59 = vpop.f32.mrf.mxu2  ;;  %v3009_v25 = vpop.f32.mrf.mxu1 }
 0x49b   :  { %v2952_v58 = vadd.f32 %v2951_v59, %v9817_v18 }
 0x49d   :  { %v3195_v45 = vmax.f32 %v2952_v58, 0.0 }
 0x49f   :  { %v9827_v34 = vadd.f32 %v3195_v45, %v2849_v29  ;;  %v3035_v29 = vpop.f32.mrf.mxu3  ;;  %v12953_v45 = vld [vmem:[#allocation53_spill] sm:$0xff] }
 0x4a0   :  { %v2995_v2 = vpop.f32.mrf.mxu0 }
 0x4a1   :  { %12949 = vst [vmem:[#allocation16_spill] sm:$0xff] %v9827_v34 }
 0x4a2   :  { %v2953_v32 = vpop.f32.mrf.mxu2 }
 0x4a3   :  { %v2954_v59 = vadd.f32 %v2953_v32, %v9822_v12  ;;  %v3271_v32 = vmul.f32 %v9827_v34, %v12953_v45 }
 0x4a5   :  { %v3214_v38 = vmax.f32 %v2954_v59, 0.0  ;;  %v12957_v59 = vmax.f32 %v9560_v44, 0.0 }
 0x4a7   :  { %v9855_v1 = vadd.f32 %v3214_v38, %v12957_v59  ;;  %v12963_v38 = vld [vmem:[#allocation66_spill] sm:$0xff] }
 0x4a9   :  { %12958 = vst [vmem:[#allocation13_spill] sm:$0xff] %v9855_v1 }
 0x4aa   :  { %v2965_v14 = vpop.f32.mrf.mxu2 }
 0x4ab   :  { %v2966_v42 = vadd.f32 %v2965_v14, %v9817_v18  ;;  %v9832_v14 = vadd.f32 %v3194_v62, %v2848_v47  ;;  %v3213_v47 = vmax.f32 %v2940_v55, 0.0  ;;  %v12955_v62 = vld [vmem:[#allocation60_spill] sm:$0xff] }
 0x4ac   :  { %v3049_v54 = vpop.f32.mrf.mxu0 }
 0x4ad   :  { %v3196_v35 = vmax.f32 %v2966_v42, 0.0  ;;  %12950 = vst [vmem:[#allocation15_spill] sm:$0xff] %v9832_v14  ;;  %v12951_v42 = vmax.f32 %v9576_v61, 0.0  ;;  %v3270_v10 = vmul.f32 %v9832_v14, %v12954_v31 }
 0x4af   :  { %v9837_v58 = vadd.f32 %v3196_v35, %v12951_v42  ;;  %v2982_v35 = vadd.f32 %v2981_v3, %v9822_v12  ;;  %v3198_v42 = vmax.f32 %v2994_v22, 0.0  ;;  %v3308_v34 = vadd.f32 %v3271_v32, %v3270_v10  ;;  %v3063_v3 = vpop.f32.mrf.mxu1 }
 0x4b0   :  { %v12960_v22 = vmax.f32 %v9569_v5, 0.0  ;;  %v12962_v32 = vmax.f32 %v9618_v50, 0.0  ;;  %v3273_v10 = vmul.f32 %v9851_v60, %v12963_v38 }
 0x4b1   :  { %12952 = vst [vmem:[#allocation17_spill] sm:$0xff] %v9837_v58  ;;  %v3272_v30 = vmul.f32 %v9837_v58, %v12955_v62  ;;  %v12959_v58 = vmax.f32 %v9572_v4, 0.0  ;;  %v3216_v41 = vmax.f32 %v2982_v35, 0.0  ;;  %v2996_v4 = vadd.f32 %v2995_v2, %v9822_v12 }
 0x4b2   :  { %v2967_v28 = vpop.f32.mrf.mxu2  ;;  %v9868_v44 = vadd.f32 %v3198_v42, %v12962_v32  ;;  %v12964_v35 = vmax.f32 %v9542_v27, 0.0  ;;  %v12966_v2 = vmax.f32 %v9604_v7, 0.0 }
 0x4b3   :  { %v2968_v52 = vadd.f32 %v2967_v28, %v9822_v12  ;;  %v3008_v28 = vadd.f32 %v3007_v26, %v9817_v18  ;;  %v3309_v14 = vadd.f32 %v3308_v34, %v3272_v30  ;;  %v3037_v30 = vpop.f32.mrf.mxu3 }
 0x4b4   :  { %v3051_v26 = vpop.f32.mrf.mxu0 }
 0x4b5   :  { %v3215_v61 = vmax.f32 %v2968_v52, 0.0  ;;  %v9860_v52 = vadd.f32 %v3213_v47, %v12959_v58  ;;  %v3199_v13 = vmax.f32 %v3008_v28, 0.0  ;;  %v3290_v58 = vmul.f32 %v9855_v1, %v12953_v45 }
 0x4b6   :  { %v3036_v47 = vadd.f32 %v3035_v29, %v9817_v18  ;;  %v9882_v28 = vadd.f32 %v3216_v41, %v12964_v35  ;;  %v3010_v29 = vadd.f32 %v3009_v25, %v9822_v12 }
 0x4b7   :  { %v9864_v48 = vadd.f32 %v3215_v61, %v12960_v22  ;;  %v3289_v5 = vmul.f32 %v9860_v52, %v12954_v31  ;;  %v3310_v61 = vadd.f32 %v3309_v14, %v3273_v10  ;;  %v9886_v42 = vadd.f32 %v3199_v13, %v12966_v2 }
 0x4b8   :  { %12965 = vst [vmem:[#allocation63_spill] sm:$0xff] %v9882_v28  ;;  %v12968_v14 = vmax.f32 %v9631_v0, 0.0  ;;  %v3201_v41 = vmax.f32 %v3036_v47, 0.0  ;;  %v3050_v10 = vadd.f32 %v3049_v54, %v9817_v18  ;;  %v3292_v35 = vmul.f32 %v9882_v28, %v12963_v38  ;;  %v3065_v0 = vpop.f32.mrf.mxu1 }
 0x4b9   :  { %12961 = vst [vmem:[#allocation64_spill] sm:$0xff] %v9864_v48  ;;  %v3291_v50 = vmul.f32 %v9864_v48, %v12955_v62  ;;  %v3328_v22 = vadd.f32 %v3290_v58, %v3289_v5  ;;  %v3218_v2 = vmax.f32 %v3010_v29, 0.0  ;;  %v12969_v48 = vld [vmem:[#allocation48_spill] sm:$0xff]  ;;  %v12971_v5 = vld [vmem:[#allocation10_spill] sm:$0xff]  ;;  %v12972_v54 = vmax.f32 %v9592_v8, 0.0 }
 0x4ba   :  { %v3021_v9 = vpop.f32.mrf.mxu2  ;;  %v3275_v25 = vmul.f32 %v9886_v42, %v12969_v48  ;;  %v3202_v29 = vmax.f32 %v3050_v10, 0.0  ;;  %v12974_v8 = vmax.f32 %v9621_v37, 0.0 }
 0x4bb   :  { %v3022_v55 = vadd.f32 %v3021_v9, %v9817_v18  ;;  %v12967_v9 = vld [vmem:[#allocation61_spill] sm:$0xff]  ;;  %v3329_v7 = vadd.f32 %v3328_v22, %v3291_v50  ;;  %v3038_v50 = vadd.f32 %v3037_v30, %v9822_v12 }
 0x4bc   :  { %v3274_v16 = vmul.f32 %v9868_v44, %v12967_v9 }
 0x4bd   :  { %v3200_v34 = vmax.f32 %v3022_v55, 0.0  ;;  %v3217_v55 = vmax.f32 %v2996_v4, 0.0  ;;  %v12970_v4 = vmax.f32 %v9628_v56, 0.0  ;;  %v3330_v22 = vadd.f32 %v3329_v7, %v3292_v35  ;;  %v3091_v56 = vpop.f32.mrf.mxu3 }
 0x4be   :  { %v3311_v13 = vadd.f32 %v3310_v61, %v3274_v16  ;;  %v9909_v61 = vadd.f32 %v3201_v41, %v12972_v54  ;;  %v3064_v16 = vadd.f32 %v3063_v3, %v9817_v18  ;;  %v12975_v3 = vld [vmem:[#allocation67_spill] sm:$0xff]  ;;  %v3220_v7 = vmax.f32 %v3038_v50, 0.0 }
 0x4bf   :  { %v9893_v32 = vadd.f32 %v3200_v34, %v12968_v14  ;;  %v9903_v58 = vadd.f32 %v3217_v55, %v12970_v4  ;;  %v12973_v55 = vmax.f32 %v9609_v51, 0.0  ;;  %v12976_v51 = vmax.f32 %v9662_v23, 0.0 }
 0x4c0   :  { %v3105_v34 = vpop.f32.mrf.mxu0  ;;  %v3312_v14 = vadd.f32 %v3311_v13, %v3275_v25  ;;  %v3277_v10 = vmul.f32 %v9909_v61, %v12975_v3  ;;  %v3203_v13 = vmax.f32 %v3064_v16, 0.0  ;;  %v12977_v50 = vmax.f32 %v9599_v19, 0.0 }
 0x4c1   :  { %v3276_v47 = vmul.f32 %v9893_v32, %v12971_v5  ;;  %v9915_v4 = vadd.f32 %v3218_v2, %v12973_v55  ;;  %v9928_v35 = vadd.f32 %v3202_v29, %v12976_v51  ;;  %v3052_v2 = vadd.f32 %v3051_v26, %v9822_v12 }
 0x4c2   :  { %v3023_v59 = vpop.f32.mrf.mxu2  ;;  %v9938_v16 = vadd.f32 %v3220_v7, %v12977_v50  ;;  %v12979_v23 = vmax.f32 %v9654_v46, 0.0  ;;  %v3066_v26 = vadd.f32 %v3065_v0, %v9822_v12  ;;  %v3106_v19 = vadd.f32 %v3105_v34, %v9817_v18 }
 0x4c3   :  { %v3024_v27 = vadd.f32 %v3023_v59, %v9822_v12  ;;  %v3313_v1 = vadd.f32 %v3312_v14, %v3276_v47  ;;  %v3294_v37 = vmul.f32 %v9915_v4, %v12969_v48 }
 0x4c4   :  { %12978 = vst [vmem:[#allocation49_spill] sm:$0xff] %v9938_v16  ;;  %v9942_v29 = vadd.f32 %v3203_v13, %v12979_v23  ;;  %v3296_v0 = vmul.f32 %v9938_v16, %v12975_v3  ;;  %v3222_v23 = vmax.f32 %v3066_v26, 0.0  ;;  %v12986_v16 = vmax.f32 %v9657_v40, 0.0 }
 0x4c5   :  { %v3219_v59 = vmax.f32 %v3024_v27, 0.0  ;;  %v3293_v27 = vmul.f32 %v9903_v58, %v12967_v9  ;;  %v3314_v47 = vadd.f32 %v3313_v1, %v3277_v10  ;;  %v3221_v1 = vmax.f32 %v3052_v2, 0.0  ;;  %v3093_v46 = vpop.f32.mrf.mxu3  ;;  %v12982_v2 = vld [vmem:[#allocation27_spill] sm:$0xff] }
 0x4c7   :  { %v9921_v41 = vadd.f32 %v3219_v59, %v12974_v8  ;;  %v3331_v25 = vadd.f32 %v3330_v22, %v3293_v27  ;;  %v3092_v59 = vadd.f32 %v3091_v56, %v9817_v18  ;;  %v12980_v22 = vld [vmem:[#allocation26_spill] sm:$0xff]  ;;  %v12981_v8 = vmax.f32 %v9672_v49, 0.0 }
 0x4c8   :  { %v3278_v55 = vmul.f32 %v9928_v35, %v12980_v22  ;;  %v3107_v27 = vpop.f32.mrf.mxu0  ;;  %v12983_v49 = vmax.f32 %v9675_v63, 0.0  ;;  %v9971_v63 = vadd.f32 %v3222_v23, %v12986_v16  ;;  %v12991_v16 = vld [vmem:[#allocation11_spill] sm:$0xff] }
 0x4c9   :  { %v3332_v56 = vadd.f32 %v3331_v25, %v3294_v37  ;;  %v3205_v7 = vmax.f32 %v3092_v59, 0.0  ;;  %v3279_v25 = vmul.f32 %v9942_v29, %v12982_v2  ;;  %v12984_v37 = vld [vmem:[#allocation28_spill] sm:$0xff] }
 0x4ca   :  { %v3077_v28 = vpop.f32.mrf.mxu2  ;;  %v3119_v14 = vpop.f32.mrf.mxu1  ;;  %v3315_v13 = vadd.f32 %v3314_v47, %v3278_v55  ;;  %v3094_v47 = vadd.f32 %v3093_v46, %v9822_v12  ;;  %v12985_v55 = vmax.f32 %v9696_v57, 0.0  ;;  %12987 = vst [vmem:[#allocation42_spill] sm:$0xff] %v9971_v63  ;;  %v12988_v46 = vmax.f32 %v9665_v15, 0.0 }
 0x4cb   :  { %v3078_v30 = vadd.f32 %v3077_v28, %v9817_v18  ;;  %v3295_v28 = vmul.f32 %v9921_v41, %v12971_v5  ;;  %v3298_v15 = vmul.f32 %v9971_v63, %v12982_v2 }
 0x4cc   :  { %v3316_v26 = vadd.f32 %v3315_v13, %v3279_v25 }
 0x4cd   :  { %v3204_v54 = vmax.f32 %v3078_v30, 0.0  ;;  %v3333_v51 = vadd.f32 %v3332_v56, %v3295_v28  ;;  %v3206_v28 = vmax.f32 %v3106_v19, 0.0  ;;  %v9966_v56 = vadd.f32 %v3205_v7, %v12985_v55 }
 0x4cf   :  { %v9949_v30 = vadd.f32 %v3204_v54, %v12981_v8  ;;  %v9959_v54 = vadd.f32 %v3221_v1, %v12983_v49  ;;  %v3334_v8 = vadd.f32 %v3333_v51, %v3296_v0  ;;  %v12990_v51 = vmax.f32 %v9703_v11, 0.0 }
 0x4d0   :  { %v3281_v0 = vmul.f32 %v9966_v56, %v12991_v16 }
 0x4d1   :  { %v3280_v34 = vmul.f32 %v9949_v30, %v12984_v37  ;;  %v3297_v1 = vmul.f32 %v9959_v54, %v12980_v22  ;;  %v9982_v13 = vadd.f32 %v3206_v28, %v12990_v51  ;;  %v12992_v28 = vld [vmem:[#allocation5_spill] sm:$0xff]  ;;  %v12995_v51 = vmax.f32 %v9732_v21, 0.0 }
 0x4d2   :  { %v3079_v10 = vpop.f32.mrf.mxu2  ;;  %v3121_v57 = vpop.f32.mrf.mxu1 }
 0x4d3   :  { %v3080_v50 = vadd.f32 %v3079_v10, %v9822_v12  ;;  %v3120_v10 = vadd.f32 %v3119_v14, %v9817_v18  ;;  %v3317_v19 = vadd.f32 %v3316_v26, %v3280_v34  ;;  %v3224_v14 = vmax.f32 %v3094_v47, 0.0 }
 0x4d4   :  { %v3335_v25 = vadd.f32 %v3334_v8, %v3297_v1  ;;  %v3282_v47 = vmul.f32 %v9982_v13, %v12992_v28  ;;  %v12993_v26 = vmax.f32 %v9699_v36, 0.0  ;;  %v3122_v8 = vadd.f32 %v3121_v57, %v9822_v12 }
 0x4d5   :  { %v3223_v59 = vmax.f32 %v3080_v50, 0.0  ;;  %v3108_v50 = vadd.f32 %v3107_v27, %v9822_v12  ;;  %v3207_v23 = vmax.f32 %v3120_v10, 0.0  ;;  %v12997_v36 = vmax.f32 %v9711_v20, 0.0 }
 0x4d7   :  { %v9978_v49 = vadd.f32 %v3223_v59, %v12988_v46  ;;  %v3225_v34 = vmax.f32 %v3108_v50, 0.0  ;;  %v3318_v59 = vadd.f32 %v3317_v19, %v3281_v0  ;;  %v9995_v46 = vadd.f32 %v3224_v14, %v12993_v26 }
 0x4d8   :  { %v10001_v50 = vadd.f32 %v3207_v23, %v12995_v51  ;;  %v3336_v19 = vadd.f32 %v3335_v25, %v3298_v15  ;;  %v3226_v23 = vmax.f32 %v3122_v8, 0.0  ;;  %v12998_v15 = vld [vmem:[#allocation62_spill] sm:$0xff] }
 0x4d9   :  { %12989 = vst [vmem:[#allocation38_spill] sm:$0xff] %v9978_v49  ;;  %v3161_v7 = vpop.f32.mrf.mxu0  ;;  %v3299_v55 = vmul.f32 %v9978_v49, %v12984_v37  ;;  %v10010_v14 = vadd.f32 %v3225_v34, %v12997_v36  ;;  %v3319_v26 = vadd.f32 %v3318_v59, %v3282_v47  ;;  %v3300_v21 = vmul.f32 %v9995_v46, %v12991_v16  ;;  %v13001_v8 = vld [vmem:[#allocation54_spill] sm:$0xff] }
 0x4da   :  { %v3133_v40 = vpop.f32.mrf.mxu2  ;;  %12994 = vst [vmem:[#allocation51_spill] sm:$0xff] %v9995_v46  ;;  %v3162_v10 = vadd.f32 %v3161_v7, %v9817_v18  ;;  %v13000_v34 = vmax.f32 %v9760_v53, 0.0  ;;  %v13002_v36 = vmax.f32 %v9738_v24, 0.0  ;;  %v13004_v46 = vmax.f32 %v9763_v6, 0.0 }
 0x4db   :  { %v3134_v27 = vadd.f32 %v3133_v40, %v9817_v18  ;;  %v12996_v40 = vmax.f32 %v9735_v17, 0.0  ;;  %v3337_v57 = vadd.f32 %v3336_v19, %v3299_v55 }
 0x4dc   :  { %v3210_v51 = vmax.f32 %v3162_v10, 0.0 }
 0x4dd   :  { %v3208_v11 = vmax.f32 %v3134_v27, 0.0 }
 0x4de   :  { %v10032_v63 = vadd.f32 %v3210_v51, %v13004_v46  ;;  %v13007_v51 = vld [vmem:[#allocation55_spill] sm:$0xff] }
 0x4df   :  { %v3147_v1 = vpop.f32.mrf.mxu3  ;;  %v10005_v0 = vadd.f32 %v3208_v11, %v12996_v40  ;;  %v3283_v11 = vmul.f32 %v10001_v50, %v12998_v15  ;;  %v3338_v40 = vadd.f32 %v3337_v57, %v3300_v21  ;;  %v13005_v21 = vmax.f32 %v9741_v39, 0.0 }
 0x4e0   :  { %v3148_v27 = vadd.f32 %v3147_v1, %v9817_v18  ;;  %v3175_v7 = vpop.f32.mrf.mxu1  ;;  %v12999_v1 = vld [vmem:[#allocation57_spill] sm:$0xff] }
 0x4e1   :  { %v3176_v25 = vadd.f32 %v3175_v7, %v9817_v18  ;;  %v3284_v20 = vmul.f32 %v10005_v0, %v12999_v1  ;;  %v3163_v55 = vpop.f32.mrf.mxu0  ;;  %v3320_v19 = vadd.f32 %v3319_v26, %v3283_v11  ;;  %v10028_v7 = vadd.f32 %v3226_v23, %v13002_v36 }
 0x4e2   :  { %v3209_v49 = vmax.f32 %v3148_v27, 0.0  ;;  %v3135_v17 = vpop.f32.mrf.mxu2  ;;  %v3164_v53 = vadd.f32 %v3163_v55, %v9822_v12  ;;  %v3301_v26 = vmul.f32 %v10010_v14, %v12992_v28  ;;  %v13008_v36 = vmax.f32 %v9786_v33, 0.0 }
 0x4e3   :  { %v3136_v47 = vadd.f32 %v3135_v17, %v9822_v12  ;;  %13003 = vst [vmem:[#allocation19_spill] sm:$0xff] %v10028_v7  ;;  %v3321_v57 = vadd.f32 %v3320_v19, %v3284_v20  ;;  %v3302_v46 = vmul.f32 %v10028_v7, %v12998_v15 }
 0x4e4   :  { %v10021_v59 = vadd.f32 %v3209_v49, %v13000_v34  ;;  %v3211_v49 = vmax.f32 %v3176_v25, 0.0  ;;  %v3339_v23 = vadd.f32 %v3338_v40, %v3301_v26  ;;  %v3286_v25 = vmul.f32 %v10032_v63, %v13007_v51 }
 0x4e5   :  { %v3227_v27 = vmax.f32 %v3136_v47, 0.0  ;;  %v3229_v55 = vmax.f32 %v3164_v53, 0.0  ;;  %v13009_v40 = vmax.f32 %v9766_v43, 0.0 }
 0x4e6   :  { %v3285_v10 = vmul.f32 %v10021_v59, %v13001_v8  ;;  %v10048_v20 = vadd.f32 %v3211_v49, %v13008_v36  ;;  %v3340_v26 = vadd.f32 %v3339_v23, %v3302_v46  ;;  %v13010_v49 = vld [vmem:[#allocation40_spill] sm:$0xff]  ;;  %v13012_v36 = vld [vmem:[#allocation34_spill] sm:$0xff] }
 0x4e7   :  { %v3149_v34 = vpop.f32.mrf.mxu3  ;;  %v10039_v17 = vadd.f32 %v3227_v27, %v13005_v21  ;;  %v13011_v21 = vmax.f32 %v13010_v49, 0.0  ;;  %v13015_v23 = vld [vmem:[#allocation52_spill] sm:$0xff] }
 0x4e8   :  { %v3150_v24 = vadd.f32 %v3149_v34, %v9822_v12  ;;  %v3322_v11 = vadd.f32 %v3321_v57, %v3285_v10  ;;  %v3177_v6 = vpop.f32.mrf.mxu1 }
 0x4e9   :  { %13006 = vst [vmem:[#allocation18_spill] sm:$0xff] %v10039_v17  ;;  %v3303_v19 = vmul.f32 %v10039_v17, %v12999_v1  ;;  %v3178_v27 = vadd.f32 %v3177_v6, %v9822_v12  ;;  %v3287_v17 = vmul.f32 %v10048_v20, %v13012_v36 }
 0x4ea   :  { %v3228_v47 = vmax.f32 %v3150_v24, 0.0  ;;  %v3189_v39 = vpop.f32.mrf.mxu2  ;;  %v3323_v33 = vadd.f32 %v3322_v11, %v3286_v25  ;;  %v10062_v24 = vadd.f32 %v3229_v55, %v13011_v21  ;;  %v13016_v25 = vld [vmem:[#allocation41_spill] sm:$0xff] }
 0x4eb   :  { %v3190_v34 = vadd.f32 %v3189_v39, %v9817_v18  ;;  %v3341_v43 = vadd.f32 %v3340_v26, %v3303_v19  ;;  %v13017_v55 = vmax.f32 %v13016_v25, 0.0 }
 0x4ec   :  { %v10054_v10 = vadd.f32 %v3228_v47, %v13009_v40  ;;  %v3230_v47 = vmax.f32 %v3178_v27, 0.0  ;;  %v13013_v40 = vld [vmem:[#allocation36_spill] sm:$0xff]  ;;  %v3324_v39 = vadd.f32 %v3323_v33, %v3287_v17  ;;  %v3305_v11 = vmul.f32 %v10062_v24, %v13007_v51 }
 0x4ed   :  { %v3212_v57 = vmax.f32 %v3190_v34, 0.0  ;;  %v13014_v7 = vmax.f32 %v13013_v40, 0.0 }
 0x4ee   :  { %v3304_v53 = vmul.f32 %v10054_v10, %v13001_v8  ;;  %v10076_v49 = vadd.f32 %v3230_v47, %v13017_v55  ;;  %v10087_v47 = vpop.permute.xlu1 %3570  ;;  %v10101_v55 = vpop.permute.xlu2 %3575 }
 0x4ef   :  { %v10068_v6 = vadd.f32 %v3212_v57, %v13014_v7  ;;  %v13018_v57 = vld [vmem:[#allocation37_spill] sm:$0xff]  ;;  %13023 = vst [vmem:[#allocation43_spill] sm:$0xff] %v10101_v55 }
 0x4f0   :  { %v3342_v18 = vadd.f32 %v3341_v43, %v3304_v53  ;;  %v3306_v53 = vmul.f32 %v10076_v49, %v13012_v36  ;;  %v13019_v21 = vmax.f32 %v13018_v57, 0.0 }
 0x4f1   :  { %v3288_v46 = vmul.f32 %v10068_v6, %v13015_v23 }
 0x4f2   :  { %v3191_v34 = vpop.f32.mrf.mxu2  ;;  %v3343_v7 = vadd.f32 %v3342_v18, %v3305_v11  ;;  %v13021_v18 = vld [vmem:[#allocation15_spill] sm:$0xff]  ;;  %v13022_v11 = vld [vmem:[#allocation16_spill] sm:$0xff] }
 0x4f3   :  { %v3192_v19 = vadd.f32 %v3191_v34, %v9822_v12  ;;  %v3325_v27 = vadd.f32 %v3324_v39, %v3288_v46 }
 0x4f4   :  { %v3344_v43 = vadd.f32 %v3343_v7, %v3306_v53 }
 0x4f5   :  { %v3231_v26 = vmax.f32 %v3192_v19, 0.0  ;;  %3326 = vadd.xlane.f32.xlu1 %v3325_v27  ;;  %v13024_v19 = vld [vmem:[#allocation17_spill] sm:$0xff] }
 0x4f6   :  { %v10089_v12 = vpop.permute.xlu1 %3625 }
 0x4f7   :  { %v10083_v17 = vadd.f32 %v3231_v26, %v13019_v21  ;;  %13020 = vst [vmem:[#allocation44_spill] sm:$0xff] %v10089_v12 }
 0x4f9   :  { %v3307_v33 = vmul.f32 %v10083_v17, %v13015_v23 }
 0x4fb   :  { %v3345_v40 = vadd.f32 %v3344_v43, %v3307_v33 }
 0x4fd   :  { %3346 = vadd.xlane.f32.xlu2 %v3345_v40 }
 0x568   :  { %v3327_v46 = vpop.xlane.xlu1 %3326 }
 0x569   :  { %v10091_v39 = vmul.f32 0.001953125, %v3327_v46 }
 0x56b   :  { %v10095_v34 = vsub.f32 %v13021_v18, %v10091_v39  ;;  %v10099_v25 = vsub.f32 %v13022_v11, %v10091_v39  ;;  %v10105_v27 = vsub.f32 %v13024_v19, %v10091_v39  ;;  %v10113_v53 = vsub.f32 %v9851_v60, %v10091_v39 }
 0x56c   :  { %v10117_v57 = vsub.f32 %v9868_v44, %v10091_v39  ;;  %v10123_v46 = vsub.f32 %v9886_v42, %v10091_v39  ;;  %v10129_v60 = vsub.f32 %v9893_v32, %v10091_v39  ;;  %v10143_v32 = vsub.f32 %v9928_v35, %v10091_v39 }
 0x56d   :  { %v3388_v26 = vmul.f32 %v10095_v34, %v12954_v31  ;;  %v3389_v7 = vmul.f32 %v10099_v25, %v12953_v45  ;;  %13025 = vst [vmem:[#allocation29_spill] sm:$0xff] %v10113_v53  ;;  %v3390_v21 = vmul.f32 %v10105_v27, %v12955_v62  ;;  %v3391_v18 = vmul.f32 %v10113_v53, %v12963_v38 }
 0x56e   :  { %13026 = vst [vmem:[#allocation30_spill] sm:$0xff] %v10129_v60  ;;  %v3392_v44 = vmul.f32 %v10117_v57, %v12967_v9  ;;  %v3393_v42 = vmul.f32 %v10123_v46, %v12969_v48  ;;  %v3394_v53 = vmul.f32 %v10129_v60, %v12971_v5 }
 0x56f   :  { %v3426_v33 = vmul.f32 %v3388_v26, %v3388_v26  ;;  %v3427_v43 = vmul.f32 %v3389_v7, %v3389_v7  ;;  %v3428_v11 = vmul.f32 %v3390_v21, %v3390_v21  ;;  %v10137_v26 = vsub.f32 %v9909_v61, %v10091_v39  ;;  %v13028_v61 = vld [vmem:[#allocation13_spill] sm:$0xff] }
 0x570   :  { %v3347_v40 = vpop.xlane.xlu2 %3346  ;;  %v3429_v7 = vmul.f32 %v3391_v18, %v3391_v18  ;;  %v3430_v21 = vmul.f32 %v3392_v44, %v3392_v44  ;;  %v10157_v18 = vsub.f32 %v9942_v29, %v10091_v39  ;;  %v3432_v44 = vmul.f32 %v3394_v53, %v3394_v53 }
 0x571   :  { %v3464_v19 = vadd.f32 %v3427_v43, %v3426_v33  ;;  %v10133_v12 = vmul.f32 0.001953125, %v3347_v40  ;;  %v3395_v35 = vmul.f32 %v10137_v26, %v12975_v3 }
 0x572   :  { %13030 = vst [vmem:[#allocation23_spill] sm:$0xff] %v10157_v18 }
 0x573   :  { %v3465_v55 = vadd.f32 %v3464_v19, %v3428_v11  ;;  %v10149_v43 = vsub.f32 %v9860_v52, %v10133_v12  ;;  %v10153_v40 = vsub.f32 %v13028_v61, %v10133_v12  ;;  %v3431_v11 = vmul.f32 %v3393_v42, %v3393_v42  ;;  %v13031_v61 = vld [vmem:[#allocation64_spill] sm:$0xff] }
 0x574   :  { %v3396_v52 = vmul.f32 %v10143_v32, %v12980_v22  ;;  %v10169_v60 = vsub.f32 %v13031_v61, %v10133_v12  ;;  %v10187_v61 = vsub.f32 %v9982_v13, %v10091_v39 }
 0x575   :  { %v3466_v33 = vadd.f32 %v3465_v55, %v3429_v7  ;;  %13027 = vst [vmem:[#allocation65_spill] sm:$0xff] %v10149_v43  ;;  %v10163_v55 = vsub.f32 %v9949_v30, %v10091_v39  ;;  %v3407_v29 = vmul.f32 %v10149_v43, %v12954_v31  ;;  %v3408_v42 = vmul.f32 %v10153_v40, %v12953_v45 }
 0x576   :  { %13029 = vst [vmem:[#allocation50_spill] sm:$0xff] %v10153_v40  ;;  %v3397_v30 = vmul.f32 %v10157_v18, %v12982_v2  ;;  %v3434_v45 = vmul.f32 %v3396_v52, %v3396_v52  ;;  %v10205_v52 = vsub.f32 %v9915_v4, %v10133_v12 }
 0x577   :  { %v3467_v19 = vadd.f32 %v3466_v33, %v3430_v21  ;;  %v10177_v21 = vsub.f32 %v9966_v56, %v10091_v39  ;;  %v3433_v33 = vmul.f32 %v3395_v35, %v3395_v35  ;;  %v3398_v31 = vmul.f32 %v10163_v55, %v12984_v37 }
 0x578   :  { %v10193_v56 = vsub.f32 %v9903_v58, %v10133_v12  ;;  %v3409_v35 = vmul.f32 %v10169_v60, %v12955_v62  ;;  %v3435_v43 = vmul.f32 %v3397_v30, %v3397_v30  ;;  %v10211_v62 = vsub.f32 %v10005_v0, %v10091_v39 }
 0x579   :  { %v3468_v7 = vadd.f32 %v3467_v19, %v3431_v11  ;;  %v13032_v11 = vld [vmem:[#allocation63_spill] sm:$0xff]  ;;  %v3399_v13 = vmul.f32 %v10177_v21, %v12991_v16  ;;  %v10217_v30 = vsub.f32 %v9921_v41, %v10133_v12  ;;  %v3412_v41 = vmul.f32 %v10205_v52, %v12969_v48 }
 0x57a   :  { %v10183_v19 = vsub.f32 %v13032_v11, %v10133_v12  ;;  %v10199_v11 = vsub.f32 %v10001_v50, %v10091_v39  ;;  %v3400_v50 = vmul.f32 %v10187_v61, %v12992_v28  ;;  %v3411_v4 = vmul.f32 %v10193_v56, %v12967_v9 }
 0x57b   :  { %v3469_v53 = vadd.f32 %v3468_v7, %v3432_v44  ;;  %v3445_v44 = vmul.f32 %v3407_v29, %v3407_v29  ;;  %v3446_v7 = vmul.f32 %v3408_v42, %v3408_v42  ;;  %v3436_v29 = vmul.f32 %v3398_v31, %v3398_v31 }
 0x57c   :  { %v3410_v58 = vmul.f32 %v10183_v19, %v12963_v38  ;;  %v10223_v38 = vsub.f32 %v10021_v59, %v10091_v39  ;;  %v3401_v0 = vmul.f32 %v10199_v11, %v12998_v15  ;;  %v3402_v59 = vmul.f32 %v10211_v62, %v12999_v1 }
 0x57d   :  { %v3470_v40 = vadd.f32 %v3469_v53, %v3433_v33  ;;  %v3484_v33 = vadd.f32 %v3446_v7, %v3445_v44  ;;  %v3437_v53 = vmul.f32 %v3399_v13, %v3399_v13  ;;  %v3438_v44 = vmul.f32 %v3400_v50, %v3400_v50  ;;  %v13034_v50 = vld [vmem:[#allocation42_spill] sm:$0xff] }
 0x57e   :  { %v3448_v31 = vmul.f32 %v3410_v58, %v3410_v58  ;;  %v10241_v13 = vsub.f32 %v9959_v54, %v10133_v12  ;;  %v10247_v58 = vsub.f32 %v10048_v20, %v10091_v39 }
 0x57f   :  { %v3471_v18 = vadd.f32 %v3470_v40, %v3434_v45  ;;  %v3447_v40 = vmul.f32 %v3409_v35, %v3409_v35  ;;  %v10235_v35 = vsub.f32 %v10032_v63, %v10091_v39  ;;  %v3403_v63 = vmul.f32 %v10223_v38, %v13001_v8 }
 0x581   :  { %v3472_v42 = vadd.f32 %v3471_v18, %v3435_v43  ;;  %v13033_v43 = vld [vmem:[#allocation49_spill] sm:$0xff]  ;;  %v3485_v9 = vadd.f32 %v3484_v33, %v3447_v40  ;;  %v3439_v40 = vmul.f32 %v3401_v0, %v3401_v0  ;;  %v3404_v20 = vmul.f32 %v10235_v35, %v13007_v51  ;;  %v13035_v0 = vld [vmem:[#allocation38_spill] sm:$0xff] }
 0x582   :  { %v10229_v18 = vsub.f32 %v13033_v43, %v10133_v12  ;;  %v3440_v43 = vmul.f32 %v3402_v59, %v3402_v59 }
 0x583   :  { %v3473_v45 = vadd.f32 %v3472_v42, %v3436_v29  ;;  %v3413_v29 = vmul.f32 %v10217_v30, %v12971_v5  ;;  %v3449_v42 = vmul.f32 %v3411_v4, %v3411_v4  ;;  %v3486_v48 = vadd.f32 %v3485_v9, %v3448_v31 }
 0x584   :  { %v3414_v54 = vmul.f32 %v10229_v18, %v12975_v3  ;;  %v10259_v4 = vsub.f32 %v10068_v6, %v10091_v39  ;;  %v10265_v9 = vsub.f32 %v13035_v0, %v10133_v12  ;;  %v13036_v39 = vld [vmem:[#allocation51_spill] sm:$0xff] }
 0x585   :  { %v3474_v7 = vadd.f32 %v3473_v45, %v3437_v53  ;;  %v10253_v53 = vsub.f32 %v13034_v50, %v10133_v12  ;;  %v3450_v45 = vmul.f32 %v3412_v41, %v3412_v41  ;;  %v3487_v5 = vadd.f32 %v3486_v48, %v3449_v42 }
 0x586   :  { %v3405_v41 = vmul.f32 %v10247_v58, %v13012_v36  ;;  %v3441_v42 = vmul.f32 %v3403_v63, %v3403_v63  ;;  %v10273_v48 = vsub.f32 %v13036_v39, %v10133_v12  ;;  %v3406_v50 = vmul.f32 %v10259_v4, %v13015_v23 }
 0x587   :  { %v3475_v33 = vadd.f32 %v3474_v7, %v3438_v44  ;;  %v3415_v44 = vmul.f32 %v10241_v13, %v12980_v22  ;;  %v3451_v7 = vmul.f32 %v3413_v29, %v3413_v29  ;;  %v3488_v3 = vadd.f32 %v3487_v5, %v3450_v45 }
 0x588   :  { %v3416_v59 = vmul.f32 %v10253_v53, %v12982_v2  ;;  %v3442_v22 = vmul.f32 %v3404_v20, %v3404_v20  ;;  %v10281_v45 = vsub.f32 %v10010_v14, %v10133_v12  ;;  %v3417_v63 = vmul.f32 %v10265_v9, %v12984_v37  ;;  %v13037_v2 = vld [vmem:[#allocation19_spill] sm:$0xff]  ;;  %v13038_v14 = vld [vmem:[#allocation18_spill] sm:$0xff] }
 0x589   :  { %v3476_v31 = vadd.f32 %v3475_v33, %v3439_v40  ;;  %v3452_v40 = vmul.f32 %v3414_v54, %v3414_v54  ;;  %v3489_v33 = vadd.f32 %v3488_v3, %v3451_v7  ;;  %v3453_v5 = vmul.f32 %v3415_v44, %v3415_v44 }
 0x58a   :  { %v10287_v54 = vsub.f32 %v13037_v2, %v10133_v12  ;;  %v3418_v7 = vmul.f32 %v10273_v48, %v12991_v16  ;;  %v3454_v20 = vmul.f32 %v3416_v59, %v3416_v59  ;;  %v10293_v39 = vsub.f32 %v13038_v14, %v10133_v12 }
 0x58b   :  { %v3477_v6 = vadd.f32 %v3476_v31, %v3440_v43  ;;  %v3490_v43 = vadd.f32 %v3489_v33, %v3452_v40  ;;  %v3443_v31 = vmul.f32 %v3405_v41, %v3405_v41  ;;  %v3419_v37 = vmul.f32 %v10281_v45, %v12992_v28 }
 0x58c   :  { %v3455_v44 = vmul.f32 %v3417_v63, %v3417_v63  ;;  %v10299_v33 = vsub.f32 %v10054_v10, %v10133_v12  ;;  %v3420_v16 = vmul.f32 %v10287_v54, %v12998_v15  ;;  %v3456_v59 = vmul.f32 %v3418_v7, %v3418_v7 }
 0x58d   :  { %v3478_v29 = vadd.f32 %v3477_v6, %v3441_v42  ;;  %v3491_v3 = vadd.f32 %v3490_v43, %v3453_v5  ;;  %v3444_v42 = vmul.f32 %v3406_v50, %v3406_v50  ;;  %v3421_v28 = vmul.f32 %v10293_v39, %v12999_v1 }
 0x58e   :  { %v10311_v5 = vsub.f32 %v10076_v49, %v10133_v12  ;;  %v3422_v10 = vmul.f32 %v10299_v33, %v13001_v8  ;;  %v3458_v15 = vmul.f32 %v3420_v16, %v3420_v16 }
 0x58f   :  { %v3479_v0 = vadd.f32 %v3478_v29, %v3442_v22  ;;  %v3492_v41 = vadd.f32 %v3491_v3, %v3454_v20  ;;  %v10305_v22 = vsub.f32 %v10062_v24, %v10133_v12  ;;  %v3457_v29 = vmul.f32 %v3419_v37, %v3419_v37  ;;  %v10325_v37 = vpop.permute.xlu0 %3620 }
 0x590   :  { %v3424_v2 = vmul.f32 %v10311_v5, %v13012_v36  ;;  %v3460_v7 = vmul.f32 %v3422_v10, %v3422_v10 }
 0x591   :  { %v3480_v6 = vadd.f32 %v3479_v0, %v3443_v31  ;;  %v3493_v50 = vadd.f32 %v3492_v41, %v3455_v44  ;;  %v10317_v31 = vsub.f32 %v10083_v17, %v10133_v12  ;;  %v3423_v24 = vmul.f32 %v10305_v22, %v13007_v51 }
 0x592   :  { %v3459_v0 = vmul.f32 %v3421_v28, %v3421_v28 }
 0x593   :  { %v3481_v40 = vadd.f32 %v3480_v6, %v3444_v42  ;;  %v3494_v63 = vadd.f32 %v3493_v50, %v3456_v59  ;;  %v3425_v20 = vmul.f32 %v10317_v31, %v13015_v23  ;;  %v3461_v8 = vmul.f32 %v3423_v24, %v3423_v24 }
 0x594   :  { %v3462_v42 = vmul.f32 %v3424_v2, %v3424_v2  ;;  %v13040_v2 = vld [vmem:[#allocation29_spill] sm:$0xff] }
 0x595   :  { %3482 = vadd.xlane.f32.xlu0 %v3481_v40  ;;  %v3495_v43 = vadd.f32 %v3494_v63, %v3457_v29  ;;  %v3463_v14 = vmul.f32 %v3425_v20, %v3425_v20 }
 0x597   :  { %v3496_v1 = vadd.f32 %v3495_v43, %v3458_v15 }
 0x599   :  { %v3497_v49 = vadd.f32 %v3496_v1, %v3459_v0 }
 0x59b   :  { %v3498_v3 = vadd.f32 %v3497_v49, %v3460_v7 }
 0x59d   :  { %v3499_v6 = vadd.f32 %v3498_v3, %v3461_v8 }
 0x59f   :  { %v3500_v17 = vadd.f32 %v3499_v6, %v3462_v42 }
 0x5a1   :  { %v3501_v12 = vadd.f32 %v3500_v17, %v3463_v14  ;;  %v13042_v14 = vld [vmem:[#allocation30_spill] sm:$0xff] }
 0x5a3   :  { %3502 = vadd.xlane.f32.xlu2 %v3501_v12 }
 0x608   :  { %v3483_v51 = vpop.xlane.xlu0 %3482 }
 0x609   :  { %v3504_v44 = vmul.f32 0.001953125, %v3483_v51 }
 0x60b   :  { %v3506_v41 = vadd.f32 1e-05, %v3504_v44 }
 0x60d   :  { %6212 = vrsqrt.f32 %v3506_v41  ;;  %vm3514_vm4 = vweird.f32 %v3506_v41 }
 0x613   :  { %v6213_v36 = vpop.eup %6212 }
 0x614   :  { %v3509_v40 = vmul.f32 %v6213_v36, %v3506_v41  ;;  %vm3515_vm3 = vweird.f32 %v6213_v36 }
 0x615   :  { %vm3516_vm5 = vmor %vm3514_vm4, %vm3515_vm3 }
 0x616   :  { %v3510_v16 = vmul.f32 %v6213_v36, %v3509_v40 }
 0x618   :  { %v3511_v59 = vmul.f32 0.5, %v3510_v16  ;;  %v13046_v16 = vld [vmem:[#allocation23_spill] sm:$0xff] }
 0x61a   :  { %v3512_v50 = vsub.f32 1.5, %v3511_v59 }
 0x61c   :  { %v3513_v23 = vmul.f32 %v6213_v36, %v3512_v50 }
 0x61e   :  { %v10327_v28 = vsel %vm3516_vm5, %v6213_v36, %v3513_v23 }
 0x61f   :  { %v3530_v29 = vmul.f32 %v10327_v28, %v10105_v27  ;;  %v3529_v63 = vmul.f32 %v10327_v28, %v10099_v25  ;;  %v3528_v10 = vmul.f32 %v10327_v28, %v10095_v34  ;;  %v3533_v0 = vmul.f32 %v10327_v28, %v10123_v46 }
 0x620   :  { %v3532_v34 = vmul.f32 %v10327_v28, %v10117_v57  ;;  %v3531_v7 = vmul.f32 %v10327_v28, %v13040_v2  ;;  %v3536_v3 = vmul.f32 %v10327_v28, %v10143_v32  ;;  %v3535_v42 = vmul.f32 %v10327_v28, %v10137_v26 }
 0x621   :  { %v3580_v15 = vmul.f32 %v10087_v47, %v3530_v29  ;;  %v3579_v43 = vmul.f32 %v10087_v47, %v3529_v63  ;;  %v3578_v24 = vmul.f32 %v10087_v47, %v3528_v10  ;;  %v3583_v46 = vmul.f32 %v10087_v47, %v3533_v0 }
 0x622   :  { %v3582_v49 = vmul.f32 %v10087_v47, %v3532_v34  ;;  %v3581_v20 = vmul.f32 %v10087_v47, %v3531_v7  ;;  %v3534_v17 = vmul.f32 %v10327_v28, %v13042_v14  ;;  %v3586_v32 = vmul.f32 %v10087_v47, %v3536_v3 }
 0x623   :  { %v10341_v1 = vadd.f32 %v10325_v37, %v3580_v15  ;;  %v10344_v27 = vadd.f32 %v10325_v37, %v3579_v43  ;;  %v10347_v25 = vadd.f32 %v10325_v37, %v3578_v24  ;;  %v10363_v57 = vadd.f32 %v10325_v37, %v3583_v46 }
 0x624   :  { %v10366_v8 = vadd.f32 %v10325_v37, %v3582_v49  ;;  %v10373_v6 = vadd.f32 %v10325_v37, %v3581_v20  ;;  %v3585_v12 = vmul.f32 %v10087_v47, %v3535_v42  ;;  %v3584_v26 = vmul.f32 %v10087_v47, %v3534_v17 }
 0x625   :  { %13039 = vst [vmem:[#allocation20_spill] sm:$0xff] %v10347_v25  ;;  %3674 = vrot.lane.b32.xlu2 %v10341_v1, %s6243_s19  ;;  %3670 = vrot.lane.b32.xlu1 %v10344_v27, %s6243_s19  ;;  %v10387_v51 = vadd.f32 %v10325_v37, %v3586_v32  ;;  %v3539_v41 = vmul.f32 %v10327_v28, %v10177_v21 }
 0x626   :  { %3666 = vrot.lane.b32.xlu0 %v10347_v25, %s6243_s19  ;;  %13041 = vst [vmem:[#allocation24_spill] sm:$0xff] %v10363_v57  ;;  %v10390_v44 = vadd.f32 %v10325_v37, %v3585_v12  ;;  %v3538_v36 = vmul.f32 %v10327_v28, %v10163_v55  ;;  %v10397_v40 = vadd.f32 %v10325_v37, %v3584_v26 }
 0x627   :  { %13043 = vst [vmem:[#allocation21_spill] sm:$0xff] %v10387_v51  ;;  %v3537_v59 = vmul.f32 %v10327_v28, %v13046_v16  ;;  %v3589_v21 = vmul.f32 %v10087_v47, %v3539_v41  ;;  %v3542_v63 = vmul.f32 %v10327_v28, %v10211_v62  ;;  %v3541_v10 = vmul.f32 %v10327_v28, %v10199_v11 }
 0x628   :  { %13044 = vst [vmem:[#allocation45_spill] sm:$0xff] %v10390_v44  ;;  %v3588_v50 = vmul.f32 %v10087_v47, %v3538_v36  ;;  %v3540_v43 = vmul.f32 %v10327_v28, %v10187_v61  ;;  %v3545_v34 = vmul.f32 %v10327_v28, %v10247_v58  ;;  %v3544_v2 = vmul.f32 %v10327_v28, %v10235_v35 }
 0x629   :  { %13045 = vst [vmem:[#allocation46_spill] sm:$0xff] %v10397_v40  ;;  %v3587_v55 = vmul.f32 %v10087_v47, %v3537_v59  ;;  %v10411_v23 = vadd.f32 %v10325_v37, %v3589_v21  ;;  %v3592_v62 = vmul.f32 %v10087_v47, %v3542_v63  ;;  %v3591_v24 = vmul.f32 %v10087_v47, %v3541_v10 }
 0x62a   :  { %v10414_v29 = vadd.f32 %v10325_v37, %v3588_v50  ;;  %v3590_v11 = vmul.f32 %v10087_v47, %v3540_v43  ;;  %v3543_v46 = vmul.f32 %v10327_v28, %v10223_v38  ;;  %v3595_v58 = vmul.f32 %v10087_v47, %v3545_v34 }
 0x62b   :  { %v10421_v15 = vadd.f32 %v10325_v37, %v3587_v55  ;;  %v10435_v0 = vadd.f32 %v10325_v37, %v3592_v62  ;;  %v10438_v61 = vadd.f32 %v10325_v37, %v3591_v24  ;;  %v3594_v49 = vmul.f32 %v10087_v47, %v3544_v2 }
 0x62c   :  { %13047 = vst [vmem:[#allocation25_spill] sm:$0xff] %v10414_v29  ;;  %v10445_v7 = vadd.f32 %v10325_v37, %v3590_v11  ;;  %v3593_v35 = vmul.f32 %v10087_v47, %v3543_v46  ;;  %v10459_v20 = vadd.f32 %v10325_v37, %v3595_v58  ;;  %v3546_v42 = vmul.f32 %v10327_v28, %v10259_v4 }
 0x62d   :  { %3686 = vrot.lane.b32.xlu2 %v10363_v57, %s6243_s19  ;;  %3682 = vrot.lane.b32.xlu1 %v10366_v8, %s6243_s19  ;;  %13048 = vst [vmem:[#allocation22_spill] sm:$0xff] %v10421_v15  ;;  %v10462_v38 = vadd.f32 %v10325_v37, %v3594_v49 }
 0x62e   :  { %3678 = vrot.lane.b32.xlu0 %v10373_v6, %s6243_s19  ;;  %13049 = vst [vmem:[#allocation12_spill] sm:$0xff] %v10435_v0  ;;  %v10465_v3 = vadd.f32 %v10325_v37, %v3593_v35  ;;  %v3596_v14 = vmul.f32 %v10087_v47, %v3546_v42  ;;  %v3503_v47 = vpop.xlane.xlu2 %3502  ;;  %v13057_v35 = vld [vmem:[#allocation65_spill] sm:$0xff] }
 0x62f   :  { %13050 = vst [vmem:[#allocation58_spill] sm:$0xff] %v10459_v20  ;;  %v3505_v28 = vmul.f32 0.001953125, %v3503_v47  ;;  %v13058_v47 = vld [vmem:[#allocation50_spill] sm:$0xff] }
 0x630   :  { %13051 = vst [vmem:[#allocation4_spill] sm:$0xff] %v10462_v38  ;;  %v10477_v17 = vadd.f32 %v10325_v37, %v3596_v14 }
 0x631   :  { %13052 = vst [vmem:[#allocation6_spill] sm:$0xff] %v10465_v3  ;;  %v3507_v32 = vadd.f32 1e-05, %v3505_v28 }
 0x633   :  { %6214 = vrsqrt.f32 %v3507_v32  ;;  %vm3524_vm8 = vweird.f32 %v3507_v32 }
 0x635   :  { %3698 = vrot.lane.b32.xlu2 %v10387_v51, %s6243_s19  ;;  %3694 = vrot.lane.b32.xlu1 %v10390_v44, %s6243_s19 }
 0x636   :  { %3690 = vrot.lane.b32.xlu0 %v10397_v40, %s6243_s19 }
 0x639   :  { %v6215_v16 = vpop.eup %6214 }
 0x63a   :  { %v3519_v59 = vmul.f32 %v6215_v16, %v3507_v32  ;;  %vm3525_vm7 = vweird.f32 %v6215_v16 }
 0x63b   :  { %vm3526_vm9 = vmor %vm3524_vm8, %vm3525_vm7 }
 0x63c   :  { %v3520_v55 = vmul.f32 %v6215_v16, %v3519_v59  ;;  %v13059_v59 = vld [vmem:[#allocation43_spill] sm:$0xff] }
 0x63d   :  { %3710 = vrot.lane.b32.xlu2 %v10411_v23, %s6243_s19  ;;  %3706 = vrot.lane.b32.xlu1 %v10414_v29, %s6243_s19 }
 0x63e   :  { %3702 = vrot.lane.b32.xlu0 %v10421_v15, %s6243_s19  ;;  %v3521_v10 = vmul.f32 0.5, %v3520_v55 }
 0x640   :  { %v3522_v24 = vsub.f32 1.5, %v3521_v10 }
 0x642   :  { %v3523_v34 = vmul.f32 %v6215_v16, %v3522_v24 }
 0x644   :  { %v10579_v58 = vsel %vm3526_vm9, %v6215_v16, %v3523_v34  ;;  %v13060_v34 = vld [vmem:[#allocation44_spill] sm:$0xff] }
 0x645   :  { %3722 = vrot.lane.b32.xlu2 %v10435_v0, %s6243_s19  ;;  %3718 = vrot.lane.b32.xlu1 %v10438_v61, %s6243_s19  ;;  %v3547_v42 = vmul.f32 %v10579_v58, %v13057_v35  ;;  %v3549_v14 = vmul.f32 %v10579_v58, %v10169_v60  ;;  %v3548_v28 = vmul.f32 %v10579_v58, %v13058_v47 }
 0x646   :  { %3714 = vrot.lane.b32.xlu0 %v10445_v7, %s6243_s19  ;;  %v3550_v47 = vmul.f32 %v10579_v58, %v10183_v19 }
 0x647   :  { %v3597_v55 = vmul.f32 %v13059_v59, %v3547_v42  ;;  %v3599_v60 = vmul.f32 %v13059_v59, %v3549_v14  ;;  %v3598_v24 = vmul.f32 %v13059_v59, %v3548_v28  ;;  %v3551_v14 = vmul.f32 %v10579_v58, %v10193_v56 }
 0x649   :  { %v10605_v35 = vadd.f32 %v13060_v34, %v3597_v55  ;;  %v10615_v42 = vadd.f32 %v13060_v34, %v3598_v24  ;;  %v3601_v56 = vmul.f32 %v13059_v59, %v3551_v14 }
 0x64b   :  { %13061 = vst [vmem:[#allocation39_spill] sm:$0xff] %v10605_v35 }
 0x64c   :  { %13063 = vst [vmem:[#allocation56_spill] sm:$0xff] %v10615_v42 }
 0x64d   :  { %3734 = vrot.lane.b32.xlu2 %v10459_v20, %s6243_s19  ;;  %3730 = vrot.lane.b32.xlu1 %v10462_v38, %s6243_s19 }
 0x64e   :  { %3726 = vrot.lane.b32.xlu0 %v10465_v3, %s6243_s19 }
 0x655   :  { %3818 = vrot.lane.b32.xlu2 %v10344_v27, %s6245_s27  ;;  %3814 = vrot.lane.b32.xlu1 %v10347_v25, %s6245_s27 }
 0x656   :  { %3738 = vrot.lane.b32.xlu0 %v10477_v17, %s6243_s19 }
 0x65d   :  { %3830 = vrot.lane.b32.xlu2 %v10366_v8, %s6245_s27  ;;  %3826 = vrot.lane.b32.xlu1 %v10373_v6, %s6245_s27 }
 0x65e   :  { %3822 = vrot.lane.b32.xlu0 %v10341_v1, %s6245_s27 }
 0x665   :  { %3934 = vrot.lane.b32.xlu2 %v10341_v1, %s6240_s25  ;;  %3838 = vrot.lane.b32.xlu1 %v10397_v40, %s6245_s27 }
 0x666   :  { %3834 = vrot.lane.b32.xlu0 %v10363_v57, %s6245_s27 }
 0x66d   :  { %3858 = vrot.lane.b32.xlu2 %v10411_v23, %s6245_s27  ;;  %3942 = vrot.lane.b32.xlu1 %v10366_v8, %s6240_s25 }
 0x66e   :  { %3938 = vrot.lane.b32.xlu0 %v10373_v6, %s6240_s25 }
 0x675   :  { %3970 = vrot.lane.b32.xlu2 %v10411_v23, %s6240_s25  ;;  %3866 = vrot.lane.b32.xlu1 %v10438_v61, %s6245_s27 }
 0x676   :  { %3862 = vrot.lane.b32.xlu0 %v10445_v7, %s6245_s27 }
 0x67d   :  { %3946 = vrot.lane.b32.xlu2 %v10363_v57, %s6240_s25  ;;  %3978 = vrot.lane.b32.xlu1 %v10438_v61, %s6240_s25 }
 0x67e   :  { %3974 = vrot.lane.b32.xlu0 %v10445_v7, %s6240_s25 }
 0x67f   :  { %v10515_v4 = vpop.permute.xlu2 %3674 }
 0x685   :  { %3926 = vrot.lane.b32.xlu2 %v10347_v25, %s6240_s25  ;;  %3982 = vrot.lane.b32.xlu1 %v10435_v0, %s6240_s25 }
 0x686   :  { %3870 = vrot.lane.b32.xlu0 %v10435_v0, %s6245_s27  ;;  %v3552_v0 = vmul.f32 %v10579_v58, %v10205_v52  ;;  %v3600_v52 = vmul.f32 %v13059_v59, %v3550_v47  ;;  %v10645_v47 = vadd.f32 %v13060_v34, %v3601_v56 }
 0x687   :  { %v10523_v37 = vpop.permute.xlu2 %3686 }
 0x688   :  { %v3602_v55 = vmul.f32 %v13059_v59, %v3552_v0  ;;  %v10635_v24 = vadd.f32 %v13060_v34, %v3600_v52  ;;  %13068 = vst [vmem:[#allocation47_spill] sm:$0xff] %v10645_v47  ;;  %v3554_v0 = vmul.f32 %v10579_v58, %v10229_v18 }
 0x68a   :  { %13066 = vst [vmem:[#allocation9_spill] sm:$0xff] %v10635_v24  ;;  %v10638_v57 = vadd.f32 %v13060_v34, %v3602_v55  ;;  %v3604_v18 = vmul.f32 %v13059_v59, %v3554_v0 }
 0x68c   :  { %13067 = vst [vmem:[#allocation53_spill] sm:$0xff] %v10638_v57 }
 0x68d   :  { %3854 = vrot.lane.b32.xlu2 %v10414_v29, %s6245_s27  ;;  %3850 = vrot.lane.b32.xlu1 %v10421_v15, %s6245_s27 }
 0x68e   :  { %3930 = vrot.lane.b32.xlu0 %v10344_v27, %s6240_s25 }
 0x68f   :  { %v10531_v12 = vpop.permute.xlu2 %3698 }
 0x690   :  { %13053 = vst [vmem:[#allocation59_spill] sm:$0xff] %v10531_v12 }
 0x695   :  { %3842 = vrot.lane.b32.xlu2 %v10390_v44, %s6245_s27  ;;  %3966 = vrot.lane.b32.xlu1 %v10414_v29, %s6240_s25 }
 0x696   :  { %3962 = vrot.lane.b32.xlu0 %v10421_v15, %s6240_s25 }
 0x697   :  { %v10539_v26 = vpop.permute.xlu2 %3710  ;;  %v10541_v41 = vpop.permute.xlu1 %3670 }
 0x698   :  { %v10543_v36 = vpop.permute.xlu0 %3666 }
 0x69d   :  { %3954 = vrot.lane.b32.xlu2 %v10390_v44, %s6240_s25  ;;  %3950 = vrot.lane.b32.xlu1 %v10397_v40, %s6240_s25  ;;  %v3558_v40 = vmul.f32 %v10579_v58, %v10273_v48  ;;  %v3561_v44 = vmul.f32 %v10579_v58, %v10293_v39 }
 0x69e   :  { %3846 = vrot.lane.b32.xlu0 %v10387_v51, %s6245_s27 }
 0x69f   :  { %v10551_v21 = vpop.permute.xlu2 %3722  ;;  %v10553_v50 = vpop.permute.xlu1 %3682 }
 0x6a0   :  { %v10555_v63 = vpop.permute.xlu0 %3678 }
 0x6a5   :  { %3878 = vrot.lane.b32.xlu2 %v10462_v38, %s6245_s27  ;;  %3874 = vrot.lane.b32.xlu1 %v10465_v3, %s6245_s27 }
 0x6a6   :  { %3958 = vrot.lane.b32.xlu0 %v10387_v51, %s6240_s25 }
 0x6a7   :  { %v10563_v43 = vpop.permute.xlu2 %3734  ;;  %v10565_v62 = vpop.permute.xlu1 %3694 }
 0x6a8   :  { %13054 = vst [vmem:[#allocation8_spill] sm:$0xff] %v10563_v43  ;;  %v10567_v11 = vpop.permute.xlu0 %3690  ;;  %v3556_v43 = vmul.f32 %v10579_v58, %v10253_v53 }
 0x6a9   :  { %13055 = vst [vmem:[#allocation31_spill] sm:$0xff] %v10565_v62  ;;  %v3565_v62 = vmul.f32 %v10579_v58, %v10317_v31 }
 0x6aa   :  { %13056 = vst [vmem:[#allocation14_spill] sm:$0xff] %v10567_v11  ;;  %v3606_v48 = vmul.f32 %v13059_v59, %v3556_v43 }
 0x6ad   :  { %3990 = vrot.lane.b32.xlu2 %v10462_v38, %s6240_s25  ;;  %3986 = vrot.lane.b32.xlu1 %v10465_v3, %s6240_s25  ;;  %v3555_v38 = vmul.f32 %v10579_v58, %v10241_v13  ;;  %v3559_v3 = vmul.f32 %v10579_v58, %v10281_v45 }
 0x6ae   :  { %3882 = vrot.lane.b32.xlu0 %v10459_v20, %s6245_s27 }
 0x6af   :  { %v10575_v2 = vpop.permute.xlu2 %3818  ;;  %v10577_v46 = vpop.permute.xlu1 %3706  ;;  %v3605_v52 = vmul.f32 %v13059_v59, %v3555_v38  ;;  %v3557_v38 = vmul.f32 %v10579_v58, %v10265_v9  ;;  %v3609_v39 = vmul.f32 %v13059_v59, %v3559_v3 }
 0x6b0   :  { %v10581_v49 = vpop.permute.xlu0 %3702 }
 0x6b1   :  { %v10668_v51 = vadd.f32 %v13060_v34, %v3605_v52  ;;  %v3607_v9 = vmul.f32 %v13059_v59, %v3557_v38 }
 0x6b3   :  { %13071 = vst [vmem:[#allocation61_spill] sm:$0xff] %v10668_v51  ;;  %v10705_v43 = vadd.f32 %v13060_v34, %v3607_v9  ;;  %v10725_v9 = vadd.f32 %v13060_v34, %v3609_v39 }
 0x6b5   :  { %3998 = vrot.lane.b32.xlu2 %v10477_v17, %s6240_s25  ;;  %3886 = vrot.lane.b32.xlu1 %v10477_v17, %s6245_s27  ;;  %v10608_v17 = vadd.f32 %v13060_v34, %v3599_v60  ;;  %13075 = vst [vmem:[#allocation26_spill] sm:$0xff] %v10705_v43 }
 0x6b6   :  { %3994 = vrot.lane.b32.xlu0 %v10459_v20, %s6240_s25  ;;  %v3553_v20 = vmul.f32 %v10579_v58, %v10217_v30  ;;  %13077 = vst [vmem:[#allocation28_spill] sm:$0xff] %v10725_v9 }
 0x6b7   :  { %v10595_v32 = vpop.permute.xlu2 %3830  ;;  %v10597_v16 = vpop.permute.xlu1 %3718  ;;  %13062 = vst [vmem:[#allocation35_spill] sm:$0xff] %v10608_v17 }
 0x6b8   :  { %v10601_v10 = vpop.permute.xlu0 %3714  ;;  %v3603_v13 = vmul.f32 %v13059_v59, %v3553_v20  ;;  %v10675_v20 = vadd.f32 %v13060_v34, %v3604_v18  ;;  %v10695_v18 = vadd.f32 %v13060_v34, %v3606_v48  ;;  %v3611_v48 = vmul.f32 %v13059_v59, %v3561_v44 }
 0x6b9   :  { %v3563_v44 = vmul.f32 %v10579_v58, %v10305_v22 }
 0x6ba   :  { %v10665_v56 = vadd.f32 %v13060_v34, %v3603_v13  ;;  %13072 = vst [vmem:[#allocation48_spill] sm:$0xff] %v10675_v20  ;;  %v3608_v13 = vmul.f32 %v13059_v59, %v3558_v40  ;;  %v3560_v40 = vmul.f32 %v10579_v58, %v10287_v54  ;;  %v10728_v11 = vadd.f32 %v13060_v34, %v3611_v48 }
 0x6bb   :  { %13073 = vst [vmem:[#allocation10_spill] sm:$0xff] %v10695_v18  ;;  %v3613_v22 = vmul.f32 %v13059_v59, %v3563_v44  ;;  %v3615_v44 = vmul.f32 %v13059_v59, %v3565_v62 }
 0x6bc   :  { %13070 = vst [vmem:[#allocation66_spill] sm:$0xff] %v10665_v56  ;;  %v3610_v54 = vmul.f32 %v13059_v59, %v3560_v40 }
 0x6bd   :  { %3668 = vrot.lane.b32.xlu2 %v10605_v35, %s6243_s19  ;;  %3676 = vrot.lane.b32.xlu1 %v10608_v17, %s6243_s19  ;;  %13078 = vst [vmem:[#allocation11_spill] sm:$0xff] %v10728_v11  ;;  %v10763_v12 = vadd.f32 %v13060_v34, %v3613_v22  ;;  %v10779_v31 = vadd.f32 %v13060_v34, %v3615_v44 }
 0x6be   :  { %3672 = vrot.lane.b32.xlu0 %v10615_v42, %s6243_s19  ;;  %v10735_v3 = vadd.f32 %v13060_v34, %v3610_v54 }
 0x6bf   :  { %v10625_v28 = vpop.permute.xlu2 %3934  ;;  %v10627_v19 = vpop.permute.xlu1 %3730  ;;  %13082 = vst [vmem:[#allocation54_spill] sm:$0xff] %v10763_v12 }
 0x6c0   :  { %13064 = vst [vmem:[#allocation33_spill] sm:$0xff] %v10627_v19  ;;  %v10631_v60 = vpop.permute.xlu0 %3726 }
 0x6c1   :  { %13065 = vst [vmem:[#allocation32_spill] sm:$0xff] %v10631_v60  ;;  %v3562_v60 = vmul.f32 %v10579_v58, %v10299_v33 }
 0x6c2   :  { %13079 = vst [vmem:[#allocation5_spill] sm:$0xff] %v10735_v3 }
 0x6c5   :  { %3680 = vrot.lane.b32.xlu2 %v10635_v24, %s6243_s19  ;;  %3688 = vrot.lane.b32.xlu1 %v10638_v57, %s6243_s19 }
 0x6c6   :  { %3684 = vrot.lane.b32.xlu0 %v10645_v47, %s6243_s19 }
 0x6c7   :  { %v10655_v14 = vpop.permute.xlu2 %3858  ;;  %v10657_v30 = vpop.permute.xlu1 %3814 }
 0x6c8   :  { %v10661_v55 = vpop.permute.xlu0 %3738 }
 0x6c9   :  { %13069 = vst [vmem:[#allocation60_spill] sm:$0xff] %v10661_v55  ;;  %v10698_v55 = vadd.f32 %v13060_v34, %v3608_v13 }
 0x6cb   :  { %13074 = vst [vmem:[#allocation67_spill] sm:$0xff] %v10698_v55 }
 0x6cd   :  { %3692 = vrot.lane.b32.xlu2 %v10665_v56, %s6243_s19  ;;  %3700 = vrot.lane.b32.xlu1 %v10668_v51, %s6243_s19 }
 0x6ce   :  { %3696 = vrot.lane.b32.xlu0 %v10675_v20, %s6243_s19 }
 0x6cf   :  { %v10685_v0 = vpop.permute.xlu2 %3970  ;;  %v10687_v53 = vpop.permute.xlu1 %3826 }
 0x6d0   :  { %v10691_v52 = vpop.permute.xlu0 %3822 }
 0x6d5   :  { %3704 = vrot.lane.b32.xlu2 %v10695_v18, %s6243_s19  ;;  %3712 = vrot.lane.b32.xlu1 %v10698_v55, %s6243_s19 }
 0x6d6   :  { %3708 = vrot.lane.b32.xlu0 %v10705_v43, %s6243_s19 }
 0x6d7   :  { %v10715_v38 = vpop.permute.xlu2 %3946  ;;  %v10717_v45 = vpop.permute.xlu1 %3838 }
 0x6d8   :  { %13076 = vst [vmem:[#allocation27_spill] sm:$0xff] %v10717_v45  ;;  %v10721_v13 = vpop.permute.xlu0 %3834  ;;  %v3564_v45 = vmul.f32 %v10579_v58, %v10311_v5  ;;  %v3612_v5 = vmul.f32 %v13059_v59, %v3562_v60 }
 0x6da   :  { %v3614_v39 = vmul.f32 %v13059_v59, %v3564_v45  ;;  %v10755_v54 = vadd.f32 %v13060_v34, %v3612_v5 }
 0x6dc   :  { %13080 = vst [vmem:[#allocation62_spill] sm:$0xff] %v10755_v54  ;;  %v10758_v19 = vadd.f32 %v13060_v34, %v3614_v39 }
 0x6dd   :  { %3716 = vrot.lane.b32.xlu2 %v10725_v9, %s6243_s19  ;;  %3724 = vrot.lane.b32.xlu1 %v10728_v11, %s6243_s19 }
 0x6de   :  { %3720 = vrot.lane.b32.xlu0 %v10735_v3, %s6243_s19  ;;  %13081 = vst [vmem:[#allocation57_spill] sm:$0xff] %v10758_v19 }
 0x6df   :  { %v10745_v40 = vpop.permute.xlu2 %3926  ;;  %v10747_v33 = vpop.permute.xlu1 %3942 }
 0x6e0   :  { %v10751_v48 = vpop.permute.xlu0 %3938 }
 0x6e5   :  { %3728 = vrot.lane.b32.xlu2 %v10755_v54, %s6243_s19  ;;  %3736 = vrot.lane.b32.xlu1 %v10758_v19, %s6243_s19 }
 0x6e6   :  { %3732 = vrot.lane.b32.xlu0 %v10763_v12, %s6243_s19 }
 0x6e7   :  { %v10771_v60 = vpop.permute.xlu2 %3854  ;;  %v10773_v45 = vpop.permute.xlu1 %3866 }
 0x6e8   :  { %v10776_v5 = vpop.permute.xlu0 %3862 }
 0x6ed   :  { %3740 = vrot.lane.b32.xlu2 %v10779_v31, %s6243_s19  ;;  %3820 = vrot.lane.b32.xlu1 %v10615_v42, %s6245_s27  ;;  %s6249_s19 = smov 120  }
 0x6ee   :  { %3816 = vrot.lane.b32.xlu0 %v10605_v35, %s6245_s27 }
 0x6ef   :  { %v10787_v58 = vpop.permute.xlu2 %3842  ;;  %v10789_v39 = vpop.permute.xlu1 %3978 }
 0x6f0   :  { %13083 = vst [vmem:[#allocation55_spill] sm:$0xff] %v10787_v58  ;;  %v10791_v22 = vpop.permute.xlu0 %3974 }
 0x6f5   :  { %3824 = vrot.lane.b32.xlu2 %v10608_v17, %s6245_s27  ;;  %3832 = vrot.lane.b32.xlu1 %v10645_v47, %s6245_s27 }
 0x6f6   :  { %3828 = vrot.lane.b32.xlu0 %v10635_v24, %s6245_s27 }
 0x6f7   :  { %v10799_v62 = vpop.permute.xlu2 %3954  ;;  %v10801_v59 = vpop.permute.xlu1 %3982 }
 0x6f8   :  { %13084 = vst [vmem:[#allocation40_spill] sm:$0xff] %v10799_v62  ;;  %v10803_v34 = vpop.permute.xlu0 %3870 }
 0x6fd   :  { %3836 = vrot.lane.b32.xlu2 %v10638_v57, %s6245_s27  ;;  %3936 = vrot.lane.b32.xlu1 %v10608_v17, %s6240_s25 }
 0x6fe   :  { %3840 = vrot.lane.b32.xlu0 %v10665_v56, %s6245_s27 }
 0x6ff   :  { %v10811_v44 = vpop.permute.xlu2 %3878  ;;  %v10813_v58 = vpop.permute.xlu1 %3850 }
 0x700   :  { %13085 = vst [vmem:[#allocation34_spill] sm:$0xff] %v10811_v44  ;;  %v10815_v29 = vpop.permute.xlu0 %3930 }
 0x705   :  { %3940 = vrot.lane.b32.xlu2 %v10635_v24, %s6240_s25  ;;  %3860 = vrot.lane.b32.xlu1 %v10698_v55, %s6245_s27 }
 0x706   :  { %3944 = vrot.lane.b32.xlu0 %v10645_v47, %s6240_s25 }
 0x707   :  { %v10823_v62 = vpop.permute.xlu2 %3990  ;;  %v10825_v17 = vpop.permute.xlu1 %3966 }
 0x708   :  { %13086 = vst [vmem:[#allocation36_spill] sm:$0xff] %v10823_v62  ;;  %v10827_v25 = vpop.permute.xlu0 %3962 }
 0x70d   :  { %3864 = vrot.lane.b32.xlu2 %v10725_v9, %s6245_s27  ;;  %3972 = vrot.lane.b32.xlu1 %v10698_v55, %s6240_s25 }
 0x70e   :  { %3868 = vrot.lane.b32.xlu0 %v10735_v3, %s6245_s27 }
 0x70f   :  { %v10835_v24 = vpop.permute.xlu2 %3998  ;;  %v10837_v44 = vpop.permute.xlu1 %3950 }
 0x710   :  { %13087 = vst [vmem:[#allocation52_spill] sm:$0xff] %v10835_v24  ;;  %v10839_v47 = vpop.permute.xlu0 %3846 }
 0x711   :  { %13088 = vst [vmem:[#allocation41_spill] sm:$0xff] %v10837_v44 }
 0x712   :  { %13089 = vst [vmem:[#allocation37_spill] sm:$0xff] %v10839_v47 }
 0x715   :  { %3976 = vrot.lane.b32.xlu2 %v10725_v9, %s6240_s25  ;;  %3948 = vrot.lane.b32.xlu1 %v10638_v57, %s6240_s25 }
 0x716   :  { %3980 = vrot.lane.b32.xlu0 %v10735_v3, %s6240_s25 }
 0x717   :  { %v10847_v62 = vpop.permute.xlu2 %3668  ;;  %v10849_v55 = vpop.permute.xlu1 %3874 }
 0x718   :  { %13090 = vst [vmem:[#allocation15_spill] sm:$0xff] %v10847_v62  ;;  %v10851_v15 = vpop.permute.xlu0 %3958 }
 0x719   :  { %13091 = vst [vmem:[#allocation16_spill] sm:$0xff] %v10849_v55 }
 0x71d   :  { %3872 = vrot.lane.b32.xlu2 %v10728_v11, %s6245_s27  ;;  %3928 = vrot.lane.b32.xlu1 %v10605_v35, %s6240_s25 }
 0x71e   :  { %3984 = vrot.lane.b32.xlu0 %v10728_v11, %s6240_s25 }
 0x71f   :  { %v10859_v9 = vpop.permute.xlu2 %3680  ;;  %v10861_v57 = vpop.permute.xlu1 %3986 }
 0x720   :  { %13092 = vst [vmem:[#allocation17_spill] sm:$0xff] %v10859_v9  ;;  %v10863_v3 = vpop.permute.xlu0 %3882 }
 0x721   :  { %13093 = vst [vmem:[#allocation13_spill] sm:$0xff] %v10863_v3 }
 0x725   :  { %3932 = vrot.lane.b32.xlu2 %v10615_v42, %s6240_s25  ;;  %3856 = vrot.lane.b32.xlu1 %v10705_v43, %s6245_s27 }
 0x726   :  { %3852 = vrot.lane.b32.xlu0 %v10695_v18, %s6245_s27 }
 0x727   :  { %v10871_v62 = vpop.permute.xlu2 %3692  ;;  %v10873_v35 = vpop.permute.xlu1 %3886 }
 0x728   :  { %13094 = vst [vmem:[#allocation64_spill] sm:$0xff] %v10871_v62  ;;  %v10875_v11 = vpop.permute.xlu0 %3994 }
 0x729   :  { %13095 = vst [vmem:[#allocation63_spill] sm:$0xff] %v10873_v35 }
 0x72a   :  { %13096 = vst [vmem:[#allocation49_spill] sm:$0xff] %v10875_v11 }
 0x72d   :  { %3964 = vrot.lane.b32.xlu2 %v10695_v18, %s6240_s25  ;;  %3844 = vrot.lane.b32.xlu1 %v10675_v20, %s6245_s27 }
 0x72e   :  { %3968 = vrot.lane.b32.xlu0 %v10705_v43, %s6240_s25 }
 0x72f   :  { %v10883_v42 = vpop.permute.xlu2 %3704  ;;  %v10885_v9 = vpop.permute.xlu1 %3676 }
 0x730   :  { %13097 = vst [vmem:[#allocation42_spill] sm:$0xff] %v10883_v42  ;;  %v10887_v24 = vpop.permute.xlu0 %3672 }
 0x731   :  { %13098 = vst [vmem:[#allocation38_spill] sm:$0xff] %v10885_v9 }
 0x732   :  { %13099 = vst [vmem:[#allocation51_spill] sm:$0xff] %v10887_v24 }
 0x735   :  { %3848 = vrot.lane.b32.xlu2 %v10668_v51, %s6245_s27  ;;  %3956 = vrot.lane.b32.xlu1 %v10675_v20, %s6240_s25 }
 0x736   :  { %3952 = vrot.lane.b32.xlu0 %v10665_v56, %s6240_s25 }
 0x737   :  { %v10895_v62 = vpop.permute.xlu2 %3716  ;;  %v10897_v18 = vpop.permute.xlu1 %3688 }
 0x738   :  { %13100 = vst [vmem:[#allocation19_spill] sm:$0xff] %v10895_v62  ;;  %v10899_v43 = vpop.permute.xlu0 %3684 }
 0x739   :  { %13101 = vst [vmem:[#allocation18_spill] sm:$0xff] %v10897_v18  ;;  %v3920_v18 = vsel %vm2121_vm15, %v10691_v52, %v10687_v53 }
 0x73a   :  { %13102 = vst [vmem:[#allocation29_spill] sm:$0xff] %v10899_v43 }
 0x73d   :  { %3960 = vrot.lane.b32.xlu2 %v10668_v51, %s6240_s25  ;;  %3880 = vrot.lane.b32.xlu1 %v10763_v12, %s6245_s27 }
 0x73e   :  { %3876 = vrot.lane.b32.xlu0 %v10755_v54, %s6245_s27 }
 0x73f   :  { %v10907_v42 = vpop.permute.xlu2 %3728  ;;  %v10909_v20 = vpop.permute.xlu1 %3700 }
 0x740   :  { %13103 = vst [vmem:[#allocation30_spill] sm:$0xff] %v10907_v42  ;;  %v10911_v56 = vpop.permute.xlu0 %3696  ;;  %v4030_v42 = vsel %vm2198_vm10, %v10751_v48, %v10747_v33 }
 0x741   :  { %13104 = vst [vmem:[#allocation23_spill] sm:$0xff] %v10909_v20  ;;  %v13109_v20 = vld [vmem:[#allocation7_spill] sm:$0xff] }
 0x742   :  { %13105 = vst [vmem:[#allocation65_spill] sm:$0xff] %v10911_v56  ;;  %v4014_v56 = vsel %vm2198_vm10, %v10685_v0, %v10791_v22  ;;  %vm4271_vm11 = vcmp.lt.s32.totalorder %v13109_v20, 120  ;;  %vm4368_vm12 = vcmp.lt.s32.totalorder %v13109_v20, 116 }
 0x745   :  { %3884 = vrot.lane.b32.xlu2 %v10758_v19, %s6245_s27  ;;  %3992 = vrot.lane.b32.xlu1 %v10763_v12, %s6240_s25  ;;  %v4032_v12 = vsel %vm2198_vm10, %v10625_v28, %v10751_v48  ;;  %v3918_v48 = vsel %vm2121_vm15, %v10687_v53, %v10595_v32 }
 0x746   :  { %3988 = vrot.lane.b32.xlu0 %v10755_v54, %s6240_s25  ;;  %v3754_v54 = vsel %vm1967_vm14, %v10539_v26, %v10601_v10  ;;  %v4040_v3 = vmax.f32 %v3920_v18, %v4032_v12  ;;  %v4012_v12 = vsel %vm2198_vm10, %v10791_v22, %v10789_v39 }
 0x747   :  { %v10919_v51 = vpop.permute.xlu2 %3740  ;;  %v10921_v24 = vpop.permute.xlu1 %3712  ;;  %v3789_v55 = vmax.f32 %v10411_v23, %v3754_v54 }
 0x748   :  { %13106 = vst [vmem:[#allocation50_spill] sm:$0xff] %v10919_v51  ;;  %v10923_v43 = vpop.permute.xlu0 %3708  ;;  %v3770_v51 = vsel %vm1967_vm14, %v10555_v63, %v10553_v50 }
 0x749   :  { %13107 = vst [vmem:[#allocation43_spill] sm:$0xff] %v10921_v24  ;;  %v4041_v24 = vmax.f32 %v3918_v48, %v4030_v42  ;;  %v4028_v42 = vsel %vm2198_vm10, %v10747_v33, %v10715_v38  ;;  %v3898_v33 = vsel %vm2121_vm15, %v10773_v45, %v10803_v34 }
 0x74a   :  { %13108 = vst [vmem:[#allocation44_spill] sm:$0xff] %v10923_v43  ;;  %v3772_v43 = vsel %vm1967_vm14, %v10515_v4, %v10555_v63 }
 0x74b   :  { %v3780_v63 = vmax.f32 %v10341_v1, %v3772_v43  ;;  %v3768_v1 = vsel %vm1967_vm14, %v10553_v50, %v10523_v37 }
 0x74c   :  { %v3782_v53 = vmax.f32 %v10366_v8, %v3768_v1  ;;  %v3750_v8 = vsel %vm1967_vm14, %v10597_v16, %v10551_v21 }
 0x74d   :  { %3996 = vrot.lane.b32.xlu2 %v10758_v19, %s6240_s25  ;;  %4000 = vrot.lane.b32.xlu1 %v10779_v31, %s6240_s25  ;;  %v3902_v19 = vsel %vm2121_vm15, %v10655_v14, %v10776_v5 }
 0x74e   :  { %3888 = vrot.lane.b32.xlu0 %v10779_v31, %s6245_s27  ;;  %v4049_v62 = vmax.f32 %v3902_v19, %v4014_v56  ;;  %v3781_v31 = vmax.f32 %v10373_v6, %v3770_v51  ;;  %v10982_v19 = vmax.f32 %v3780_v63, %v4040_v3  ;;  %v3916_v6 = vsel %vm2121_vm15, %v10595_v32, %v10721_v13  ;;  %s6250_s27 = smov 116  }
 0x74f   :  { %v10967_v9 = vpop.permute.xlu2 %3824  ;;  %v10969_v35 = vpop.permute.xlu1 %3724  ;;  %v3752_v51 = vsel %vm1967_vm14, %v10601_v10, %v10597_v16  ;;  %v4042_v23 = vmax.f32 %v3916_v6, %v4028_v42  ;;  %v4010_v3 = vsel %vm2198_vm10, %v10789_v39, %v10801_v59  ;;  %v3758_v63 = vsel %vm1967_vm14, %v10581_v49, %v10577_v46 }
 0x750   :  { %13110 = vst [vmem:[#allocation7_spill] sm:$0xff] %v10969_v35  ;;  %v10971_v11 = vpop.permute.xlu0 %3720  ;;  %v4077_v47 = vmax.f32 %v3781_v31, %v4041_v24  ;;  %v10976_v44 = vmax.f32 %v3789_v55, %v4049_v62  ;;  %v3900_v24 = vsel %vm2121_vm15, %v10776_v5, %v10773_v45  ;;  %v3790_v18 = vmax.f32 %v10445_v7, %v3752_v51 }
 0x751   :  { %13112 = vst [vmem:[#allocation69_spill] sm:$0xff] %v10982_v19  ;;  %v4050_v56 = vmax.f32 %v3900_v24, %v4012_v12  ;;  %v11017_v43 = vmax.f32 %v3782_v53, %v4042_v23  ;;  %v4051_v7 = vmax.f32 %v3898_v33, %v4010_v3  ;;  %v3791_v45 = vmax.f32 %v10438_v61, %v3750_v8 }
 0x752   :  { %13111 = vst [vmem:[#allocation68_spill] sm:$0xff] %v10976_v44  ;;  %v4034_v61 = vsel %vm2198_vm10, %v10815_v29, %v10625_v28  ;;  %v4036_v31 = vsel %vm2198_vm10, %v10745_v40, %v10815_v29  ;;  %v3774_v28 = vsel %vm1967_vm14, %v10541_v41, %v10515_v4  ;;  %v3922_v29 = vsel %vm2121_vm15, %v10575_v2, %v10691_v52 }
 0x753   :  { %v4086_v10 = vmax.f32 %v3790_v18, %v4050_v56  ;;  %v11042_v22 = vmax.f32 %v3791_v45, %v4051_v7  ;;  %v3906_v40 = vsel %vm2121_vm15, %v10813_v58, %v10771_v60  ;;  %v3776_v4 = vsel %vm1967_vm14, %v10543_v36, %v10541_v41  ;;  %v13118_v56 = vld [vmem:[#allocation22_spill] sm:$0xff]  ;;  %v13119_v18 = vld [vmem:[#allocation20_spill] sm:$0xff]  ;;  %v13123_v7 = vld [vmem:[#allocation25_spill] sm:$0xff] }
 0x754   :  { %v3924_v42 = vsel %vm2121_vm15, %v10657_v30, %v10575_v2  ;;  %v4039_v12 = vmax.f32 %v3922_v29, %v4034_v61  ;;  %v3779_v24 = vmax.f32 %v10344_v27, %v3774_v28  ;;  %v3787_v53 = vmax.f32 %v13118_v56, %v3758_v63  ;;  %v13126_v28 = vld [vmem:[#allocation40_spill] sm:$0xff] }
 0x755   :  { %4122 = vrot.lane.b32.xlu1 %v4077_v47, %s6248_s9  ;;  %4150 = vrot.lane.b32.xlu2 %v10976_v44, %s6248_s9  ;;  %v4038_v51 = vmax.f32 %v3924_v42, %v4036_v31  ;;  %v3778_v41 = vmax.f32 %v13119_v18, %v3776_v4  ;;  %v4016_v2 = vsel %vm2198_vm10, %v10825_v17, %v10685_v0  ;;  %v13127_v29 = vld [vmem:[#allocation36_spill] sm:$0xff]  ;;  %v13128_v4 = vld [vmem:[#allocation41_spill] sm:$0xff] }
 0x756   :  { %4118 = vrot.lane.b32.xlu0 %v10982_v19, %s6248_s9  ;;  %v4075_v36 = vmax.f32 %v3779_v24, %v4039_v12  ;;  %v3756_v27 = vsel %vm1967_vm14, %v10577_v46, %v10539_v26  ;;  %v3904_v30 = vsel %vm2121_vm15, %v10771_v60, %v10655_v14  ;;  %v4022_v63 = vsel %vm2198_vm10, %v13126_v28, %v10851_v15  ;;  %v13129_v12 = vld [vmem:[#allocation59_spill] sm:$0xff]  ;;  %v13131_v24 = vld [vmem:[#allocation33_spill] sm:$0xff]  ;;  %v13132_v56 = vld [vmem:[#allocation32_spill] sm:$0xff] }
 0x757   :  { %v11009_v50 = vpop.permute.xlu2 %3836  ;;  %v11011_v55 = vpop.permute.xlu1 %3736  ;;  %v11106_v3 = vmax.f32 %v3778_v41, %v4038_v51  ;;  %v4048_v0 = vmax.f32 %v3904_v30, %v4016_v2  ;;  %v3788_v45 = vmax.f32 %v13123_v7, %v3756_v27  ;;  %v4024_v42 = vsel %vm2198_vm10, %v13128_v4, %v13126_v28  ;;  %v13133_v18 = vld [vmem:[#allocation37_spill] sm:$0xff]  ;;  %v13134_v41 = vld [vmem:[#allocation55_spill] sm:$0xff]  ;;  %v13135_v2 = vld [vmem:[#allocation34_spill] sm:$0xff] }
 0x758   :  { %13113 = vst [vmem:[#allocation70_spill] sm:$0xff] %v11011_v55  ;;  %v11013_v32 = vpop.permute.xlu0 %3732  ;;  %v13136_v27 = vld [vmem:[#allocation16_spill] sm:$0xff] }
 0x759   :  { %13114 = vst [vmem:[#allocation71_spill] sm:$0xff] %v11013_v32  ;;  %v4084_v61 = vmax.f32 %v3788_v45, %v4048_v0  ;;  %v3894_v30 = vsel %vm2121_vm15, %v13136_v27, %v13135_v2  ;;  %v13137_v0 = vld [vmem:[#allocation14_spill] sm:$0xff]  ;;  %v13138_v45 = vld [vmem:[#allocation27_spill] sm:$0xff] }
 0x75a   :  { %13121 = vst [vmem:[#allocation20_spill] sm:$0xff] %v11106_v3 }
 0x75d   :  { %4215 = vrot.lane.b32.xlu1 %v4077_v47, %s6249_s19  ;;  %4219 = vrot.lane.b32.xlu2 %v11017_v43, %s6249_s19 }
 0x75e   :  { %4154 = vrot.lane.b32.xlu0 %v4086_v10, %s6248_s9 }
 0x75f   :  { %v11035_v54 = vpop.permute.xlu2 %3940  ;;  %v11037_v5 = vpop.permute.xlu1 %3820 }
 0x760   :  { %13115 = vst [vmem:[#allocation72_spill] sm:$0xff] %v11037_v5  ;;  %v11039_v39 = vpop.permute.xlu0 %3816 }
 0x761   :  { %13116 = vst [vmem:[#allocation73_spill] sm:$0xff] %v11039_v39  ;;  %v13141_v39 = vld [vmem:[#allocation46_spill] sm:$0xff] }
 0x765   :  { %4312 = vrot.lane.b32.xlu2 %v4077_v47, %s6250_s27  ;;  %4251 = vrot.lane.b32.xlu1 %v11042_v22, %s6249_s19  ;;  %v4018_v47 = vsel %vm2198_vm10, %v10827_v25, %v10825_v17 }
 0x766   :  { %4247 = vrot.lane.b32.xlu0 %v4086_v10, %s6249_s19  ;;  %v4047_v52 = vmax.f32 %v3906_v40, %v4018_v47  ;;  %v4006_v40 = vsel %vm2198_vm10, %v10861_v57, %v13127_v29 }
 0x767   :  { %v11048_v16 = vpop.permute.xlu2 %3864  ;;  %v11050_v62 = vpop.permute.xlu1 %3832 }
 0x768   :  { %v11052_v48 = vpop.permute.xlu0 %3828 }
 0x76d   :  { %4348 = vrot.lane.b32.xlu2 %v11042_v22, %s6250_s27  ;;  %4344 = vrot.lane.b32.xlu1 %v4086_v10, %s6250_s27  ;;  %v11104_v10 = vmax.f32 %v3787_v53, %v4047_v52  ;;  %v13130_v52 = vld [vmem:[#allocation31_spill] sm:$0xff]  ;;  %v3746_v53 = vsel %vm1967_vm14, %v13132_v56, %v13131_v24 }
 0x76e   :  { %4316 = vrot.lane.b32.xlu0 %v11017_v43, %s6250_s27  ;;  %v3762_v51 = vsel %vm1967_vm14, %v13130_v52, %v13129_v12  ;;  %v3764_v7 = vsel %vm1967_vm14, %v13137_v0, %v13130_v52 }
 0x76f   :  { %v11095_v1 = vpop.permute.xlu2 %3976  ;;  %v11097_v6 = vpop.permute.xlu1 %3936  ;;  %13120 = vst [vmem:[#allocation22_spill] sm:$0xff] %v11104_v10  ;;  %v3784_v52 = vmax.f32 %v13141_v39, %v3764_v7  ;;  %v13151_v7 = vld [vmem:[#allocation60_spill] sm:$0xff] }
 0x770   :  { %v11099_v23 = vpop.permute.xlu0 %3840 }
 0x771   :  { %13117 = vst [vmem:[#allocation74_spill] sm:$0xff] %v11099_v23 }
 0x775   :  { %4114 = vrot.lane.b32.xlu1 %v4075_v36, %s6248_s9  ;;  %4142 = vrot.lane.b32.xlu2 %v11104_v10, %s6248_s9  ;;  %v4053_v10 = vmax.f32 %v3894_v30, %v4006_v40  ;;  %v13144_v40 = vld [vmem:[#allocation49_spill] sm:$0xff] }
 0x776   :  { %4110 = vrot.lane.b32.xlu0 %v11106_v3, %s6248_s9 }
 0x777   :  { %v11125_v33 = vpop.permute.xlu2 %3872  ;;  %v11127_v17 = vpop.permute.xlu1 %3860 }
 0x778   :  { %13122 = vst [vmem:[#allocation75_spill] sm:$0xff] %v11125_v33  ;;  %v11129_v8 = vpop.permute.xlu0 %3944 }
 0x77d   :  { %4207 = vrot.lane.b32.xlu1 %v4075_v36, %s6249_s19  ;;  %4211 = vrot.lane.b32.xlu2 %v10982_v19, %s6249_s19 }
 0x77e   :  { %4146 = vrot.lane.b32.xlu0 %v4084_v61, %s6248_s9 }
 0x77f   :  { %v11136_v26 = vpop.permute.xlu2 %3932  ;;  %v11138_v46 = vpop.permute.xlu1 %3972 }
 0x780   :  { %13124 = vst [vmem:[#allocation25_spill] sm:$0xff] %v11136_v26  ;;  %v11140_v14 = vpop.permute.xlu0 %3868 }
 0x785   :  { %4243 = vrot.lane.b32.xlu1 %v10976_v44, %s6249_s19  ;;  %4304 = vrot.lane.b32.xlu2 %v4075_v36, %s6250_s27  ;;  %v3910_v36 = vsel %vm2121_vm15, %v13134_v41, %v13133_v18 }
 0x786   :  { %4239 = vrot.lane.b32.xlu0 %v4084_v61, %s6249_s19  ;;  %v4045_v28 = vmax.f32 %v3910_v36, %v4022_v63  ;;  %v4020_v63 = vsel %vm2198_vm10, %v10851_v15, %v10827_v25  ;;  %v3908_v25 = vsel %vm2121_vm15, %v13133_v18, %v10813_v58  ;;  %v13145_v15 = vld [vmem:[#allocation8_spill] sm:$0xff] }
 0x787   :  { %v11146_v60 = vpop.permute.xlu2 %3964  ;;  %v11148_v47 = vpop.permute.xlu1 %3948  ;;  %v4046_v39 = vmax.f32 %v3908_v25, %v4020_v63  ;;  %v13150_v36 = vld [vmem:[#allocation52_spill] sm:$0xff] }
 0x788   :  { %13125 = vst [vmem:[#allocation76_spill] sm:$0xff] %v11146_v60  ;;  %v11150_v31 = vpop.permute.xlu0 %3980  ;;  %v13140_v60 = vld [vmem:[#allocation6_spill] sm:$0xff] }
 0x789   :  { %v3793_v33 = vmax.f32 %v13140_v60, %v3746_v53 }
 0x78b   :  { %v11202_v35 = vmax.f32 %v3793_v33, %v4053_v10 }
 0x78d   :  { %4336 = vrot.lane.b32.xlu1 %v4084_v61, %s6250_s27  ;;  %4340 = vrot.lane.b32.xlu2 %v10976_v44, %s6250_s27  ;;  %v3912_v61 = vsel %vm2121_vm15, %v13138_v45, %v13134_v41  ;;  %13142 = vst [vmem:[#allocation40_spill] sm:$0xff] %v11202_v35  ;;  %v13149_v41 = vld [vmem:[#allocation63_spill] sm:$0xff] }
 0x78e   :  { %4308 = vrot.lane.b32.xlu0 %v10982_v19, %s6250_s27  ;;  %v4044_v32 = vmax.f32 %v3912_v61, %v4024_v42  ;;  %v13139_v19 = vld [vmem:[#allocation45_spill] sm:$0xff]  ;;  %v4004_v42 = vsel %vm2198_vm10, %v13127_v29, %v13144_v40  ;;  %v3742_v61 = vsel %vm1967_vm14, %v13145_v15, %v13151_v7 }
 0x78f   :  { %v11193_v3 = vpop.permute.xlu2 %3848  ;;  %v11195_v44 = vpop.permute.xlu1 %3928  ;;  %v3785_v23 = vmax.f32 %v13139_v19, %v3762_v51  ;;  %v3760_v19 = vsel %vm1967_vm14, %v13129_v12, %v10581_v49  ;;  %v13147_v29 = vld [vmem:[#allocation21_spill] sm:$0xff]  ;;  %v13148_v51 = vld [vmem:[#allocation4_spill] sm:$0xff] }
 0x790   :  { %v11197_v55 = vpop.permute.xlu0 %3984  ;;  %v11204_v26 = vmax.f32 %v3784_v52, %v4044_v32  ;;  %v3744_v32 = vsel %vm1967_vm14, %v13131_v24, %v13145_v15  ;;  %v3786_v12 = vmax.f32 %v13147_v29, %v3760_v19 }
 0x791   :  { %v4081_v5 = vmax.f32 %v3785_v23, %v4045_v28  ;;  %v13146_v23 = vld [vmem:[#allocation13_spill] sm:$0xff]  ;;  %v3794_v53 = vmax.f32 %v13148_v51, %v3744_v32 }
 0x792   :  { %13143 = vst [vmem:[#allocation36_spill] sm:$0xff] %v11204_v26  ;;  %v3892_v10 = vsel %vm2121_vm15, %v13135_v2, %v13146_v23  ;;  %v4082_v18 = vmax.f32 %v3786_v12, %v4046_v39  ;;  %v3890_v24 = vsel %vm2121_vm15, %v13146_v23, %v13149_v41  ;;  %v4002_v2 = vsel %vm2198_vm10, %v13144_v40, %v13150_v36  ;;  %v13152_v40 = vld [vmem:[#allocation58_spill] sm:$0xff]  ;;  %v13153_v12 = vld [vmem:[#allocation24_spill] sm:$0xff] }
 0x793   :  { %v4054_v60 = vmax.f32 %v3892_v10, %v4004_v42  ;;  %v4055_v28 = vmax.f32 %v3890_v24, %v4002_v2  ;;  %v3795_v19 = vmax.f32 %v13152_v40, %v3742_v61  ;;  %v4026_v23 = vsel %vm2198_vm10, %v10715_v38, %v13128_v4  ;;  %v13155_v41 = vld [vmem:[#allocation12_spill] sm:$0xff]  ;;  %v13157_v2 = vld [vmem:[#allocation17_spill] sm:$0xff] }
 0x794   :  { %v3914_v10 = vsel %vm2121_vm15, %v10721_v13, %v13138_v45  ;;  %v3748_v13 = vsel %vm1967_vm14, %v10551_v21, %v13132_v56  ;;  %v3921_v61 = vsel %vm2121_vm15, %v10967_v9, %v11052_v48 }
 0x795   :  { %4166 = vrot.lane.b32.xlu2 %v11202_v35, %s6248_s9  ;;  %4138 = vrot.lane.b32.xlu1 %v4081_v5, %s6248_s9  ;;  %v4090_v30 = vmax.f32 %v3794_v53, %v4054_v60  ;;  %v4091_v25 = vmax.f32 %v3795_v19, %v4055_v28  ;;  %v4043_v60 = vmax.f32 %v3914_v10, %v4026_v23  ;;  %v13160_v23 = vld [vmem:[#allocation35_spill] sm:$0xff] }
 0x796   :  { %4134 = vrot.lane.b32.xlu0 %v11204_v26, %s6248_s9  ;;  %v3792_v24 = vmax.f32 %v13155_v41, %v3748_v13 }
 0x797   :  { %v11235_v49 = vpop.permute.xlu2 %3960  ;;  %v11237_v33 = vpop.permute.xlu1 %3856 }
 0x798   :  { %v11239_v58 = vpop.permute.xlu0 %3852 }
 0x79d   :  { %4231 = vrot.lane.b32.xlu1 %v4081_v5, %s6249_s19  ;;  %4235 = vrot.lane.b32.xlu2 %v4082_v18, %s6249_s19 }
 0x79e   :  { %4170 = vrot.lane.b32.xlu0 %v4090_v30, %s6248_s9 }
 0x79f   :  { %v11258_v52 = vpop.permute.xlu2 %3884  ;;  %v11260_v63 = vpop.permute.xlu1 %3844 }
 0x7a0   :  { %v11262_v42 = vpop.permute.xlu0 %3968 }
 0x7a5   :  { %4328 = vrot.lane.b32.xlu2 %v4081_v5, %s6250_s27  ;;  %4267 = vrot.lane.b32.xlu1 %v4091_v25, %s6249_s19  ;;  %v3766_v5 = vsel %vm1967_vm14, %v10523_v37, %v13137_v0  ;;  %v4008_v37 = vsel %vm2198_vm10, %v10801_v59, %v10861_v57  ;;  %v3896_v0 = vsel %vm2121_vm15, %v10803_v34, %v13136_v27 }
 0x7a6   :  { %4263 = vrot.lane.b32.xlu0 %v4090_v30, %s6249_s19  ;;  %v3783_v51 = vmax.f32 %v13153_v12, %v3766_v5  ;;  %v4052_v59 = vmax.f32 %v3896_v0, %v4008_v37  ;;  %v4033_v27 = vsel %vm2198_vm10, %v11097_v6, %v11035_v54  ;;  %v4013_v12 = vsel %vm2198_vm10, %v11095_v1, %v11150_v31  ;;  %v13162_v37 = vld [vmem:[#allocation43_spill] sm:$0xff] }
 0x7a7   :  { %v11268_v32 = vpop.permute.xlu2 %3996  ;;  %v11270_v15 = vpop.permute.xlu1 %3956  ;;  %v4058_v28 = vmax.f32 %v3921_v61, %v4033_v27 }
 0x7a8   :  { %v11272_v39 = vpop.permute.xlu0 %3952  ;;  %v4079_v53 = vmax.f32 %v3783_v51, %v4043_v60  ;;  %v4088_v36 = vmax.f32 %v3792_v24, %v4052_v59  ;;  %v4015_v60 = vsel %vm2198_vm10, %v11138_v46, %v11095_v1  ;;  %v13161_v51 = vld [vmem:[#allocation19_spill] sm:$0xff]  ;;  %v3903_v1 = vsel %vm2121_vm15, %v11127_v17, %v11048_v16 }
 0x7a9   :  { %v3755_v13 = vsel %vm1967_vm14, %v13162_v37, %v13161_v51  ;;  %v3753_v0 = vsel %vm1967_vm14, %v13161_v51, %v10971_v11  ;;  %v3901_v59 = vsel %vm2121_vm15, %v11048_v16, %v11140_v14  ;;  %v4067_v41 = vmax.f32 %v3903_v1, %v4015_v60  ;;  %v13167_v60 = vld [vmem:[#allocation18_spill] sm:$0xff] }
 0x7aa   :  { %v4068_v24 = vmax.f32 %v3901_v59, %v4013_v12  ;;  %v4029_v16 = vsel %vm2198_vm10, %v11129_v8, %v11148_v47  ;;  %v13168_v12 = vld [vmem:[#allocation29_spill] sm:$0xff] }
 0x7ad   :  { %4364 = vrot.lane.b32.xlu2 %v4091_v25, %s6250_s27  ;;  %4360 = vrot.lane.b32.xlu1 %v4090_v30, %s6250_s27  ;;  %v13158_v30 = vld [vmem:[#allocation38_spill] sm:$0xff] }
 0x7ae   :  { %4332 = vrot.lane.b32.xlu0 %v4082_v18, %s6250_s27  ;;  %v3773_v7 = vsel %vm1967_vm14, %v13158_v30, %v13157_v2 }
 0x7af   :  { %v11289_v29 = vpop.permute.xlu1 %3880  ;;  %v11291_v38 = vpop.permute.xlu2 %4150  ;;  %v3798_v5 = vmax.f32 %v13160_v23, %v3773_v7 }
 0x7b0   :  { %v11293_v4 = vpop.permute.xlu0 %3876 }
 0x7b1   :  { %v11354_v10 = vmax.f32 %v3798_v5, %v4058_v28  ;;  %v13165_v28 = vld [vmem:[#allocation67_spill] sm:$0xff]  ;;  %v13166_v5 = vld [vmem:[#allocation28_spill] sm:$0xff] }
 0x7b2   :  { %v3807_v23 = vmax.f32 %v13165_v28, %v3755_v13  ;;  %v3808_v51 = vmax.f32 %v13166_v5, %v3753_v0  ;;  %v3769_v13 = vsel %vm1967_vm14, %v13168_v12, %v13167_v60  ;;  %v3917_v0 = vsel %vm2121_vm15, %v11050_v62, %v11009_v50  ;;  %v13171_v5 = vld [vmem:[#allocation9_spill] sm:$0xff] }
 0x7b3   :  { %v4060_v1 = vmax.f32 %v3917_v0, %v4029_v16  ;;  %v13175_v0 = vld [vmem:[#allocation51_spill] sm:$0xff] }
 0x7b5   :  { %4126 = vrot.lane.b32.xlu2 %v11017_v43, %s6248_s9  ;;  %4223 = vrot.lane.b32.xlu1 %v4079_v53, %s6249_s19 }
 0x7b6   :  { %4130 = vrot.lane.b32.xlu0 %v4079_v53, %s6248_s9 }
 0x7b7   :  { %v11312_v45 = vpop.permute.xlu1 %3992  ;;  %v11314_v57 = vpop.permute.xlu2 %4219 }
 0x7b8   :  { %13154 = vst [vmem:[#allocation41_spill] sm:$0xff] %v11314_v57  ;;  %v11316_v18 = vpop.permute.xlu0 %3988 }
 0x7bd   :  { %4158 = vrot.lane.b32.xlu2 %v11042_v22, %s6248_s9  ;;  %4259 = vrot.lane.b32.xlu1 %v11202_v35, %s6249_s19 }
 0x7be   :  { %4162 = vrot.lane.b32.xlu0 %v4088_v36, %s6248_s9 }
 0x7bf   :  { %v11324_v21 = vpop.permute.xlu1 %4000  ;;  %v11326_v34 = vpop.permute.xlu2 %4312 }
 0x7c0   :  { %13156 = vst [vmem:[#allocation59_spill] sm:$0xff] %v11326_v34  ;;  %v11328_v56 = vpop.permute.xlu0 %3888 }
 0x7c5   :  { %4227 = vrot.lane.b32.xlu2 %v11204_v26, %s6249_s19  ;;  %4324 = vrot.lane.b32.xlu1 %v11204_v26, %s6250_s27  ;;  %v11395_v26 = vmax.f32 %v3808_v51, %v4068_v24 }
 0x7c6   :  { %4255 = vrot.lane.b32.xlu0 %v4088_v36, %s6249_s19 }
 0x7c7   :  { %v11347_v40 = vpop.permute.xlu1 %4122  ;;  %v11349_v19 = vpop.permute.xlu2 %4348 }
 0x7c8   :  { %v11351_v25 = vpop.permute.xlu0 %4118 }
 0x7c9   :  { %13159 = vst [vmem:[#allocation31_spill] sm:$0xff] %v11351_v25 }
 0x7cd   :  { %4356 = vrot.lane.b32.xlu1 %v11202_v35, %s6250_s27  ;;  %4120 = vrot.lane.b32.xlu2 %v11354_v10, %s6248_s9  ;;  %v11393_v35 = vmax.f32 %v3807_v23, %v4067_v41  ;;  %v13170_v23 = vld [vmem:[#allocation47_spill] sm:$0xff] }
 0x7ce   :  { %4320 = vrot.lane.b32.xlu0 %v4079_v53, %s6250_s27  ;;  %v4031_v53 = vsel %vm2198_vm10, %v11035_v54, %v11129_v8  ;;  %v3771_v54 = vsel %vm1967_vm14, %v13157_v2, %v13168_v12  ;;  %v3919_v8 = vsel %vm2121_vm15, %v11052_v48, %v11050_v62 }
 0x7cf   :  { %v11385_v27 = vpop.permute.xlu1 %4215  ;;  %v11387_v7 = vpop.permute.xlu2 %4142  ;;  %v4059_v24 = vmax.f32 %v3919_v8, %v4031_v53  ;;  %v3799_v51 = vmax.f32 %v13171_v5, %v3771_v54  ;;  %v13174_v53 = vld [vmem:[#allocation25_spill] sm:$0xff]  ;;  %v13176_v54 = vld [vmem:[#allocation15_spill] sm:$0xff] }
 0x7d0   :  { %13163 = vst [vmem:[#allocation33_spill] sm:$0xff] %v11385_v27  ;;  %v11389_v61 = vpop.permute.xlu0 %4154  ;;  %v4037_v12 = vsel %vm2198_vm10, %v11195_v44, %v13174_v53  ;;  %v3777_v8 = vsel %vm1967_vm14, %v13176_v54, %v13175_v0  ;;  %v13183_v27 = vld [vmem:[#allocation5_spill] sm:$0xff] }
 0x7d1   :  { %13164 = vst [vmem:[#allocation32_spill] sm:$0xff] %v11387_v7  ;;  %v4095_v2 = vmax.f32 %v3799_v51, %v4059_v24  ;;  %v13178_v24 = vld [vmem:[#allocation72_spill] sm:$0xff] }
 0x7d5   :  { %4152 = vrot.lane.b32.xlu1 %v11393_v35, %s6248_s9  ;;  %4156 = vrot.lane.b32.xlu2 %v11395_v26, %s6248_s9 }
 0x7d6   :  { %4352 = vrot.lane.b32.xlu0 %v4088_v36, %s6250_s27  ;;  %v3800_v36 = vmax.f32 %v13170_v23, %v3769_v13  ;;  %v4011_v13 = vsel %vm2198_vm10, %v11150_v31, %v11197_v55  ;;  %v13179_v23 = vld [vmem:[#allocation73_spill] sm:$0xff] }
 0x7d7   :  { %v11426_v59 = vpop.permute.xlu1 %4251  ;;  %v11428_v41 = vpop.permute.xlu2 %4211  ;;  %v3925_v31 = vsel %vm2121_vm15, %v13179_v23, %v13178_v24 }
 0x7d8   :  { %13169 = vst [vmem:[#allocation37_spill] sm:$0xff] %v11428_v41  ;;  %v11430_v28 = vpop.permute.xlu0 %4247  ;;  %v11434_v7 = vmax.f32 %v3800_v36, %v4060_v1  ;;  %v13177_v1 = vld [vmem:[#allocation7_spill] sm:$0xff]  ;;  %v4056_v51 = vmax.f32 %v3925_v31, %v4037_v12 }
 0x7d9   :  { %v3751_v44 = vsel %vm1967_vm14, %v10971_v11, %v13177_v1  ;;  %v13180_v36 = vld [vmem:[#allocation75_spill] sm:$0xff] }
 0x7da   :  { %v3899_v5 = vsel %vm2121_vm15, %v11140_v14, %v13180_v36  ;;  %v13182_v11 = vld [vmem:[#allocation39_spill] sm:$0xff]  ;;  %v3809_v57 = vmax.f32 %v13183_v27, %v3751_v44  ;;  %v4017_v14 = vsel %vm2198_vm10, %v11262_v42, %v11138_v46  ;;  %v13186_v27 = vld [vmem:[#allocation44_spill] sm:$0xff] }
 0x7dd   :  { %4221 = vrot.lane.b32.xlu1 %v11434_v7, %s6249_s19  ;;  %4249 = vrot.lane.b32.xlu2 %v11395_v26, %s6249_s19 }
 0x7de   :  { %4124 = vrot.lane.b32.xlu0 %v4095_v2, %s6248_s9 }
 0x7df   :  { %v11441_v62 = vpop.permute.xlu1 %4344  ;;  %v11443_v48 = vpop.permute.xlu2 %4304 }
 0x7e0   :  { %13172 = vst [vmem:[#allocation55_spill] sm:$0xff] %v11443_v48  ;;  %v11445_v16 = vpop.permute.xlu0 %4316  ;;  %v4069_v48 = vmax.f32 %v3899_v5, %v4011_v13  ;;  %v13189_v5 = vld [vmem:[#allocation10_spill] sm:$0xff] }
 0x7e1   :  { %13173 = vst [vmem:[#allocation34_spill] sm:$0xff] %v11445_v16  ;;  %v3796_v16 = vmax.f32 %v13182_v11, %v3777_v8  ;;  %v13190_v11 = vld [vmem:[#allocation26_spill] sm:$0xff] }
 0x7e2   :  { %v11485_v25 = vmax.f32 %v3809_v57, %v4069_v48  ;;  %v3757_v57 = vsel %vm1967_vm14, %v13186_v27, %v13162_v37  ;;  %v13187_v48 = vld [vmem:[#allocation42_spill] sm:$0xff] }
 0x7e3   :  { %v11483_v23 = vmax.f32 %v3796_v16, %v4056_v51  ;;  %v3759_v46 = vsel %vm1967_vm14, %v13187_v48, %v13186_v27  ;;  %v3907_v16 = vsel %vm2121_vm15, %v11239_v58, %v11237_v33 }
 0x7e4   :  { %v3805_v51 = vmax.f32 %v13189_v5, %v3759_v46 }
 0x7e5   :  { %4314 = vrot.lane.b32.xlu1 %v4095_v2, %s6250_s27  ;;  %4318 = vrot.lane.b32.xlu2 %v11434_v7, %s6250_s27  ;;  %13184 = vst [vmem:[#allocation14_spill] sm:$0xff] %v11483_v23 }
 0x7e6   :  { %4217 = vrot.lane.b32.xlu0 %v4095_v2, %s6249_s19  ;;  %v13185_v2 = vld [vmem:[#allocation76_spill] sm:$0xff] }
 0x7e7   :  { %v11475_v54 = vpop.permute.xlu1 %4114  ;;  %v11477_v41 = vpop.permute.xlu2 %4340  ;;  %v4019_v12 = vsel %vm2198_vm10, %v13185_v2, %v11262_v42  ;;  %v3905_v42 = vsel %vm2121_vm15, %v11237_v33, %v11127_v17  ;;  %v3806_v17 = vmax.f32 %v13190_v11, %v3757_v57  ;;  %v4035_v33 = vsel %vm2198_vm10, %v13174_v53, %v11097_v6 }
 0x7e8   :  { %13181 = vst [vmem:[#allocation16_spill] sm:$0xff] %v11477_v41  ;;  %v11479_v34 = vpop.permute.xlu0 %4110  ;;  %v4065_v13 = vmax.f32 %v3907_v16, %v4019_v12  ;;  %v4066_v37 = vmax.f32 %v3905_v42, %v4017_v14  ;;  %v3775_v14 = vsel %vm1967_vm14, %v13175_v0, %v13158_v30  ;;  %v3923_v12 = vsel %vm2121_vm15, %v13178_v24, %v10967_v9  ;;  %v13195_v42 = vld [vmem:[#allocation56_spill] sm:$0xff] }
 0x7e9   :  { %v4057_v53 = vmax.f32 %v3923_v12, %v4035_v33  ;;  %v3797_v16 = vmax.f32 %v13195_v42, %v3775_v14  ;;  %v4025_v24 = vsel %vm2198_vm10, %v11272_v39, %v11270_v15 }
 0x7ea   :  { %v11525_v27 = vmax.f32 %v3805_v51, %v4065_v13  ;;  %v13198_v13 = vld [vmem:[#allocation65_spill] sm:$0xff]  ;;  %v13200_v51 = vld [vmem:[#allocation74_spill] sm:$0xff] }
 0x7eb   :  { %v3913_v11 = vsel %vm2121_vm15, %v13200_v51, %v11260_v63 }
 0x7ec   :  { %13191 = vst [vmem:[#allocation45_spill] sm:$0xff] %v11525_v27 }
 0x7ed   :  { %4112 = vrot.lane.b32.xlu2 %v11483_v23, %s6248_s9  ;;  %4350 = vrot.lane.b32.xlu1 %v11485_v25, %s6250_s27  ;;  %v4102_v23 = vmax.f32 %v3806_v17, %v4066_v37  ;;  %v13199_v37 = vld [vmem:[#allocation64_spill] sm:$0xff]  ;;  %v4062_v17 = vmax.f32 %v3913_v11, %v4025_v24  ;;  %v13205_v24 = vld [vmem:[#allocation70_spill] sm:$0xff] }
 0x7ee   :  { %4253 = vrot.lane.b32.xlu0 %v11485_v25, %s6249_s19  ;;  %v3765_v5 = vsel %vm1967_vm14, %v13199_v37, %v13198_v13 }
 0x7ef   :  { %v11517_v8 = vpop.permute.xlu1 %4207  ;;  %v11519_v44 = vpop.permute.xlu2 %4166 }
 0x7f0   :  { %13188 = vst [vmem:[#allocation27_spill] sm:$0xff] %v11519_v44  ;;  %v11521_v31 = vpop.permute.xlu0 %4146 }
 0x7f5   :  { %4144 = vrot.lane.b32.xlu1 %v11525_v27, %s6248_s9  ;;  %4148 = vrot.lane.b32.xlu2 %v4102_v23, %s6248_s9  ;;  %v4005_v27 = vsel %vm2198_vm10, %v11312_v45, %v11268_v32 }
 0x7f6   :  { %4346 = vrot.lane.b32.xlu0 %v11395_v26, %s6250_s27  ;;  %v4093_v26 = vmax.f32 %v3797_v16, %v4057_v53  ;;  %v13204_v53 = vld [vmem:[#allocation66_spill] sm:$0xff] }
 0x7f7   :  { %v11544_v57 = vpop.permute.xlu1 %4243  ;;  %v11546_v6 = vpop.permute.xlu2 %4235  ;;  %v3802_v42 = vmax.f32 %v13204_v53, %v3765_v5  ;;  %v13206_v5 = vld [vmem:[#allocation71_spill] sm:$0xff] }
 0x7f8   :  { %13192 = vst [vmem:[#allocation6_spill] sm:$0xff] %v11544_v57  ;;  %v11548_v46 = vpop.permute.xlu0 %4239  ;;  %v3745_v11 = vsel %vm1967_vm14, %v13206_v5, %v13205_v24 }
 0x7f9   :  { %13193 = vst [vmem:[#allocation46_spill] sm:$0xff] %v11546_v6  ;;  %v11584_v16 = vmax.f32 %v3802_v42, %v4062_v17  ;;  %v13207_v17 = vld [vmem:[#allocation30_spill] sm:$0xff]  ;;  %v3895_v42 = vsel %vm2121_vm15, %v11293_v4, %v11289_v29 }
 0x7fa   :  { %13194 = vst [vmem:[#allocation49_spill] sm:$0xff] %v11548_v46  ;;  %v3747_v53 = vsel %vm1967_vm14, %v13207_v17, %v13206_v5 }
 0x7fd   :  { %4213 = vrot.lane.b32.xlu1 %v11354_v10, %s6249_s19  ;;  %4241 = vrot.lane.b32.xlu2 %v4102_v23, %s6249_s19 }
 0x7fe   :  { %4116 = vrot.lane.b32.xlu0 %v4093_v26, %s6248_s9 }
 0x7ff   :  { %v11555_v30 = vpop.permute.xlu1 %4336  ;;  %v11557_v9 = vpop.permute.xlu2 %4328 }
 0x800   :  { %13196 = vst [vmem:[#allocation8_spill] sm:$0xff] %v11555_v30  ;;  %v11559_v0 = vpop.permute.xlu0 %4308  ;;  %v13209_v30 = vld [vmem:[#allocation54_spill] sm:$0xff] }
 0x801   :  { %13197 = vst [vmem:[#allocation13_spill] sm:$0xff] %v11557_v9  ;;  %v3812_v41 = vmax.f32 %v13209_v30, %v3745_v11 }
 0x805   :  { %4306 = vrot.lane.b32.xlu1 %v4093_v26, %s6250_s27  ;;  %4310 = vrot.lane.b32.xlu2 %v11354_v10, %s6250_s27 }
 0x806   :  { %4209 = vrot.lane.b32.xlu0 %v4093_v26, %s6249_s19  ;;  %v4007_v26 = vsel %vm2198_vm10, %v11316_v18, %v11312_v45  ;;  %v3893_v45 = vsel %vm2121_vm15, %v11289_v29, %v11258_v52  ;;  %v4021_v29 = vsel %vm2198_vm10, %v11235_v49, %v13185_v2 }
 0x807   :  { %v11577_v33 = vpop.permute.xlu1 %4138  ;;  %v11579_v14 = vpop.permute.xlu2 %4364  ;;  %v4071_v44 = vmax.f32 %v3895_v42, %v4007_v26  ;;  %v13212_v26 = vld [vmem:[#allocation48_spill] sm:$0xff]  ;;  %v4027_v42 = vsel %vm2198_vm10, %v11148_v47, %v11272_v39  ;;  %v13213_v47 = vld [vmem:[#allocation50_spill] sm:$0xff] }
 0x808   :  { %13201 = vst [vmem:[#allocation21_spill] sm:$0xff] %v11577_v33  ;;  %v11581_v12 = vpop.permute.xlu0 %4134  ;;  %v3743_v39 = vsel %vm1967_vm14, %v13205_v24, %v13213_v47  ;;  %v4009_v24 = vsel %vm2198_vm10, %v11197_v55, %v11316_v18  ;;  %v13216_v18 = vld [vmem:[#allocation11_spill] sm:$0xff] }
 0x809   :  { %13202 = vst [vmem:[#allocation4_spill] sm:$0xff] %v11579_v14  ;;  %v4072_v14 = vmax.f32 %v3893_v45, %v4005_v27  ;;  %v3909_v27 = vsel %vm2121_vm15, %v11193_v3, %v11239_v58 }
 0x80a   :  { %13203 = vst [vmem:[#allocation63_spill] sm:$0xff] %v11581_v12  ;;  %v13208_v12 = vld [vmem:[#allocation62_spill] sm:$0xff] }
 0x80b   :  { %v3811_v33 = vmax.f32 %v13208_v12, %v3747_v53  ;;  %v4108_v46 = vmax.f32 %v3812_v41, %v4072_v14  ;;  %v4023_v12 = vsel %vm2198_vm10, %v11270_v15, %v11235_v49  ;;  %v13210_v41 = vld [vmem:[#allocation23_spill] sm:$0xff]  ;;  %v3911_v49 = vsel %vm2121_vm15, %v11260_v63, %v11193_v3 }
 0x80c   :  { %v3761_v2 = vsel %vm1967_vm14, %v13210_v41, %v13187_v48  ;;  %v3763_v58 = vsel %vm1967_vm14, %v13198_v13, %v13210_v41  ;;  %v13211_v48 = vld [vmem:[#allocation61_spill] sm:$0xff] }
 0x80d   :  { %4342 = vrot.lane.b32.xlu1 %v11393_v35, %s6250_s27  ;;  %4136 = vrot.lane.b32.xlu2 %v11584_v16, %s6248_s9  ;;  %v11624_v57 = vmax.f32 %v3811_v33, %v4071_v44  ;;  %v4064_v44 = vmax.f32 %v3909_v27, %v4021_v29  ;;  %v4063_v33 = vmax.f32 %v3911_v49, %v4023_v12 }
 0x80e   :  { %4245 = vrot.lane.b32.xlu0 %v11393_v35, %s6249_s19  ;;  %v3803_v11 = vmax.f32 %v13212_v26, %v3763_v58  ;;  %v4003_v29 = vsel %vm2198_vm10, %v11268_v32, %v11324_v21  ;;  %v3891_v27 = vsel %vm2121_vm15, %v11258_v52, %v11328_v56  ;;  %v3767_v12 = vsel %vm1967_vm14, %v13167_v60, %v13199_v37  ;;  %v13214_v58 = vld [vmem:[#allocation53_spill] sm:$0xff] }
 0x80f   :  { %v11616_v9 = vpop.permute.xlu1 %4231  ;;  %v11618_v6 = vpop.permute.xlu2 %4126  ;;  %v3915_v32 = vsel %vm2121_vm15, %v11009_v50, %v13200_v51  ;;  %v4073_v21 = vmax.f32 %v3891_v27, %v4003_v29  ;;  %v3801_v60 = vmax.f32 %v13214_v58, %v3767_v12  ;;  %v13215_v37 = vld [vmem:[#allocation57_spill] sm:$0xff]  ;;  %v3749_v50 = vsel %vm1967_vm14, %v13177_v1, %v13207_v17 }
 0x810   :  { %v11620_v5 = vpop.permute.xlu0 %4170  ;;  %v4099_v45 = vmax.f32 %v3803_v11, %v4063_v33  ;;  %v4061_v52 = vmax.f32 %v3915_v32, %v4027_v42  ;;  %v3897_v51 = vsel %vm2121_vm15, %v13180_v36, %v11293_v4  ;;  %v3810_v11 = vmax.f32 %v13216_v18, %v3749_v50  ;;  %v13217_v32 = vld [vmem:[#allocation68_spill] sm:$0xff] }
 0x811   :  { %vm4174_vm10 = vcmp.lt.s32.totalorder %v13109_v20, 124  ;;  %vm4436_vm14 = vcmask 15368   ;;  %vm5245_vm15 = vcmask 1041408  }
 0x812   :  { %v4097_v49 = vmax.f32 %v3801_v60, %v4061_v52 }
 0x815   :  { %4172 = vrot.lane.b32.xlu2 %v4108_v46, %s6248_s9  ;;  %4168 = vrot.lane.b32.xlu1 %v11624_v57, %s6248_s9 }
 0x816   :  { %4338 = vrot.lane.b32.xlu0 %v4102_v23, %s6250_s27  ;;  %v3804_v23 = vmax.f32 %v13211_v48, %v3761_v2  ;;  %v4070_v48 = vmax.f32 %v3897_v51, %v4009_v24  ;;  %v13221_v24 = vld [vmem:[#allocation69_spill] sm:$0xff] }
 0x817   :  { %v11654_v15 = vpop.permute.xlu2 %4158  ;;  %v11656_v30 = vpop.permute.xlu1 %4267 }
 0x818   :  { %v11658_v14 = vpop.permute.xlu0 %4263  ;;  %v4100_v53 = vmax.f32 %v3804_v23, %v4064_v44  ;;  %v3813_v44 = vmax.f32 %v13215_v37, %v3743_v39  ;;  %v4276_v39 = vsel %vm4271_vm11, %v11430_v28, %v11426_v59  ;;  %v13219_v37 = vld [vmem:[#allocation41_spill] sm:$0xff] }
 0x81a   :  { %v4109_v33 = vmax.f32 %v3813_v44, %v4073_v21  ;;  %v13220_v44 = vld [vmem:[#allocation33_spill] sm:$0xff] }
 0x81d   :  { %4265 = vrot.lane.b32.xlu2 %v4108_v46, %s6249_s19  ;;  %4237 = vrot.lane.b32.xlu1 %v4100_v53, %s6249_s19 }
 0x81e   :  { %4140 = vrot.lane.b32.xlu0 %v4099_v45, %s6248_s9 }
 0x81f   :  { %v4228_v3 = vpop.permute.xlu2 %4227  ;;  %v11665_v63 = vpop.permute.xlu1 %4360 }
 0x820   :  { %v11667_v13 = vpop.permute.xlu0 %4332 }
 0x825   :  { %4334 = vrot.lane.b32.xlu2 %v4100_v53, %s6250_s27  ;;  %4330 = vrot.lane.b32.xlu1 %v4099_v45, %s6250_s27  ;;  %v4106_v53 = vmax.f32 %v3810_v11, %v4070_v48  ;;  %v13222_v48 = vld [vmem:[#allocation34_spill] sm:$0xff] }
 0x826   :  { %4233 = vrot.lane.b32.xlu0 %v4099_v45, %s6249_s19 }
 0x827   :  { %v4224_v56 = vpop.permute.xlu1 %4223  ;;  %v11696_v41 = vpop.permute.xlu2 %4120 }
 0x828   :  { %v4131_v2 = vpop.permute.xlu0 %4130 }
 0x829   :  { %v4185_v36 = vsel %vm4174_vm10, %v11618_v6, %v4131_v2  ;;  %v4179_v6 = vsel %vm4174_vm10, %v11291_v38, %v11389_v61  ;;  %v4373_v61 = vsel %vm4368_vm12, %v11441_v62, %v11349_v19 }
 0x82a   :  { %v4193_v42 = vadd.f32 %v4185_v36, %v11017_v43  ;;  %v4196_v52 = vadd.f32 %v4179_v6, %v13217_v32 }
 0x82c   :  { %v4293_v21 = vadd.f32 %v4276_v39, %v4196_v52  ;;  %v13225_v39 = vld [vmem:[#allocation20_spill] sm:$0xff]  ;;  %v13226_v52 = vld [vmem:[#allocation55_spill] sm:$0xff] }
 0x82d   :  { %4132 = vrot.lane.b32.xlu2 %v4097_v49, %s6248_s9  ;;  %4366 = vrot.lane.b32.xlu1 %v4109_v33, %s6250_s27 }
 0x82e   :  { %4269 = vrot.lane.b32.xlu0 %v4109_v33, %s6249_s19  ;;  %v4390_v28 = vadd.f32 %v4373_v61, %v4293_v21  ;;  %v13227_v61 = vld [vmem:[#allocation32_spill] sm:$0xff] }
 0x82f   :  { %v4260_v23 = vpop.permute.xlu1 %4259  ;;  %v4157_v26 = vpop.permute.xlu2 %4156  ;;  %v4181_v21 = vsel %vm4174_vm10, %v13227_v61, %v11521_v31 }
 0x830   :  { %v4163_v55 = vpop.permute.xlu0 %4162  ;;  %v4406_v51 = vmul.f32 0.25, %v4390_v28 }
 0x831   :  { %v4177_v38 = vsel %vm4174_vm10, %v11654_v15, %v4163_v55  ;;  %v13218_v15 = vld [vmem:[#allocation31_spill] sm:$0xff] }
 0x832   :  { %v4197_v59 = vadd.f32 %v4177_v38, %v11042_v22  ;;  %v4187_v19 = vsel %vm4174_vm10, %v13218_v15, %v11347_v40  ;;  %v13223_v40 = vld [vmem:[#allocation59_spill] sm:$0xff]  ;;  %v13229_v15 = vld [vmem:[#allocation49_spill] sm:$0xff] }
 0x833   :  { %v4192_v50 = vadd.f32 %v4187_v19, %v13221_v24 }
 0x835   :  { %4164 = vrot.lane.b32.xlu2 %v4106_v53, %s6248_s9  ;;  %4128 = vrot.lane.b32.xlu1 %v11434_v7, %s6248_s9 }
 0x836   :  { %4362 = vrot.lane.b32.xlu0 %v4108_v46, %s6250_s27  ;;  %v4282_v46 = vsel %vm4271_vm11, %v4224_v56, %v4228_v3 }
 0x837   :  { %v4325_v1 = vpop.permute.xlu1 %4324  ;;  %v11720_v17 = vpop.permute.xlu2 %4249  ;;  %v4290_v43 = vadd.f32 %v4282_v46, %v4193_v42  ;;  %v4189_v42 = vsel %vm4174_vm10, %v11479_v34, %v11475_v54  ;;  %v4383_v34 = vsel %vm4368_vm12, %v13226_v52, %v11559_v0  ;;  %v13240_v52 = vld [vmem:[#allocation4_spill] sm:$0xff] }
 0x838   :  { %v4256_v4 = vpop.permute.xlu0 %4255  ;;  %v4191_v32 = vadd.f32 %v4189_v42, %v13225_v39  ;;  %v13237_v42 = vld [vmem:[#allocation13_spill] sm:$0xff] }
 0x839   :  { %v4274_v45 = vsel %vm4271_vm11, %v4256_v4, %v4260_v23  ;;  %v4381_v23 = vsel %vm4368_vm12, %v13223_v40, %v13222_v48  ;;  %v13234_v48 = vld [vmem:[#allocation63_spill] sm:$0xff] }
 0x83a   :  { %v4294_v62 = vadd.f32 %v4274_v45, %v4197_v59 }
 0x83d   :  { %4257 = vrot.lane.b32.xlu2 %v4106_v53, %s6249_s19  ;;  %4160 = vrot.lane.b32.xlu1 %v11485_v25, %s6248_s9 }
 0x83e   :  { %4225 = vrot.lane.b32.xlu0 %v4097_v49, %s6249_s19 }
 0x83f   :  { %v4357_v29 = vpop.permute.xlu1 %4356  ;;  %v4319_v27 = vpop.permute.xlu2 %4318 }
 0x840   :  { %v4321_v12 = vpop.permute.xlu0 %4320 }
 0x841   :  { %v4379_v47 = vsel %vm4368_vm12, %v4321_v12, %v4325_v1 }
 0x842   :  { %v11747_v3 = vadd.f32 %v4379_v47, %v4290_v43  ;;  %v13224_v43 = vld [vmem:[#allocation37_spill] sm:$0xff] }
 0x843   :  { %v4286_v12 = vsel %vm4271_vm11, %v11517_v8, %v13224_v43 }
 0x844   :  { %v4288_v54 = vadd.f32 %v4286_v12, %v4191_v32 }
 0x845   :  { %4322 = vrot.lane.b32.xlu2 %v4097_v49, %s6250_s27  ;;  %4229 = vrot.lane.b32.xlu1 %v11584_v16, %s6249_s19  ;;  %v4284_v49 = vsel %vm4271_vm11, %v13220_v44, %v13219_v37  ;;  %v13231_v44 = vld [vmem:[#allocation16_spill] sm:$0xff] }
 0x846   :  { %4261 = vrot.lane.b32.xlu0 %v11624_v57, %s6249_s19  ;;  %v4385_v8 = vadd.f32 %v4383_v34, %v4288_v54  ;;  %v4369_v34 = vsel %vm4368_vm12, %v11665_v63, %v13240_v52 }
 0x847   :  { %v4153_v56 = vpop.permute.xlu1 %4152  ;;  %v11763_v2 = vpop.permute.xlu2 %4112 }
 0x848   :  { %v4180_v58 = vsel %vm4174_vm10, %v4153_v56, %v4157_v26  ;;  %v4353_v60 = vpop.permute.xlu0 %4352  ;;  %v4289_v26 = vadd.f32 %v4284_v49, %v4192_v50  ;;  %v13228_v56 = vld [vmem:[#allocation6_spill] sm:$0xff]  ;;  %v4401_v37 = vmul.f32 0.25, %v4385_v8  ;;  %v13232_v49 = vld [vmem:[#allocation8_spill] sm:$0xff]  ;;  %v13233_v50 = vld [vmem:[#allocation21_spill] sm:$0xff] }
 0x849   :  { %v4371_v22 = vsel %vm4368_vm12, %v4353_v60, %v4357_v29  ;;  %v4204_v0 = vadd.f32 %v4180_v58, %v11393_v35  ;;  %v4278_v19 = vsel %vm4271_vm11, %v13229_v15, %v13228_v56  ;;  %v13230_v60 = vld [vmem:[#allocation22_spill] sm:$0xff]  ;;  %v4375_v31 = vsel %vm4368_vm12, %v13232_v49, %v13231_v44 }
 0x84a   :  { %v11777_v33 = vadd.f32 %v4371_v22, %v4294_v62  ;;  %v4386_v55 = vadd.f32 %v4381_v23, %v4289_v26  ;;  %v4195_v22 = vadd.f32 %v4181_v21, %v13230_v60  ;;  %v4183_v40 = vsel %vm4174_vm10, %v13234_v48, %v13233_v50 }
 0x84c   :  { %v4402_v36 = vmul.f32 0.25, %v4386_v55  ;;  %v4292_v35 = vadd.f32 %v4278_v19, %v4195_v22  ;;  %v13242_v19 = vld [vmem:[#allocation45_spill] sm:$0xff] }
 0x84d   :  { %4354 = vrot.lane.b32.xlu2 %v4106_v53, %s6250_s27  ;;  %4547 = vrot.lane.b32.xlu1 %v4406_v51, %s6251_s24 }
 0x84e   :  { %4326 = vrot.lane.b32.xlu0 %v11584_v16, %s6250_s27 }
 0x84f   :  { %v4222_v18 = vpop.permute.xlu1 %4221  ;;  %v4149_v11 = vpop.permute.xlu2 %4148 }
 0x850   :  { %v4125_v1 = vpop.permute.xlu0 %4124 }
 0x851   :  { %v4188_v4 = vsel %vm4174_vm10, %v11696_v41, %v4125_v1 }
 0x852   :  { %v4200_v41 = vadd.f32 %v4188_v4, %v11354_v10 }
 0x855   :  { %4507 = vrot.lane.b32.xlu1 %v4402_v36, %s6252_s29  ;;  %4523 = vrot.lane.b32.xlu2 %v4402_v36, %s6253_s30 }
 0x856   :  { %4358 = vrot.lane.b32.xlu0 %v11624_v57, %s6250_s27 }
 0x857   :  { %v4315_v53 = vpop.permute.xlu1 %4314  ;;  %v11795_v45 = vpop.permute.xlu2 %4241 }
 0x858   :  { %v4382_v46 = vsel %vm4368_vm12, %v4315_v53, %v4319_v27  ;;  %v4218_v29 = vpop.permute.xlu0 %4217 }
 0x859   :  { %v4285_v6 = vsel %vm4271_vm11, %v4218_v29, %v4222_v18  ;;  %v13235_v18 = vld [vmem:[#allocation46_spill] sm:$0xff] }
 0x85a   :  { %v4297_v47 = vadd.f32 %v4285_v6, %v4200_v41  ;;  %v4377_v41 = vsel %vm4368_vm12, %v13237_v42, %v11667_v13  ;;  %v13238_v6 = vld [vmem:[#allocation27_spill] sm:$0xff]  ;;  %v4272_v13 = vsel %vm4271_vm11, %v11658_v14, %v11656_v30 }
 0x85b   :  { %v4175_v43 = vsel %vm4174_vm10, %v13238_v6, %v11620_v5 }
 0x85c   :  { %v11815_v10 = vadd.f32 %v4382_v46, %v4297_v47  ;;  %v13239_v47 = vld [vmem:[#allocation40_spill] sm:$0xff] }
 0x85d   :  { %4515 = vrot.lane.b32.xlu1 %v4406_v51, %s6247_s2  ;;  %4489 = vrot.lane.b32.xlu2 %v4402_v36, %s6254_s5  ;;  %v4198_v39 = vadd.f32 %v4175_v43, %v13239_v47 }
 0x85e   :  { %4539 = vrot.lane.b32.xlu0 %v4402_v36, %s6255_s21  ;;  %v13236_v36 = vld [vmem:[#allocation36_spill] sm:$0xff] }
 0x85f   :  { %v4351_v27 = vpop.permute.xlu1 %4350  ;;  %v4311_v38 = vpop.permute.xlu2 %4310  ;;  %v4194_v53 = vadd.f32 %v4183_v40, %v13236_v36  ;;  %v4295_v54 = vadd.f32 %v4272_v13, %v4198_v39 }
 0x860   :  { %v4254_v59 = vpop.permute.xlu0 %4253 }
 0x861   :  { %v4277_v28 = vsel %vm4271_vm11, %v11720_v17, %v4254_v59  ;;  %v4389_v17 = vadd.f32 %v4375_v31, %v4292_v35  ;;  %v4392_v5 = vadd.f32 %v4369_v34, %v4295_v54  ;;  %v11909_v31 = vmul.f32 0.25, %v11777_v33 }
 0x862   :  { %v4301_v62 = vadd.f32 %v4277_v28, %v4204_v0 }
 0x863   :  { %v4405_v4 = vmul.f32 0.25, %v4389_v17  ;;  %v4408_v59 = vmul.f32 0.25, %v4392_v5 }
 0x865   :  { %4499 = vrot.lane.b32.xlu2 %v4406_v51, %s6256_s28  ;;  %4455 = vrot.lane.b32.xlu1 %v4401_v37, %s6254_s5 }
 0x866   :  { %4531 = vrot.lane.b32.xlu0 %v4406_v51, %s6240_s25  ;;  %v4280_v51 = vsel %vm4271_vm11, %v11616_v9, %v13235_v18 }
 0x867   :  { %v4145_v58 = vpop.permute.xlu1 %4144  ;;  %v11840_v24 = vpop.permute.xlu2 %4136 }
 0x868   :  { %v4182_v23 = vsel %vm4174_vm10, %v4145_v58, %v4149_v11  ;;  %v4347_v26 = vpop.permute.xlu0 %4346  ;;  %v4291_v11 = vadd.f32 %v4280_v51, %v4194_v53  ;;  %v4403_v58 = vmul.f32 0.25, %v11747_v3 }
 0x869   :  { %v4374_v55 = vsel %vm4368_vm12, %v4347_v26, %v4351_v27  ;;  %v13241_v27 = vld [vmem:[#allocation14_spill] sm:$0xff] }
 0x86a   :  { %v11854_v1 = vadd.f32 %v4374_v55, %v4301_v62  ;;  %v4388_v46 = vadd.f32 %v4377_v41, %v4291_v11  ;;  %v4203_v62 = vadd.f32 %v4182_v23, %v13242_v19  ;;  %v4410_v55 = vmul.f32 0.25, %v11815_v10 }
 0x86c   :  { %v4404_v32 = vmul.f32 0.25, %v4388_v46 }
 0x86d   :  { %4447 = vrot.lane.b32.xlu1 %v4405_v4, %s6257_s0  ;;  %4471 = vrot.lane.b32.xlu2 %v4401_v37, %s6252_s29 }
 0x86e   :  { %4479 = vrot.lane.b32.xlu0 %v4405_v4, %s6247_s2 }
 0x86f   :  { %v4214_v9 = vpop.permute.xlu1 %4213  ;;  %v11864_v29 = vpop.permute.xlu2 %4172 }
 0x870   :  { %v4117_v12 = vpop.permute.xlu0 %4116 }
 0x871   :  { %v4190_v8 = vsel %vm4174_vm10, %v11763_v2, %v4117_v12 }
 0x872   :  { %v4199_v61 = vadd.f32 %v4190_v8, %v13241_v27 }
 0x875   :  { %4463 = vrot.lane.b32.xlu2 %v4405_v4, %s6256_s28  ;;  %4675 = vrot.lane.b32.xlu1 %v4404_v32, %s6258_s17 }
 0x876   :  { %4439 = vrot.lane.b32.xlu0 %v4401_v37, %s6259_s1 }
 0x877   :  { %v4307_v30 = vpop.permute.xlu1 %4306  ;;  %v4266_v14 = vpop.permute.xlu2 %4265 }
 0x878   :  { %v4210_v21 = vpop.permute.xlu0 %4209  ;;  %v4384_v2 = vsel %vm4368_vm12, %v4307_v30, %v4311_v38 }
 0x879   :  { %v4287_v63 = vsel %vm4271_vm11, %v4210_v21, %v4214_v9  ;;  %v4414_v9 = vmul.f32 0.25, %v11854_v1 }
 0x87a   :  { %v4296_v0 = vadd.f32 %v4287_v63, %v4199_v61 }
 0x87c   :  { %v11890_v28 = vadd.f32 %v4384_v2, %v4296_v0 }
 0x87d   :  { %4419 = vrot.lane.b32.xlu2 %v4401_v37, %s6238_s26  ;;  %4667 = vrot.lane.b32.xlu1 %v4408_v59, %s6260_s4 }
 0x87e   :  { %4430 = vrot.lane.b32.xlu0 %v4405_v4, %s6261_s18  ;;  %v4409_v43 = vmul.f32 0.25, %v11890_v28 }
 0x87f   :  { %v11895_v56 = vpop.permute.xlu1 %4342  ;;  %v4335_v15 = vpop.permute.xlu2 %4334 }
 0x880   :  { %v4246_v60 = vpop.permute.xlu0 %4245 }
 0x881   :  { %v4279_v38 = vsel %vm4271_vm11, %v11795_v45, %v4246_v60 }
 0x882   :  { %v11901_v22 = vadd.f32 %v4279_v38, %v4203_v62 }
 0x885   :  { %4683 = vrot.lane.b32.xlu2 %v4408_v59, %s6262_s7  ;;  %4625 = vrot.lane.b32.xlu1 %v4404_v32, %s6263_s23 }
 0x886   :  { %4659 = vrot.lane.b32.xlu0 %v4404_v32, %s6264_s6 }
 0x887   :  { %v11906_v37 = vpop.permute.xlu2 %4132  ;;  %v4169_v44 = vpop.permute.xlu1 %4168 }
 0x888   :  { %v4339_v49 = vpop.permute.xlu0 %4338  ;;  %v4176_v51 = vsel %vm4174_vm10, %v4169_v44, %v11864_v29 }
 0x889   :  { %v4206_v10 = vadd.f32 %v4176_v51, %v11624_v57  ;;  %v4376_v12 = vsel %vm4368_vm12, %v4339_v49, %v11895_v56  ;;  %v4766_v51 = vld [vmem:[%s12303_s11 + $0x60] sm:$0xff] }
 0x88a   :  { %v4397_v13 = vadd.f32 %v4376_v12, %v11901_v22 }
 0x88c   :  { %v4413_v8 = vmul.f32 0.25, %v4397_v13  ;;  %v4758_v13 = vld [vmem:[%s12303_s11 + $0x20] sm:$0xff] }
 0x88d   :  { %4643 = vrot.lane.b32.xlu2 %v4404_v32, %s6265_s22  ;;  %4615 = vrot.lane.b32.xlu1 %v11909_v31, %s6232_s20 }
 0x88e   :  { %4651 = vrot.lane.b32.xlu0 %v4408_v59, %s6232_s20 }
 0x88f   :  { %v4165_v45 = vpop.permute.xlu2 %4164  ;;  %v4238_v35 = vpop.permute.xlu1 %4237 }
 0x890   :  { %v4141_v17 = vpop.permute.xlu0 %4140 }
 0x891   :  { %v4184_v50 = vsel %vm4174_vm10, %v11840_v24, %v4141_v17 }
 0x892   :  { %v4202_v40 = vadd.f32 %v4184_v50, %v11584_v16 }
 0x895   :  { %4635 = vrot.lane.b32.xlu2 %v4408_v59, %s6266_s3  ;;  %4575 = vrot.lane.b32.xlu1 %v4403_v58, %s6255_s21 }
 0x896   :  { %4607 = vrot.lane.b32.xlu0 %v4403_v58, %s6265_s22 }
 0x897   :  { %v4258_v33 = vpop.permute.xlu2 %4257  ;;  %v4331_v48 = vpop.permute.xlu1 %4330 }
 0x898   :  { %v4234_v23 = vpop.permute.xlu0 %4233  ;;  %v4378_v24 = vsel %vm4368_vm12, %v4331_v48, %v4335_v15 }
 0x899   :  { %v4281_v26 = vsel %vm4271_vm11, %v4234_v23, %v4238_v35 }
 0x89a   :  { %v4299_v3 = vadd.f32 %v4281_v26, %v4202_v40 }
 0x89c   :  { %v11928_v18 = vadd.f32 %v4378_v24, %v4299_v3 }
 0x89d   :  { %4591 = vrot.lane.b32.xlu2 %v4403_v58, %s6263_s23  ;;  %4525 = vrot.lane.b32.xlu1 %v4410_v55, %s6253_s30 }
 0x89e   :  { %4599 = vrot.lane.b32.xlu0 %v11909_v31, %s6266_s3  ;;  %v4412_v20 = vmul.f32 0.25, %v11928_v18 }
 0x89f   :  { %v4323_v16 = vpop.permute.xlu2 %4322  ;;  %v4367_v4 = vpop.permute.xlu1 %4366 }
 0x8a0   :  { %v4270_v36 = vpop.permute.xlu0 %4269 }
 0x8a1   :  { %v4273_v53 = vsel %vm4271_vm11, %v4266_v14, %v4270_v36  ;;  %v4765_v36 = vld [vmem:[%s12303_s11 + $0x58] sm:$0xff] }
 0x8a2   :  { %v4303_v42 = vadd.f32 %v4273_v53, %v4206_v10  ;;  %v4764_v53 = vld [vmem:[%s12303_s11 + $0x50] sm:$0xff] }
 0x8a5   :  { %4583 = vrot.lane.b32.xlu2 %v11909_v31, %s6251_s24  ;;  %4491 = vrot.lane.b32.xlu1 %v4410_v55, %s6254_s5 }
 0x8a6   :  { %4557 = vrot.lane.b32.xlu0 %v4403_v58, %s6253_s30 }
 0x8a7   :  { %v4355_v41 = vpop.permute.xlu2 %4354  ;;  %v4129_v11 = vpop.permute.xlu1 %4128 }
 0x8a8   :  { %v4363_v46 = vpop.permute.xlu0 %4362  ;;  %v4186_v5 = vsel %vm4174_vm10, %v4129_v11, %v11906_v37 }
 0x8a9   :  { %v4370_v59 = vsel %vm4368_vm12, %v4363_v46, %v4367_v4 }
 0x8ad   :  { %4541 = vrot.lane.b32.xlu2 %v4410_v55, %s6255_s21  ;;  %4501 = vrot.lane.b32.xlu1 %v4414_v9, %s6256_s28 }
 0x8ae   :  { %4549 = vrot.lane.b32.xlu0 %v4414_v9, %s6251_s24 }
 0x8af   :  { %v4161_v57 = vpop.permute.xlu1 %4160  ;;  %v4524_v29 = vpop.permute.xlu2 %4523 }
 0x8b0   :  { %4529 = vst.msk [vmem:[#allocation3 + $0x60] sm:$0xff] %vm4425_vm13, %v4524_v29  ;;  %v4226_v6 = vpop.permute.xlu0 %4225  ;;  %v4178_v1 = vsel %vm4174_vm10, %v4161_v57, %v4165_v45  ;;  %v4763_v57 = vld [vmem:[%s12303_s11 + $0x48] sm:$0xff]  ;;  %v4762_v29 = vld [vmem:[%s12303_s11 + $0x40] sm:$0xff] }
 0x8b1   :  { %v4205_v32 = vadd.f32 %v4178_v1, %v11485_v25  ;;  %v4201_v25 = vadd.f32 %v4186_v5, %v11434_v7  ;;  %v4400_v7 = vadd.f32 %v4370_v59, %v4303_v42  ;;  %v4767_v42 = vld [vmem:[%s12303_s11 + $0x68] sm:$0xff] }
 0x8b2   :  { %v4759_v1 = vld [vmem:[%s12303_s11 + $0x28] sm:$0xff] }
 0x8b3   :  { %v4416_v62 = vmul.f32 0.25, %v4400_v7 }
 0x8b5   :  { %4533 = vrot.lane.b32.xlu2 %v4414_v9, %s6240_s25  ;;  %4473 = vrot.lane.b32.xlu1 %v4409_v43, %s6252_s29 }
 0x8b6   :  { %4509 = vrot.lane.b32.xlu0 %v4410_v55, %s6252_s29 }
 0x8b7   :  { %v4230_v47 = vpop.permute.xlu1 %4229  ;;  %v4490_v39 = vpop.permute.xlu2 %4489 }
 0x8b8   :  { %4495 = vst.msk [vmem:[#allocation3 + $0x40] sm:$0xff] %vm4425_vm13, %v4490_v39  ;;  %v4262_v52 = vpop.permute.xlu0 %4261  ;;  %v4283_v30 = vsel %vm4271_vm11, %v4226_v6, %v4230_v47  ;;  %v4761_v47 = vld [vmem:[%s12303_s11 + $0x38] sm:$0xff] }
 0x8b9   :  { %v4275_v34 = vsel %vm4271_vm11, %v4258_v33, %v4262_v52  ;;  %v4298_v61 = vadd.f32 %v4283_v30, %v4201_v25 }
 0x8ba   :  { %v4302_v54 = vadd.f32 %v4275_v34, %v4205_v32  ;;  %v4754_v34 = vld [vmem:[%s12303_s11] sm:$0xff] }
 0x8bd   :  { %4465 = vrot.lane.b32.xlu1 %v4413_v8, %s6256_s28  ;;  %4481 = vrot.lane.b32.xlu2 %v4413_v8, %s6247_s2 }
 0x8be   :  { %4517 = vrot.lane.b32.xlu0 %v4414_v9, %s6247_s2  ;;  %v4760_v9 = vld [vmem:[%s12303_s11 + $0x30] sm:$0xff] }
 0x8bf   :  { %v4548_v14 = vpop.permute.xlu1 %4547  ;;  %v4500_v27 = vpop.permute.xlu2 %4499 }
 0x8c0   :  { %4505 = vst.msk [vmem:[#allocation3 + $0x40] sm:$0xff] %vm4436_vm14, %v4500_v27  ;;  %v4327_v21 = vpop.permute.xlu0 %4326  ;;  %v5061_v27 = vld [vmem:[%s12304_s13 + $0x50] sm:$0xf] }
 0x8c1   :  { %v4380_v63 = vsel %vm4368_vm12, %v4323_v16, %v4327_v21 }
 0x8c2   :  { %v4395_v0 = vadd.f32 %v4380_v63, %v4298_v61  ;;  %v4755_v61 = vld [vmem:[%s12303_s11 + $0x8] sm:$0xff] }
 0x8c4   :  { %v4411_v58 = vmul.f32 0.25, %v4395_v0 }
 0x8c5   :  { %4421 = vrot.lane.b32.xlu1 %v4409_v43, %s6238_s26  ;;  %4441 = vrot.lane.b32.xlu2 %v4409_v43, %s6259_s1 }
 0x8c6   :  { %4457 = vrot.lane.b32.xlu0 %v4409_v43, %s6254_s5 }
 0x8c7   :  { %v4508_v2 = vpop.permute.xlu1 %4507  ;;  %v4472_v28 = vpop.permute.xlu2 %4471 }
 0x8c8   :  { %4513 = vst.msk [vmem:[#allocation3 + $0x50] sm:$0xff] %vm4425_vm13, %v4508_v2  ;;  %v4359_v56 = vpop.permute.xlu0 %4358 }
 0x8c9   :  { %4477 = vst.msk [vmem:[#allocation3 + $0x30] sm:$0xff] %vm4425_vm13, %v4472_v28  ;;  %v4372_v15 = vsel %vm4368_vm12, %v4355_v41, %v4359_v56  ;;  %v5058_v28 = vld [vmem:[%s12304_s13 + $0x38] sm:$0xff]  ;;  %v5057_v56 = vld [vmem:[%s12304_s13 + $0x30] sm:$0xff] }
 0x8ca   :  { %v4399_v19 = vadd.f32 %v4372_v15, %v4302_v54  ;;  %v4757_v54 = vld [vmem:[%s12303_s11 + $0x18] sm:$0xff]  ;;  %v5060_v15 = vld [vmem:[%s12304_s13 + $0x48] sm:$0xff] }
 0x8cc   :  { %v4415_v40 = vmul.f32 0.25, %v4399_v19 }
 0x8cd   :  { %4432 = vrot.lane.b32.xlu2 %v4413_v8, %s6261_s18  ;;  %4685 = vrot.lane.b32.xlu1 %v4416_v62, %s6262_s7 }
 0x8ce   :  { %4449 = vrot.lane.b32.xlu0 %v4413_v8, %s6257_s0  ;;  %v4756_v8 = vld [vmem:[%s12303_s11 + $0x10] sm:$0xff] }
 0x8cf   :  { %v4516_v60 = vpop.permute.xlu1 %4515  ;;  %v4464_v38 = vpop.permute.xlu2 %4463 }
 0x8d0   :  { %4521 = vst.msk [vmem:[#allocation3 + $0x50] sm:$0xff] %vm4436_vm14, %v4516_v60  ;;  %v4540_v22 = vpop.permute.xlu0 %4539 }
 0x8d1   :  { %4545 = vst.msk [vmem:[#allocation3 + $0x70] sm:$0xff] %vm4425_vm13, %v4540_v22 }
 0x8d2   :  { %4553 = vst.msk [vmem:[#allocation3 + $0x70] sm:$0xff] %vm4436_vm14, %v4548_v14  ;;  %v5059_v14 = vld [vmem:[%s12304_s13 + $0x40] sm:$0xff] }
 0x8d5   :  { %4661 = vrot.lane.b32.xlu2 %v4412_v20, %s6264_s6  ;;  %4645 = vrot.lane.b32.xlu1 %v4412_v20, %s6265_s22 }
 0x8d6   :  { %4677 = vrot.lane.b32.xlu0 %v4412_v20, %s6258_s17 }
 0x8d7   :  { %v4456_v37 = vpop.permute.xlu1 %4455  ;;  %v4420_v44 = vpop.permute.xlu2 %4419 }
 0x8d8   :  { %4461 = vst.msk [vmem:[#allocation3 + $0x20] sm:$0xff] %vm4425_vm13, %v4456_v37  ;;  %v4532_v49 = vpop.permute.xlu0 %4531  ;;  %v5053_v37 = vld [vmem:[%s12304_s13 + $0x10] sm:$0xff] }
 0x8d9   :  { %4469 = vst.msk [vmem:[#allocation3 + $0x20] sm:$0xff] %vm4436_vm14, %v4464_v38  ;;  %v4705_v59 = vld [vmem:[#allocation3 + $0x70] sm:$0xff] }
 0x8da   :  { %4426 = vst.msk [vmem:[#allocation3] sm:$0xff] %vm4425_vm13, %v4420_v44  ;;  %v5056_v44 = vld [vmem:[%s12304_s13 + $0x28] sm:$0xff] }
 0x8db   :  { %4537 = vst.msk [vmem:[#allocation3 + $0x60] sm:$0xff] %vm4436_vm14, %v4532_v49  ;;  %v5055_v49 = vld [vmem:[%s12304_s13 + $0x20] sm:$0xff] }
 0x8dd   :  { %4653 = vrot.lane.b32.xlu2 %v4416_v62, %s6232_s20  ;;  %4637 = vrot.lane.b32.xlu1 %v4416_v62, %s6266_s3 }
 0x8de   :  { %4669 = vrot.lane.b32.xlu0 %v4416_v62, %s6260_s4 }
 0x8df   :  { %v4448_v45 = vpop.permute.xlu1 %4447  ;;  %v4684_v35 = vpop.permute.xlu2 %4683 }
 0x8e0   :  { %v4480_v17 = vpop.permute.xlu0 %4479 }
 0x8e1   :  { %4485 = vst.msk [vmem:[#allocation3 + $0x30] sm:$0xff] %vm4436_vm14, %v4480_v17 }
 0x8e2   :  { %v4703_v62 = vld [vmem:[#allocation3 + $0x60] sm:$0xff] }
 0x8e5   :  { %4593 = vrot.lane.b32.xlu1 %v4411_v58, %s6263_s23  ;;  %4609 = vrot.lane.b32.xlu2 %v4411_v58, %s6265_s22 }
 0x8e6   :  { %4627 = vrot.lane.b32.xlu0 %v4412_v20, %s6263_s23 }
 0x8e7   :  { %v4644_v50 = vpop.permute.xlu2 %4643  ;;  %v4676_v33 = vpop.permute.xlu1 %4675 }
 0x8e8   :  { %4649 = vst.msk [vmem:[#allocation3 + $0xd0] sm:$0xff] %vm4425_vm13, %v4644_v50  ;;  %v4440_v48 = vpop.permute.xlu0 %4439 }
 0x8e9   :  { %4681 = vst.msk [vmem:[#allocation3 + $0xf0] sm:$0xff] %vm4425_vm13, %v4676_v33 }
 0x8ea   :  { %4689 = vst.msk [vmem:[#allocation3 + $0xf0] sm:$0xff] %vm4436_vm14, %v4684_v35 }
 0x8eb   :  { %4445 = vst.msk [vmem:[#allocation3 + $0x10] sm:$0xff] %vm4425_vm13, %v4440_v48  ;;  %v5052_v48 = vld [vmem:[%s12304_s13 + $0x8] sm:$0xff] }
 0x8ec   :  { %4453 = vst.msk [vmem:[#allocation3 + $0x10] sm:$0xff] %vm4436_vm14, %v4448_v45 }
 0x8ed   :  { %4585 = vrot.lane.b32.xlu1 %v4415_v40, %s6251_s24  ;;  %4601 = vrot.lane.b32.xlu2 %v4415_v40, %s6266_s3 }
 0x8ee   :  { %4617 = vrot.lane.b32.xlu0 %v4415_v40, %s6232_s20 }
 0x8ef   :  { %v4636_v23 = vpop.permute.xlu2 %4635  ;;  %v4668_v26 = vpop.permute.xlu1 %4667 }
 0x8f0   :  { %v4431_v3 = vpop.permute.xlu0 %4430 }
 0x8f1   :  { %4437 = vst.msk [vmem:[#allocation3] sm:$0xff] %vm4436_vm14, %v4431_v3  ;;  %v4699_v3 = vld [vmem:[#allocation3 + $0x40] sm:$0xff] }
 0x8f5   :  { %4567 = vrot.lane.b32.xlu1 %v11909_v31, %s6240_s25  ;;  %4559 = vrot.lane.b32.xlu2 %v4411_v58, %s6253_s30  ;;  %v4768_v31 = vld [vmem:[%s12303_s11 + $0x70] sm:$0xff] }
 0x8f6   :  { %4577 = vrot.lane.b32.xlu0 %v4411_v58, %s6255_s21  ;;  %v4701_v58 = vld [vmem:[#allocation3 + $0x50] sm:$0xff] }
 0x8f7   :  { %v4626_v55 = vpop.permute.xlu1 %4625  ;;  %v4592_v24 = vpop.permute.xlu2 %4591 }
 0x8f8   :  { %4631 = vst.msk [vmem:[#allocation3 + $0xc0] sm:$0xff] %vm4425_vm13, %v4626_v55  ;;  %v4660_v18 = vpop.permute.xlu0 %4659 }
 0x8f9   :  { %4641 = vst.msk [vmem:[#allocation3 + $0xc0] sm:$0xff] %vm4436_vm14, %v4636_v23 }
 0x8fa   :  { %4597 = vst.msk [vmem:[#allocation3 + $0xa0] sm:$0xff] %vm4425_vm13, %v4592_v24 }
 0x8fb   :  { %4665 = vst.msk [vmem:[#allocation3 + $0xe0] sm:$0xff] %vm4425_vm13, %v4660_v18 }
 0x8fc   :  { %4673 = vst.msk [vmem:[#allocation3 + $0xe0] sm:$0xff] %vm4436_vm14, %v4668_v26  ;;  %v5054_v26 = vld [vmem:[%s12304_s13 + $0x18] sm:$0xff] }
 0x8fd   :  { %4831 = vperm.xlu1 %6211, %v4766_v51   ;;  %4841 = vperm.xlu2 %5849, %v4768_v31  }
 0x8fe   :  { %4569 = vrot.lane.b32.xlu0 %v4415_v40, %s6240_s25  ;;  %v5051_v40 = vld [vmem:[%s12304_s13] sm:$0xff] }
 0x8ff   :  { %v4584_v16 = vpop.permute.xlu2 %4583  ;;  %v4616_v4 = vpop.permute.xlu1 %4615 }
 0x900   :  { %v4652_v10 = vpop.permute.xlu0 %4651 }
 0x901   :  { %4657 = vst.msk [vmem:[#allocation3 + $0xd0] sm:$0xff] %vm4436_vm14, %v4652_v10  ;;  %v5225_v10 = vld [vmem:[%s12305_s15 + $0x8] sm:$0x3] }
 0x905   :  { %4826 = vperm.xlu1 %6211, %v4765_v36   ;;  %4821 = vperm.xlu2 %5849, %v4764_v53   ;;  %v5224_v53 = vld [vmem:[%s12305_s15] sm:$0xff] }
 0x906   :  { %4836 = vperm.xlu0 %6210, %v4767_v42   ;;  %v4695_v42 = vld [vmem:[#allocation3 + $0x20] sm:$0xff] }
 0x907   :  { %v4576_v41 = vpop.permute.xlu1 %4575  ;;  %v4542_v11 = vpop.permute.xlu2 %4541 }
 0x908   :  { %4581 = vst.msk [vmem:[#allocation3 + $0x90] sm:$0xff] %vm4425_vm13, %v4576_v41  ;;  %v4608_v46 = vpop.permute.xlu0 %4607 }
 0x909   :  { %4589 = vst.msk [vmem:[#allocation3 + $0x90] sm:$0xff] %vm4436_vm14, %v4584_v16  ;;  %v4697_v16 = vld [vmem:[#allocation3 + $0x30] sm:$0xff] }
 0x90a   :  { %4546 = vst.msk [vmem:[#allocation3 + $0x78] sm:$0xff] %vm4425_vm13, %v4542_v11 }
 0x90b   :  { %4613 = vst.msk [vmem:[#allocation3 + $0xb0] sm:$0xff] %vm4425_vm13, %v4608_v46 }
 0x90c   :  { %4621 = vst.msk [vmem:[#allocation3 + $0xb0] sm:$0xff] %vm4436_vm14, %v4616_v4 }
 0x90d   :  { %4801 = vperm.xlu1 %6211, %v4760_v9   ;;  %4816 = vperm.xlu2 %5849, %v4763_v57   ;;  %v4693_v57 = vld [vmem:[#allocation3 + $0x10] sm:$0xff] }
 0x90e   :  { %4811 = vperm.xlu0 %6210, %v4762_v29  }
 0x90f   :  { %v4526_v6 = vpop.permute.xlu1 %4525  ;;  %v4534_v43 = vpop.permute.xlu2 %4533 }
 0x910   :  { %4530 = vst.msk [vmem:[#allocation3 + $0x68] sm:$0xff] %vm4425_vm13, %v4526_v6  ;;  %v4600_v12 = vpop.permute.xlu0 %4599 }
 0x911   :  { %4538 = vst.msk [vmem:[#allocation3 + $0x68] sm:$0xff] %vm4436_vm14, %v4534_v43 }
 0x912   :  { %4605 = vst.msk [vmem:[#allocation3 + $0xa0] sm:$0xff] %vm4436_vm14, %v4600_v12  ;;  %v5338_v12 = vld [vmem:[%s12306_s10] sm:$0xf] }
 0x915   :  { %4796 = vperm.xlu1 %6211, %v4759_v1   ;;  %4791 = vperm.xlu2 %5849, %v4758_v13   ;;  %v5426_v1 = vld [vmem:[%s12306_s10 + $0x4] sm:$0xf0]  ;;  %v4691_v13 = vld [vmem:[#allocation3] sm:$0xff] }
 0x916   :  { %4806 = vperm.xlu0 %6210, %v4761_v47  }
 0x917   :  { %v4492_v39 = vpop.permute.xlu1 %4491  ;;  %v4482_v32 = vpop.permute.xlu2 %4481 }
 0x918   :  { %4496 = vst.msk [vmem:[#allocation3 + $0x48] sm:$0xff] %vm4425_vm13, %v4492_v39  ;;  %v4558_v52 = vpop.permute.xlu0 %4557  ;;  %v4704_v19 = vld [vmem:[#allocation3 + $0x68] sm:$0xff]  ;;  %v5339_v39 = vor.u32 %v5426_v1, %v5338_v12  ;;  %v5436_v12 = vld [vmem:[%s12306_s10 + $0x54] sm:$0xf0] }
 0x919   :  { %4563 = vst.msk [vmem:[#allocation3 + $0x80] sm:$0xff] %vm4425_vm13, %v4558_v52  ;;  %v4729_v60 = vpack.c.bf16 %v4704_v19, %v4703_v62 }
 0x91d   :  { %4771 = vperm.xlu1 %6211, %v4754_v34   ;;  %4786 = vperm.xlu2 %5849, %v4757_v54   ;;  %v4721_v54 = vld [vmem:[#allocation3 + $0xf0] sm:$0xff] }
 0x91e   :  { %4781 = vperm.xlu0 %6210, %v4756_v8  }
 0x91f   :  { %v4502_v5 = vpop.permute.xlu1 %4501  ;;  %v4442_v30 = vpop.permute.xlu2 %4441 }
 0x920   :  { %4506 = vst.msk [vmem:[#allocation3 + $0x48] sm:$0xff] %vm4436_vm14, %v4502_v5  ;;  %v4550_v25 = vpop.permute.xlu0 %4549 }
 0x921   :  { %4446 = vst.msk [vmem:[#allocation3 + $0x18] sm:$0xff] %vm4425_vm13, %v4442_v30 }
 0x922   :  { %4554 = vst.msk [vmem:[#allocation3 + $0x78] sm:$0xff] %vm4436_vm14, %v4550_v25 }
 0x925   :  { %5104 = vperm.xlu1 %6211, %v5059_v14   ;;  %5114 = vperm.xlu2 %5849, %v5061_v27   ;;  %v4719_v14 = vld [vmem:[#allocation3 + $0xe0] sm:$0xff] }
 0x926   :  { %4776 = vperm.xlu0 %6210, %v4755_v61  }
 0x927   :  { %v4474_v21 = vpop.permute.xlu1 %4473  ;;  %v4433_v63 = vpop.permute.xlu2 %4432  ;;  %v4700_v23 = vld [vmem:[#allocation3 + $0x48] sm:$0xff] }
 0x928   :  { %4478 = vst.msk [vmem:[#allocation3 + $0x38] sm:$0xff] %vm4425_vm13, %v4474_v21  ;;  %v4510_v0 = vpop.permute.xlu0 %4509  ;;  %v4727_v55 = vpack.c.bf16 %v4700_v23, %v4699_v3  ;;  %v5425_v23 = vld [vmem:[%s12306_s10 + $0x4] sm:$0xf] }
 0x929   :  { %4486 = vst.msk [vmem:[#allocation3 + $0x38] sm:$0xff] %vm4436_vm14, %v4482_v32  ;;  %v4706_v7 = vld [vmem:[#allocation3 + $0x78] sm:$0xff] }
 0x92a   :  { %4514 = vst.msk [vmem:[#allocation3 + $0x58] sm:$0xff] %vm4425_vm13, %v4510_v0  ;;  %v4730_v2 = vpack.c.bf16 %v4706_v7, %v4705_v59  ;;  %v5428_v0 = vld [vmem:[%s12306_s10 + $0x14] sm:$0xf0]  ;;  %v4717_v59 = vld [vmem:[#allocation3 + $0xd0] sm:$0xff] }
 0x92c   :  { %4921 = vmatpush.bf16.msra.mxu3 %v4730_v2 }
 0x92d   :  { %5099 = vperm.xlu1 %6211, %v5058_v28   ;;  %5094 = vperm.xlu2 %5849, %v5057_v56  }
 0x92e   :  { %5109 = vperm.xlu0 %6210, %v5060_v15   ;;  %v4715_v15 = vld [vmem:[#allocation3 + $0xc0] sm:$0xff] }
 0x92f   :  { %v4466_v38 = vpop.permute.xlu1 %4465  ;;  %v4662_v22 = vpop.permute.xlu2 %4661 }
 0x930   :  { %4922 = vmatpush.bf16.msra.mxu3 %v4729_v60  ;;  %4666 = vst.msk [vmem:[#allocation3 + $0xe8] sm:$0xff] %vm4425_vm13, %v4662_v22  ;;  %v4518_v20 = vpop.permute.xlu0 %4517  ;;  %v4698_v24 = vld [vmem:[#allocation3 + $0x38] sm:$0xff]  ;;  %v4713_v22 = vld [vmem:[#allocation3 + $0xb0] sm:$0xff] }
 0x931   :  { %4522 = vst.msk [vmem:[#allocation3 + $0x58] sm:$0xff] %vm4436_vm14, %v4518_v20  ;;  %v4726_v4 = vpack.c.bf16 %v4698_v24, %v4697_v16 }
 0x935   :  { %5074 = vperm.xlu1 %6211, %v5053_v37   ;;  %5089 = vperm.xlu2 %5849, %v5056_v44  }
 0x936   :  { %5084 = vperm.xlu0 %6210, %v5055_v49   ;;  %v5354_v49 = vld [vmem:[%s12306_s10 + $0x20] sm:$0xf] }
 0x937   :  { %v4422_v45 = vpop.permute.xlu1 %4421  ;;  %v4654_v35 = vpop.permute.xlu2 %4653 }
 0x938   :  { %4427 = vst.msk [vmem:[#allocation3 + $0x8] sm:$0xff] %vm4425_vm13, %v4422_v45  ;;  %v4458_v17 = vpop.permute.xlu0 %4457  ;;  %v4702_v50 = vld [vmem:[#allocation3 + $0x58] sm:$0xff]  ;;  %v5430_v45 = vld [vmem:[%s12306_s10 + $0x24] sm:$0xf0] }
 0x939   :  { %4438 = vst.msk [vmem:[#allocation3 + $0x8] sm:$0xff] %vm4436_vm14, %v4433_v63  ;;  %v4728_v33 = vpack.c.bf16 %v4702_v50, %v4701_v58  ;;  %v5346_v63 = vld [vmem:[%s12306_s10 + $0x10] sm:$0xf]  ;;  %v5355_v58 = vor.u32 %v5430_v45, %v5354_v49 }
 0x93a   :  { %4462 = vst.msk [vmem:[#allocation3 + $0x28] sm:$0xff] %vm4425_vm13, %v4458_v17  ;;  %v5347_v2 = vor.u32 %v5428_v0, %v5346_v63  ;;  %v5380_v63 = vld [vmem:[%s12306_s10 + $0x58] sm:$0xf0] }
 0x93b   :  { %4470 = vst.msk [vmem:[#allocation3 + $0x28] sm:$0xff] %vm4436_vm14, %v4466_v38  ;;  %4923 = vmatpush.bf16.msra.mxu3 %v4728_v33  ;;  %v4709_v33 = vld [vmem:[#allocation3 + $0x90] sm:$0xff] }
 0x93d   :  { %5069 = vperm.xlu1 %6211, %v5052_v48   ;;  %5064 = vperm.xlu2 %5849, %v5051_v40  }
 0x93e   :  { %5079 = vperm.xlu0 %6210, %v5054_v26   ;;  %v5340_v26 = vld [vmem:[%s12306_s10 + $0x8] sm:$0xf0] }
 0x93f   :  { %4924 = vmatpush.bf16.msra.mxu3 %v4727_v55  ;;  %v4686_v18 = vpop.permute.xlu1 %4685  ;;  %v4610_v51 = vpop.permute.xlu2 %4609 }
 0x940   :  { %4614 = vst.msk [vmem:[#allocation3 + $0xb8] sm:$0xff] %vm4425_vm13, %v4610_v51  ;;  %v4450_v31 = vpop.permute.xlu0 %4449  ;;  %v4692_v43 = vld [vmem:[#allocation3 + $0x8] sm:$0xff]  ;;  %v5362_v51 = vld [vmem:[%s12306_s10 + $0x30] sm:$0xf] }
 0x941   :  { %4454 = vst.msk [vmem:[#allocation3 + $0x18] sm:$0xff] %vm4436_vm14, %v4450_v31  ;;  %v4723_v47 = vpack.c.bf16 %v4692_v43, %v4691_v13  ;;  %v5432_v31 = vld [vmem:[%s12306_s10 + $0x34] sm:$0xf0]  ;;  %v5378_v43 = vld [vmem:[%s12306_s10 + $0x50] sm:$0xf] }
 0x942   :  { %v4696_v36 = vld [vmem:[#allocation3 + $0x28] sm:$0xff]  ;;  %v5363_v16 = vor.u32 %v5432_v31, %v5362_v51  ;;  %v5379_v1 = vor.u32 %v5436_v12, %v5378_v43  ;;  %v4753_v13 = vld [vmem:[%s12306_s10 + $0x70] sm:$0xff] }
 0x943   :  { %4925 = vmatpush.bf16.msra.mxu3 %v4726_v4  ;;  %v4725_v41 = vpack.c.bf16 %v4696_v36, %v4695_v42  ;;  %v5427_v4 = vld [vmem:[%s12306_s10 + $0x14] sm:$0xf]  ;;  %v5434_v42 = vld [vmem:[%s12306_s10 + $0x44] sm:$0xf0] }
 0x945   :  { %5233 = vperm.xlu2 %5849, %v5225_v10   ;;  %v5348_v10 = vld [vmem:[%s12306_s10 + $0x18] sm:$0xf0] }
 0x946   :  { %5228 = vperm.xlu0 %6210, %v5224_v53   ;;  %v5351_v36 = vor.u32 %v5427_v4, %v5348_v10  ;;  %v5370_v53 = vld [vmem:[%s12306_s10 + $0x40] sm:$0xf] }
 0x947   :  { %4926 = vmatpush.bf16.msra.mxu3 %v4725_v41  ;;  %v4646_v11 = vpop.permute.xlu1 %4645  ;;  %v4602_v46 = vpop.permute.xlu2 %4601  ;;  %v5371_v41 = vor.u32 %v5434_v42, %v5370_v53 }
 0x948   :  { %4650 = vst.msk [vmem:[#allocation3 + $0xd8] sm:$0xff] %vm4425_vm13, %v4646_v11  ;;  %v4678_v9 = vpop.permute.xlu0 %4677  ;;  %v4694_v29 = vld [vmem:[#allocation3 + $0x18] sm:$0xff]  ;;  %v5437_v11 = vld [vmem:[%s12306_s10 + $0x64] sm:$0xf] }
 0x949   :  { %4658 = vst.msk [vmem:[#allocation3 + $0xd8] sm:$0xff] %vm4436_vm14, %v4654_v35  ;;  %v4724_v6 = vpack.c.bf16 %v4694_v29, %v4693_v57  ;;  %v4711_v35 = vld [vmem:[#allocation3 + $0xa0] sm:$0xff]  ;;  %v5356_v29 = vld [vmem:[%s12306_s10 + $0x28] sm:$0xf0] }
 0x94a   :  { %4682 = vst.msk [vmem:[#allocation3 + $0xf8] sm:$0xff] %vm4425_vm13, %v4678_v9  ;;  %v5429_v57 = vld [vmem:[%s12306_s10 + $0x24] sm:$0xf] }
 0x94b   :  { %4690 = vst.msk [vmem:[#allocation3 + $0xf8] sm:$0xff] %vm4436_vm14, %v4686_v18  ;;  %4927 = vmatpush.bf16.msra.mxu3 %v4724_v6  ;;  %v5343_v18 = vor.u32 %v5425_v23, %v5340_v26  ;;  %v5359_v6 = vor.u32 %v5429_v57, %v5356_v29 }
 0x94f   :  { %4928 = vmatpush.bf16.msra.mxu3 %v4723_v47  ;;  %v4638_v32 = vpop.permute.xlu1 %4637  ;;  %v4560_v52 = vpop.permute.xlu2 %4559  ;;  %v4888_v47 = vunpack.c.h.b16 %v4753_v13 }
 0x950   :  { %4564 = vst.msk [vmem:[#allocation3 + $0x88] sm:$0xff] %vm4425_vm13, %v4560_v52  ;;  %v4670_v34 = vpop.permute.xlu0 %4669  ;;  %v4718_v21 = vld [vmem:[#allocation3 + $0xd8] sm:$0xff] }
 0x951   :  { %4674 = vst.msk [vmem:[#allocation3 + $0xe8] sm:$0xff] %vm4436_vm14, %v4670_v34  ;;  %v4736_v7 = vpack.c.bf16 %v4718_v21, %v4717_v59  ;;  %v5364_v52 = vld [vmem:[%s12306_s10 + $0x38] sm:$0xf0]  ;;  %v5435_v21 = vld [vmem:[%s12306_s10 + $0x54] sm:$0xf] }
 0x952   :  { %4929 = vmatmul.bf16.vlgmr.msra.gmra.mxu3 %v5339_v39  ;;  %v4722_v8 = vld [vmem:[#allocation3 + $0xf8] sm:$0xff]  ;;  %v4904_v39 = vpack.c.b16 %v4888_v47, %v4888_v47  ;;  %v5383_v0 = vor.u32 %v5435_v21, %v5380_v63 }
 0x953   :  { %v4738_v5 = vpack.c.bf16 %v4722_v8, %v4721_v54  ;;  %v5386_v54 = vld [vmem:[%s12306_s10 + $0x60] sm:$0xf]  ;;  %v5438_v8 = vld [vmem:[%s12306_s10 + $0x64] sm:$0xf0] }
 0x955   :  { %4969 = vmatpush.bf16.msra.mxu0 %v4738_v5  ;;  %5445 = vmatpush.bf16.msrb.mxu2 %v4738_v5  ;;  %v5387_v5 = vor.u32 %v5438_v8, %v5386_v54 }
 0x957   :  { %v4594_v30 = vpop.permute.xlu1 %4593 }
 0x958   :  { %4598 = vst.msk [vmem:[#allocation3 + $0xa8] sm:$0xff] %vm4425_vm13, %v4594_v30  ;;  %v4628_v25 = vpop.permute.xlu0 %4627  ;;  %v4720_v27 = vld [vmem:[#allocation3 + $0xe8] sm:$0xff]  ;;  %v5433_v30 = vld [vmem:[%s12306_s10 + $0x44] sm:$0xf] }
 0x959   :  { %4606 = vst.msk [vmem:[#allocation3 + $0xa8] sm:$0xff] %vm4436_vm14, %v4602_v46  ;;  %v4737_v61 = vpack.c.bf16 %v4720_v27, %v4719_v14  ;;  %v5388_v46 = vld [vmem:[%s12306_s10 + $0x68] sm:$0xf0]  ;;  %v4887_v27 = vunpack.c.l.b16 %v4753_v13 }
 0x95a   :  { %4632 = vst.msk [vmem:[#allocation3 + $0xc8] sm:$0xff] %vm4425_vm13, %v4628_v25  ;;  %v5391_v9 = vor.u32 %v5437_v11, %v5388_v46  ;;  %v5372_v25 = vld [vmem:[%s12306_s10 + $0x48] sm:$0xf0] }
 0x95b   :  { %4642 = vst.msk [vmem:[#allocation3 + $0xc8] sm:$0xff] %vm4436_vm14, %v4638_v32  ;;  %4970 = vmatpush.bf16.msra.mxu0 %v4737_v61  ;;  %5446 = vmatpush.bf16.msrb.mxu2 %v4737_v61  ;;  %v5431_v32 = vld [vmem:[%s12306_s10 + $0x34] sm:$0xf]  ;;  %v5375_v14 = vor.u32 %v5433_v30, %v5372_v25  ;;  %v4903_v61 = vpack.c.b16 %v4887_v27, %v4887_v27 }
 0x95c   :  { %v5367_v34 = vor.u32 %v5431_v32, %v5364_v52 }
 0x95f   :  { %4971 = vmatpush.bf16.msra.mxu0 %v4736_v7  ;;  %5447 = vmatpush.bf16.msrb.mxu2 %v4736_v7  ;;  %v4586_v28 = vpop.permute.xlu1 %4585 }
 0x960   :  { %v4618_v56 = vpop.permute.xlu0 %4617  ;;  %v4712_v44 = vld [vmem:[#allocation3 + $0xa8] sm:$0xff] }
 0x961   :  { %4622 = vst.msk [vmem:[#allocation3 + $0xb8] sm:$0xff] %vm4436_vm14, %v4618_v56  ;;  %v4733_v17 = vpack.c.bf16 %v4712_v44, %v4711_v35 }
 0x962   :  { %4934 = vmatmul.bf16.gmra.mxu3 %v5347_v2  ;;  %v4716_v19 = vld [vmem:[#allocation3 + $0xc8] sm:$0xff] }
 0x963   :  { %v4735_v62 = vpack.c.bf16 %v4716_v19, %v4715_v15 }
 0x965   :  { %4972 = vmatpush.bf16.msra.mxu0 %v4735_v62  ;;  %5448 = vmatpush.bf16.msrb.mxu2 %v4735_v62 }
 0x967   :  { %v4568_v60 = vpop.permute.xlu1 %4567 }
 0x968   :  { %4573 = vst.msk [vmem:[#allocation3 + $0x80] sm:$0xff] %vm4436_vm14, %v4568_v60  ;;  %v4578_v38 = vpop.permute.xlu0 %4577  ;;  %v4714_v20 = vld [vmem:[#allocation3 + $0xb8] sm:$0xff]  ;;  %v12243_v60 = vpop.permute.xlu2 %4841 }
 0x969   :  { %4582 = vst.msk [vmem:[#allocation3 + $0x98] sm:$0xff] %vm4425_vm13, %v4578_v38  ;;  %v4734_v37 = vpack.c.bf16 %v4714_v20, %v4713_v22 }
 0x96a   :  { %4590 = vst.msk [vmem:[#allocation3 + $0x98] sm:$0xff] %vm4436_vm14, %v4586_v28 }
 0x96b   :  { %4973 = vmatpush.bf16.msra.mxu0 %v4734_v37  ;;  %5449 = vmatpush.bf16.msrb.mxu2 %v4734_v37 }
 0x96f   :  { %4974 = vmatpush.bf16.msra.mxu0 %v4733_v17  ;;  %5450 = vmatpush.bf16.msrb.mxu2 %v4733_v17  ;;  %v4707_v3 = vld [vmem:[#allocation3 + $0x80] sm:$0xff]  ;;  %v12235_v59 = vpop.permute.xlu1 %4831 }
 0x970   :  { %v4570_v50 = vpop.permute.xlu0 %4569  ;;  %v12245_v37 = vpop.permute.xlu2 %4821 }
 0x971   :  { %4574 = vst.msk [vmem:[#allocation3 + $0x88] sm:$0xff] %vm4436_vm14, %v4570_v50  ;;  %v4710_v48 = vld [vmem:[#allocation3 + $0x98] sm:$0xff] }
 0x972   :  { %4939 = vmatmul.bf16.gmra.mxu3 %v5355_v58  ;;  %v4732_v40 = vpack.c.bf16 %v4710_v48, %v4709_v33 }
 0x974   :  { %4975 = vmatpush.bf16.msra.mxu0 %v4732_v40  ;;  %5451 = vmatpush.bf16.msrb.mxu2 %v4732_v40 }
 0x977   :  { %v12239_v28 = vpop.permute.xlu1 %4826 }
 0x978   :  { %v4708_v55 = vld [vmem:[#allocation3 + $0x88] sm:$0xff]  ;;  %v12237_v2 = vpop.permute.xlu0 %4836  ;;  %v12247_v50 = vpop.permute.xlu2 %4816 }
 0x979   :  { %v4731_v24 = vpack.c.bf16 %v4708_v55, %v4707_v3 }
 0x97b   :  { %4976 = vmatpush.bf16.msra.mxu0 %v4731_v24  ;;  %5452 = vmatpush.bf16.msrb.mxu2 %v4731_v24 }
 0x97e   :  { %4977 = vmatmul.bf16.vlgmr.msra.gmra.mxu0 %v5343_v18  ;;  %5007 = vmatmul.bf16.vlgmr.msrb.gmra.mxu2 %v5391_v9 }
 0x97f   :  { %v4802_v19 = vpop.permute.xlu1 %4801 }
 0x980   :  { %v12241_v15 = vpop.permute.xlu0 %4811  ;;  %v4792_v18 = vpop.permute.xlu2 %4791 }
 0x982   :  { %4944 = vmatmul.bf16.gmra.mxu3 %v5363_v16 }
 0x987   :  { %v4797_v20 = vpop.permute.xlu1 %4796 }
 0x988   :  { %v4807_v38 = vpop.permute.xlu0 %4806 }
 0x98e   :  { %4982 = vmatmul.bf16.gmra.mxu0 %v5351_v36  ;;  %5012 = vmatmul.bf16.gmra.mxu2 %v4904_v39  ;;  %v4787_v36 = vpop.permute.xlu2 %4786 }
 0x98f   :  { %v4772_v45 = vpop.permute.xlu1 %4771 }
 0x990   :  { %v4782_v49 = vpop.permute.xlu0 %4781 }
 0x992   :  { %4949 = vmatmul.bf16.gmra.mxu3 %v5371_v41 }
 0x998   :  { %v4777_v48 = vpop.permute.xlu0 %4776 }
 0x99e   :  { %4987 = vmatmul.bf16.gmra.mxu0 %v5359_v6 }
 0x9a2   :  { %4954 = vmatmul.bf16.gmra.mxu3 %v5379_v1 }
 0x9ae   :  { %4992 = vmatmul.bf16.gmra.mxu0 %v5367_v34 }
 0x9b2   :  { %4959 = vmatmul.bf16.gmra.mxu3 %v5387_v5 }
 0x9be   :  { %4997 = vmatmul.bf16.gmra.mxu0 %v5375_v14 }
 0x9c2   :  { %4964 = vmatmul.bf16.gmra.mxu3 %v4903_v61 }
 0x9ce   :  { %5002 = vmatmul.bf16.gmra.mxu0 %v5383_v0 }
 0x9d5   :  { %v4930_v7 = vpop.f32.mrf.mxu3 }
 0x9d6   :  { %v4931_v35 = vadd.f32 %v4930_v7, %v4772_v45 }
 0x9dd   :  { %v4932_v56 = vpop.f32.mrf.mxu3 }
 0x9de   :  { %v4933_v40 = vadd.f32 %v4932_v56, %v4777_v48 }
 0x9e5   :  { %v4935_v62 = vpop.f32.mrf.mxu3 }
 0x9e6   :  { %v4936_v31 = vadd.f32 %v4935_v62, %v4782_v49 }
 0x9ed   :  { %v4937_v22 = vpop.f32.mrf.mxu3 }
 0x9ee   :  { %v4938_v53 = vadd.f32 %v4937_v22, %v4787_v36 }
 0x9f5   :  { %v4940_v44 = vpop.f32.mrf.mxu3 }
 0x9f6   :  { %v4941_v6 = vadd.f32 %v4940_v44, %v4792_v18 }
 0x9fb   :  { %v4978_v17 = vpop.f32.mrf.mxu0 }
 0x9fc   :  { %v4979_v58 = vadd.f32 %v4978_v17, %v4931_v35 }
 0x9fd   :  { %v4942_v33 = vpop.f32.mrf.mxu3 }
 0x9fe   :  { %v5017_v55 = vmax.f32 %v4979_v58, 0.0  ;;  %v4943_v47 = vadd.f32 %v4942_v33, %v4797_v20 }
 0xa01   :  { %v5008_v29 = vpop.f32.mrf.mxu2 }
 0xa03   :  { %v4980_v23 = vpop.f32.mrf.mxu0 }
 0xa04   :  { %v4981_v26 = vadd.f32 %v4980_v23, %v4933_v40 }
 0xa05   :  { %v4945_v3 = vpop.f32.mrf.mxu3 }
 0xa06   :  { %v5018_v24 = vmax.f32 %v4981_v26, 0.0  ;;  %v4946_v14 = vadd.f32 %v4945_v3, %v4802_v19 }
 0xa08   :  { %v12249_v51 = vpack.c.bf16 %v5018_v24, %v5017_v55 }
 0xa09   :  { %v5010_v13 = vpop.f32.mrf.mxu2 }
 0xa0b   :  { %v4983_v16 = vpop.f32.mrf.mxu0 }
 0xa0c   :  { %v4984_v4 = vadd.f32 %v4983_v16, %v4936_v31 }
 0xa0d   :  { %v4947_v10 = vpop.f32.mrf.mxu3 }
 0xa0e   :  { %v5019_v46 = vmax.f32 %v4984_v4, 0.0  ;;  %v4948_v61 = vadd.f32 %v4947_v10, %v4807_v38 }
 0xa11   :  { %v5013_v5 = vpop.f32.mrf.mxu2 }
 0xa13   :  { %v4985_v42 = vpop.f32.mrf.mxu0 }
 0xa14   :  { %v4986_v41 = vadd.f32 %v4985_v42, %v4938_v53 }
 0xa15   :  { %v4950_v11 = vpop.f32.mrf.mxu3 }
 0xa16   :  { %v5020_v9 = vmax.f32 %v4986_v41, 0.0  ;;  %v4951_v4 = vadd.f32 %v4950_v11, %v12241_v15  ;;  %v5440_v15 = vld [vmem:[%s12307_s12 + $0x8] sm:$0xff]  ;;  %v5442_v11 = vld [vmem:[%s12307_s12 + $0x18] sm:$0xff] }
 0xa18   :  { %v12251_v57 = vpack.c.bf16 %v5020_v9, %v5019_v46 }
 0xa19   :  { %v5015_v27 = vpop.f32.mrf.mxu2 }
 0xa1b   :  { %v4988_v43 = vpop.f32.mrf.mxu0 }
 0xa1c   :  { %v4989_v12 = vadd.f32 %v4988_v43, %v4941_v6 }
 0xa1d   :  { %v4952_v1 = vpop.f32.mrf.mxu3 }
 0xa1e   :  { %v5021_v34 = vmax.f32 %v4989_v12, 0.0  ;;  %v4953_v31 = vadd.f32 %v4952_v1, %v12247_v50  ;;  %v5441_v50 = vld [vmem:[%s12307_s12 + $0x10] sm:$0xff]  ;;  %v5115_v12 = vpop.permute.xlu2 %5114  ;;  %v5105_v1 = vpop.permute.xlu1 %5104 }
 0xa23   :  { %v4990_v39 = vpop.f32.mrf.mxu0 }
 0xa24   :  { %v4991_v32 = vadd.f32 %v4990_v39, %v4943_v47 }
 0xa25   :  { %v4955_v52 = vpop.f32.mrf.mxu3 }
 0xa26   :  { %v5022_v54 = vmax.f32 %v4991_v32, 0.0  ;;  %v4956_v18 = vadd.f32 %v4955_v52, %v12245_v37  ;;  %v5100_v47 = vpop.permute.xlu1 %5099 }
 0xa28   :  { %v5045_v8 = vpack.c.bf16 %v5022_v54, %v5021_v34  ;;  %v5110_v34 = vpop.permute.xlu0 %5109 }
 0xa2b   :  { %v4993_v30 = vpop.f32.mrf.mxu0 }
 0xa2c   :  { %v4994_v21 = vadd.f32 %v4993_v30, %v4946_v14 }
 0xa2d   :  { %v4957_v25 = vpop.f32.mrf.mxu3 }
 0xa2e   :  { %v5023_v56 = vmax.f32 %v4994_v21, 0.0  ;;  %v5075_v32 = vpop.permute.xlu1 %5074 }
 0xa30   :  { %v5085_v21 = vpop.permute.xlu0 %5084 }
 0xa33   :  { %v4995_v63 = vpop.f32.mrf.mxu0 }
 0xa34   :  { %v4996_v0 = vadd.f32 %v4995_v63, %v4948_v61 }
 0xa35   :  { %v4960_v7 = vpop.f32.mrf.mxu3 }
 0xa36   :  { %v5024_v62 = vmax.f32 %v4996_v0, 0.0  ;;  %v4961_v58 = vadd.f32 %v4960_v7, %v12235_v59 }
 0xa38   :  { %v5046_v22 = vpack.c.bf16 %v5024_v62, %v5023_v56  ;;  %v5009_v48 = vadd.f32 %v5008_v29, %v4961_v58  ;;  %v5080_v7 = vpop.permute.xlu0 %5079 }
 0xa3a   :  { %v5029_v24 = vmax.f32 %v5009_v48, 0.0 }
 0xa3b   :  { %v4998_v20 = vpop.f32.mrf.mxu0 }
 0xa3c   :  { %v4999_v53 = vadd.f32 %v4998_v20, %v4951_v4 }
 0xa3d   :  { %v4962_v44 = vpop.f32.mrf.mxu3 }
 0xa3e   :  { %v4963_v45 = vadd.f32 %v4962_v44, %v12237_v2  ;;  %v5025_v29 = vmax.f32 %v4999_v53, 0.0 }
 0xa40   :  { %v5011_v33 = vadd.f32 %v5010_v13, %v4963_v45  ;;  %v5095_v13 = vpop.permute.xlu2 %5094 }
 0xa42   :  { %v5030_v26 = vmax.f32 %v5011_v33, 0.0 }
 0xa43   :  { %v5000_v49 = vpop.f32.mrf.mxu0 }
 0xa44   :  { %v5049_v2 = vpack.c.bf16 %v5030_v26, %v5029_v24  ;;  %v5001_v10 = vadd.f32 %v5000_v49, %v4953_v31 }
 0xa45   :  { %v4965_v35 = vpop.f32.mrf.mxu3 }
 0xa46   :  { %v4966_v17 = vadd.f32 %v4965_v35, %v12243_v60  ;;  %v4958_v60 = vadd.f32 %v4957_v25, %v12239_v28  ;;  %v5026_v46 = vmax.f32 %v5001_v10, 0.0  ;;  %v5439_v28 = vld [vmem:[%s12307_s12] sm:$0xff] }
 0xa48   :  { %v5014_v19 = vadd.f32 %v5013_v5, %v4966_v17  ;;  %v5047_v37 = vpack.c.bf16 %v5026_v46, %v5025_v29  ;;  %v5090_v39 = vpop.permute.xlu2 %5089  ;;  %v5070_v5 = vpop.permute.xlu1 %5069  ;;  %v5420_v46 = vld [vmem:[%s12308_s14] sm:$0xf] }
 0xa4a   :  { %v5031_v38 = vmax.f32 %v5014_v19, 0.0 }
 0xa4b   :  { %v5003_v40 = vpop.f32.mrf.mxu0 }
 0xa4c   :  { %v5050_v23 = vpack.c.bf16 %v5031_v38, %v5031_v38  ;;  %v5004_v59 = vadd.f32 %v5003_v40, %v4956_v18 }
 0xa4d   :  { %v4967_v3 = vpop.f32.mrf.mxu3 }
 0xa4e   :  { %v5165_v55 = vsel %vm987_vm6, %v5050_v23, 0  ;;  %v5027_v42 = vmax.f32 %v5004_v59, 0.0  ;;  %vm5145_vm6 = vcmask 982016  }
 0xa4f   :  { %5167 = vmatpush.bf16.msra.mxu1 %v5165_v55 }
 0xa50   :  { %v5065_v54 = vpop.permute.xlu2 %5064 }
 0xa53   :  { %v5005_v16 = vpop.f32.mrf.mxu0  ;;  %5168 = vmatpush.bf16.msra.mxu1 %v5049_v2 }
 0xa54   :  { %v5006_v36 = vadd.f32 %v5005_v16, %v4958_v60 }
 0xa56   :  { %v5028_v41 = vmax.f32 %v5006_v36, 0.0 }
 0xa58   :  { %v5048_v9 = vpack.c.bf16 %v5028_v41, %v5027_v42 }
 0xa5a   :  { %5169 = vmatpush.bf16.msra.mxu1 %v5048_v9  ;;  %v5444_v9 = vld [vmem:[%s12308_s14] sm:$0x10] }
 0xa5b   :  { %v5421_v29 = vor.u32 %v5444_v9, %v5420_v46 }
 0xa5e   :  { %5170 = vmatpush.bf16.msra.mxu1 %v5047_v37  ;;  %v5229_v37 = vpop.permute.xlu0 %5228 }
 0xa62   :  { %5171 = vmatpush.bf16.msra.mxu1 %v5046_v22 }
 0xa66   :  { %5172 = vmatpush.bf16.msra.mxu1 %v5045_v8 }
 0xa6a   :  { %5173 = vmatpush.bf16.msra.mxu1 %v12251_v57  ;;  %v5042_v57 = vld [vmem:[%s12307_s12 + $0x28] sm:$0x3] }
 0xa6b   :  { %v5138_v6 = vunpack.c.l.b16 %v5042_v57 }
 0xa6d   :  { %v5144_v43 = vpack.c.b16 %v5138_v6, %v5138_v6 }
 0xa6e   :  { %5174 = vmatpush.bf16.msra.mxu1 %v12249_v51  ;;  %v5443_v51 = vld [vmem:[%s12307_s12 + $0x20] sm:$0xff] }
 0xa71   :  { %5412 = vmatmul.msk.bf16.vlgmr.msra.gmra.mxu1 %vm5145_vm6, %v5439_v28 }
 0xa81   :  { %5413 = vmatmul.msk.bf16.gmra.mxu1 %vm5145_vm6, %v5440_v15 }
 0xa91   :  { %5414 = vmatmul.msk.bf16.gmra.mxu1 %vm5145_vm6, %v5441_v50  ;;  %v5234_v50 = vpop.permute.xlu2 %5233 }
 0xaa1   :  { %5415 = vmatmul.msk.bf16.gmra.mxu1 %vm5145_vm6, %v5442_v11 }
 0xab1   :  { %5416 = vmatmul.msk.bf16.gmra.mxu1 %vm5145_vm6, %v5443_v51 }
 0xac1   :  { %5417 = vmatmul.msk.bf16.gmra.mxu1 %vm5145_vm6, %v5144_v43 }
 0xaee   :  { %v5176_v52 = vpop.f32.mrf.mxu1 }
 0xaef   :  { %v5177_v8 = vadd.f32 %v5176_v52, %v5065_v54 }
 0xaf1   :  { %v5205_v14 = vmax.f32 %v5177_v8, 0.0 }
 0xaf6   :  { %v5178_v30 = vpop.f32.mrf.mxu1 }
 0xaf7   :  { %v5179_v25 = vadd.f32 %v5178_v30, %v5070_v5 }
 0xaf9   :  { %v5206_v27 = vmax.f32 %v5179_v25, 0.0 }
 0xafb   :  { %v5218_v61 = vpack.c.bf16 %v5206_v27, %v5205_v14 }
 0xafe   :  { %v5181_v63 = vpop.f32.mrf.mxu1 }
 0xaff   :  { %v5182_v0 = vadd.f32 %v5181_v63, %v5075_v32 }
 0xb01   :  { %v5207_v22 = vmax.f32 %v5182_v0, 0.0 }
 0xb06   :  { %v5183_v56 = vpop.f32.mrf.mxu1 }
 0xb07   :  { %v5184_v62 = vadd.f32 %v5183_v56, %v5080_v7 }
 0xb09   :  { %v5208_v20 = vmax.f32 %v5184_v62, 0.0 }
 0xb0b   :  { %v5219_v44 = vpack.c.bf16 %v5208_v20, %v5207_v22 }
 0xb0e   :  { %v5186_v49 = vpop.f32.mrf.mxu1 }
 0xb0f   :  { %v5187_v4 = vadd.f32 %v5186_v49, %v5085_v21 }
 0xb11   :  { %v5209_v42 = vmax.f32 %v5187_v4, 0.0 }
 0xb16   :  { %v5188_v45 = vpop.f32.mrf.mxu1 }
 0xb17   :  { %v5189_v60 = vadd.f32 %v5188_v45, %v5090_v39 }
 0xb19   :  { %v5210_v36 = vmax.f32 %v5189_v60, 0.0 }
 0xb1b   :  { %v5220_v41 = vpack.c.bf16 %v5210_v36, %v5209_v42 }
 0xb1e   :  { %v5191_v35 = vpop.f32.mrf.mxu1 }
 0xb1f   :  { %v5192_v18 = vadd.f32 %v5191_v35, %v5095_v13 }
 0xb21   :  { %v5211_v10 = vmax.f32 %v5192_v18, 0.0 }
 0xb26   :  { %v5193_v17 = vpop.f32.mrf.mxu1 }
 0xb27   :  { %v5194_v3 = vadd.f32 %v5193_v17, %v5100_v47 }
 0xb29   :  { %v5212_v59 = vmax.f32 %v5194_v3, 0.0 }
 0xb2b   :  { %v5221_v53 = vpack.c.bf16 %v5212_v59, %v5211_v10 }
 0xb2e   :  { %v5196_v58 = vpop.f32.mrf.mxu1 }
 0xb2f   :  { %v5197_v23 = vadd.f32 %v5196_v58, %v5105_v1 }
 0xb31   :  { %v5213_v2 = vmax.f32 %v5197_v23, 0.0 }
 0xb36   :  { %v5198_v19 = vpop.f32.mrf.mxu1 }
 0xb37   :  { %v5199_v48 = vadd.f32 %v5198_v19, %v5110_v34 }
 0xb39   :  { %v5214_v55 = vmax.f32 %v5199_v48, 0.0 }
 0xb3b   :  { %v5222_v16 = vpack.c.bf16 %v5214_v55, %v5213_v2 }
 0xb3e   :  { %v5201_v33 = vpop.f32.mrf.mxu1 }
 0xb3f   :  { %v5202_v38 = vadd.f32 %v5201_v33, %v5115_v12 }
 0xb41   :  { %v5215_v40 = vmax.f32 %v5202_v38, 0.0 }
 0xb43   :  { %v5223_v26 = vpack.c.bf16 %v5215_v40, %v5215_v40 }
 0xb45   :  { %v5247_v24 = vsel %vm5245_vm15, %v5223_v26, 0 }
 0xb46   :  { %v5203_v31 = vpop.f32.mrf.mxu1  ;;  %5251 = vmatpush.bf16.msra.mxu2 %v5247_v24 }
 0xb4a   :  { %5252 = vmatpush.bf16.msra.mxu2 %v5222_v16 }
 0xb4e   :  { %5253 = vmatpush.bf16.msra.mxu2 %v5221_v53 }
 0xb52   :  { %5254 = vmatpush.bf16.msra.mxu2 %v5220_v41 }
 0xb56   :  { %5255 = vmatpush.bf16.msra.mxu2 %v5219_v44 }
 0xb5a   :  { %5256 = vmatpush.bf16.msra.mxu2 %v5218_v61 }
 0xb5d   :  { %5422 = vmatmul.msk.bf16.vlgmr.msra.gmra.mxu2 %vm5241_vm0, %v5421_v29 }
 0xbe0   :  { %v5258_v28 = vpop.f32.mrf.mxu2 }
 0xbe1   :  { %v5259_v15 = vadd.f32 %v5258_v28, %v5229_v37 }
 0xbe3   :  { %5264 = vst.msk [vmem:[%s12309_s16] sm:$0xff] %vm5263_vm1, %v5259_v15 }
 0xbe8   :  { %v5260_v11 = vpop.f32.mrf.mxu2 }
 0xbe9   :  { %v5261_v51 = vadd.f32 %v5260_v11, %v5234_v50 }
 0xbeb   :  { %5266 = vst.msk [vmem:[%s12309_s16 + $0x8] sm:$0x3] %vm5265_vm2, %v5261_v51 }

</bundles_post_ra>
